<compile_context>
chip_gen: v6e
topology: v6e:2x2x1
jax: 0.10.0
libtpu: 0.0.40
codegen_flags: <defaults>
</compile_context>

<pallas_src>
import functools
import math

import jax
import jax.numpy as jnp
from jax.experimental import pallas as pl
from jax.experimental.pallas import tpu as pltpu

HALF = jnp.bfloat16  # TPU analog of torch.float16
EPS = 1e-5


# --------------------------------------------------------------------------
# Chip-dependent defaults
# --------------------------------------------------------------------------
def _device_kind() -> str:
    try:
        return jax.devices()[0].device_kind.lower()
    except Exception:
        return ""


def _is_v6_or_newer(kind: str) -> bool:
    return ("v6" in kind) or ("v7" in kind) or ("7x" in kind)


def _softmax_dtype():
    # bf16 exp/elementwise only pays on v6e/v7x (EUP/VPU have bf16 paths);
    # v5e and older (or unknown) keep the softmax math in f32.
    return HALF if _is_v6_or_newer(_device_kind()) else jnp.float32


def _vmem_limit_bytes() -> int:
    # Derive the scoped-VMEM budget from the chip instead of hard-coding 48MiB.
    try:
        cap = int(pltpu.get_tpu_info().vmem_capacity_bytes)
    except Exception:
        kind = _device_kind()
        cap = (64 if ("v7" in kind or "7x" in kind) else 128) * 1024 * 1024
    return int(cap * 0.7)


def _default_tiles(seq_len: int):
    # Bigger query tiles on the 256-wide MXUs (v6e/v7x); 128 fills v5e's MXU.
    tq = 256 if _is_v6_or_newer(_device_kind()) else 128
    tq = min(tq, seq_len)
    while seq_len % tq:
        tq //= 2
    tk = min(512, seq_len)
    while seq_len % tk:
        tk //= 2
    return tq, tk


# --------------------------------------------------------------------------
# Kernel 1: K/V projection (prologue)
# --------------------------------------------------------------------------
def kv_projection_kernel(x_ref, wk_ref, wv_ref, k_ref, v_ref, *, num_heads):
    """Grid (B, S//TS): one head-split relayout per seq tile, not per (qt,kt)."""
    ts, e = x_ref.shape[1], x_ref.shape[2]
    dh = e // num_heads
    x = x_ref[0]                                                    # (TS, E) bf16
    k = jnp.dot(x, wk_ref[...], preferred_element_type=jnp.float32).astype(HALF)
    v = jnp.dot(x, wv_ref[...], preferred_element_type=jnp.float32).astype(HALF)
    k_ref[0] = jnp.swapaxes(k.reshape(ts, num_heads, dh), 0, 1)     # (H, TS, Dh)
    v_ref[0] = jnp.swapaxes(v.reshape(ts, num_heads, dh), 0, 1)


# --------------------------------------------------------------------------
# Kernel 2: flash attention + out-proj + LN1 + FFN + LN2
# --------------------------------------------------------------------------
def attention_ffn_kernel(x_ref, k_ref, v_ref, wq_ref, wo_ref, bo_ref,
                         g1_ref, b1_ref, w1_ref, w2_ref, g2_ref, b2_ref,
                         o_ref, qh_sc, m_sc, l_sc, acc_sc,
                         *, num_heads, softmax_dtype):
    kt = pl.program_id(2)
    n_kt = pl.num_programs(2)
    tq, e = x_ref.shape[1], x_ref.shape[2]
    dh = e // num_heads
    f32 = jnp.float32

    def mm(a, w):  # MXU matmul: bf16 operands, f32 accumulation
        return jnp.dot(a, w, preferred_element_type=f32)

    # --- first K chunk: project Q (scale pre-folded into wq), reset state ---
    @pl.when(kt == 0)
    def _():
        q = mm(x_ref[0], wq_ref[...]).astype(HALF)                  # (TQ, E)
        qh_sc[...] = jnp.swapaxes(q.reshape(tq, num_heads, dh), 0, 1)
        m_sc[...] = jnp.full_like(m_sc, -jnp.inf)
        l_sc[...] = jnp.zeros_like(l_sc)
        acc_sc[...] = jnp.zeros_like(acc_sc)

    # --- flash online-softmax update for this K/V chunk ---
    s = jnp.einsum('hqd,hkd->hqk', qh_sc[...], k_ref[0],
                   preferred_element_type=f32)                      # (H, TQ, TK)
    m_prev = m_sc[...]
    m_new = jnp.maximum(m_prev, jnp.max(s, axis=-1, keepdims=True))
    alpha = jnp.exp(m_prev - m_new)                                 # (H, TQ, 1) f32
    p = jnp.exp((s - m_new).astype(softmax_dtype))                  # unnormalized
    l_sc[...] = alpha * l_sc[...] + jnp.sum(p.astype(f32), axis=-1, keepdims=True)
    pv = jnp.einsum('hqk,hkd->hqd', p.astype(HALF), v_ref[0],
                    preferred_element_type=f32)                     # (H, TQ, Dh)
    acc_sc[...] = alpha * acc_sc[...] + pv
    m_sc[...] = m_new

    # --- last K chunk: normalize, out-proj, LN1, FFN, LN2, store ---
    @pl.when(kt == n_kt - 1)
    def _():
        inv = pl.reciprocal(l_sc[...], approx=True)                 # deferred norm
        oh = (acc_sc[...] * inv).astype(HALF)                       # (H, TQ, Dh)
        attn = jnp.swapaxes(oh, 0, 1).reshape(tq, e)                # (TQ, E)
        attn_out = (mm(attn, wo_ref[...]) + bo_ref[0].astype(f32)).astype(HALF)

        h1 = (x_ref[0] + attn_out).astype(f32)                      # residual (bf16 add)
        mu1 = jnp.mean(h1, axis=-1, keepdims=True)
        c1 = h1 - mu1
        var1 = jnp.mean(c1 * c1, axis=-1, keepdims=True)
        x1 = (c1 * jax.lax.rsqrt(var1 + EPS) * g1_ref[0].astype(f32)
              + b1_ref[0].astype(f32)).astype(HALF)

        # TODO(synk): launch_tensor_core_ffn internals are opaque; ReLU assumed,
        # fc1/fc2 biases are never passed to it so they are omitted.
        ff = jnp.maximum(mm(x1, w1_ref[...]), 0.0).astype(HALF)
        ff = mm(ff, w2_ref[...]).astype(HALF)

        h2 = (x1 + ff).astype(f32)
        mu2 = jnp.mean(h2, axis=-1, keepdims=True)
        c2 = h2 - mu2
        var2 = jnp.mean(c2 * c2, axis=-1, keepdims=True)
        out = (c2 * jax.lax.rsqrt(var2 + EPS) * g2_ref[0].astype(f32)
               + b2_ref[0].astype(f32))
        o_ref[0] = out.astype(HALF)


# --------------------------------------------------------------------------
# Parameters
# --------------------------------------------------------------------------
def make_params(key, embed_dim, ffn_dim):
    """Deterministic init mimicking PyTorch kaiming_uniform(a=sqrt(5)) bounds."""
    ks = jax.random.split(key, 8)

    def kaiming_t(k, out_f, in_f):
        bound = 1.0 / math.sqrt(in_f)
        w = jax.random.uniform(k, (out_f, in_f), jnp.float32, -bound, bound)
        return w.T.astype(HALF)            # pre-transposed to (in, out)

    E, F = embed_dim, ffn_dim
    return dict(
        wq=kaiming_t(ks[0], E, E),
        wk=kaiming_t(ks[1], E, E),
        wv=kaiming_t(ks[2], E, E),
        wo=kaiming_t(ks[3], E, E),
        bo=jax.random.uniform(ks[4], (1, E), jnp.float32,
                              -1.0 / math.sqrt(E), 1.0 / math.sqrt(E)).astype(HALF),
        w1=kaiming_t(ks[5], F, E),          # (E, F)
        w2=kaiming_t(ks[6], E, F),          # (F, E)
        g1=jnp.ones((1, E), jnp.float32),
        b1=jnp.zeros((1, E), jnp.float32),
        g2=jnp.ones((1, E), jnp.float32),
        b2=jnp.zeros((1, E), jnp.float32),
    )


# --------------------------------------------------------------------------
# Wrapper
# --------------------------------------------------------------------------
def transformer_layer(x, params, num_heads, *, tq=None, tk=None, ts=None):
    B, S, E = x.shape
    F = params["w1"].shape[1]
    assert E % num_heads == 0, "embed_dim must be divisible by num_heads"
    Dh = E // num_heads
    scale = 1.0 / math.sqrt(Dh)

    dtq, dtk = _default_tiles(S)
    tq = dtq if tq is None else tq
    tk = dtk if tk is None else tk
    ts = min(512, S) if ts is None else ts
    assert S % tq == 0 and S % tk == 0 and S % ts == 0

    vmem_limit = _vmem_limit_bytes()
    softmax_dtype = _softmax_dtype()

    # Fold the 1/sqrt(Dh) attention scale into Wq once, host-side.
    wq_scaled = (params["wq"].astype(jnp.float32) * scale).astype(HALF)

    def run(single_buffer_weights):
        # Constant-index weight/bias blocks: fetched once, never refetched, so
        # a single buffer (no double-buffering) saves VMEM.
        def wspec(shape):
            idx = lambda *_: (0,) * len(shape)
            if single_buffer_weights:
                return pl.BlockSpec(shape, idx, pipeline_mode=pl.Buffered(1))
            return pl.BlockSpec(shape, idx)

        # ---- prologue: K/V projection, head-major (B, H, S, Dh) in HBM ----
        k_hm, v_hm = pl.pallas_call(
            functools.partial(kv_projection_kernel, num_heads=num_heads),
            out_shape=(jax.ShapeDtypeStruct((B, num_heads, S, Dh), HALF),
                       jax.ShapeDtypeStruct((B, num_heads, S, Dh), HALF)),
            grid_spec=pltpu.PrefetchScalarGridSpec(
                num_scalar_prefetch=0,
                grid=(B, S // ts),
                in_specs=[
                    pl.BlockSpec((1, ts, E), lambda b, st: (b, st, 0)),
                    wspec((E, E)),   # wk
                    wspec((E, E)),   # wv
                ],
                out_specs=[
                    pl.BlockSpec((1, num_heads, ts, Dh), lambda b, st: (b, 0, st, 0)),
                    pl.BlockSpec((1, num_heads, ts, Dh), lambda b, st: (b, 0, st, 0)),
                ],
            ),
            compiler_params=pltpu.CompilerParams(
                dimension_semantics=("parallel", "parallel"),
                vmem_limit_bytes=vmem_limit,
            ),
        )(x, params["wk"], params["wv"])

        # ---- main: flash attention + out-proj + LN1 + FFN + LN2 ----
        main_kernel = functools.partial(attention_ffn_kernel,
                                        num_heads=num_heads,
                                        softmax_dtype=softmax_dtype)
        return pl.pallas_call(
            main_kernel,
            out_shape=jax.ShapeDtypeStruct((B, S, E), HALF),
            grid_spec=pltpu.PrefetchScalarGridSpec(
                num_scalar_prefetch=0,
                grid=(B, S // tq, S // tk),   # K-chunk (reduction) axis last
                in_specs=[
                    pl.BlockSpec((1, tq, E), lambda b, qt, kt: (b, qt, 0)),     # x tile
                    pl.BlockSpec((1, num_heads, tk, Dh),
                                 lambda b, qt, kt: (b, 0, kt, 0)),              # K chunk
                    pl.BlockSpec((1, num_heads, tk, Dh),
                                 lambda b, qt, kt: (b, 0, kt, 0)),              # V chunk
                    wspec((E, E)),   # wq (scale folded in)
                    wspec((E, E)),   # wo
                    wspec((1, E)),   # bo
                    wspec((1, E)),   # gamma1
                    wspec((1, E)),   # beta1
                    wspec((E, F)),   # w1
                    wspec((F, E)),   # w2
                    wspec((1, E)),   # gamma2
                    wspec((1, E)),   # beta2
                ],
                out_specs=pl.BlockSpec((1, tq, E), lambda b, qt, kt: (b, qt, 0)),
                scratch_shapes=[
                    pltpu.VMEM((num_heads, tq, Dh), HALF),         # Q, head-major
                    pltpu.VMEM((num_heads, tq, 1), jnp.float32),   # running max
                    pltpu.VMEM((num_heads, tq, 1), jnp.float32),   # running denom
                    pltpu.VMEM((num_heads, tq, Dh), jnp.float32),  # output accum
                ],
            ),
            compiler_params=pltpu.CompilerParams(
                dimension_semantics=("parallel", "parallel", "arbitrary"),
                vmem_limit_bytes=vmem_limit,
            ),
        )(x, k_hm, v_hm, wq_scaled, params["wo"], params["bo"],
          params["g1"], params["b1"], params["w1"], params["w2"],
          params["g2"], params["b2"])

    try:
        return run(single_buffer_weights=True)
    except Exception:
        # Fallback for jax versions without BlockSpec.pipeline_mode support.
        return run(single_buffer_weights=False)


# --------------------------------------------------------------------------
# Pure-JAX reference (mirrors the kernel's bf16 cast points) for validation
# --------------------------------------------------------------------------
def reference(x, params, num_heads):
    B, S, E = x.shape
    H = num_heads
    Dh = E // H
    scale = 1.0 / math.sqrt(Dh)
    f32 = jnp.float32
    wq = (params["wq"].astype(f32) * scale).astype(HALF)

    def mm(a, w):
        return jnp.dot(a, w, preferred_element_type=f32)

    def ln(h, g, b):
        h = h.astype(f32)
        mu = jnp.mean(h, axis=-1, keepdims=True)
        c = h - mu
        var = jnp.mean(c * c, axis=-1, keepdims=True)
        return (c * jax.lax.rsqrt(var + EPS) * g + b).astype(HALF)

    outs = []
    for bi in range(B):
        xb = x[bi]
        q = mm(xb, wq).astype(HALF)
        k = mm(xb, params["wk"]).astype(HALF)
        v = mm(xb, params["wv"]).astype(HALF)
        qh = jnp.swapaxes(q.reshape(S, H, Dh), 0, 1)
        kh = jnp.swapaxes(k.reshape(S, H, Dh), 0, 1)
        vh = jnp.swapaxes(v.reshape(S, H, Dh), 0, 1)
        s = jnp.einsum('hqd,hkd->hqk', qh, kh, preferred_element_type=f32)
        p = jax.nn.softmax(s, axis=-1).astype(HALF)
        oh = jnp.einsum('hqk,hkd->hqd', p, vh, preferred_element_type=f32)
        attn = jnp.swapaxes(oh.astype(HALF), 0, 1).reshape(S, E)
        attn_out = (mm(attn, params["wo"]) + params["bo"][0].astype(f32)).astype(HALF)
        x1 = ln(xb + attn_out, params["g1"][0], params["b1"][0])
        ff = jnp.maximum(mm(x1, params["w1"]), 0.0).astype(HALF)
        ff = mm(ff, params["w2"]).astype(HALF)
        outs.append(ln(x1 + ff, params["g2"][0], params["b2"][0]))
    return jnp.stack(outs)


if __name__ == "__main__":
    # Small but TPU-friendly shapes: Dh = 128 keeps every matmul / DMA
    # lane-dense; S = 256 with tq = tk = 128 exercises a (2, 2, 2) grid
    # (multi-query-tile AND multi-K-chunk flash path) plus the prologue.
    B, S, E, H, F = 2, 256, 256, 2, 512

    key = jax.random.PRNGKey(0)
    kx, kp = jax.random.split(key)
    x = jax.random.normal(kx, (B, S, E), jnp.float32).astype(HALF)
    params = make_params(kp, E, F)

    out = transformer_layer(x, params, num_heads=H, tq=128, tk=128, ts=256)
    out = jax.block_until_ready(out)

    assert out.shape == (B, S, E) and out.dtype == HALF
    out_f32 = out.astype(jnp.float32)
    assert bool(jnp.all(jnp.isfinite(out_f32)))

    ref = reference(x, params, num_heads=H).astype(jnp.float32)
    max_err = float(jnp.max(jnp.abs(out_f32 - ref)))
    assert max_err <= 0.1, max_err

    print("KERNEL_OK")
</pallas_src>

<mosaic_0001>
module attributes {stable_mosaic.version = 11 : i64} {
  func.func @kv_projection_kernel(%arg0: i32, %arg1: i32, %arg2: memref<1x256x256xbf16, #tpu.memory_space<vmem>>, %arg3: memref<256x256xbf16, #tpu.memory_space<vmem>>, %arg4: memref<256x256xbf16, #tpu.memory_space<vmem>>, %arg5: memref<1x2x256x128xbf16, #tpu.memory_space<vmem>>, %arg6: memref<1x2x256x128xbf16, #tpu.memory_space<vmem>>) attributes {dimension_semantics = [#tpu.dimension_semantics<parallel>, #tpu.dimension_semantics<parallel>], iteration_bounds = array<i64: 2, 1>, scalar_prefetch = 0 : i64, scratch_operands = 0 : i64, tpu.core_type = #tpu.core_type<tc>, window_params = [{transform_indices = @transform_0, window_bounds = array<i64: 1, 256, 256>}, {pipeline_mode = #tpu.pipeline_mode<synchronous>, transform_indices = @transform_1, window_bounds = array<i64: 256, 256>}, {pipeline_mode = #tpu.pipeline_mode<synchronous>, transform_indices = @transform_2, window_bounds = array<i64: 256, 256>}, {transform_indices = @transform_3, window_bounds = array<i64: 1, 2, 256, 128>}, {transform_indices = @transform_4, window_bounds = array<i64: 1, 2, 256, 128>}]} {
    %c0 = arith.constant 0 : index
    %c0_0 = arith.constant 0 : index
    %c0_1 = arith.constant 0 : index
    %0 = vector.load %arg2[%c0, %c0_0, %c0_1] : memref<1x256x256xbf16, #tpu.memory_space<vmem>>, vector<1x256x256xbf16>
    %1 = vector.shape_cast %0 : vector<1x256x256xbf16> to vector<256x256xbf16>
    %c0_2 = arith.constant 0 : index
    %c0_3 = arith.constant 0 : index
    %2 = vector.load %arg3[%c0_2, %c0_3] : memref<256x256xbf16, #tpu.memory_space<vmem>>, vector<256x256xbf16>
    %cst = arith.constant dense<0.000000e+00> : vector<256x256xf32>
    %3 = tpu.matmul %1, %2, %cst {dimension_numbers = #tpu.dot_dimension_numbers<[1], [0], [0], [1], [0, 0, 1, 1], [], []>} : vector<256x256xbf16>, vector<256x256xbf16>, vector<256x256xf32> -> vector<256x256xf32>
    %4 = arith.truncf %3 : vector<256x256xf32> to vector<256x256xbf16>
    %c0_4 = arith.constant 0 : index
    %c0_5 = arith.constant 0 : index
    %5 = vector.load %arg4[%c0_4, %c0_5] : memref<256x256xbf16, #tpu.memory_space<vmem>>, vector<256x256xbf16>
    %cst_6 = arith.constant dense<0.000000e+00> : vector<256x256xf32>
    %6 = tpu.matmul %1, %5, %cst_6 {dimension_numbers = #tpu.dot_dimension_numbers<[1], [0], [0], [1], [0, 0, 1, 1], [], []>} : vector<256x256xbf16>, vector<256x256xbf16>, vector<256x256xf32> -> vector<256x256xf32>
    %7 = arith.truncf %6 : vector<256x256xf32> to vector<256x256xbf16>
    %8 = vector.shape_cast %4 : vector<256x256xbf16> to vector<256x2x128xbf16>
    %9 = tpu.transpose %8, [1, 0, 2] : vector<256x2x128xbf16> -> vector<2x256x128xbf16>
    %c0_7 = arith.constant 0 : index
    %c0_8 = arith.constant 0 : index
    %c0_9 = arith.constant 0 : index
    %c0_10 = arith.constant 0 : index
    %10 = vector.load %arg5[%c0_7, %c0_8, %c0_9, %c0_10] : memref<1x2x256x128xbf16, #tpu.memory_space<vmem>>, vector<1x2x256x128xbf16>
    %11 = vector.shape_cast %10 : vector<1x2x256x128xbf16> to vector<2x256x128xbf16>
    %12 = vector.shape_cast %9 : vector<2x256x128xbf16> to vector<1x2x256x128xbf16>
    tpu.vector_store %arg5[%c0_7, %c0_8, %c0_9, %c0_10], %12 {strides = array<i32>} : memref<1x2x256x128xbf16, #tpu.memory_space<vmem>>, vector<1x2x256x128xbf16>,
    %13 = vector.shape_cast %7 : vector<256x256xbf16> to vector<256x2x128xbf16>
    %14 = tpu.transpose %13, [1, 0, 2] : vector<256x2x128xbf16> -> vector<2x256x128xbf16>
    %c0_11 = arith.constant 0 : index
    %c0_12 = arith.constant 0 : index
    %c0_13 = arith.constant 0 : index
    %c0_14 = arith.constant 0 : index
    %15 = vector.load %arg6[%c0_11, %c0_12, %c0_13, %c0_14] : memref<1x2x256x128xbf16, #tpu.memory_space<vmem>>, vector<1x2x256x128xbf16>
    %16 = vector.shape_cast %15 : vector<1x2x256x128xbf16> to vector<2x256x128xbf16>
    %17 = vector.shape_cast %14 : vector<2x256x128xbf16> to vector<1x2x256x128xbf16>
    tpu.vector_store %arg6[%c0_11, %c0_12, %c0_13, %c0_14], %17 {strides = array<i32>} : memref<1x2x256x128xbf16, #tpu.memory_space<vmem>>, vector<1x2x256x128xbf16>,
    return
  }
  func.func @transform_0(%arg0: i32, %arg1: i32) -> (i32, i32, i32) {
    %c0_i32 = arith.constant 0 : i32
    %c0_i32_0 = arith.constant 0 : i32
    return %arg0, %arg1, %c0_i32 : i32, i32, i32
  }
  func.func @transform_1(%arg0: i32, %arg1: i32) -> (i32, i32) {
    %c0_i32 = arith.constant 0 : i32
    %c0_i32_0 = arith.constant 0 : i32
    %c0_i32_1 = arith.constant 0 : i32
    return %c0_i32, %c0_i32_0 : i32, i32
  }
  func.func @transform_2(%arg0: i32, %arg1: i32) -> (i32, i32) {
    %c0_i32 = arith.constant 0 : i32
    %c0_i32_0 = arith.constant 0 : i32
    %c0_i32_1 = arith.constant 0 : i32
    return %c0_i32, %c0_i32_0 : i32, i32
  }
  func.func @transform_3(%arg0: i32, %arg1: i32) -> (i32, i32, i32, i32) {
    %c0_i32 = arith.constant 0 : i32
    %c0_i32_0 = arith.constant 0 : i32
    %c0_i32_1 = arith.constant 0 : i32
    return %arg0, %c0_i32, %arg1, %c0_i32_0 : i32, i32, i32, i32
  }
  func.func @transform_4(%arg0: i32, %arg1: i32) -> (i32, i32, i32, i32) {
    %c0_i32 = arith.constant 0 : i32
    %c0_i32_0 = arith.constant 0 : i32
    %c0_i32_1 = arith.constant 0 : i32
    return %arg0, %c0_i32, %arg1, %c0_i32_0 : i32, i32, i32, i32
  }
}

module attributes {stable_mosaic.version = 11 : i64} {
  func.func @kv_projection_kernel(%arg0: i32, %arg1: i32, %arg2: memref<1x256x256xbf16, #tpu.memory_space<vmem>>, %arg3: memref<256x256xbf16, #tpu.memory_space<vmem>>, %arg4: memref<256x256xbf16, #tpu.memory_space<vmem>>, %arg5: memref<1x2x256x128xbf16, #tpu.memory_space<vmem>>, %arg6: memref<1x2x256x128xbf16, #tpu.memory_space<vmem>>) attributes {dimension_semantics = [#tpu.dimension_semantics<parallel>, #tpu.dimension_semantics<parallel>], iteration_bounds = array<i64: 2, 1>, scalar_prefetch = 0 : i64, scratch_operands = 0 : i64, tpu.core_type = #tpu.core_type<tc>, window_params = [{transform_indices = @transform_0, window_bounds = array<i64: 1, 256, 256>}, {pipeline_mode = #tpu.pipeline_mode<synchronous>, transform_indices = @transform_1, window_bounds = array<i64: 256, 256>}, {pipeline_mode = #tpu.pipeline_mode<synchronous>, transform_indices = @transform_2, window_bounds = array<i64: 256, 256>}, {transform_indices = @transform_3, window_bounds = array<i64: 1, 2, 256, 128>}, {transform_indices = @transform_4, window_bounds = array<i64: 1, 2, 256, 128>}]} {
    %c0 = arith.constant 0 : index
    %c0_0 = arith.constant 0 : index
    %c0_1 = arith.constant 0 : index
    %0 = vector.load %arg2[%c0, %c0_0, %c0_1] : memref<1x256x256xbf16, #tpu.memory_space<vmem>>, vector<1x256x256xbf16>
    %1 = vector.shape_cast %0 : vector<1x256x256xbf16> to vector<256x256xbf16>
    %c0_2 = arith.constant 0 : index
    %c0_3 = arith.constant 0 : index
    %2 = vector.load %arg3[%c0_2, %c0_3] : memref<256x256xbf16, #tpu.memory_space<vmem>>, vector<256x256xbf16>
    %cst = arith.constant dense<0.000000e+00> : vector<256x256xf32>
    %3 = tpu.matmul %1, %2, %cst {dimension_numbers = #tpu.dot_dimension_numbers<[1], [0], [0], [1], [0, 0, 1, 1], [], []>} : vector<256x256xbf16>, vector<256x256xbf16>, vector<256x256xf32> -> vector<256x256xf32>
    %4 = arith.truncf %3 : vector<256x256xf32> to vector<256x256xbf16>
    %c0_4 = arith.constant 0 : index
    %c0_5 = arith.constant 0 : index
    %5 = vector.load %arg4[%c0_4, %c0_5] : memref<256x256xbf16, #tpu.memory_space<vmem>>, vector<256x256xbf16>
    %cst_6 = arith.constant dense<0.000000e+00> : vector<256x256xf32>
    %6 = tpu.matmul %1, %5, %cst_6 {dimension_numbers = #tpu.dot_dimension_numbers<[1], [0], [0], [1], [0, 0, 1, 1], [], []>} : vector<256x256xbf16>, vector<256x256xbf16>, vector<256x256xf32> -> vector<256x256xf32>
    %7 = arith.truncf %6 : vector<256x256xf32> to vector<256x256xbf16>
    %8 = vector.shape_cast %4 : vector<256x256xbf16> to vector<256x2x128xbf16>
    %9 = tpu.transpose %8, [1, 0, 2] : vector<256x2x128xbf16> -> vector<2x256x128xbf16>
    %c0_7 = arith.constant 0 : index
    %c0_8 = arith.constant 0 : index
    %c0_9 = arith.constant 0 : index
    %c0_10 = arith.constant 0 : index
    %10 = vector.load %arg5[%c0_7, %c0_8, %c0_9, %c0_10] : memref<1x2x256x128xbf16, #tpu.memory_space<vmem>>, vector<1x2x256x128xbf16>
    %11 = vector.shape_cast %10 : vector<1x2x256x128xbf16> to vector<2x256x128xbf16>
    %12 = vector.shape_cast %9 : vector<2x256x128xbf16> to vector<1x2x256x128xbf16>
    tpu.vector_store %arg5[%c0_7, %c0_8, %c0_9, %c0_10], %12 {strides = array<i32>} : memref<1x2x256x128xbf16, #tpu.memory_space<vmem>>, vector<1x2x256x128xbf16>,
    %13 = vector.shape_cast %7 : vector<256x256xbf16> to vector<256x2x128xbf16>
    %14 = tpu.transpose %13, [1, 0, 2] : vector<256x2x128xbf16> -> vector<2x256x128xbf16>
    %c0_11 = arith.constant 0 : index
    %c0_12 = arith.constant 0 : index
    %c0_13 = arith.constant 0 : index
    %c0_14 = arith.constant 0 : index
    %15 = vector.load %arg6[%c0_11, %c0_12, %c0_13, %c0_14] : memref<1x2x256x128xbf16, #tpu.memory_space<vmem>>, vector<1x2x256x128xbf16>
    %16 = vector.shape_cast %15 : vector<1x2x256x128xbf16> to vector<2x256x128xbf16>
    %17 = vector.shape_cast %14 : vector<2x256x128xbf16> to vector<1x2x256x128xbf16>
    tpu.vector_store %arg6[%c0_11, %c0_12, %c0_13, %c0_14], %17 {strides = array<i32>} : memref<1x2x256x128xbf16, #tpu.memory_space<vmem>>, vector<1x2x256x128xbf16>,
    return
  }
  func.func @transform_0(%arg0: i32, %arg1: i32) -> (i32, i32, i32) {
    %c0_i32 = arith.constant 0 : i32
    %c0_i32_0 = arith.constant 0 : i32
    return %arg0, %arg1, %c0_i32 : i32, i32, i32
  }
  func.func @transform_1(%arg0: i32, %arg1: i32) -> (i32, i32) {
    %c0_i32 = arith.constant 0 : i32
    %c0_i32_0 = arith.constant 0 : i32
    %c0_i32_1 = arith.constant 0 : i32
    return %c0_i32, %c0_i32_0 : i32, i32
  }
  func.func @transform_2(%arg0: i32, %arg1: i32) -> (i32, i32) {
    %c0_i32 = arith.constant 0 : i32
    %c0_i32_0 = arith.constant 0 : i32
    %c0_i32_1 = arith.constant 0 : i32
    return %c0_i32, %c0_i32_0 : i32, i32
  }
  func.func @transform_3(%arg0: i32, %arg1: i32) -> (i32, i32, i32, i32) {
    %c0_i32 = arith.constant 0 : i32
    %c0_i32_0 = arith.constant 0 : i32
    %c0_i32_1 = arith.constant 0 : i32
    return %arg0, %c0_i32, %arg1, %c0_i32_0 : i32, i32, i32, i32
  }
  func.func @transform_4(%arg0: i32, %arg1: i32) -> (i32, i32, i32, i32) {
    %c0_i32 = arith.constant 0 : i32
    %c0_i32_0 = arith.constant 0 : i32
    %c0_i32_1 = arith.constant 0 : i32
    return %arg0, %c0_i32, %arg1, %c0_i32_0 : i32, i32, i32, i32
  }
}

</mosaic_0001>

<bundles_post_ra>
// kernel: tpu_custom_call.1
= control target key start
LH: loop header
LB: loop body
LE: loop exit
PB: predicated region body
PF: predicated region fallthrough
CT: control target
= control target key end

     0   :  { %10 = vsyncpa [#allocation3], 0  ;;  %s11219_s0 = inlined_call_operand.hbm [shape: bf16[2,256,256], index: 0, kind: input, shape index: {}]   ;;  %s11220_s1 = inlined_call_operand.hbm [shape: bf16[256,256], index: 1, kind: input, shape index: {}]   ;;  %s11221_s2 = inlined_call_operand.hbm [shape: bf16[256,256], index: 2, kind: input, shape index: {}]   ;;  %s11222_s3 = inlined_call_operand.hbm [shape: bf16[2,2,256,128], index: 3, kind: output, shape index: {0}]   ;;  %s11223_s4 = inlined_call_operand.hbm [shape: bf16[2,2,256,128], index: 4, kind: output, shape index: {1}]  }
   0x1   :  { %12 = vsyncpa [#allocation3 + $0x1], 0 }
   0x2   :  { %13 = vsyncpa [#allocation6], 0 }
   0x3   :  { %14 = vsyncpa [#allocation4], 0 }
   0x4   :  { %16 = vsyncpa [#allocation4 + $0x1], 0 }
   0x5   :  { %17 = vsyncpa [#allocation10], 0 }
   0x6   :  { %19 = vsyncpa [#allocation10 + $0x1], 0  ;;  %s9575_s15 = smov 0   ;;  %s9577_s16 = smov 0  }
   0x7   :  { %s9579_s17 = smov 0   ;;  %s9581_s18 = smov 0  }
   0x8   :  { %s9583_s19 = smov 0   ;;  %s9585_s20 = smov 0  }
   0x9 LB: > { %s8725_s21 = sadd.s32 4294967295, %s9536_s20   ;;  %s8726_s22 = sadd.s32 4294967294, %s9536_s20   ;;  %s9536_s20 = sphi %s9585_s20, %s25_s20   ;;  %s9532_s19 = sphi %s9583_s19, %s11242_s19   ;;  %s9528_s18 = sphi %s9581_s18, %s11241_s18   ;;  %s9524_s17 = sphi %s9579_s17, %s11240_s17   ;;  %s9520_s16 = sphi %s9577_s16, %s11239_s16   ;;  %s9516_s15 = sphi %s9575_s15, %s11238_s15  }
   0xa   : > { %p59_p0 = scmp.ne.s32.totalorder %s9520_s16, %s9516_s15  ;;  %p9609_p1 = scmp.eq.s32.totalorder %s8725_s21, 0 }
   0xb   : > { %p9613_p2 = scmp.eq.s32.totalorder %s8725_s21, 1  ;;  %p133_p3 = scmp.eq.s32.totalorder %s8726_s22, 1 }
   0xc   : > { %p9619_p4 = por %p9609_p1, %p59_p0  ;;  %p8727_p5 = scmp.ge.s32.totalorder %s9536_s20, 1 }
   0xd   : > { %p9624_p6 = por %p133_p3, %p59_p0  ;;  %p168_p7 = scmp.lt.s32.totalorder %s9536_s20, 3 }
   0xe   : > { %s9538_s28 = smov [#allocation5]   ;;  %s9539_s5 = smov [#allocation7]  }
   0xf   : > { %s11229_s26 = scalar_select %p9624_p6, 1, 0 }
  0x10   : > { %p9629_p8 = pnand %p8727_p5, %p168_p7  ;;  %s180_s29 = sshll.u32 %s9538_s28, 4  ;;  %s181_s29 = int_to_ptr.vmem [resolvable:$true] %s180_s29 }
  0x11   : > { %s193_s6 = sshll.u32 %s9539_s5, 4  ;;  %s9353_s7 = scalar_lea.vmem %s181_s29, 4096  ;;  %s194_s6 = int_to_ptr.vmem [resolvable:$true] %s193_s6 }
  0x12   : > { %p9117_p9 = pneg %p9629_p8  ;;  %p9354_p13 = scmp.ne.s32.totalorder %s181_s29, %s9353_s7 }
  0x13   : > { %p9361_p5 = scmp.lt.s32.totalorder %s181_s29, %s181_s29  ;;  %p9362_p7 = scmp.lt.s32.totalorder %s9353_s7, %s9353_s7 }
  0x14   : > { %p9638_p11 = pnand %p9117_p9, %p9609_p1 }
  0x15   : > { %p9363_p10 = por %p9362_p7, %p9361_p5 }
  0x16   : > { %p9344_p12 = pneg %p9638_p11 }
  0x18   : > { %p9356_p0 = pnand %p9354_p13, %p9344_p12 }
  0x1a   : > { %p9357_p3 = pneg %p9356_p0 }
  0x1c   : > { %p9364_p9 = pnand %p9363_p10, %p9357_p3 }
  0x1e   : > { %9367 = shalt.err (!%p9364_p9)
}
  0x1f   : > { %s11224_s8 = smov 128   ;;  %s11225_s9 = smov 8  }
  0x20   : > { %9120 = dma.hbm_to_vmem [thread:$0]  (!%p9638_p11), %s11220_s1, 4096, %s181_s29, [#allocation6], %s11224_s8, %s11224_s8, %s11225_s9  }
  0x21   : > { %s9379_s12 = scalar_lea.vmem %s194_s6, 4096  ;;  %p9387_p10 = scmp.lt.s32.totalorder %s194_s6, %s194_s6 }
  0x22   : > { %p9380_p13 = scmp.ne.s32.totalorder %s194_s6, %s9379_s12  ;;  %p9388_p3 = scmp.lt.s32.totalorder %s9379_s12, %s9379_s12 }
  0x24   : > { %p9382_p0 = pnand %p9380_p13, %p9344_p12  ;;  %p9389_p7 = por %p9388_p3, %p9387_p10 }
  0x26   : > { %p9383_p5 = pneg %p9382_p0 }
  0x28   : > { %p9390_p9 = pnand %p9389_p7, %p9383_p5 }
  0x2a   : > { %9393 = shalt.err (!%p9390_p9)
}
  0x2b   : > { %9123 = dma.hbm_to_vmem [thread:$0]  (!%p9638_p11), %s11221_s2, 4096, %s194_s6, [#allocation6], %s11224_s8, %s11224_s8, %s11225_s9  }
  0x2c   : > { %s37_s21 = sadd.s32 1, %s9532_s19  ;;  %s46_s22 = sadd.s32 1, %s9524_s17 }
  0x2d   : > { %p39_p12 = scmp.ge.s32.totalorder %s37_s21, 2  ;;  %p53_p13 = scmp.ne.s32.totalorder %s9524_s17, %s9520_s16 }
  0x2e   : > { %p54_p0 = scmp.eq.s32.totalorder %s9536_s20, 0  ;;  %p9137_p5 = scmp.lt.s32.totalorder %s9536_s20, 2 }
  0x2f   : > { %s11244_s21 = smov (%p39_p12, %s37_s21), 0  ;;  %p9676_p3 = por %p9613_p2, %p53_p13 }
  0x30   : > { %p55_p10 = por %p54_p0, %p53_p13  ;;  %s41_s29 = ssub.s32 %s9532_s19, %s11244_s21 }
  0x31   : > { %s207_s30 = sand.u32 1, %s9524_s17   ;;  %p44_p7 = scmp.eq.s32.totalorder %s41_s29, 0 }
  0x32   : > { %s8731_s5 = sshll.u32 %s207_s30, 8  ;;  %s9100_s6 = sshll.u32 %s9532_s19, 12 }
  0x33   : > { %s9685_s7 = scalar_select %p44_p7, %s9524_s17, %s46_s22  }
  0x34   : > { %s220_s12 = scalar_lea.hbm %s11219_s0, %s9100_s6  ;;  %s211_s13 = scalar_lea.vmem [#allocation2], %s8731_s5 }
  0x35   : > { %s221_s14 = sshll.u32 %s211_s13, 4  ;;  %p9692_p11 = pnand %p9137_p5, %p55_p10  ;;  %s222_s14 = int_to_ptr.vmem [resolvable:$true] %s221_s14 }
  0x36   : > { %s208_s8 = scalar_lea.sflag [#allocation3], %s207_s30  ;;  %s9407_s29 = scalar_lea.vmem %s222_s14, 4096 }
  0x37   : > { %p9396_p2 = pneg %p9692_p11  ;;  %p9408_p9 = scmp.ne.s32.totalorder %s222_s14, %s9407_s29 }
  0x38   : > { %s9542_s22 = smov [#allocation2]  }
  0x39   : > { %p9410_p12 = pnand %p9408_p9, %p9396_p2  ;;  %s9412_s9 = sshll.u32 %s9542_s22, 4  ;;  %s9413_s9 = int_to_ptr.vmem [resolvable:$false] %s9412_s9 }
  0x3a   : > { %s9414_s6 = scalar_lea.vmem %s9413_s9, 8192  ;;  %p9415_p0 = scmp.lt.s32.totalorder %s222_s14, %s9413_s9 }
  0x3b   : > { %p9411_p13 = pneg %p9410_p12  ;;  %p9416_p7 = scmp.lt.s32.totalorder %s9414_s6, %s9407_s29 }
  0x3d   : > { %p9417_p6 = por %p9416_p7, %p9415_p0 }
  0x3f   : > { %p9418_p5 = pnand %p9417_p6, %p9411_p13 }
  0x41   : > { %9421 = shalt.err (!%p9418_p5)
}
  0x42   : > { %s11234_s5 = smov 8   ;;  %s11235_s10 = smov 128  }
  0x43   : > { %9127 = dma.hbm_to_vmem [thread:$0]  (!%p9692_p11), %s220_s12, 4096, %s222_s14, %s208_s8, %s11235_s10, %s11235_s10, %s11234_s5  }
  0x44   : > { %233 = sbr.rel (%p9629_p8) target bundleno = 851 (0x353), region = 32  ;;  %s9706_s30 = sand.u32 (!%p9629_p8), 1, %s9520_s16  }
  0x45   : > { %s9709_s9 = sshll.u32 (!%p9629_p8), %s9706_s30, 8  ;;  %s236_s11 = scalar_lea.sflag (!%p9629_p8), [#allocation3], %s9706_s30 }
  0x46   : > { %s9713_s13 = scalar_lea.vmem (!%p9629_p8), [#allocation2], %s9709_s9 }
  0x49   : > { %9499 = dma.done.wait (%p9619_p4), %s236_s11, 4096  }
  0x4a   : > { %9501 = vsyncadd (%p9619_p4), %s236_s11, 4294963200 }
  0x4b   : > { %9503 = dma.done.wait (%p9609_p1), [#allocation6], 8192  }
  0x4c   : > { %9505 = vsyncadd (%p9609_p1), [#allocation6], 4294959104  ;;  %v9198_v0 = vld [vmem:[#allocation5 + $0x74] ss:$8 sps:$4 sm:$0xff]   ;;  %v9202_v2 = vld [vmem:[#allocation5 + $0x70] ss:$8 sps:$4 sm:$0xff]  }
  0x4d   : > { %v9200_v1 = vld [vmem:[#allocation7 + $0x74] ss:$8 sps:$4 sm:$0xff]   ;;  %665 = vmatprep.subr.bf16.mxu0 %v9198_v0  ;;  %v9203_v3 = vld [vmem:[#allocation7 + $0x70] ss:$8 sps:$4 sm:$0xff]   ;;  %v9204_v4 = vld [vmem:[#allocation5 + $0x64] ss:$8 sps:$4 sm:$0xff]  }
  0x4e   : > { %1082 = vmatprep.subr.bf16.mxu1 %v9200_v1  ;;  %666 = vmatpush1.bf16.msra.mxu0 %v9202_v2  ;;  %v9206_v5 = vld [vmem:[#allocation7 + $0x64] ss:$8 sps:$4 sm:$0xff]   ;;  %v9208_v6 = vld [vmem:[#allocation5 + $0x60] ss:$8 sps:$4 sm:$0xff]   ;;  %v9210_v8 = vld [vmem:[#allocation5 + $0x54] ss:$8 sps:$4 sm:$0xff]  }
  0x4f   : > { %1083 = vmatpush1.bf16.msra.mxu1 %v9203_v3  ;;  %667 = vmatprep.subr.bf16.mxu0 %v9204_v4  ;;  %v9209_v7 = vld [vmem:[#allocation7 + $0x60] ss:$8 sps:$4 sm:$0xff]   ;;  %v9212_v9 = vld [vmem:[#allocation7 + $0x54] ss:$8 sps:$4 sm:$0xff]   ;;  %v9214_v10 = vld [vmem:[#allocation5 + $0x50] ss:$8 sps:$4 sm:$0xff]  }
  0x50   : > { %1084 = vmatprep.subr.bf16.mxu1 %v9206_v5  ;;  %v9215_v11 = vld [vmem:[#allocation7 + $0x50] ss:$8 sps:$4 sm:$0xff]   ;;  %v9216_v12 = vld [vmem:[#allocation5 + $0x44] ss:$8 sps:$4 sm:$0xff]   ;;  %v9220_v14 = vld [vmem:[#allocation5 + $0x40] ss:$8 sps:$4 sm:$0xff]  }
  0x51   : > { %v9218_v13 = vld [vmem:[#allocation7 + $0x44] ss:$8 sps:$4 sm:$0xff]   ;;  %v9221_v15 = vld [vmem:[#allocation7 + $0x40] ss:$8 sps:$4 sm:$0xff]   ;;  %v9222_v16 = vld [vmem:[#allocation5 + $0x34] ss:$8 sps:$4 sm:$0xff]  }
  0x52   : > { %668 = vmatpush1.bf16.msra.mxu0 %v9208_v6  ;;  %v9224_v17 = vld [vmem:[#allocation7 + $0x34] ss:$8 sps:$4 sm:$0xff]   ;;  %v9226_v18 = vld [vmem:[#allocation5 + $0x30] ss:$8 sps:$4 sm:$0xff]   ;;  %v9228_v20 = vld [vmem:[#allocation5 + $0x24] ss:$8 sps:$4 sm:$0xff]  }
  0x53   : > { %1085 = vmatpush1.bf16.msra.mxu1 %v9209_v7  ;;  %669 = vmatprep.subr.bf16.mxu0 %v9210_v8  ;;  %v9227_v19 = vld [vmem:[#allocation7 + $0x30] ss:$8 sps:$4 sm:$0xff]   ;;  %v9230_v21 = vld [vmem:[#allocation7 + $0x24] ss:$8 sps:$4 sm:$0xff]   ;;  %v9232_v22 = vld [vmem:[#allocation5 + $0x20] ss:$8 sps:$4 sm:$0xff]  }
  0x54   : > { %1086 = vmatprep.subr.bf16.mxu1 %v9212_v9  ;;  %v9233_v23 = vld [vmem:[#allocation7 + $0x20] ss:$8 sps:$4 sm:$0xff]   ;;  %v9234_v24 = vld [vmem:[#allocation5 + $0x14] ss:$8 sps:$4 sm:$0xff]   ;;  %v9238_v26 = vld [vmem:[#allocation5 + $0x10] ss:$8 sps:$4 sm:$0xff]  }
  0x55   : > { %v9236_v25 = vld [vmem:[#allocation7 + $0x14] ss:$8 sps:$4 sm:$0xff]   ;;  %v9239_v27 = vld [vmem:[#allocation7 + $0x10] ss:$8 sps:$4 sm:$0xff]   ;;  %v9240_v28 = vld [vmem:[#allocation5 + $0x4] ss:$8 sps:$4 sm:$0xff]  }
  0x56   : > { %670 = vmatpush1.bf16.msra.mxu0 %v9214_v10  ;;  %v9242_v29 = vld [vmem:[#allocation7 + $0x4] ss:$8 sps:$4 sm:$0xff]   ;;  %v9244_v30 = vld [vmem:[#allocation5] ss:$8 sps:$4 sm:$0xff]   ;;  %v9246_v32 = vld [vmem:[#allocation5 + $0xf4] ss:$8 sps:$4 sm:$0xff]  }
  0x57   : > { %1087 = vmatpush1.bf16.msra.mxu1 %v9215_v11  ;;  %671 = vmatprep.subr.bf16.mxu0 %v9216_v12  ;;  %v9245_v31 = vld [vmem:[#allocation7] ss:$8 sps:$4 sm:$0xff]   ;;  %v9248_v33 = vld [vmem:[#allocation7 + $0xf4] ss:$8 sps:$4 sm:$0xff]   ;;  %v9250_v34 = vld [vmem:[#allocation5 + $0xf0] ss:$8 sps:$4 sm:$0xff]  }
  0x58   : > { %1088 = vmatprep.subr.bf16.mxu1 %v9218_v13  ;;  %v9251_v35 = vld [vmem:[#allocation7 + $0xf0] ss:$8 sps:$4 sm:$0xff]   ;;  %v9252_v36 = vld [vmem:[#allocation5 + $0xe4] ss:$8 sps:$4 sm:$0xff]   ;;  %v9256_v38 = vld [vmem:[#allocation5 + $0xe0] ss:$8 sps:$4 sm:$0xff]  }
  0x59   : > { %v9254_v37 = vld [vmem:[#allocation7 + $0xe4] ss:$8 sps:$4 sm:$0xff]   ;;  %v9257_v39 = vld [vmem:[#allocation7 + $0xe0] ss:$8 sps:$4 sm:$0xff]   ;;  %v9258_v40 = vld [vmem:[#allocation5 + $0xd4] ss:$8 sps:$4 sm:$0xff]  }
  0x5a   : > { %672 = vmatpush1.bf16.msra.mxu0 %v9220_v14  ;;  %v9260_v41 = vld [vmem:[#allocation7 + $0xd4] ss:$8 sps:$4 sm:$0xff]   ;;  %v9262_v42 = vld [vmem:[#allocation5 + $0xd0] ss:$8 sps:$4 sm:$0xff]   ;;  %v9264_v44 = vld [vmem:[#allocation5 + $0xc4] ss:$8 sps:$4 sm:$0xff]  }
  0x5b   : > { %1089 = vmatpush1.bf16.msra.mxu1 %v9221_v15  ;;  %673 = vmatprep.subr.bf16.mxu0 %v9222_v16  ;;  %v9263_v43 = vld [vmem:[#allocation7 + $0xd0] ss:$8 sps:$4 sm:$0xff]   ;;  %v9266_v45 = vld [vmem:[#allocation7 + $0xc4] ss:$8 sps:$4 sm:$0xff]   ;;  %v9268_v46 = vld [vmem:[#allocation5 + $0xc0] ss:$8 sps:$4 sm:$0xff]  }
  0x5c   : > { %1090 = vmatprep.subr.bf16.mxu1 %v9224_v17  ;;  %v9269_v47 = vld [vmem:[#allocation7 + $0xc0] ss:$8 sps:$4 sm:$0xff]   ;;  %v9296_v48 = vld [vmem:[%s9713_s13 + $0x4] ss:$8 sps:$4 sm:$0xff]   ;;  %v9270_v49 = vld [vmem:[#allocation5 + $0xb4] ss:$8 sps:$4 sm:$0xff]  }
  0x5d   : > { %v9272_v50 = vld [vmem:[#allocation7 + $0xb4] ss:$8 sps:$4 sm:$0xff]   ;;  %697 = vmatprep.mubr.bf16.mxu0 %v9296_v48  ;;  %1114 = vmatprep.mubr.bf16.mxu1 %v9296_v48  ;;  %v9274_v51 = vld [vmem:[#allocation5 + $0xb0] ss:$8 sps:$4 sm:$0xff]   ;;  %v9276_v53 = vld [vmem:[#allocation5 + $0xa4] ss:$8 sps:$4 sm:$0xff]  }
  0x5e   : > { %674 = vmatpush1.bf16.msra.mxu0 %v9226_v18  ;;  %v9275_v52 = vld [vmem:[#allocation7 + $0xb0] ss:$8 sps:$4 sm:$0xff]   ;;  %v9278_v54 = vld [vmem:[#allocation7 + $0xa4] ss:$8 sps:$4 sm:$0xff]   ;;  %v9280_v55 = vld [vmem:[#allocation5 + $0xa0] ss:$8 sps:$4 sm:$0xff]  }
  0x5f   : > { %1091 = vmatpush1.bf16.msra.mxu1 %v9227_v19  ;;  %675 = vmatprep.subr.bf16.mxu0 %v9228_v20  ;;  %v9281_v56 = vld [vmem:[#allocation7 + $0xa0] ss:$8 sps:$4 sm:$0xff]   ;;  %v9282_v57 = vld [vmem:[#allocation5 + $0x94] ss:$8 sps:$4 sm:$0xff]   ;;  %v9286_v59 = vld [vmem:[#allocation5 + $0x90] ss:$8 sps:$4 sm:$0xff]  }
  0x60   : > { %1092 = vmatprep.subr.bf16.mxu1 %v9230_v21  ;;  %v9284_v58 = vld [vmem:[#allocation7 + $0x94] ss:$8 sps:$4 sm:$0xff]   ;;  %v9287_v60 = vld [vmem:[#allocation7 + $0x90] ss:$8 sps:$4 sm:$0xff]   ;;  %v9288_v61 = vld [vmem:[#allocation5 + $0x84] ss:$8 sps:$4 sm:$0xff]  }
  0x61   : > { %v9290_v62 = vld [vmem:[#allocation7 + $0x84] ss:$8 sps:$4 sm:$0xff]   ;;  %v9292_v63 = vld [vmem:[#allocation5 + $0x80] ss:$8 sps:$4 sm:$0xff]   ;;  %v9297_v2 = vld [vmem:[%s9713_s13 + $0x14] ss:$8 sps:$4 sm:$0xff]  }
  0x62   : > { %676 = vmatpush1.bf16.msra.mxu0 %v9232_v22  ;;  %v9293_v0 = vld [vmem:[#allocation7 + $0x80] ss:$8 sps:$4 sm:$0xff]   ;;  %v9299_v3 = vld [vmem:[%s9713_s13 + $0x10] ss:$8 sps:$4 sm:$0xff]   ;;  %v9300_v4 = vld [vmem:[%s9713_s13 + $0x24] ss:$8 sps:$4 sm:$0xff]  }
  0x63   : > { %1093 = vmatpush1.bf16.msra.mxu1 %v9233_v23  ;;  %677 = vmatprep.subr.bf16.mxu0 %v9234_v24  ;;  %v9294_v1 = vld [vmem:[%s9713_s13] ss:$8 sps:$4 sm:$0xff]   ;;  %v9303_v6 = vld [vmem:[%s9713_s13 + $0x34] ss:$8 sps:$4 sm:$0xff]   ;;  %v9305_v7 = vld [vmem:[%s9713_s13 + $0x30] ss:$8 sps:$4 sm:$0xff]  }
  0x64   : > { %1094 = vmatprep.subr.bf16.mxu1 %v9236_v25  ;;  %v9302_v5 = vld [vmem:[%s9713_s13 + $0x20] ss:$8 sps:$4 sm:$0xff]   ;;  %v9306_v8 = vld [vmem:[%s9713_s13 + $0x44] ss:$8 sps:$4 sm:$0xff]   ;;  %v9309_v10 = vld [vmem:[%s9713_s13 + $0x54] ss:$8 sps:$4 sm:$0xff]  }
  0x65   : > { %v9308_v9 = vld [vmem:[%s9713_s13 + $0x40] ss:$8 sps:$4 sm:$0xff]   ;;  %v9311_v11 = vld [vmem:[%s9713_s13 + $0x50] ss:$8 sps:$4 sm:$0xff]   ;;  %v9312_v12 = vld [vmem:[%s9713_s13 + $0x64] ss:$8 sps:$4 sm:$0xff]  }
  0x66   : > { %678 = vmatpush1.bf16.msra.mxu0 %v9238_v26  ;;  %v9314_v13 = vld [vmem:[%s9713_s13 + $0x60] ss:$8 sps:$4 sm:$0xff]   ;;  %v9315_v14 = vld [vmem:[%s9713_s13 + $0x74] ss:$8 sps:$4 sm:$0xff]   ;;  %v9317_v15 = vld [vmem:[%s9713_s13 + $0x70] ss:$8 sps:$4 sm:$0xff]  }
  0x67   : > { %1095 = vmatpush1.bf16.msra.mxu1 %v9239_v27  ;;  %679 = vmatprep.subr.bf16.mxu0 %v9240_v28  ;;  %v9318_v16 = vld [vmem:[%s9713_s13 + $0x84] ss:$8 sps:$4 sm:$0xff]   ;;  %v9320_v17 = vld [vmem:[%s9713_s13 + $0x80] ss:$8 sps:$4 sm:$0xff]   ;;  %v9321_v18 = vld [vmem:[%s9713_s13 + $0x94] ss:$8 sps:$4 sm:$0xff]  }
  0x68   : > { %1096 = vmatprep.subr.bf16.mxu1 %v9242_v29  ;;  %v9323_v19 = vld [vmem:[%s9713_s13 + $0x90] ss:$8 sps:$4 sm:$0xff]   ;;  %v9324_v20 = vld [vmem:[%s9713_s13 + $0xa4] ss:$8 sps:$4 sm:$0xff]   ;;  %v9326_v21 = vld [vmem:[%s9713_s13 + $0xa0] ss:$8 sps:$4 sm:$0xff]  }
  0x69   : > { %v9327_v22 = vld [vmem:[%s9713_s13 + $0xb4] ss:$8 sps:$4 sm:$0xff]   ;;  %v9329_v23 = vld [vmem:[%s9713_s13 + $0xb0] ss:$8 sps:$4 sm:$0xff]   ;;  %v9330_v24 = vld [vmem:[%s9713_s13 + $0xc4] ss:$8 sps:$4 sm:$0xff]  }
  0x6a   : > { %680 = vmatpush1.bf16.msra.mxu0 %v9244_v30  ;;  %v9332_v25 = vld [vmem:[%s9713_s13 + $0xc0] ss:$8 sps:$4 sm:$0xff]   ;;  %v9333_v26 = vld [vmem:[%s9713_s13 + $0xd4] ss:$8 sps:$4 sm:$0xff]   ;;  %v9335_v27 = vld [vmem:[%s9713_s13 + $0xd0] ss:$8 sps:$4 sm:$0xff]  }
  0x6b   : > { %1097 = vmatpush1.bf16.msra.mxu1 %v9245_v31  ;;  %681 = vmatprep.subr.bf16.mxu0 %v9246_v32  ;;  %v9336_v28 = vld [vmem:[%s9713_s13 + $0xe4] ss:$8 sps:$4 sm:$0xff]   ;;  %v9338_v29 = vld [vmem:[%s9713_s13 + $0xe0] ss:$8 sps:$4 sm:$0xff]   ;;  %v9339_v30 = vld [vmem:[%s9713_s13 + $0xf4] ss:$8 sps:$4 sm:$0xff]  }
  0x6c   : > { %1098 = vmatprep.subr.bf16.mxu1 %v9248_v33  ;;  %v9341_v31 = vld [vmem:[%s9713_s13 + $0xf0] ss:$8 sps:$4 sm:$0xff]   ;;  %v9543_v32 = vmov 1983009808   ;;  %s9846_s23 = scalar_lea.vmem [#allocation8], %s9709_s9  ;;  %s9879_s25 = scalar_lea.vmem [#allocation9], %s9709_s9 }
  0x6d   : > { %v1443_v33 = vunpack.c.l.s4 %v9543_v32  ;;  %s9101_s27 = sshll.u32 %s9528_s18, 12  ;;  %s8566_s8 = sshll.u32 %s9846_s23, 4  ;;  %s11122_s8 = int_to_ptr.vmem [resolvable:$true] %s8566_s8 }
  0x6e   : > { %682 = vmatpush2.bf16.msra.mxu0 %v9250_v34  ;;  %v1445_v34 = vlaneseq  ;;  %s11120_s24 = scalar_lea.hbm %s11222_s3, %s9101_s27  ;;  %s8546_s29 = scalar_lea.sflag [#allocation4], %s9706_s30 }
  0x6f   : > { %1099 = vmatpush2.bf16.msra.mxu1 %v9251_v35  ;;  %683 = vmatprep.subr.bf16.mxu0 %v9252_v36  ;;  %s9422_s22 = scalar_lea.vmem %s11122_s8, 4096  ;;  %s9546_s6 = smov [#allocation8]  }
  0x70   : > { %1100 = vmatprep.subr.bf16.mxu1 %v9254_v37  ;;  %v9544_v37 = vmov 1934713408   ;;  %p9423_p1 = scmp.ne.s32.totalorder %s11122_s8, %s9422_s22  ;;  %s9426_s5 = sshll.u32 %s9546_s6, 4  ;;  %s9427_s5 = int_to_ptr.vmem [resolvable:$false] %s9426_s5 }
  0x71   : > { %s9428_s10 = scalar_lea.vmem %s9427_s5, 8192  ;;  %p9429_p8 = scmp.lt.s32.totalorder %s11122_s8, %s9427_s5 }
  0x72   : > { %684 = vmatpush2.bf16.msra.mxu0 %v9256_v38  ;;  %v1458_v38 = vunpack.c.l.s4 %v9544_v37  ;;  %p9424_p4 = pnand %p9423_p1, %p9676_p3  ;;  %p9430_p10 = scmp.lt.s32.totalorder %s9428_s10, %s9422_s22 }
  0x73   : > { %1101 = vmatpush2.bf16.msra.mxu1 %v9257_v39  ;;  %685 = vmatprep.subr.bf16.mxu0 %v9258_v40 }
  0x74   : > { %1102 = vmatprep.subr.bf16.mxu1 %v9260_v41  ;;  %v1444_v41 = vunpack.c.0.s8 %v1443_v33  ;;  %p9425_p6 = pneg %p9424_p4  ;;  %p9431_p11 = por %p9430_p10, %p9429_p8 }
  0x76   : > { %686 = vmatpush2.bf16.msra.mxu0 %v9262_v42  ;;  %v1446_v42 = vshrl.u32 %v1445_v34, 7  ;;  %p9432_p2 = pnand %p9431_p11, %p9425_p6 }
  0x77   : > { %1103 = vmatpush2.bf16.msra.mxu1 %v9263_v43  ;;  %687 = vmatprep.subr.bf16.mxu0 %v9264_v44 }
  0x78   : > { %1104 = vmatprep.subr.bf16.mxu1 %v9266_v45  ;;  %v1459_v45 = vunpack.c.0.s8 %v1458_v38 }
  0x7a   : > { %688 = vmatpush2.bf16.msra.mxu0 %v9268_v46 }
  0x7b   : > { %1105 = vmatpush2.bf16.msra.mxu1 %v9269_v47  ;;  %689 = vmatprep.subr.bf16.mxu0 %v9270_v49 }
  0x7c   : > { %1106 = vmatprep.subr.bf16.mxu1 %v9272_v50 }
  0x7e   : > { %690 = vmatpush2.bf16.msra.mxu0 %v9274_v51  ;;  %v9545_v51 = vmov 0  }
  0x7f   : > { %1107 = vmatpush2.bf16.msra.mxu1 %v9275_v52  ;;  %691 = vmatprep.subr.bf16.mxu0 %v9276_v53  ;;  %v9757_v52 = vpack.i.b16 %v9545_v51, %v9545_v51  ;;  %v9759_v53 = vsub.s32 %v1444_v41, %v1446_v42 }
  0x80   : > { %1108 = vmatprep.subr.bf16.mxu1 %v9278_v54 }
  0x82   : > { %692 = vmatpush2.bf16.msra.mxu0 %v9280_v55 }
  0x83   : > { %1109 = vmatpush2.bf16.msra.mxu1 %v9281_v56  ;;  %693 = vmatprep.subr.bf16.mxu0 %v9282_v57  ;;  %v9761_v56 = vsub.s32 %v1459_v45, %v1446_v42 }
  0x84   : > { %1110 = vmatprep.subr.bf16.mxu1 %v9284_v58 }
  0x86   : > { %694 = vmatpush2.bf16.msra.mxu0 %v9286_v59 }
  0x87   : > { %1111 = vmatpush2.bf16.msra.mxu1 %v9287_v60  ;;  %695 = vmatprep.subr.bf16.mxu0 %v9288_v61 }
  0x88   : > { %1112 = vmatprep.subr.bf16.mxu1 %v9290_v62 }
  0x8a   : > { %696 = vmatpush2.bf16.msra.mxu0 %v9292_v63 }
  0x8b   : > { %1113 = vmatpush2.bf16.msra.mxu1 %v9293_v0 }
  0x8d   : > { %698 = vmatmul.mubr.bf16.vlgmr.msra.gmra.mxu0 %v9294_v1 }
  0x8e   : > { %1115 = vmatmul.mubr.bf16.vlgmr.msra.gmra.mxu1 %v9294_v1  ;;  %707 = vmatprep.mubr.bf16.mxu0 %v9297_v2 }
  0x8f   : > { %1124 = vmatprep.mubr.bf16.mxu1 %v9297_v2 }
  0x95   : > { %708 = vmatmul.mubr.bf16.gmra.mxu0 %v9299_v3 }
  0x96   : > { %1125 = vmatmul.mubr.bf16.gmra.mxu1 %v9299_v3  ;;  %717 = vmatprep.mubr.bf16.mxu0 %v9300_v4 }
  0x97   : > { %1134 = vmatprep.mubr.bf16.mxu1 %v9300_v4 }
  0x9d   : > { %718 = vmatmul.mubr.bf16.gmra.mxu0 %v9302_v5 }
  0x9e   : > { %1135 = vmatmul.mubr.bf16.gmra.mxu1 %v9302_v5  ;;  %727 = vmatprep.mubr.bf16.mxu0 %v9303_v6 }
  0x9f   : > { %1144 = vmatprep.mubr.bf16.mxu1 %v9303_v6 }
  0xa5   : > { %728 = vmatmul.mubr.bf16.gmra.mxu0 %v9305_v7 }
  0xa6   : > { %1145 = vmatmul.mubr.bf16.gmra.mxu1 %v9305_v7  ;;  %737 = vmatprep.mubr.bf16.mxu0 %v9306_v8 }
  0xa7   : > { %1154 = vmatprep.mubr.bf16.mxu1 %v9306_v8 }
  0xad   : > { %738 = vmatmul.mubr.bf16.gmra.mxu0 %v9308_v9 }
  0xae   : > { %1155 = vmatmul.mubr.bf16.gmra.mxu1 %v9308_v9  ;;  %747 = vmatprep.mubr.bf16.mxu0 %v9309_v10 }
  0xaf   : > { %1164 = vmatprep.mubr.bf16.mxu1 %v9309_v10 }
  0xb5   : > { %748 = vmatmul.mubr.bf16.gmra.mxu0 %v9311_v11 }
  0xb6   : > { %1165 = vmatmul.mubr.bf16.gmra.mxu1 %v9311_v11  ;;  %757 = vmatprep.mubr.bf16.mxu0 %v9312_v12 }
  0xb7   : > { %1174 = vmatprep.mubr.bf16.mxu1 %v9312_v12 }
  0xbd   : > { %758 = vmatmul.mubr.bf16.gmra.mxu0 %v9314_v13 }
  0xbe   : > { %1175 = vmatmul.mubr.bf16.gmra.mxu1 %v9314_v13  ;;  %767 = vmatprep.mubr.bf16.mxu0 %v9315_v14 }
  0xbf   : > { %1184 = vmatprep.mubr.bf16.mxu1 %v9315_v14 }
  0xc5   : > { %768 = vmatmul.mubr.bf16.gmra.mxu0 %v9317_v15 }
  0xc6   : > { %1185 = vmatmul.mubr.bf16.gmra.mxu1 %v9317_v15  ;;  %777 = vmatprep.mubr.bf16.mxu0 %v9318_v16 }
  0xc7   : > { %1194 = vmatprep.mubr.bf16.mxu1 %v9318_v16 }
  0xcd   : > { %778 = vmatmul.mubr.bf16.gmra.mxu0 %v9320_v17 }
  0xce   : > { %1195 = vmatmul.mubr.bf16.gmra.mxu1 %v9320_v17  ;;  %787 = vmatprep.mubr.bf16.mxu0 %v9321_v18 }
  0xcf   : > { %1204 = vmatprep.mubr.bf16.mxu1 %v9321_v18 }
  0xd5   : > { %788 = vmatmul.mubr.bf16.gmra.mxu0 %v9323_v19 }
  0xd6   : > { %1205 = vmatmul.mubr.bf16.gmra.mxu1 %v9323_v19  ;;  %797 = vmatprep.mubr.bf16.mxu0 %v9324_v20 }
  0xd7   : > { %1214 = vmatprep.mubr.bf16.mxu1 %v9324_v20 }
  0xdd   : > { %798 = vmatmul.mubr.bf16.gmra.mxu0 %v9326_v21 }
  0xde   : > { %1215 = vmatmul.mubr.bf16.gmra.mxu1 %v9326_v21  ;;  %807 = vmatprep.mubr.bf16.mxu0 %v9327_v22 }
  0xdf   : > { %1224 = vmatprep.mubr.bf16.mxu1 %v9327_v22 }
  0xe5   : > { %808 = vmatmul.mubr.bf16.gmra.mxu0 %v9329_v23 }
  0xe6   : > { %1225 = vmatmul.mubr.bf16.gmra.mxu1 %v9329_v23  ;;  %817 = vmatprep.mubr.bf16.mxu0 %v9330_v24 }
  0xe7   : > { %1234 = vmatprep.mubr.bf16.mxu1 %v9330_v24 }
  0xed   : > { %818 = vmatmul.mubr.bf16.gmra.mxu0 %v9332_v25 }
  0xee   : > { %1235 = vmatmul.mubr.bf16.gmra.mxu1 %v9332_v25  ;;  %827 = vmatprep.mubr.bf16.mxu0 %v9333_v26 }
  0xef   : > { %1244 = vmatprep.mubr.bf16.mxu1 %v9333_v26 }
  0xf5   : > { %828 = vmatmul.mubr.bf16.gmra.mxu0 %v9335_v27 }
  0xf6   : > { %1245 = vmatmul.mubr.bf16.gmra.mxu1 %v9335_v27  ;;  %837 = vmatprep.mubr.bf16.mxu0 %v9336_v28 }
  0xf7   : > { %1254 = vmatprep.mubr.bf16.mxu1 %v9336_v28 }
  0xfd   : > { %838 = vmatmul.mubr.bf16.gmra.mxu0 %v9338_v29 }
  0xfe   : > { %1255 = vmatmul.mubr.bf16.gmra.mxu1 %v9338_v29  ;;  %847 = vmatprep.mubr.bf16.mxu0 %v9339_v30 }
  0xff   : > { %1264 = vmatprep.mubr.bf16.mxu1 %v9339_v30 }
 0x105   : > { %848 = vmatmul.mubr.bf16.gmra.mxu0 %v9341_v31 }
 0x106   : > { %1265 = vmatmul.mubr.bf16.gmra.mxu1 %v9341_v31 }
 0x14d   : > { %v699_v35 = vpop.f32.mrf.mxu0 }
 0x14e   : > { %v1116_v36 = vpop.f32.mrf.mxu1 }
 0x14f   : > { %v701_v39 = vpop.f32.mrf.mxu0 }
 0x150   : > { %v1118_v40 = vpop.f32.mrf.mxu1 }
 0x151   : > { %v703_v43 = vpop.f32.mrf.mxu0 }
 0x152   : > { %v1120_v44 = vpop.f32.mrf.mxu1  ;;  %v858_v46 = vpack.c.bf16 %v703_v43, %v699_v35 }
 0x153   : > { %v1275_v47 = vpack.c.bf16 %v1120_v44, %v1116_v36  ;;  %v705_v48 = vpop.f32.mrf.mxu0 }
 0x154   : > { %v1122_v49 = vpop.f32.mrf.mxu1  ;;  %v859_v50 = vpack.c.bf16 %v705_v48, %v701_v39  ;;  %v1311_v55 = vshrl.u32 %v858_v46, 16 }
 0x155   : > { %v1276_v54 = vpack.c.bf16 %v1122_v49, %v1118_v40  ;;  %v4933_v61 = vshrl.u32 %v1275_v47, 16  ;;  %v9763_v62 = vpop.f32.mrf.mxu0 }
 0x156   : > { %v1309_v57 = vpack.i.b16 %v859_v50, %v858_v46  ;;  %v1312_v58 = vshrl.u32 %v859_v50, 16  ;;  %v9767_v2 = vpop.f32.mrf.mxu1 }
 0x157   : > { %v4931_v59 = vpack.i.b16 %v1276_v54, %v1275_v47  ;;  %v4934_v60 = vshrl.u32 %v1276_v54, 16  ;;  %v9781_v14 = vpop.f32.mrf.mxu0 }
 0x158   : > { %v1313_v63 = vpack.i.b16 %v1312_v58, %v1311_v55  ;;  %v1441_v0 = vcombine.high %v1309_v57, %v9757_v52  ;;  %v1448_v1 = vrot.slane %v1309_v57, %v9759_v53  ;;  %v9787_v19 = vpop.f32.mrf.mxu1 }
 0x159   : > { %v4935_v3 = vpack.i.b16 %v4934_v60, %v4933_v61  ;;  %v5057_v4 = vcombine.high %v4931_v59, %v9757_v52  ;;  %v5064_v5 = vrot.slane %v4931_v59, %v9759_v53  ;;  %v9799_v32 = vpop.f32.mrf.mxu0 }
 0x15a   : > { %v1455_v6 = vrot.slane %v1441_v0, %v9759_v53  ;;  %v1456_v7 = vcombine.high %v1448_v1, %v9545_v51  ;;  %v1463_v8 = vrot.slane %v1448_v1, %v9761_v56  ;;  %v1490_v9 = vcombine.high %v1313_v63, %v9757_v52  ;;  %v9803_v37 = vpop.f32.mrf.mxu1 }
 0x15b   : > { %v1497_v10 = vrot.slane %v1313_v63, %v9759_v53  ;;  %v5071_v11 = vrot.slane %v5057_v4, %v9759_v53  ;;  %v5072_v12 = vcombine.high %v5064_v5, %v9545_v51  ;;  %v9779_v13 = vrot.slane %v5064_v5, %v9761_v56  ;;  %v715_v50 = vpop.f32.mrf.mxu0 }
 0x15c   : > { %v1470_v15 = vrot.slane %v1456_v7, %v9761_v56  ;;  %v1471_v16 = vcombine.high %v1455_v6, %v9545_v51  ;;  %v1478_v17 = vrot.slane %v1455_v6, %v9761_v56  ;;  %v1504_v18 = vrot.slane %v1490_v9, %v9759_v53  ;;  %v1132_v59 = vpop.f32.mrf.mxu1 }
 0x15d   : > { %v1505_v20 = vcombine.high %v1497_v10, %v9545_v51  ;;  %v1512_v21 = vrot.slane %v1497_v10, %v9761_v56  ;;  %v5086_v22 = vrot.slane %v5072_v12, %v9761_v56  ;;  %v5087_v23 = vcombine.high %v5071_v11, %v9545_v51  ;;  %v719_v10 = vpop.f32.mrf.mxu0 }
 0x15e   : > { %v1485_v24 = vrot.slane %v1471_v16, %v9761_v56  ;;  %v1520_v25 = vcombine.high %v1504_v18, %v9545_v51  ;;  %v1527_v26 = vrot.slane %v1504_v18, %v9761_v56  ;;  %v3009_v27 = vcombine.low %v1463_v8, %v1470_v15 }
 0x15f   : > { %v1519_v28 = vrot.slane %v1505_v20, %v9761_v56  ;;  %v8836_v29 = vcombine.high %v1463_v8, %v1470_v15  ;;  %v5094_v30 = vrot.slane %v5071_v11, %v9761_v56  ;;  %v5101_v31 = vrot.slane %v5087_v23, %v9761_v56 }
 0x160   : > { %v1534_v33 = vrot.slane %v1520_v25, %v9761_v56  ;;  %v3016_v34 = vrot.slane %v3009_v27, %v9759_v53  ;;  %v3025_v35 = vcombine.low %v1478_v17, %v1485_v24  ;;  %v8837_v36 = vcombine.high %v1478_v17, %v1485_v24  ;;  %v1136_v17 = vpop.f32.mrf.mxu1 }
 0x161   : > { %v3024_v38 = vrot.slane %v8836_v29, %v9759_v53  ;;  %v3058_v39 = vcombine.low %v1512_v21, %v1519_v28  ;;  %v8838_v40 = vcombine.high %v1512_v21, %v1519_v28  ;;  %v5106_v41 = vcombine.high %v4935_v3, %v9757_v52 }
 0x162   : > { %v3032_v42 = vrot.slane %v3025_v35, %v9759_v53  ;;  %v3040_v43 = vrot.slane %v8837_v36, %v9759_v53  ;;  %v3074_v44 = vcombine.low %v1527_v26, %v1534_v33  ;;  %v8839_v45 = vcombine.high %v1527_v26, %v1534_v33  ;;  %v9832_v33 = vpop.f32.mrf.mxu0 }
 0x163   : > { %v3041_v46 = vcombine.low %v3016_v34, %v3024_v38  ;;  %v3065_v47 = vrot.slane %v3058_v39, %v9759_v53  ;;  %v3073_v48 = vrot.slane %v8838_v40, %v9759_v53  ;;  %v5113_v49 = vrot.slane %v4935_v3, %v9759_v53 }
 0x164   : > { %v3049_v54 = vcombine.low %v3032_v42, %v3040_v43  ;;  %v3081_v55 = vrot.slane %v3074_v44, %v9759_v53  ;;  %v3089_v57 = vrot.slane %v8839_v45, %v9759_v53  ;;  %v5120_v58 = vrot.slane %v5106_v41, %v9759_v53 }
 0x165   : > { %v3048_v60 = vrot.slane %v3041_v46, %v9761_v56  ;;  %v3090_v61 = vcombine.low %v3065_v47, %v3073_v48  ;;  %v5121_v63 = vcombine.high %v5113_v49, %v9545_v51  ;;  %v5128_v0 = vrot.slane %v5113_v49, %v9761_v56 }
 0x166   : > { %v3056_v1 = vrot.slane %v3049_v54, %v9761_v56  ;;  %v3098_v4 = vcombine.low %v3081_v55, %v3089_v57  ;;  %v5136_v3 = vcombine.high %v5120_v58, %v9545_v51  ;;  %v5143_v5 = vrot.slane %v5120_v58, %v9761_v56  ;;  %v723_v54 = vpop.f32.mrf.mxu0 }
 0x167   : > { %v3097_v6 = vrot.slane %v3090_v61, %v9761_v56  ;;  %v5135_v7 = vrot.slane %v5121_v63, %v9761_v56  ;;  %v6625_v8 = vcombine.low %v9779_v13, %v5086_v22  ;;  %v8964_v9 = vcombine.high %v9779_v13, %v5086_v22 }
 0x168   : > { %v3057_v11 = vcombine.low %v3048_v60, %v3056_v1  ;;  %v3105_v12 = vrot.slane %v3098_v4, %v9761_v56  ;;  %v5150_v15 = vrot.slane %v5136_v3, %v9761_v56  ;;  %v6641_v16 = vcombine.low %v5094_v30, %v5101_v31 }
 0x169   : > { %v6632_v18 = vrot.slane %v6625_v8, %v9759_v53  ;;  %v6640_v20 = vrot.slane %v8964_v9, %v9759_v53  ;;  %v8965_v21 = vcombine.high %v5094_v30, %v5101_v31  ;;  %v6674_v23 = vcombine.low %v5128_v0, %v5135_v7  ;;  %v9835_v30 = vpop.f32.mrf.mxu1 }
 0x16a   : > { %v3106_v24 = vcombine.low %v3097_v6, %v3105_v12  ;;  %v4580_v25 = vshrl.u32 %v3057_v11, 16  ;;  %v6648_v26 = vrot.slane %v6641_v16, %v9759_v53  ;;  %v8966_v27 = vcombine.high %v5128_v0, %v5135_v7 }
 0x16b   : > { %v6656_v13 = vrot.slane %v8965_v21, %v9759_v53  ;;  %v6657_v22 = vcombine.low %v6632_v18, %v6640_v20  ;;  %v6681_v28 = vrot.slane %v6674_v23, %v9759_v53  ;;  %v6690_v29 = vcombine.low %v5143_v5, %v5150_v15  ;;  %v1140_v58 = vpop.f32.mrf.mxu1 }
 0x16c   : > { %v4579_v34 = vpack.i.b16 %v3106_v24, %v3057_v11  ;;  %v4581_v35 = vshrl.u32 %v3106_v24, 16  ;;  %v6689_v36 = vrot.slane %v8966_v27, %v9759_v53  ;;  %v8967_v38 = vcombine.high %v5143_v5, %v5150_v15 }
 0x16d   : > { %v6664_v31 = vrot.slane %v6657_v22, %v9761_v56  ;;  %v6665_v39 = vcombine.low %v6648_v26, %v6656_v13  ;;  %v6697_v40 = vrot.slane %v6690_v29, %v9759_v53  ;;  %v860_v41 = vpack.c.bf16 %v9799_v32, %v9763_v62 }
 0x16e   : > { %v4582_v42 = vpack.i.b16 %v4581_v35, %v4580_v25  ;;  %v8900_v43 = vcombine.low %v4579_v34, %v4579_v34  ;;  %v8901_v44 = vcombine.high %v4579_v34, %v4579_v34  ;;  %v6705_v45 = vrot.slane %v8967_v38, %v9759_v53 }
 0x16f   : > { %v6672_v46 = vrot.slane %v6665_v39, %v9761_v56  ;;  %v6706_v47 = vcombine.low %v6681_v28, %v6689_v36  ;;  %v1325_v48 = vshrl.u32 %v860_v41, 16  ;;  %v1277_v49 = vpack.c.bf16 %v9803_v37, %v9767_v2 }
 0x170   : > { %v8932_v55 = vcombine.low %v4582_v42, %v4582_v42  ;;  %v8933_v57 = vcombine.high %v4582_v42, %v4582_v42  ;;  %4865 = vst [vmem:[%s9846_s23] sm:$0xf] %v8900_v43  ;;  %4866 = vst [vmem:[%s9846_s23 + $0x4] sm:$0xf] %v8901_v44  ;;  %v6714_v62 = vcombine.low %v6697_v40, %v6705_v45 }
 0x171   : > { %v861_v32 = vpack.c.bf16 %v715_v50, %v9781_v14  ;;  %v6673_v60 = vcombine.low %v6664_v31, %v6672_v46  ;;  %v6713_v61 = vrot.slane %v6706_v47, %v9761_v56  ;;  %v4941_v63 = vshrl.u32 %v1277_v49, 16 }
 0x172   : > { %v1278_v2 = vpack.c.bf16 %v1132_v59, %v9787_v19  ;;  %4897 = vst [vmem:[%s9846_s23 + $0x80] sm:$0xf] %v8932_v55  ;;  %4898 = vst [vmem:[%s9846_s23 + $0x84] sm:$0xf] %v8933_v57  ;;  %v6721_v37 = vrot.slane %v6714_v62, %v9761_v56  ;;  %v9856_v4 = vpack.c.bf16 %v723_v54, %v719_v10 }
 0x173   : > { %v1323_v0 = vpack.i.b16 %v861_v32, %v860_v41  ;;  %v1326_v1 = vshrl.u32 %v861_v32, 16  ;;  %v8196_v3 = vshrl.u32 %v6673_v60, 16  ;;  %v9858_v7 = vpack.c.bf16 %v1140_v58, %v1136_v17 }
 0x174   : > { %v4939_v5 = vpack.i.b16 %v1278_v2, %v1277_v49  ;;  %v4942_v6 = vshrl.u32 %v1278_v2, 16  ;;  %v6722_v14 = vcombine.low %v6713_v61, %v6721_v37  ;;  %v1333_v10 = vshrl.u32 %v9856_v4, 16 }
 0x175   : > { %v1327_v50 = vpack.i.b16 %v1326_v1, %v1325_v48  ;;  %v1539_v8 = vcombine.high %v1323_v0, %v9757_v52  ;;  %v1546_v9 = vrot.slane %v1323_v0, %v9759_v53 }
 0x176   : > { %v9862_v19 = vpack.i.b16 %v4942_v6, %v4941_v63  ;;  %v5155_v59 = vcombine.high %v4939_v5, %v9757_v52  ;;  %v5162_v11 = vrot.slane %v4939_v5, %v9759_v53  ;;  %v8195_v12 = vpack.i.b16 %v6722_v14, %v6673_v60 }
 0x177   : > { %v8197_v15 = vshrl.u32 %v6722_v14, 16  ;;  %v1553_v16 = vrot.slane %v1539_v8, %v9759_v53  ;;  %v1554_v17 = vcombine.high %v1546_v9, %v9545_v51  ;;  %v1561_v18 = vrot.slane %v1546_v9, %v9761_v56 }
 0x178   : > { %v1588_v20 = vcombine.high %v1327_v50, %v9757_v52  ;;  %v1595_v21 = vrot.slane %v1327_v50, %v9759_v53  ;;  %v5169_v23 = vrot.slane %v5155_v59, %v9759_v53  ;;  %v9028_v25 = vcombine.low %v8195_v12, %v8195_v12 }
 0x179   : > { %v8198_v24 = vpack.i.b16 %v8197_v15, %v8196_v3  ;;  %v9029_v26 = vcombine.high %v8195_v12, %v8195_v12  ;;  %v1568_v27 = vrot.slane %v1554_v17, %v9761_v56  ;;  %v1569_v13 = vcombine.high %v1553_v16, %v9545_v51 }
 0x17a   : > { %v1576_v22 = vrot.slane %v1553_v16, %v9761_v56  ;;  %v1602_v28 = vrot.slane %v1588_v20, %v9759_v53  ;;  %v1603_v29 = vcombine.high %v1595_v21, %v9545_v51  ;;  %8481 = vst [vmem:[%s9879_s25] sm:$0xf] %v9028_v25  ;;  %v1610_v36 = vrot.slane %v1595_v21, %v9761_v56 }
 0x17b   : > { %v9060_v34 = vcombine.low %v8198_v24, %v8198_v24  ;;  %v9061_v35 = vcombine.high %v8198_v24, %v8198_v24  ;;  %8482 = vst [vmem:[%s9879_s25 + $0x4] sm:$0xf] %v9029_v26  ;;  %v3107_v38 = vcombine.low %v1561_v18, %v1568_v27  ;;  %v1583_v31 = vrot.slane %v1569_v13, %v9761_v56 }
 0x17c   : > { %v1617_v39 = vrot.slane %v1603_v29, %v9761_v56  ;;  %v1618_v40 = vcombine.high %v1602_v28, %v9545_v51  ;;  %v1625_v41 = vrot.slane %v1602_v28, %v9761_v56  ;;  %v8840_v43 = vcombine.high %v1561_v18, %v1568_v27 }
 0x17d   : > { %8513 = vst [vmem:[%s9879_s25 + $0x80] sm:$0xf] %v9060_v34  ;;  %8514 = vst [vmem:[%s9879_s25 + $0x84] sm:$0xf] %v9061_v35  ;;  %v3114_v42 = vrot.slane %v3107_v38, %v9759_v53  ;;  %v5170_v44 = vcombine.high %v5162_v11, %v9545_v51  ;;  %v5177_v45 = vrot.slane %v5162_v11, %v9761_v56  ;;  %v4949_v34 = vshrl.u32 %v9858_v7, 16 }
 0x17e   : > { %v1632_v46 = vrot.slane %v1618_v40, %v9761_v56  ;;  %v3123_v47 = vcombine.low %v1576_v22, %v1583_v31  ;;  %v8841_v48 = vcombine.high %v1576_v22, %v1583_v31  ;;  %v3156_v49 = vcombine.low %v1610_v36, %v1617_v39 }
 0x17f   : > { %v3122_v54 = vrot.slane %v8840_v43, %v9759_v53  ;;  %v8842_v55 = vcombine.high %v1610_v36, %v1617_v39  ;;  %v5184_v57 = vrot.slane %v5170_v44, %v9761_v56  ;;  %v5185_v62 = vcombine.high %v5169_v23, %v9545_v51  ;;  %v725_v43 = vpop.f32.mrf.mxu0 }
 0x180   : > { %v3130_v32 = vrot.slane %v3123_v47, %v9759_v53  ;;  %v3138_v58 = vrot.slane %v8841_v48, %v9759_v53  ;;  %v3163_v60 = vrot.slane %v3156_v49, %v9759_v53  ;;  %v3172_v61 = vcombine.low %v1625_v41, %v1632_v46  ;;  %v1142_v48 = vpop.f32.mrf.mxu1 }
 0x181   : > { %v3139_v63 = vcombine.low %v3114_v42, %v3122_v54  ;;  %v3171_v2 = vrot.slane %v8842_v55, %v9759_v53  ;;  %v8843_v37 = vcombine.high %v1625_v41, %v1632_v46  ;;  %v5192_v0 = vrot.slane %v5169_v23, %v9761_v56 }
 0x182   : > { %v3147_v1 = vcombine.low %v3130_v32, %v3138_v58  ;;  %v3179_v3 = vrot.slane %v3172_v61, %v9759_v53  ;;  %v5199_v5 = vrot.slane %v5185_v62, %v9761_v56  ;;  %v5204_v6 = vcombine.high %v9862_v19, %v9757_v52 }
 0x183   : > { %v3146_v14 = vrot.slane %v3139_v63, %v9761_v56  ;;  %v3187_v50 = vrot.slane %v8843_v37, %v9759_v53  ;;  %v3188_v8 = vcombine.low %v3163_v60, %v3171_v2  ;;  %v5211_v9 = vrot.slane %v9862_v19, %v9759_v53 }
 0x184   : > { %v3154_v59 = vrot.slane %v3147_v1, %v9761_v56  ;;  %v5218_v11 = vrot.slane %v5204_v6, %v9759_v53  ;;  %v6723_v12 = vcombine.low %v5177_v45, %v5184_v57  ;;  %v8968_v15 = vcombine.high %v5177_v45, %v5184_v57 }
 0x185   : > { %v3195_v16 = vrot.slane %v3188_v8, %v9761_v56  ;;  %v3196_v17 = vcombine.low %v3179_v3, %v3187_v50  ;;  %v5219_v18 = vcombine.high %v5211_v9, %v9545_v51  ;;  %v5226_v20 = vrot.slane %v5211_v9, %v9761_v56 }
 0x186   : > { %v3155_v21 = vcombine.low %v3146_v14, %v3154_v59  ;;  %v5234_v23 = vcombine.high %v5218_v11, %v9545_v51  ;;  %v5241_v24 = vrot.slane %v5218_v11, %v9761_v56  ;;  %v6730_v19 = vrot.slane %v6723_v12, %v9759_v53 }
 0x187   : > { %v3203_v25 = vrot.slane %v3196_v17, %v9761_v56  ;;  %v5233_v26 = vrot.slane %v5219_v18, %v9761_v56  ;;  %v6738_v27 = vrot.slane %v8968_v15, %v9759_v53  ;;  %v6739_v13 = vcombine.low %v5192_v0, %v5199_v5  ;;  %v9947_v17 = vpop.f32.mrf.mxu0 }
 0x188   : > { %v4586_v22 = vshrl.u32 %v3155_v21, 16  ;;  %v5248_v28 = vrot.slane %v5234_v23, %v9761_v56  ;;  %v8969_v29 = vcombine.high %v5192_v0, %v5199_v5  ;;  %v863_v60 = vpack.c.bf16 %v725_v43, %v9832_v33 }
 0x189   : > { %v3204_v35 = vcombine.low %v3195_v16, %v3203_v25  ;;  %v6746_v36 = vrot.slane %v6739_v13, %v9759_v53  ;;  %v6755_v38 = vcombine.low %v6730_v19, %v6738_v27  ;;  %v6772_v31 = vcombine.low %v5226_v20, %v5233_v26 }
 0x18a   : > { %v6754_v39 = vrot.slane %v8969_v29, %v9759_v53  ;;  %v8970_v40 = vcombine.high %v5226_v20, %v5233_v26  ;;  %v6788_v41 = vcombine.low %v5241_v24, %v5248_v28  ;;  %v8971_v42 = vcombine.high %v5241_v24, %v5248_v28 }
 0x18b   : > { %v4585_v44 = vpack.i.b16 %v3204_v35, %v3155_v21  ;;  %v4587_v45 = vshrl.u32 %v3204_v35, 16  ;;  %v6762_v46 = vrot.slane %v6755_v38, %v9761_v56  ;;  %v6779_v47 = vrot.slane %v6772_v31, %v9759_v53  ;;  %v9959_v35 = vpop.f32.mrf.mxu0 }
 0x18c   : > { %v6763_v49 = vcombine.low %v6746_v36, %v6754_v39  ;;  %v6787_v54 = vrot.slane %v8970_v40, %v9759_v53  ;;  %v6795_v55 = vrot.slane %v6788_v41, %v9759_v53  ;;  %v6803_v57 = vrot.slane %v8971_v42, %v9759_v53 }
 0x18d   : > { %v4588_v62 = vpack.i.b16 %v4587_v45, %v4586_v22  ;;  %v8902_v32 = vcombine.low %v4585_v44, %v4585_v44  ;;  %v8903_v58 = vcombine.high %v4585_v44, %v4585_v44  ;;  %v1280_v37 = vpack.c.bf16 %v1142_v48, %v9835_v30 }
 0x18e   : > { %v6770_v61 = vrot.slane %v6763_v49, %v9761_v56  ;;  %v6804_v63 = vcombine.low %v6779_v47, %v6787_v54  ;;  %v6812_v2 = vcombine.low %v6795_v55, %v6803_v57  ;;  %v1331_v3 = vpack.i.b16 %v863_v60, %v9856_v4  ;;  %v733_v55 = vpop.f32.mrf.mxu0 }
 0x18f   : > { %v8934_v0 = vcombine.low %v4588_v62, %v4588_v62  ;;  %v8935_v1 = vcombine.high %v4588_v62, %v4588_v62  ;;  %4867 = vst [vmem:[%s9846_s23 + $0x8] sm:$0xf] %v8902_v32  ;;  %4868 = vst [vmem:[%s9846_s23 + $0xc] sm:$0xf] %v8903_v58  ;;  %v1334_v5 = vshrl.u32 %v863_v60, 16  ;;  %v4947_v33 = vpack.i.b16 %v1280_v37, %v9858_v7 }
 0x190   : > { %v6771_v6 = vcombine.low %v6762_v46, %v6770_v61  ;;  %v6811_v14 = vrot.slane %v6804_v63, %v9761_v56  ;;  %v6819_v50 = vrot.slane %v6812_v2, %v9761_v56  ;;  %v1637_v30 = vcombine.high %v1331_v3, %v9757_v52 }
 0x191   : > { %4899 = vst [vmem:[%s9846_s23 + $0x88] sm:$0xf] %v8934_v0  ;;  %4900 = vst [vmem:[%s9846_s23 + $0x8c] sm:$0xf] %v8935_v1  ;;  %v1335_v8 = vpack.i.b16 %v1334_v5, %v1333_v10  ;;  %v1644_v9 = vrot.slane %v1331_v3, %v9759_v53  ;;  %v4950_v59 = vshrl.u32 %v1280_v37, 16  ;;  %v5253_v15 = vcombine.high %v4947_v33, %v9757_v52  ;;  %v1146_v3 = vpop.f32.mrf.mxu1 }
 0x192   : > { %v6820_v11 = vcombine.low %v6811_v14, %v6819_v50  ;;  %v8202_v12 = vshrl.u32 %v6771_v6, 16  ;;  %v5260_v16 = vrot.slane %v4947_v33, %v9759_v53  ;;  %v1651_v7 = vrot.slane %v1637_v30, %v9759_v53  ;;  %v735_v33 = vpop.f32.mrf.mxu0 }
 0x193   : > { %v1652_v18 = vcombine.high %v1644_v9, %v9545_v51  ;;  %v1659_v4 = vrot.slane %v1644_v9, %v9761_v56  ;;  %v1686_v10 = vcombine.high %v1335_v8, %v9757_v52  ;;  %v1693_v23 = vrot.slane %v1335_v8, %v9759_v53 }
 0x194   : > { %v8201_v20 = vpack.i.b16 %v6820_v11, %v6771_v6  ;;  %v8203_v21 = vshrl.u32 %v6820_v11, 16  ;;  %v4951_v24 = vpack.i.b16 %v4950_v59, %v4949_v34  ;;  %v1667_v25 = vcombine.high %v1651_v7, %v9545_v51 }
 0x195   : > { %v1666_v19 = vrot.slane %v1652_v18, %v9761_v56  ;;  %v1674_v26 = vrot.slane %v1651_v7, %v9761_v56  ;;  %v1700_v27 = vrot.slane %v1686_v10, %v9759_v53  ;;  %v1701_v29 = vcombine.high %v1693_v23, %v9545_v51 }
 0x196   : > { %v8204_v13 = vpack.i.b16 %v8203_v21, %v8202_v12  ;;  %v9030_v22 = vcombine.low %v8201_v20, %v8201_v20  ;;  %v9031_v28 = vcombine.high %v8201_v20, %v8201_v20  ;;  %v1681_v34 = vrot.slane %v1667_v25, %v9761_v56  ;;  %v1148_v21 = vpop.f32.mrf.mxu1 }
 0x197   : > { %v1708_v36 = vrot.slane %v1693_v23, %v9761_v56  ;;  %v1716_v38 = vcombine.high %v1700_v27, %v9545_v51  ;;  %v1723_v31 = vrot.slane %v1700_v27, %v9761_v56  ;;  %v1715_v41 = vrot.slane %v1701_v29, %v9761_v56 }
 0x198   : > { %v9062_v39 = vcombine.low %v8204_v13, %v8204_v13  ;;  %v9063_v40 = vcombine.high %v8204_v13, %v8204_v13  ;;  %8483 = vst [vmem:[%s9879_s25 + $0x8] sm:$0xf] %v9030_v22  ;;  %8484 = vst [vmem:[%s9879_s25 + $0xc] sm:$0xf] %v9031_v28  ;;  %v3205_v42 = vcombine.low %v1659_v4, %v1666_v19 }
 0x199   : > { %v1730_v43 = vrot.slane %v1716_v38, %v9761_v56  ;;  %v8844_v44 = vcombine.high %v1659_v4, %v1666_v19  ;;  %v3221_v45 = vcombine.low %v1674_v26, %v1681_v34  ;;  %v8845_v46 = vcombine.high %v1674_v26, %v1681_v34  ;;  %v739_v26 = vpop.f32.mrf.mxu0 }
 0x19a   : > { %8515 = vst [vmem:[%s9879_s25 + $0x88] sm:$0xf] %v9062_v39  ;;  %8516 = vst [vmem:[%s9879_s25 + $0x8c] sm:$0xf] %v9063_v40  ;;  %v3212_v47 = vrot.slane %v3205_v42, %v9759_v53  ;;  %v3254_v48 = vcombine.low %v1708_v36, %v1715_v41  ;;  %v8846_v49 = vcombine.high %v1708_v36, %v1715_v41  ;;  %v1150_v41 = vpop.f32.mrf.mxu1 }
 0x19b   : > { %v5267_v54 = vrot.slane %v5253_v15, %v9759_v53  ;;  %v3220_v57 = vrot.slane %v8844_v44, %v9759_v53  ;;  %v3228_v62 = vrot.slane %v3221_v45, %v9759_v53  ;;  %v3236_v32 = vrot.slane %v8845_v46, %v9759_v53  ;;  %v10003_v46 = vpop.f32.mrf.mxu0 }
 0x19c   : > { %v3270_v58 = vcombine.low %v1723_v31, %v1730_v43  ;;  %v3261_v60 = vrot.slane %v3254_v48, %v9759_v53  ;;  %v3269_v61 = vrot.slane %v8846_v49, %v9759_v53  ;;  %v8847_v63 = vcombine.high %v1723_v31, %v1730_v43 }
 0x19d   : > { %v5268_v2 = vcombine.high %v5260_v16, %v9545_v51  ;;  %v3237_v37 = vcombine.low %v3212_v47, %v3220_v57  ;;  %v3245_v0 = vcombine.low %v3228_v62, %v3236_v32  ;;  %v5283_v50 = vcombine.high %v5267_v54, %v9545_v51 }
 0x19e   : > { %v3277_v1 = vrot.slane %v3270_v58, %v9759_v53  ;;  %v3285_v5 = vrot.slane %v8847_v63, %v9759_v53  ;;  %v3286_v6 = vcombine.low %v3261_v60, %v3269_v61  ;;  %v5275_v9 = vrot.slane %v5260_v16, %v9761_v56  ;;  %v1152_v63 = vpop.f32.mrf.mxu1 }
 0x19f   : > { %v5282_v14 = vrot.slane %v5268_v2, %v9761_v56  ;;  %v3244_v8 = vrot.slane %v3237_v37, %v9761_v56  ;;  %v3252_v30 = vrot.slane %v3245_v0, %v9761_v56  ;;  %v5302_v59 = vcombine.high %v4951_v24, %v9757_v52 }
 0x1a0   : > { %v3294_v11 = vcombine.low %v3277_v1, %v3285_v5  ;;  %v5290_v12 = vrot.slane %v5267_v54, %v9761_v56  ;;  %v5297_v15 = vrot.slane %v5283_v50, %v9761_v56  ;;  %v5309_v7 = vrot.slane %v4951_v24, %v9759_v53  ;;  %v743_v1 = vpop.f32.mrf.mxu0 }
 0x1a1   : > { %v3253_v18 = vcombine.low %v3244_v8, %v3252_v30  ;;  %v5316_v4 = vrot.slane %v5302_v59, %v9759_v53  ;;  %v6821_v10 = vcombine.low %v5275_v9, %v5282_v14  ;;  %v8972_v20 = vcombine.high %v5275_v9, %v5282_v14 }
 0x1a2   : > { %v3293_v23 = vrot.slane %v3286_v6, %v9761_v56  ;;  %v3301_v19 = vrot.slane %v3294_v11, %v9761_v56  ;;  %v5317_v16 = vcombine.high %v5309_v7, %v9545_v51  ;;  %v6837_v25 = vcombine.low %v5290_v12, %v5297_v15 }
 0x1a3   : > { %v4592_v27 = vshrl.u32 %v3253_v18, 16  ;;  %v5324_v13 = vrot.slane %v5309_v7, %v9761_v56  ;;  %v5332_v22 = vcombine.high %v5316_v4, %v9545_v51  ;;  %v6828_v24 = vrot.slane %v6821_v10, %v9759_v53 }
 0x1a4   : > { %v3302_v28 = vcombine.low %v3293_v23, %v3301_v19  ;;  %v5331_v29 = vrot.slane %v5317_v16, %v9761_v56  ;;  %v5339_v34 = vrot.slane %v5316_v4, %v9761_v56  ;;  %v6836_v36 = vrot.slane %v8972_v20, %v9759_v53  ;;  %v1156_v19 = vpop.f32.mrf.mxu1 }
 0x1a5   : > { %v5346_v38 = vrot.slane %v5332_v22, %v9761_v56  ;;  %v6844_v31 = vrot.slane %v6837_v25, %v9759_v53  ;;  %v8973_v39 = vcombine.high %v5290_v12, %v5297_v15  ;;  %v864_v40 = vpack.c.bf16 %v733_v55, %v9947_v17 }
 0x1a6   : > { %v4591_v42 = vpack.i.b16 %v3302_v28, %v3253_v18  ;;  %v4593_v43 = vshrl.u32 %v3302_v28, 16  ;;  %v6853_v44 = vcombine.low %v6828_v24, %v6836_v36  ;;  %v6870_v45 = vcombine.low %v5324_v13, %v5331_v29 }
 0x1a7   : > { %v6852_v47 = vrot.slane %v8973_v39, %v9759_v53  ;;  %v8974_v48 = vcombine.high %v5324_v13, %v5331_v29  ;;  %v6886_v49 = vcombine.low %v5339_v34, %v5346_v38  ;;  %v8975_v54 = vcombine.high %v5339_v34, %v5346_v38 }
 0x1a8   : > { %v4594_v57 = vpack.i.b16 %v4593_v43, %v4592_v27  ;;  %v8904_v62 = vcombine.low %v4591_v42, %v4591_v42  ;;  %v8905_v32 = vcombine.high %v4591_v42, %v4591_v42  ;;  %v1281_v58 = vpack.c.bf16 %v1150_v41, %v1146_v3  ;;  %v10037_v41 = vpop.f32.mrf.mxu1 }
 0x1a9   : > { %v6861_v17 = vcombine.low %v6844_v31, %v6852_v47  ;;  %v6877_v55 = vrot.slane %v6870_v45, %v9759_v53  ;;  %v6885_v60 = vrot.slane %v8974_v48, %v9759_v53  ;;  %v6893_v61 = vrot.slane %v6886_v49, %v9759_v53 }
 0x1aa   : > { %v8936_v2 = vcombine.low %v4594_v57, %v4594_v57  ;;  %v8937_v37 = vcombine.high %v4594_v57, %v4594_v57  ;;  %4869 = vst [vmem:[%s9846_s23 + $0x10] sm:$0xf] %v8904_v62  ;;  %4870 = vst [vmem:[%s9846_s23 + $0x14] sm:$0xf] %v8905_v32  ;;  %v6901_v0 = vrot.slane %v8975_v54, %v9759_v53  ;;  %v1341_v8 = vshrl.u32 %v864_v40, 16 }
 0x1ab   : > { %v6860_v5 = vrot.slane %v6853_v44, %v9761_v56  ;;  %v6868_v3 = vrot.slane %v6861_v17, %v9761_v56  ;;  %v6902_v6 = vcombine.low %v6877_v55, %v6885_v60  ;;  %v865_v14 = vpack.c.bf16 %v735_v33, %v9959_v35 }
 0x1ac   : > { %4901 = vst [vmem:[%s9846_s23 + $0x90] sm:$0xf] %v8936_v2  ;;  %4902 = vst [vmem:[%s9846_s23 + $0x94] sm:$0xf] %v8937_v37  ;;  %v6910_v50 = vcombine.low %v6893_v61, %v6901_v0  ;;  %v4957_v30 = vshrl.u32 %v1281_v58, 16  ;;  %v1282_v9 = vpack.c.bf16 %v1152_v63, %v1148_v21  ;;  %v10017_v15 = vpack.c.bf16 %v743_v1, %v739_v26  ;;  %v1160_v63 = vpop.f32.mrf.mxu1 }
 0x1ad   : > { %v6869_v59 = vcombine.low %v6860_v5, %v6868_v3  ;;  %v1339_v11 = vpack.i.b16 %v865_v14, %v864_v40  ;;  %v1342_v12 = vshrl.u32 %v865_v14, 16  ;;  %v6909_v7 = vrot.slane %v6902_v6, %v9761_v56 }
 0x1ae   : > { %v6917_v18 = vrot.slane %v6910_v50, %v9761_v56  ;;  %v4955_v4 = vpack.i.b16 %v1282_v9, %v1281_v58  ;;  %v4958_v10 = vshrl.u32 %v1282_v9, 16  ;;  %v10057_v9 = vpack.c.bf16 %v1160_v63, %v1156_v19 }
 0x1af   : > { %v8208_v20 = vshrl.u32 %v6869_v59, 16  ;;  %v1343_v23 = vpack.i.b16 %v1342_v12, %v1341_v8  ;;  %v1735_v35 = vcombine.high %v1339_v11, %v9757_v52  ;;  %v1742_v33 = vrot.slane %v1339_v11, %v9759_v53 }
 0x1b0   : > { %v6918_v16 = vcombine.low %v6909_v7, %v6917_v18  ;;  %v10023_v21 = vpack.i.b16 %v4958_v10, %v4957_v30  ;;  %v5351_v25 = vcombine.high %v4955_v4, %v9757_v52  ;;  %v5358_v26 = vrot.slane %v4955_v4, %v9759_v53 }
 0x1b1   : > { %v1749_v27 = vrot.slane %v1735_v35, %v9759_v53  ;;  %v1750_v13 = vcombine.high %v1742_v33, %v9545_v51  ;;  %v1757_v22 = vrot.slane %v1742_v33, %v9761_v56  ;;  %v1784_v24 = vcombine.high %v1343_v23, %v9757_v52 }
 0x1b2   : > { %v8207_v28 = vpack.i.b16 %v6918_v16, %v6869_v59  ;;  %v8209_v29 = vshrl.u32 %v6918_v16, 16  ;;  %v1791_v34 = vrot.slane %v1343_v23, %v9759_v53  ;;  %v5365_v36 = vrot.slane %v5351_v25, %v9759_v53  ;;  %v745_v23 = vpop.f32.mrf.mxu0 }
 0x1b3   : > { %v1764_v38 = vrot.slane %v1750_v13, %v9761_v56  ;;  %v1765_v31 = vcombine.high %v1749_v27, %v9545_v51  ;;  %v1772_v39 = vrot.slane %v1749_v27, %v9761_v56  ;;  %v1798_v40 = vrot.slane %v1784_v24, %v9759_v53 }
 0x1b4   : > { %v8210_v42 = vpack.i.b16 %v8209_v29, %v8208_v20  ;;  %v9032_v43 = vcombine.low %v8207_v28, %v8207_v28  ;;  %v9033_v44 = vcombine.high %v8207_v28, %v8207_v28  ;;  %v1799_v45 = vcombine.high %v1791_v34, %v9545_v51 }
 0x1b5   : > { %v1779_v47 = vrot.slane %v1765_v31, %v9761_v56  ;;  %v1806_v48 = vrot.slane %v1791_v34, %v9761_v56  ;;  %v1814_v49 = vcombine.high %v1798_v40, %v9545_v51  ;;  %v1821_v54 = vrot.slane %v1798_v40, %v9761_v56 }
 0x1b6   : > { %v9064_v57 = vcombine.low %v8210_v42, %v8210_v42  ;;  %v9065_v62 = vcombine.high %v8210_v42, %v8210_v42  ;;  %8485 = vst [vmem:[%s9879_s25 + $0x10] sm:$0xf] %v9032_v43  ;;  %8486 = vst [vmem:[%s9879_s25 + $0x14] sm:$0xf] %v9033_v44  ;;  %v1813_v32 = vrot.slane %v1799_v45, %v9761_v56 }
 0x1b7   : > { %v3303_v58 = vcombine.low %v1757_v22, %v1764_v38  ;;  %v1828_v17 = vrot.slane %v1814_v49, %v9761_v56  ;;  %v8848_v55 = vcombine.high %v1757_v22, %v1764_v38  ;;  %v3319_v60 = vcombine.low %v1772_v39, %v1779_v47 }
 0x1b8   : > { %v8849_v61 = vcombine.high %v1772_v39, %v1779_v47  ;;  %8517 = vst [vmem:[%s9879_s25 + $0x90] sm:$0xf] %v9064_v57  ;;  %8518 = vst [vmem:[%s9879_s25 + $0x94] sm:$0xf] %v9065_v62  ;;  %v3352_v37 = vcombine.low %v1806_v48, %v1813_v32  ;;  %v8850_v0 = vcombine.high %v1806_v48, %v1813_v32 }
 0x1b9   : > { %v3310_v2 = vrot.slane %v3303_v58, %v9759_v53  ;;  %v5366_v1 = vcombine.high %v5358_v26, %v9545_v51  ;;  %v3318_v5 = vrot.slane %v8848_v55, %v9759_v53  ;;  %v3326_v3 = vrot.slane %v3319_v60, %v9759_v53 }
 0x1ba   : > { %v3334_v6 = vrot.slane %v8849_v61, %v9759_v53  ;;  %v3368_v14 = vcombine.low %v1821_v54, %v1828_v17  ;;  %v3359_v50 = vrot.slane %v3352_v37, %v9759_v53  ;;  %v3367_v8 = vrot.slane %v8850_v0, %v9759_v53  ;;  %v1162_v0 = vpop.f32.mrf.mxu1 }
 0x1bb   : > { %v8851_v30 = vcombine.high %v1821_v54, %v1828_v17  ;;  %v3335_v59 = vcombine.low %v3310_v2, %v3318_v5  ;;  %v5380_v7 = vrot.slane %v5366_v1, %v9761_v56  ;;  %v5373_v10 = vrot.slane %v5358_v26, %v9761_v56 }
 0x1bc   : > { %v3343_v11 = vcombine.low %v3326_v3, %v3334_v6  ;;  %v3375_v12 = vrot.slane %v3368_v14, %v9759_v53  ;;  %v3384_v4 = vcombine.low %v3359_v50, %v3367_v8  ;;  %v5381_v20 = vcombine.high %v5365_v36, %v9545_v51 }
 0x1bd   : > { %v3383_v18 = vrot.slane %v8851_v30, %v9759_v53  ;;  %v3342_v35 = vrot.slane %v3335_v59, %v9761_v56  ;;  %v5400_v19 = vcombine.high %v10023_v21, %v9757_v52  ;;  %v5407_v16 = vrot.slane %v10023_v21, %v9759_v53  ;;  %v749_v21 = vpop.f32.mrf.mxu0 }
 0x1be   : > { %v3350_v33 = vrot.slane %v3343_v11, %v9761_v56  ;;  %v5388_v27 = vrot.slane %v5365_v36, %v9761_v56  ;;  %v5395_v13 = vrot.slane %v5381_v20, %v9761_v56  ;;  %v6919_v22 = vcombine.low %v5373_v10, %v5380_v7 }
 0x1bf   : > { %v3392_v25 = vcombine.low %v3375_v12, %v3383_v18  ;;  %v3391_v24 = vrot.slane %v3384_v4, %v9761_v56  ;;  %v5414_v28 = vrot.slane %v5400_v19, %v9759_v53  ;;  %v5415_v29 = vcombine.high %v5407_v16, %v9545_v51  ;;  %v10085_v60 = vpop.f32.mrf.mxu0 }
 0x1c0   : > { %v3351_v26 = vcombine.low %v3342_v35, %v3350_v33  ;;  %v6926_v38 = vrot.slane %v6919_v22, %v9759_v53  ;;  %v8976_v31 = vcombine.high %v5373_v10, %v5380_v7  ;;  %v6935_v39 = vcombine.low %v5388_v27, %v5395_v13 }
 0x1c1   : > { %v3399_v34 = vrot.slane %v3392_v25, %v9761_v56  ;;  %v5422_v36 = vrot.slane %v5407_v16, %v9761_v56  ;;  %v5429_v42 = vrot.slane %v5415_v29, %v9761_v56  ;;  %v5430_v43 = vcombine.high %v5414_v28, %v9545_v51  ;;  %v753_v18 = vpop.f32.mrf.mxu0 }
 0x1c2   : > { %v4598_v40 = vshrl.u32 %v3351_v26, 16  ;;  %v5437_v45 = vrot.slane %v5414_v28, %v9761_v56  ;;  %v6934_v47 = vrot.slane %v8976_v31, %v9759_v53  ;;  %v8977_v48 = vcombine.high %v5388_v27, %v5395_v13  ;;  %v1166_v28 = vpop.f32.mrf.mxu1 }
 0x1c3   : > { %v3400_v44 = vcombine.low %v3391_v24, %v3399_v34  ;;  %v5444_v49 = vrot.slane %v5430_v43, %v9761_v56  ;;  %v6942_v54 = vrot.slane %v6935_v39, %v9759_v53  ;;  %v6968_v57 = vcombine.low %v5422_v36, %v5429_v42 }
 0x1c4   : > { %v8978_v62 = vcombine.high %v5422_v36, %v5429_v42  ;;  %v6950_v17 = vrot.slane %v8977_v48, %v9759_v53  ;;  %v6951_v55 = vcombine.low %v6926_v38, %v6934_v47  ;;  %v1349_v6 = vshrl.u32 %v10017_v15, 16 }
 0x1c5   : > { %v4597_v32 = vpack.i.b16 %v3400_v44, %v3351_v26  ;;  %v4599_v58 = vshrl.u32 %v3400_v44, 16  ;;  %v6975_v61 = vrot.slane %v6968_v57, %v9759_v53  ;;  %v6984_v2 = vcombine.low %v5437_v45, %v5444_v49 }
 0x1c6   : > { %v6983_v63 = vrot.slane %v8978_v62, %v9759_v53  ;;  %v8979_v37 = vcombine.high %v5437_v45, %v5444_v49  ;;  %v6959_v14 = vcombine.low %v6942_v54, %v6950_v17  ;;  %v867_v12 = vpack.c.bf16 %v745_v23, %v10003_v46  ;;  %v10123_v49 = vpop.f32.mrf.mxu1 }
 0x1c7   : > { %v4600_v1 = vpack.i.b16 %v4599_v58, %v4598_v40  ;;  %v8906_v5 = vcombine.low %v4597_v32, %v4597_v32  ;;  %v8907_v3 = vcombine.high %v4597_v32, %v4597_v32  ;;  %v6991_v50 = vrot.slane %v6984_v2, %v9759_v53 }
 0x1c8   : > { %v6999_v8 = vrot.slane %v8979_v37, %v9759_v53  ;;  %v7000_v30 = vcombine.low %v6975_v61, %v6983_v63  ;;  %v1284_v7 = vpack.c.bf16 %v1162_v0, %v10037_v41  ;;  %v6958_v4 = vrot.slane %v6951_v55, %v9761_v56 }
 0x1c9   : > { %v8938_v59 = vcombine.low %v4600_v1, %v4600_v1  ;;  %v8939_v11 = vcombine.high %v4600_v1, %v4600_v1  ;;  %4871 = vst [vmem:[%s9846_s23 + $0x18] sm:$0xf] %v8906_v5  ;;  %4872 = vst [vmem:[%s9846_s23 + $0x1c] sm:$0xf] %v8907_v3  ;;  %v6966_v10 = vrot.slane %v6959_v14, %v9761_v56  ;;  %v4965_v35 = vshrl.u32 %v10057_v9, 16  ;;  %v1170_v14 = vpop.f32.mrf.mxu1 }
 0x1ca   : > { %v7008_v20 = vcombine.low %v6991_v50, %v6999_v8  ;;  %v1347_v33 = vpack.i.b16 %v867_v12, %v10017_v15  ;;  %v1350_v19 = vshrl.u32 %v867_v12, 16  ;;  %v4963_v16 = vpack.i.b16 %v1284_v7, %v10057_v9 }
 0x1cb   : > { %4903 = vst [vmem:[%s9846_s23 + $0x98] sm:$0xf] %v8938_v59  ;;  %4904 = vst [vmem:[%s9846_s23 + $0x9c] sm:$0xf] %v8939_v11  ;;  %v4966_v25 = vshrl.u32 %v1284_v7, 16  ;;  %v6967_v27 = vcombine.low %v6958_v4, %v6966_v10  ;;  %v7007_v46 = vrot.slane %v7000_v30, %v9761_v56  ;;  %v10105_v23 = vpack.c.bf16 %v753_v18, %v749_v21 }
 0x1cc   : > { %v7015_v41 = vrot.slane %v7008_v20, %v9761_v56  ;;  %v1351_v13 = vpack.i.b16 %v1350_v19, %v1349_v6  ;;  %v1833_v22 = vcombine.high %v1347_v33, %v9757_v52  ;;  %v1840_v26 = vrot.slane %v1347_v33, %v9759_v53 }
 0x1cd   : > { %v10109_v24 = vpack.i.b16 %v4966_v25, %v4965_v35  ;;  %v8214_v29 = vshrl.u32 %v6967_v27, 16  ;;  %v5449_v9 = vcombine.high %v4963_v16, %v9757_v52  ;;  %v5456_v34 = vrot.slane %v4963_v16, %v9759_v53 }
 0x1ce   : > { %v7016_v15 = vcombine.low %v7007_v46, %v7015_v41  ;;  %v1847_v38 = vrot.slane %v1833_v22, %v9759_v53  ;;  %v1848_v31 = vcombine.high %v1840_v26, %v9545_v51  ;;  %v1855_v39 = vrot.slane %v1840_v26, %v9761_v56  ;;  %v755_v22 = vpop.f32.mrf.mxu0 }
 0x1cf   : > { %v1882_v21 = vcombine.high %v1351_v13, %v9757_v52  ;;  %v1889_v42 = vrot.slane %v1351_v13, %v9759_v53  ;;  %v5463_v43 = vrot.slane %v5449_v9, %v9759_v53  ;;  %v5464_v59 = vcombine.high %v5456_v34, %v9545_v51 }
 0x1d0   : > { %v8213_v40 = vpack.i.b16 %v7016_v15, %v6967_v27  ;;  %v8215_v36 = vshrl.u32 %v7016_v15, 16  ;;  %v1862_v44 = vrot.slane %v1848_v31, %v9761_v56  ;;  %v1863_v45 = vcombine.high %v1847_v38, %v9545_v51 }
 0x1d1   : > { %v1870_v47 = vrot.slane %v1847_v38, %v9761_v56  ;;  %v1896_v48 = vrot.slane %v1882_v21, %v9759_v53  ;;  %v1897_v32 = vcombine.high %v1889_v42, %v9545_v51  ;;  %v1904_v17 = vrot.slane %v1889_v42, %v9761_v56 }
 0x1d2   : > { %v8216_v54 = vpack.i.b16 %v8215_v36, %v8214_v29  ;;  %v9034_v57 = vcombine.low %v8213_v40, %v8213_v40  ;;  %v9035_v62 = vcombine.high %v8213_v40, %v8213_v40  ;;  %v1877_v58 = vrot.slane %v1863_v45, %v9761_v56 }
 0x1d3   : > { %v1912_v55 = vcombine.high %v1896_v48, %v9545_v51  ;;  %v1919_v61 = vrot.slane %v1896_v48, %v9761_v56  ;;  %v1911_v37 = vrot.slane %v1897_v32, %v9761_v56  ;;  %v3401_v0 = vcombine.low %v1855_v39, %v1862_v44 }
 0x1d4   : > { %v9066_v63 = vcombine.low %v8216_v54, %v8216_v54  ;;  %v9067_v2 = vcombine.high %v8216_v54, %v8216_v54  ;;  %8487 = vst [vmem:[%s9879_s25 + $0x18] sm:$0xf] %v9034_v57  ;;  %8488 = vst [vmem:[%s9879_s25 + $0x1c] sm:$0xf] %v9035_v62  ;;  %v8852_v5 = vcombine.high %v1855_v39, %v1862_v44 }
 0x1d5   : > { %v1926_v1 = vrot.slane %v1912_v55, %v9761_v56  ;;  %v3417_v3 = vcombine.low %v1870_v47, %v1877_v58  ;;  %v8853_v6 = vcombine.high %v1870_v47, %v1877_v58  ;;  %v3408_v50 = vrot.slane %v3401_v0, %v9759_v53 }
 0x1d6   : > { %8519 = vst [vmem:[%s9879_s25 + $0x98] sm:$0xf] %v9066_v63  ;;  %8520 = vst [vmem:[%s9879_s25 + $0x9c] sm:$0xf] %v9067_v2  ;;  %v3450_v8 = vcombine.low %v1904_v17, %v1911_v37  ;;  %v8854_v30 = vcombine.high %v1904_v17, %v1911_v37  ;;  %v3416_v11 = vrot.slane %v8852_v5, %v9759_v53 }
 0x1d7   : > { %v3424_v12 = vrot.slane %v3417_v3, %v9759_v53  ;;  %v3432_v7 = vrot.slane %v8853_v6, %v9759_v53  ;;  %v3466_v18 = vcombine.low %v1919_v61, %v1926_v1  ;;  %v8855_v20 = vcombine.high %v1919_v61, %v1926_v1 }
 0x1d8   : > { %v3457_v4 = vrot.slane %v3450_v8, %v9759_v53  ;;  %v3465_v10 = vrot.slane %v8854_v30, %v9759_v53  ;;  %v10143_v35 = vpack.c.bf16 %v1170_v14, %v1166_v28  ;;  %v3433_v33 = vcombine.low %v3408_v50, %v3416_v11  ;;  %v1172_v30 = vpop.f32.mrf.mxu1 }
 0x1d9   : > { %v3441_v19 = vcombine.low %v3424_v12, %v3432_v7  ;;  %v3473_v16 = vrot.slane %v3466_v18, %v9759_v53  ;;  %v5478_v25 = vrot.slane %v5464_v59, %v9761_v56  ;;  %v3481_v27 = vrot.slane %v8855_v20, %v9759_v53 }
 0x1da   : > { %v3482_v46 = vcombine.low %v3457_v4, %v3465_v10  ;;  %v5471_v41 = vrot.slane %v5456_v34, %v9761_v56  ;;  %v5479_v13 = vcombine.high %v5463_v43, %v9545_v51  ;;  %v3440_v26 = vrot.slane %v3433_v33, %v9761_v56 }
 0x1db   : > { %v3448_v15 = vrot.slane %v3441_v19, %v9761_v56  ;;  %v5498_v28 = vcombine.high %v10109_v24, %v9757_v52  ;;  %v5505_v29 = vrot.slane %v10109_v24, %v9759_v53  ;;  %v3490_v9 = vcombine.low %v3473_v16, %v3481_v27  ;;  %v759_v24 = vpop.f32.mrf.mxu0 }
 0x1dc   : > { %v5486_v38 = vrot.slane %v5463_v43, %v9761_v56  ;;  %v5493_v31 = vrot.slane %v5479_v13, %v9761_v56  ;;  %v7017_v39 = vcombine.low %v5471_v41, %v5478_v25  ;;  %v3489_v21 = vrot.slane %v3482_v46, %v9761_v56 }
 0x1dd   : > { %v3449_v34 = vcombine.low %v3440_v26, %v3448_v15  ;;  %v5512_v40 = vrot.slane %v5498_v28, %v9759_v53  ;;  %v5513_v36 = vcombine.high %v5505_v29, %v9545_v51  ;;  %v3497_v42 = vrot.slane %v3490_v9, %v9761_v56  ;;  %v10171_v3 = vpop.f32.mrf.mxu0 }
 0x1de   : > { %v7024_v44 = vrot.slane %v7017_v39, %v9759_v53  ;;  %v8980_v45 = vcombine.high %v5471_v41, %v5478_v25  ;;  %v7033_v47 = vcombine.low %v5486_v38, %v5493_v31  ;;  %v5520_v43 = vrot.slane %v5505_v29, %v9761_v56 }
 0x1df   : > { %v4604_v48 = vshrl.u32 %v3449_v34, 16  ;;  %v5527_v54 = vrot.slane %v5513_v36, %v9761_v56  ;;  %v5528_v57 = vcombine.high %v5512_v40, %v9545_v51  ;;  %v3498_v62 = vcombine.low %v3489_v21, %v3497_v42  ;;  %v763_v27 = vpop.f32.mrf.mxu0 }
 0x1e0   : > { %v5535_v32 = vrot.slane %v5512_v40, %v9761_v56  ;;  %v7032_v58 = vrot.slane %v8980_v45, %v9759_v53  ;;  %v8981_v17 = vcombine.high %v5486_v38, %v5493_v31  ;;  %v7040_v61 = vrot.slane %v7033_v47, %v9759_v53  ;;  %v1176_v40 = vpop.f32.mrf.mxu1 }
 0x1e1   : > { %v5542_v55 = vrot.slane %v5528_v57, %v9761_v56  ;;  %v7066_v63 = vcombine.low %v5520_v43, %v5527_v54  ;;  %v8982_v2 = vcombine.high %v5520_v43, %v5527_v54  ;;  %v4603_v37 = vpack.i.b16 %v3498_v62, %v3449_v34 }
 0x1e2   : > { %v4605_v0 = vshrl.u32 %v3498_v62, 16  ;;  %v7048_v1 = vrot.slane %v8981_v17, %v9759_v53  ;;  %v7049_v5 = vcombine.low %v7024_v44, %v7032_v58  ;;  %v1357_v7 = vshrl.u32 %v10105_v23, 16 }
 0x1e3   : > { %v7073_v6 = vrot.slane %v7066_v63, %v9759_v53  ;;  %v7081_v14 = vrot.slane %v8982_v2, %v9759_v53  ;;  %v7082_v50 = vcombine.low %v5535_v32, %v5542_v55  ;;  %v8983_v8 = vcombine.high %v5535_v32, %v5542_v55  ;;  %v10209_v55 = vpop.f32.mrf.mxu1 }
 0x1e4   : > { %v4606_v59 = vpack.i.b16 %v4605_v0, %v4604_v48  ;;  %v8908_v11 = vcombine.low %v4603_v37, %v4603_v37  ;;  %v8909_v12 = vcombine.high %v4603_v37, %v4603_v37  ;;  %v7057_v18 = vcombine.low %v7040_v61, %v7048_v1 }
 0x1e5   : > { %v7089_v4 = vrot.slane %v7082_v50, %v9759_v53  ;;  %v7097_v10 = vrot.slane %v8983_v8, %v9759_v53  ;;  %v7098_v20 = vcombine.low %v7073_v6, %v7081_v14  ;;  %v869_v16 = vpack.c.bf16 %v755_v22, %v10085_v60 }
 0x1e6   : > { %v8940_v33 = vcombine.low %v4606_v59, %v4606_v59  ;;  %v8941_v19 = vcombine.high %v4606_v59, %v4606_v59  ;;  %4873 = vst [vmem:[%s9846_s23 + $0x20] sm:$0xf] %v8908_v11  ;;  %4874 = vst [vmem:[%s9846_s23 + $0x24] sm:$0xf] %v8909_v12  ;;  %v1286_v25 = vpack.c.bf16 %v1172_v30, %v10123_v49  ;;  %v4973_v26 = vshrl.u32 %v10143_v35, 16 }
 0x1e7   : > { %v7056_v46 = vrot.slane %v7049_v5, %v9761_v56  ;;  %v7064_v41 = vrot.slane %v7057_v18, %v9761_v56  ;;  %v7106_v13 = vcombine.low %v7089_v4, %v7097_v10  ;;  %v1355_v15 = vpack.i.b16 %v869_v16, %v10105_v23  ;;  %v1180_v18 = vpop.f32.mrf.mxu1 }
 0x1e8   : > { %4905 = vst [vmem:[%s9846_s23 + $0xa0] sm:$0xf] %v8940_v33  ;;  %4906 = vst [vmem:[%s9846_s23 + $0xa4] sm:$0xf] %v8941_v19  ;;  %v1358_v28 = vshrl.u32 %v869_v16, 16  ;;  %v4971_v29 = vpack.i.b16 %v1286_v25, %v10143_v35  ;;  %v4974_v9 = vshrl.u32 %v1286_v25, 16  ;;  %v7105_v60 = vrot.slane %v7098_v20, %v9761_v56 }
 0x1e9   : > { %v7065_v38 = vcombine.low %v7056_v46, %v7064_v41  ;;  %v7113_v49 = vrot.slane %v7106_v13, %v9761_v56  ;;  %v10191_v22 = vpack.c.bf16 %v763_v27, %v759_v24  ;;  %v1931_v39 = vcombine.high %v1355_v15, %v9757_v52 }
 0x1ea   : > { %v1359_v31 = vpack.i.b16 %v1358_v28, %v1357_v7  ;;  %v1938_v34 = vrot.slane %v1355_v15, %v9759_v53  ;;  %v10195_v21 = vpack.i.b16 %v4974_v9, %v4973_v26  ;;  %v5547_v35 = vcombine.high %v4971_v29, %v9757_v52 }
 0x1eb   : > { %v7114_v23 = vcombine.low %v7105_v60, %v7113_v49  ;;  %v8220_v36 = vshrl.u32 %v7065_v38, 16  ;;  %v5554_v42 = vrot.slane %v4971_v29, %v9759_v53  ;;  %v1945_v44 = vrot.slane %v1931_v39, %v9759_v53  ;;  %v765_v39 = vpop.f32.mrf.mxu0 }
 0x1ec   : > { %v1946_v45 = vcombine.high %v1938_v34, %v9545_v51  ;;  %v1953_v47 = vrot.slane %v1938_v34, %v9761_v56  ;;  %v1980_v24 = vcombine.high %v1359_v31, %v9757_v52  ;;  %v1987_v54 = vrot.slane %v1359_v31, %v9759_v53 }
 0x1ed   : > { %v8219_v48 = vpack.i.b16 %v7114_v23, %v7065_v38  ;;  %v8221_v43 = vshrl.u32 %v7114_v23, 16  ;;  %v5561_v57 = vrot.slane %v5547_v35, %v9759_v53  ;;  %v1961_v32 = vcombine.high %v1945_v44, %v9545_v51 }
 0x1ee   : > { %v1960_v62 = vrot.slane %v1946_v45, %v9761_v56  ;;  %v1968_v58 = vrot.slane %v1945_v44, %v9761_v56  ;;  %v1994_v17 = vrot.slane %v1980_v24, %v9759_v53  ;;  %v1995_v37 = vcombine.high %v1987_v54, %v9545_v51 }
 0x1ef   : > { %v8222_v61 = vpack.i.b16 %v8221_v43, %v8220_v36  ;;  %v9036_v63 = vcombine.low %v8219_v48, %v8219_v48  ;;  %v9037_v2 = vcombine.high %v8219_v48, %v8219_v48  ;;  %v1975_v0 = vrot.slane %v1961_v32, %v9761_v56 }
 0x1f0   : > { %v2002_v1 = vrot.slane %v1987_v54, %v9761_v56  ;;  %v2010_v5 = vcombine.high %v1994_v17, %v9545_v51  ;;  %v2017_v6 = vrot.slane %v1994_v17, %v9761_v56  ;;  %v2009_v8 = vrot.slane %v1995_v37, %v9761_v56 }
 0x1f1   : > { %v9068_v14 = vcombine.low %v8222_v61, %v8222_v61  ;;  %v9069_v50 = vcombine.high %v8222_v61, %v8222_v61  ;;  %8489 = vst [vmem:[%s9879_s25 + $0x20] sm:$0xf] %v9036_v63  ;;  %8490 = vst [vmem:[%s9879_s25 + $0x24] sm:$0xf] %v9037_v2  ;;  %v3499_v30 = vcombine.low %v1953_v47, %v1960_v62 }
 0x1f2   : > { %v2024_v59 = vrot.slane %v2010_v5, %v9761_v56  ;;  %v8856_v11 = vcombine.high %v1953_v47, %v1960_v62  ;;  %v3515_v12 = vcombine.low %v1968_v58, %v1975_v0  ;;  %v8857_v7 = vcombine.high %v1968_v58, %v1975_v0 }
 0x1f3   : > { %8521 = vst [vmem:[%s9879_s25 + $0xa0] sm:$0xf] %v9068_v14  ;;  %8522 = vst [vmem:[%s9879_s25 + $0xa4] sm:$0xf] %v9069_v50  ;;  %v3506_v4 = vrot.slane %v3499_v30, %v9759_v53  ;;  %v3548_v10 = vcombine.low %v2002_v1, %v2009_v8  ;;  %v8858_v20 = vcombine.high %v2002_v1, %v2009_v8 }
 0x1f4   : > { %v5562_v33 = vcombine.high %v5554_v42, %v9545_v51  ;;  %v3514_v19 = vrot.slane %v8856_v11, %v9759_v53  ;;  %v3522_v16 = vrot.slane %v3515_v12, %v9759_v53  ;;  %v3530_v25 = vrot.slane %v8857_v7, %v9759_v53 }
 0x1f5   : > { %v3564_v27 = vcombine.low %v2017_v6, %v2024_v59  ;;  %v3555_v46 = vrot.slane %v3548_v10, %v9759_v53  ;;  %v3563_v41 = vrot.slane %v8858_v20, %v9759_v53  ;;  %v8859_v13 = vcombine.high %v2017_v6, %v2024_v59  ;;  %v1182_v20 = vpop.f32.mrf.mxu1 }
 0x1f6   : > { %v10229_v26 = vpack.c.bf16 %v1180_v18, %v1176_v40  ;;  %v3531_v15 = vcombine.low %v3506_v4, %v3514_v19  ;;  %v3539_v28 = vcombine.low %v3522_v16, %v3530_v25  ;;  %v5576_v9 = vrot.slane %v5562_v33, %v9761_v56 }
 0x1f7   : > { %v3571_v29 = vrot.slane %v3564_v27, %v9759_v53  ;;  %v3579_v38 = vrot.slane %v8859_v13, %v9759_v53  ;;  %v3580_v60 = vcombine.low %v3555_v46, %v3563_v41  ;;  %v5569_v49 = vrot.slane %v5554_v42, %v9761_v56 }
 0x1f8   : > { %v5577_v31 = vcombine.high %v5561_v57, %v9545_v51  ;;  %v3538_v34 = vrot.slane %v3531_v15, %v9761_v56  ;;  %v3546_v23 = vrot.slane %v3539_v28, %v9761_v56  ;;  %v5596_v40 = vcombine.high %v10195_v21, %v9757_v52 }
 0x1f9   : > { %v5603_v36 = vrot.slane %v10195_v21, %v9759_v53  ;;  %v3588_v35 = vcombine.low %v3571_v29, %v3579_v38  ;;  %v5584_v44 = vrot.slane %v5561_v57, %v9761_v56  ;;  %v7115_v47 = vcombine.low %v5569_v49, %v5576_v9  ;;  %v769_v21 = vpop.f32.mrf.mxu0 }
 0x1fa   : > { %v5591_v45 = vrot.slane %v5577_v31, %v9761_v56  ;;  %v3547_v42 = vcombine.low %v3538_v34, %v3546_v23  ;;  %v3587_v24 = vrot.slane %v3580_v60, %v9761_v56  ;;  %v5610_v48 = vrot.slane %v5596_v40, %v9759_v53 }
 0x1fb   : > { %v5611_v43 = vcombine.high %v5603_v36, %v9545_v51  ;;  %v3595_v54 = vrot.slane %v3588_v35, %v9761_v56  ;;  %v7122_v62 = vrot.slane %v7115_v47, %v9759_v53  ;;  %v8984_v32 = vcombine.high %v5569_v49, %v5576_v9  ;;  %v10257_v12 = vpop.f32.mrf.mxu0 }
 0x1fc   : > { %v7131_v58 = vcombine.low %v5584_v44, %v5591_v45  ;;  %v4610_v17 = vshrl.u32 %v3547_v42, 16  ;;  %v5618_v57 = vrot.slane %v5603_v36, %v9761_v56  ;;  %v5626_v63 = vcombine.high %v5610_v48, %v9545_v51 }
 0x1fd   : > { %v5625_v61 = vrot.slane %v5611_v43, %v9761_v56  ;;  %v3596_v2 = vcombine.low %v3587_v24, %v3595_v54  ;;  %v5633_v37 = vrot.slane %v5610_v48, %v9761_v56  ;;  %v7130_v0 = vrot.slane %v8984_v32, %v9759_v53  ;;  %v773_v38 = vpop.f32.mrf.mxu0  ;;  %v1186_v48 = vpop.f32.mrf.mxu1 }
 0x1fe   : > { %v8985_v1 = vcombine.high %v5584_v44, %v5591_v45  ;;  %v5640_v5 = vrot.slane %v5626_v63, %v9761_v56  ;;  %v7138_v6 = vrot.slane %v7131_v58, %v9759_v53  ;;  %v1365_v25 = vshrl.u32 %v10191_v22, 16 }
 0x1ff   : > { %v7164_v14 = vcombine.low %v5618_v57, %v5625_v61  ;;  %v8986_v50 = vcombine.high %v5618_v57, %v5625_v61  ;;  %v4609_v8 = vpack.i.b16 %v3596_v2, %v3547_v42  ;;  %v4611_v30 = vshrl.u32 %v3596_v2, 16 }
 0x200   : > { %v7146_v59 = vrot.slane %v8985_v1, %v9759_v53  ;;  %v7147_v11 = vcombine.low %v7122_v62, %v7130_v0  ;;  %v7180_v4 = vcombine.low %v5633_v37, %v5640_v5  ;;  %v8987_v10 = vcombine.high %v5633_v37, %v5640_v5  ;;  %v10295_v5 = vpop.f32.mrf.mxu1 }
 0x201   : > { %v7171_v7 = vrot.slane %v7164_v14, %v9759_v53  ;;  %v7179_v18 = vrot.slane %v8986_v50, %v9759_v53  ;;  %v4612_v33 = vpack.i.b16 %v4611_v30, %v4610_v17  ;;  %v8910_v19 = vcombine.low %v4609_v8, %v4609_v8 }
 0x202   : > { %v8911_v16 = vcombine.high %v4609_v8, %v4609_v8  ;;  %v7155_v27 = vcombine.low %v7138_v6, %v7146_v59  ;;  %v7187_v46 = vrot.slane %v7180_v4, %v9759_v53  ;;  %v7195_v41 = vrot.slane %v8987_v10, %v9759_v53 }
 0x203   : > { %v7196_v13 = vcombine.low %v7171_v7, %v7179_v18  ;;  %v8942_v15 = vcombine.low %v4612_v33, %v4612_v33  ;;  %v8943_v28 = vcombine.high %v4612_v33, %v4612_v33  ;;  %4875 = vst [vmem:[%s9846_s23 + $0x28] sm:$0xf] %v8910_v19  ;;  %v871_v29 = vpack.c.bf16 %v765_v39, %v10171_v3 }
 0x204   : > { %4876 = vst [vmem:[%s9846_s23 + $0x2c] sm:$0xf] %v8911_v16  ;;  %v1288_v9 = vpack.c.bf16 %v1182_v20, %v10209_v55  ;;  %v7154_v60 = vrot.slane %v7147_v11, %v9761_v56  ;;  %v7162_v49 = vrot.slane %v7155_v27, %v9761_v56  ;;  %v7204_v31 = vcombine.low %v7187_v46, %v7195_v41  ;;  %v1190_v27 = vpop.f32.mrf.mxu1 }
 0x205   : > { %v4981_v34 = vshrl.u32 %v10229_v26, 16  ;;  %4907 = vst [vmem:[%s9846_s23 + $0xa8] sm:$0xf] %v8942_v15  ;;  %4908 = vst [vmem:[%s9846_s23 + $0xac] sm:$0xf] %v8943_v28  ;;  %v1363_v23 = vpack.i.b16 %v871_v29, %v10191_v22  ;;  %v1366_v40 = vshrl.u32 %v871_v29, 16  ;;  %v7203_v3 = vrot.slane %v7196_v13, %v9761_v56 }
 0x206   : > { %v4979_v36 = vpack.i.b16 %v1288_v9, %v10229_v26  ;;  %v4982_v35 = vshrl.u32 %v1288_v9, 16  ;;  %v7163_v44 = vcombine.low %v7154_v60, %v7162_v49  ;;  %v7211_v55 = vrot.slane %v7204_v31, %v9761_v56 }
 0x207   : > { %v10277_v39 = vpack.c.bf16 %v773_v38, %v769_v21  ;;  %v1367_v45 = vpack.i.b16 %v1366_v40, %v1365_v25  ;;  %v2029_v47 = vcombine.high %v1363_v23, %v9757_v52  ;;  %v2036_v42 = vrot.slane %v1363_v23, %v9759_v53 }
 0x208   : > { %v10281_v24 = vpack.i.b16 %v4982_v35, %v4981_v34  ;;  %v7212_v22 = vcombine.low %v7203_v3, %v7211_v55  ;;  %v8226_v43 = vshrl.u32 %v7163_v44, 16  ;;  %v5645_v26 = vcombine.high %v4979_v36, %v9757_v52 }
 0x209   : > { %v5652_v54 = vrot.slane %v4979_v36, %v9759_v53  ;;  %v2043_v62 = vrot.slane %v2029_v47, %v9759_v53  ;;  %v2044_v32 = vcombine.high %v2036_v42, %v9545_v51  ;;  %v2051_v58 = vrot.slane %v2036_v42, %v9761_v56  ;;  %v775_v47 = vpop.f32.mrf.mxu0 }
 0x20a   : > { %v2078_v21 = vcombine.high %v1367_v45, %v9757_v52  ;;  %v8225_v17 = vpack.i.b16 %v7212_v22, %v7163_v44  ;;  %v8227_v57 = vshrl.u32 %v7212_v22, 16  ;;  %v2085_v61 = vrot.slane %v1367_v45, %v9759_v53 }
 0x20b   : > { %v5659_v63 = vrot.slane %v5645_v26, %v9759_v53  ;;  %v2058_v2 = vrot.slane %v2044_v32, %v9761_v56  ;;  %v2059_v37 = vcombine.high %v2043_v62, %v9545_v51  ;;  %v2066_v0 = vrot.slane %v2043_v62, %v9761_v56 }
 0x20c   : > { %v2092_v1 = vrot.slane %v2078_v21, %v9759_v53  ;;  %v8228_v6 = vpack.i.b16 %v8227_v57, %v8226_v43  ;;  %v9038_v14 = vcombine.low %v8225_v17, %v8225_v17  ;;  %v9039_v50 = vcombine.high %v8225_v17, %v8225_v17 }
 0x20d   : > { %v2093_v8 = vcombine.high %v2085_v61, %v9545_v51  ;;  %v2073_v30 = vrot.slane %v2059_v37, %v9761_v56  ;;  %v2100_v59 = vrot.slane %v2085_v61, %v9761_v56  ;;  %v3597_v20 = vcombine.low %v2051_v58, %v2058_v2 }
 0x20e   : > { %v2108_v11 = vcombine.high %v2092_v1, %v9545_v51  ;;  %v2115_v7 = vrot.slane %v2092_v1, %v9761_v56  ;;  %v9070_v18 = vcombine.low %v8228_v6, %v8228_v6  ;;  %v9071_v4 = vcombine.high %v8228_v6, %v8228_v6  ;;  %8491 = vst [vmem:[%s9879_s25 + $0x28] sm:$0xf] %v9038_v14 }
 0x20f   : > { %8492 = vst [vmem:[%s9879_s25 + $0x2c] sm:$0xf] %v9039_v50  ;;  %v2107_v10 = vrot.slane %v2093_v8, %v9761_v56  ;;  %v8860_v19 = vcombine.high %v2051_v58, %v2058_v2  ;;  %v3613_v16 = vcombine.low %v2066_v0, %v2073_v30  ;;  %v8861_v25 = vcombine.high %v2066_v0, %v2073_v30 }
 0x210   : > { %v2122_v33 = vrot.slane %v2108_v11, %v9761_v56  ;;  %8523 = vst [vmem:[%s9879_s25 + $0xa8] sm:$0xf] %v9070_v18  ;;  %8524 = vst [vmem:[%s9879_s25 + $0xac] sm:$0xf] %v9071_v4  ;;  %v3604_v46 = vrot.slane %v3597_v20, %v9759_v53  ;;  %v5660_v15 = vcombine.high %v5652_v54, %v9545_v51 }
 0x211   : > { %v3646_v41 = vcombine.low %v2100_v59, %v2107_v10  ;;  %v8862_v13 = vcombine.high %v2100_v59, %v2107_v10  ;;  %v3612_v28 = vrot.slane %v8860_v19, %v9759_v53  ;;  %v3620_v29 = vrot.slane %v3613_v16, %v9759_v53 }
 0x212   : > { %v3628_v9 = vrot.slane %v8861_v25, %v9759_v53  ;;  %v3662_v38 = vcombine.low %v2115_v7, %v2122_v33  ;;  %v8863_v31 = vcombine.high %v2115_v7, %v2122_v33  ;;  %v10315_v34 = vpack.c.bf16 %v1190_v27, %v1186_v48 }
 0x213   : > { %v3653_v60 = vrot.slane %v3646_v41, %v9759_v53  ;;  %v3661_v49 = vrot.slane %v8862_v13, %v9759_v53  ;;  %v3629_v23 = vcombine.low %v3604_v46, %v3612_v28  ;;  %v5674_v35 = vrot.slane %v5660_v15, %v9761_v56  ;;  %v1192_v13 = vpop.f32.mrf.mxu1 }
 0x214   : > { %v3637_v40 = vcombine.low %v3620_v29, %v3628_v9  ;;  %v3669_v36 = vrot.slane %v3662_v38, %v9759_v53  ;;  %v3677_v44 = vrot.slane %v8863_v31, %v9759_v53  ;;  %v5667_v55 = vrot.slane %v5652_v54, %v9761_v56 }
 0x215   : > { %v3678_v3 = vcombine.low %v3653_v60, %v3661_v49  ;;  %v5675_v45 = vcombine.high %v5659_v63, %v9545_v51  ;;  %v3636_v42 = vrot.slane %v3629_v23, %v9761_v56  ;;  %v5694_v48 = vcombine.high %v10281_v24, %v9757_v52 }
 0x216   : > { %v3644_v22 = vrot.slane %v3637_v40, %v9761_v56  ;;  %v5701_v43 = vrot.slane %v10281_v24, %v9759_v53  ;;  %v3686_v26 = vcombine.low %v3669_v36, %v3677_v44  ;;  %v5682_v62 = vrot.slane %v5659_v63, %v9761_v56  ;;  %v779_v24 = vpop.f32.mrf.mxu0 }
 0x217   : > { %v5689_v32 = vrot.slane %v5675_v45, %v9761_v56  ;;  %v7213_v58 = vcombine.low %v5667_v55, %v5674_v35  ;;  %v3685_v21 = vrot.slane %v3678_v3, %v9761_v56  ;;  %v5708_v17 = vrot.slane %v5694_v48, %v9759_v53 }
 0x218   : > { %v3645_v54 = vcombine.low %v3636_v42, %v3644_v22  ;;  %v5709_v57 = vcombine.high %v5701_v43, %v9545_v51  ;;  %v3693_v61 = vrot.slane %v3686_v26, %v9761_v56  ;;  %v8988_v37 = vcombine.high %v5667_v55, %v5674_v35  ;;  %v10343_v16 = vpop.f32.mrf.mxu0 }
 0x219   : > { %v7220_v2 = vrot.slane %v7213_v58, %v9759_v53  ;;  %v7229_v0 = vcombine.low %v5682_v62, %v5689_v32  ;;  %v5716_v63 = vrot.slane %v5701_v43, %v9761_v56  ;;  %v5724_v14 = vcombine.high %v5708_v17, %v9545_v51 }
 0x21a   : > { %v4616_v1 = vshrl.u32 %v3645_v54, 16  ;;  %v5723_v6 = vrot.slane %v5709_v57, %v9761_v56  ;;  %v3694_v50 = vcombine.low %v3685_v21, %v3693_v61  ;;  %v5731_v8 = vrot.slane %v5708_v17, %v9761_v56  ;;  %v783_v44 = vpop.f32.mrf.mxu0  ;;  %v1196_v17 = vpop.f32.mrf.mxu1 }
 0x21b   : > { %v7228_v30 = vrot.slane %v8988_v37, %v9759_v53  ;;  %v8989_v59 = vcombine.high %v5682_v62, %v5689_v32  ;;  %v5738_v11 = vrot.slane %v5724_v14, %v9761_v56  ;;  %v7236_v7 = vrot.slane %v7229_v0, %v9759_v53 }
 0x21c   : > { %v7262_v18 = vcombine.low %v5716_v63, %v5723_v6  ;;  %v8990_v4 = vcombine.high %v5716_v63, %v5723_v6  ;;  %v4615_v10 = vpack.i.b16 %v3694_v50, %v3645_v54  ;;  %v4617_v20 = vshrl.u32 %v3694_v50, 16 }
 0x21d   : > { %v7244_v33 = vrot.slane %v8989_v59, %v9759_v53  ;;  %v7245_v19 = vcombine.low %v7220_v2, %v7228_v30  ;;  %v7278_v46 = vcombine.low %v5731_v8, %v5738_v11  ;;  %v8991_v41 = vcombine.high %v5731_v8, %v5738_v11  ;;  %v10381_v11 = vpop.f32.mrf.mxu1 }
 0x21e   : > { %v7269_v25 = vrot.slane %v7262_v18, %v9759_v53  ;;  %v7277_v27 = vrot.slane %v8990_v4, %v9759_v53  ;;  %v4618_v15 = vpack.i.b16 %v4617_v20, %v4616_v1  ;;  %v8912_v28 = vcombine.low %v4615_v10, %v4615_v10 }
 0x21f   : > { %v8913_v29 = vcombine.high %v4615_v10, %v4615_v10  ;;  %v1373_v9 = vshrl.u32 %v10277_v39, 16  ;;  %v7253_v38 = vcombine.low %v7236_v7, %v7244_v33  ;;  %v7285_v60 = vrot.slane %v7278_v46, %v9759_v53 }
 0x220   : > { %v7293_v49 = vrot.slane %v8991_v41, %v9759_v53  ;;  %v7294_v31 = vcombine.low %v7269_v25, %v7277_v27  ;;  %v8944_v23 = vcombine.low %v4618_v15, %v4618_v15  ;;  %v8945_v40 = vcombine.high %v4618_v15, %v4618_v15  ;;  %4877 = vst [vmem:[%s9846_s23 + $0x30] sm:$0xf] %v8912_v28 }
 0x221   : > { %4878 = vst [vmem:[%s9846_s23 + $0x34] sm:$0xf] %v8913_v29  ;;  %v873_v36 = vpack.c.bf16 %v775_v47, %v10257_v12  ;;  %v1290_v35 = vpack.c.bf16 %v1192_v13, %v10295_v5  ;;  %v7252_v3 = vrot.slane %v7245_v19, %v9761_v56  ;;  %v7260_v55 = vrot.slane %v7253_v38, %v9761_v56  ;;  %v1200_v38 = vpop.f32.mrf.mxu1 }
 0x222   : > { %v7302_v45 = vcombine.low %v7285_v60, %v7293_v49  ;;  %v4989_v42 = vshrl.u32 %v10315_v34, 16  ;;  %4909 = vst [vmem:[%s9846_s23 + $0xb0] sm:$0xf] %v8944_v23  ;;  %4910 = vst [vmem:[%s9846_s23 + $0xb4] sm:$0xf] %v8945_v40  ;;  %v7301_v12 = vrot.slane %v7294_v31, %v9761_v56  ;;  %v10363_v47 = vpack.c.bf16 %v783_v44, %v779_v24 }
 0x223   : > { %v1371_v22 = vpack.i.b16 %v873_v36, %v10277_v39  ;;  %v1374_v48 = vshrl.u32 %v873_v36, 16  ;;  %v4987_v43 = vpack.i.b16 %v1290_v35, %v10315_v34  ;;  %v4990_v26 = vshrl.u32 %v1290_v35, 16 }
 0x224   : > { %v7261_v62 = vcombine.low %v7252_v3, %v7260_v55  ;;  %v7309_v5 = vrot.slane %v7302_v45, %v9761_v56 }
 0x225   : > { %v1375_v32 = vpack.i.b16 %v1374_v48, %v1373_v9  ;;  %v2127_v58 = vcombine.high %v1371_v22, %v9757_v52  ;;  %v2134_v54 = vrot.slane %v1371_v22, %v9759_v53  ;;  %v10367_v21 = vpack.i.b16 %v4990_v26, %v4989_v42 }
 0x226   : > { %v7310_v39 = vcombine.low %v7301_v12, %v7309_v5  ;;  %v8232_v57 = vshrl.u32 %v7261_v62, 16  ;;  %v5743_v34 = vcombine.high %v4987_v43, %v9757_v52  ;;  %v5750_v61 = vrot.slane %v4987_v43, %v9759_v53 }
 0x227   : > { %v2141_v2 = vrot.slane %v2127_v58, %v9759_v53  ;;  %v2142_v37 = vcombine.high %v2134_v54, %v9545_v51  ;;  %v2149_v0 = vrot.slane %v2134_v54, %v9761_v56  ;;  %v2176_v24 = vcombine.high %v1375_v32, %v9757_v52  ;;  %v785_v58 = vpop.f32.mrf.mxu0 }
 0x228   : > { %v8231_v1 = vpack.i.b16 %v7310_v39, %v7261_v62  ;;  %v8233_v63 = vshrl.u32 %v7310_v39, 16  ;;  %v2183_v6 = vrot.slane %v1375_v32, %v9759_v53  ;;  %v5757_v14 = vrot.slane %v5743_v34, %v9759_v53 }
 0x229   : > { %v2156_v50 = vrot.slane %v2142_v37, %v9761_v56  ;;  %v2157_v8 = vcombine.high %v2141_v2, %v9545_v51  ;;  %v2164_v30 = vrot.slane %v2141_v2, %v9761_v56  ;;  %v2190_v59 = vrot.slane %v2176_v24, %v9759_v53 }
 0x22a   : > { %v8234_v7 = vpack.i.b16 %v8233_v63, %v8232_v57  ;;  %v9040_v18 = vcombine.low %v8231_v1, %v8231_v1  ;;  %v9041_v4 = vcombine.high %v8231_v1, %v8231_v1  ;;  %v2191_v10 = vcombine.high %v2183_v6, %v9545_v51 }
 0x22b   : > { %v2171_v20 = vrot.slane %v2157_v8, %v9761_v56  ;;  %v2198_v33 = vrot.slane %v2183_v6, %v9761_v56  ;;  %v2206_v19 = vcombine.high %v2190_v59, %v9545_v51  ;;  %v2213_v25 = vrot.slane %v2190_v59, %v9761_v56 }
 0x22c   : > { %v9072_v27 = vcombine.low %v8234_v7, %v8234_v7  ;;  %v9073_v46 = vcombine.high %v8234_v7, %v8234_v7  ;;  %8493 = vst [vmem:[%s9879_s25 + $0x30] sm:$0xf] %v9040_v18  ;;  %8494 = vst [vmem:[%s9879_s25 + $0x34] sm:$0xf] %v9041_v4  ;;  %v2205_v41 = vrot.slane %v2191_v10, %v9761_v56 }
 0x22d   : > { %v3695_v13 = vcombine.low %v2149_v0, %v2156_v50  ;;  %v2220_v15 = vrot.slane %v2206_v19, %v9761_v56  ;;  %v8864_v28 = vcombine.high %v2149_v0, %v2156_v50  ;;  %v3711_v29 = vcombine.low %v2164_v30, %v2171_v20 }
 0x22e   : > { %v8865_v9 = vcombine.high %v2164_v30, %v2171_v20  ;;  %8525 = vst [vmem:[%s9879_s25 + $0xb0] sm:$0xf] %v9072_v27  ;;  %8526 = vst [vmem:[%s9879_s25 + $0xb4] sm:$0xf] %v9073_v46  ;;  %v3744_v49 = vcombine.low %v2198_v33, %v2205_v41  ;;  %v8866_v31 = vcombine.high %v2198_v33, %v2205_v41 }
 0x22f   : > { %v3702_v60 = vrot.slane %v3695_v13, %v9759_v53  ;;  %v5758_v23 = vcombine.high %v5750_v61, %v9545_v51  ;;  %v3710_v40 = vrot.slane %v8864_v28, %v9759_v53  ;;  %v3718_v36 = vrot.slane %v3711_v29, %v9759_v53 }
 0x230   : > { %v3726_v35 = vrot.slane %v8865_v9, %v9759_v53  ;;  %v3760_v44 = vcombine.low %v2213_v25, %v2220_v15  ;;  %v3751_v3 = vrot.slane %v3744_v49, %v9759_v53  ;;  %v3759_v55 = vrot.slane %v8866_v31, %v9759_v53  ;;  %v1202_v31 = vpop.f32.mrf.mxu1 }
 0x231   : > { %v8867_v45 = vcombine.high %v2213_v25, %v2220_v15  ;;  %v10401_v42 = vpack.c.bf16 %v1200_v38, %v1196_v17  ;;  %v3727_v22 = vcombine.low %v3702_v60, %v3710_v40  ;;  %v5772_v26 = vrot.slane %v5758_v23, %v9761_v56 }
 0x232   : > { %v3735_v48 = vcombine.low %v3718_v36, %v3726_v35  ;;  %v3767_v43 = vrot.slane %v3760_v44, %v9759_v53  ;;  %v3776_v12 = vcombine.low %v3751_v3, %v3759_v55  ;;  %v5765_v5 = vrot.slane %v5750_v61, %v9761_v56 }
 0x233   : > { %v3775_v62 = vrot.slane %v8867_v45, %v9759_v53  ;;  %v5773_v32 = vcombine.high %v5757_v14, %v9545_v51  ;;  %v3734_v54 = vrot.slane %v3727_v22, %v9761_v56  ;;  %v5792_v17 = vcombine.high %v10367_v21, %v9757_v52 }
 0x234   : > { %v3742_v39 = vrot.slane %v3735_v48, %v9761_v56  ;;  %v5799_v57 = vrot.slane %v10367_v21, %v9759_v53  ;;  %v5780_v2 = vrot.slane %v5757_v14, %v9761_v56  ;;  %v7311_v0 = vcombine.low %v5765_v5, %v5772_v26  ;;  %v789_v21 = vpop.f32.mrf.mxu0 }
 0x235   : > { %v3784_v34 = vcombine.low %v3767_v43, %v3775_v62  ;;  %v5787_v37 = vrot.slane %v5773_v32, %v9761_v56  ;;  %v3783_v24 = vrot.slane %v3776_v12, %v9761_v56  ;;  %v5806_v1 = vrot.slane %v5792_v17, %v9759_v53 }
 0x236   : > { %v3743_v61 = vcombine.low %v3734_v54, %v3742_v39  ;;  %v5807_v63 = vcombine.high %v5799_v57, %v9545_v51  ;;  %v7318_v50 = vrot.slane %v7311_v0, %v9759_v53  ;;  %v8992_v8 = vcombine.high %v5765_v5, %v5772_v26  ;;  %v10429_v29 = vpop.f32.mrf.mxu0 }
 0x237   : > { %v3791_v6 = vrot.slane %v3784_v34, %v9761_v56  ;;  %v7327_v30 = vcombine.low %v5780_v2, %v5787_v37  ;;  %v5814_v14 = vrot.slane %v5799_v57, %v9761_v56  ;;  %v5822_v18 = vcombine.high %v5806_v1, %v9545_v51 }
 0x238   : > { %v4622_v59 = vshrl.u32 %v3743_v61, 16  ;;  %v5821_v7 = vrot.slane %v5807_v63, %v9761_v56  ;;  %v5829_v10 = vrot.slane %v5806_v1, %v9761_v56  ;;  %v7326_v20 = vrot.slane %v8992_v8, %v9759_v53  ;;  %v793_v62 = vpop.f32.mrf.mxu0  ;;  %v1206_v1 = vpop.f32.mrf.mxu1 }
 0x239   : > { %v3792_v4 = vcombine.low %v3783_v24, %v3791_v6  ;;  %v8993_v33 = vcombine.high %v5780_v2, %v5787_v37  ;;  %v5836_v19 = vrot.slane %v5822_v18, %v9761_v56  ;;  %v7334_v25 = vrot.slane %v7327_v30, %v9759_v53 }
 0x23a   : > { %v7360_v27 = vcombine.low %v5814_v14, %v5821_v7  ;;  %v8994_v46 = vcombine.high %v5814_v14, %v5821_v7  ;;  %v7343_v28 = vcombine.low %v7318_v50, %v7326_v20  ;;  %v1381_v35 = vshrl.u32 %v10363_v47, 16 }
 0x23b   : > { %v4621_v41 = vpack.i.b16 %v3792_v4, %v3743_v61  ;;  %v4623_v13 = vshrl.u32 %v3792_v4, 16  ;;  %v7342_v15 = vrot.slane %v8993_v33, %v9759_v53  ;;  %v7376_v60 = vcombine.low %v5829_v10, %v5836_v19 }
 0x23c   : > { %v7367_v9 = vrot.slane %v7360_v27, %v9759_v53  ;;  %v7375_v38 = vrot.slane %v8994_v46, %v9759_v53  ;;  %v8995_v49 = vcombine.high %v5829_v10, %v5836_v19  ;;  %v875_v43 = vpack.c.bf16 %v785_v58, %v10343_v16  ;;  %v10467_v19 = vpop.f32.mrf.mxu1 }
 0x23d   : > { %v4624_v23 = vpack.i.b16 %v4623_v13, %v4622_v59  ;;  %v8914_v40 = vcombine.low %v4621_v41, %v4621_v41  ;;  %v8915_v36 = vcombine.high %v4621_v41, %v4621_v41  ;;  %v7351_v44 = vcombine.low %v7334_v25, %v7342_v15 }
 0x23e   : > { %v7383_v3 = vrot.slane %v7376_v60, %v9759_v53  ;;  %v7391_v55 = vrot.slane %v8995_v49, %v9759_v53  ;;  %v7392_v45 = vcombine.low %v7367_v9, %v7375_v38  ;;  %v1292_v26 = vpack.c.bf16 %v1202_v31, %v10381_v11 }
 0x23f   : > { %v8946_v22 = vcombine.low %v4624_v23, %v4624_v23  ;;  %v8947_v48 = vcombine.high %v4624_v23, %v4624_v23  ;;  %4879 = vst [vmem:[%s9846_s23 + $0x38] sm:$0xf] %v8914_v40  ;;  %4880 = vst [vmem:[%s9846_s23 + $0x3c] sm:$0xf] %v8915_v36  ;;  %v7350_v12 = vrot.slane %v7343_v28, %v9761_v56  ;;  %v4997_v54 = vshrl.u32 %v10401_v42, 16 }
 0x240   : > { %v7358_v5 = vrot.slane %v7351_v44, %v9761_v56  ;;  %v7400_v32 = vcombine.low %v7383_v3, %v7391_v55  ;;  %v1379_v39 = vpack.i.b16 %v875_v43, %v10363_v47  ;;  %v1382_v17 = vshrl.u32 %v875_v43, 16  ;;  %v1210_v44 = vpop.f32.mrf.mxu1 }
 0x241   : > { %4911 = vst [vmem:[%s9846_s23 + $0xb8] sm:$0xf] %v8946_v22  ;;  %4912 = vst [vmem:[%s9846_s23 + $0xbc] sm:$0xf] %v8947_v48  ;;  %v4995_v57 = vpack.i.b16 %v1292_v26, %v10401_v42  ;;  %v4998_v34 = vshrl.u32 %v1292_v26, 16  ;;  %v7399_v16 = vrot.slane %v7392_v45, %v9761_v56  ;;  %v10449_v58 = vpack.c.bf16 %v793_v62, %v789_v21 }
 0x242   : > { %v7359_v2 = vcombine.low %v7350_v12, %v7358_v5  ;;  %v7407_v11 = vrot.slane %v7400_v32, %v9761_v56  ;;  %v1383_v37 = vpack.i.b16 %v1382_v17, %v1381_v35  ;;  %v2225_v0 = vcombine.high %v1379_v39, %v9757_v52 }
 0x243   : > { %v2232_v61 = vrot.slane %v1379_v39, %v9759_v53  ;;  %v10453_v24 = vpack.i.b16 %v4998_v34, %v4997_v54  ;;  %v5841_v42 = vcombine.high %v4995_v57, %v9757_v52  ;;  %v5848_v6 = vrot.slane %v4995_v57, %v9759_v53 }
 0x244   : > { %v7408_v47 = vcombine.low %v7399_v16, %v7407_v11  ;;  %v8238_v63 = vshrl.u32 %v7359_v2, 16  ;;  %v2239_v50 = vrot.slane %v2225_v0, %v9759_v53  ;;  %v2274_v21 = vcombine.high %v1383_v37, %v9757_v52  ;;  %v795_v0 = vpop.f32.mrf.mxu0 }
 0x245   : > { %v2240_v8 = vcombine.high %v2232_v61, %v9545_v51  ;;  %v2247_v30 = vrot.slane %v2232_v61, %v9761_v56  ;;  %v2281_v7 = vrot.slane %v1383_v37, %v9759_v53  ;;  %v5855_v18 = vrot.slane %v5841_v42, %v9759_v53 }
 0x246   : > { %v8237_v59 = vpack.i.b16 %v7408_v47, %v7359_v2  ;;  %v8239_v14 = vshrl.u32 %v7408_v47, 16  ;;  %v2255_v10 = vcombine.high %v2239_v50, %v9545_v51  ;;  %v2262_v20 = vrot.slane %v2239_v50, %v9761_v56 }
 0x247   : > { %v2254_v4 = vrot.slane %v2240_v8, %v9761_v56  ;;  %v2288_v33 = vrot.slane %v2274_v21, %v9759_v53  ;;  %v2289_v41 = vcombine.high %v2281_v7, %v9545_v51  ;;  %v2296_v15 = vrot.slane %v2281_v7, %v9761_v56 }
 0x248   : > { %v8240_v25 = vpack.i.b16 %v8239_v14, %v8238_v63  ;;  %v9042_v27 = vcombine.low %v8237_v59, %v8237_v59  ;;  %v9043_v46 = vcombine.high %v8237_v59, %v8237_v59  ;;  %v2269_v13 = vrot.slane %v2255_v10, %v9761_v56 }
 0x249   : > { %v2304_v28 = vcombine.high %v2288_v33, %v9545_v51  ;;  %v2311_v9 = vrot.slane %v2288_v33, %v9761_v56  ;;  %v2303_v49 = vrot.slane %v2289_v41, %v9761_v56  ;;  %v3793_v31 = vcombine.low %v2247_v30, %v2254_v4 }
 0x24a   : > { %v9074_v38 = vcombine.low %v8240_v25, %v8240_v25  ;;  %v9075_v60 = vcombine.high %v8240_v25, %v8240_v25  ;;  %8495 = vst [vmem:[%s9879_s25 + $0x38] sm:$0xf] %v9042_v27  ;;  %8496 = vst [vmem:[%s9879_s25 + $0x3c] sm:$0xf] %v9043_v46  ;;  %v8868_v40 = vcombine.high %v2247_v30, %v2254_v4 }
 0x24b   : > { %v2318_v23 = vrot.slane %v2304_v28, %v9761_v56  ;;  %v3809_v36 = vcombine.low %v2262_v20, %v2269_v13  ;;  %v8869_v35 = vcombine.high %v2262_v20, %v2269_v13  ;;  %v3800_v3 = vrot.slane %v3793_v31, %v9759_v53 }
 0x24c   : > { %8527 = vst [vmem:[%s9879_s25 + $0xb8] sm:$0xf] %v9074_v38  ;;  %8528 = vst [vmem:[%s9879_s25 + $0xbc] sm:$0xf] %v9075_v60  ;;  %v3842_v55 = vcombine.low %v2296_v15, %v2303_v49  ;;  %v8870_v45 = vcombine.high %v2296_v15, %v2303_v49  ;;  %v5856_v22 = vcombine.high %v5848_v6, %v9545_v51 }
 0x24d   : > { %v3808_v48 = vrot.slane %v8868_v40, %v9759_v53  ;;  %v3816_v43 = vrot.slane %v3809_v36, %v9759_v53  ;;  %v3824_v26 = vrot.slane %v8869_v35, %v9759_v53  ;;  %v3858_v62 = vcombine.low %v2311_v9, %v2318_v23 }
 0x24e   : > { %v3849_v12 = vrot.slane %v3842_v55, %v9759_v53  ;;  %v3857_v5 = vrot.slane %v8870_v45, %v9759_v53  ;;  %v8871_v32 = vcombine.high %v2311_v9, %v2318_v23  ;;  %v10487_v54 = vpack.c.bf16 %v1210_v44, %v1206_v1  ;;  %v1212_v45 = vpop.f32.mrf.mxu1 }
 0x24f   : > { %v3825_v39 = vcombine.low %v3800_v3, %v3808_v48  ;;  %v3833_v17 = vcombine.low %v3816_v43, %v3824_v26  ;;  %v3865_v57 = vrot.slane %v3858_v62, %v9759_v53  ;;  %v5870_v34 = vrot.slane %v5856_v22, %v9761_v56 }
 0x250   : > { %v3873_v2 = vrot.slane %v8871_v32, %v9759_v53  ;;  %v3874_v16 = vcombine.low %v3849_v12, %v3857_v5  ;;  %v5863_v11 = vrot.slane %v5848_v6, %v9761_v56  ;;  %v5871_v37 = vcombine.high %v5855_v18, %v9545_v51 }
 0x251   : > { %v3832_v61 = vrot.slane %v3825_v39, %v9761_v56  ;;  %v3840_v47 = vrot.slane %v3833_v17, %v9761_v56  ;;  %v5890_v1 = vcombine.high %v10453_v24, %v9757_v52  ;;  %v5897_v63 = vrot.slane %v10453_v24, %v9759_v53  ;;  %v799_v24 = vpop.f32.mrf.mxu0 }
 0x252   : > { %v3882_v42 = vcombine.low %v3865_v57, %v3873_v2  ;;  %v5878_v50 = vrot.slane %v5855_v18, %v9761_v56  ;;  %v5885_v8 = vrot.slane %v5871_v37, %v9761_v56  ;;  %v7409_v30 = vcombine.low %v5863_v11, %v5870_v34 }
 0x253   : > { %v3841_v6 = vcombine.low %v3832_v61, %v3840_v47  ;;  %v3881_v21 = vrot.slane %v3874_v16, %v9761_v56  ;;  %v5904_v59 = vrot.slane %v5890_v1, %v9759_v53  ;;  %v5905_v14 = vcombine.high %v5897_v63, %v9545_v51  ;;  %v10515_v36 = vpop.f32.mrf.mxu0 }
 0x254   : > { %v3889_v7 = vrot.slane %v3882_v42, %v9761_v56  ;;  %v7416_v4 = vrot.slane %v7409_v30, %v9759_v53  ;;  %v8996_v10 = vcombine.high %v5863_v11, %v5870_v34  ;;  %v7425_v20 = vcombine.low %v5878_v50, %v5885_v8 }
 0x255   : > { %v4628_v33 = vshrl.u32 %v3841_v6, 16  ;;  %v5912_v18 = vrot.slane %v5897_v63, %v9761_v56  ;;  %v5919_v25 = vrot.slane %v5905_v14, %v9761_v56  ;;  %v5920_v27 = vcombine.high %v5904_v59, %v9545_v51  ;;  %v803_v2 = vpop.f32.mrf.mxu0 }
 0x256   : > { %v3890_v46 = vcombine.low %v3881_v21, %v3889_v7  ;;  %v5927_v41 = vrot.slane %v5904_v59, %v9761_v56  ;;  %v7424_v13 = vrot.slane %v8996_v10, %v9759_v53  ;;  %v8997_v15 = vcombine.high %v5878_v50, %v5885_v8  ;;  %v1216_v59 = vpop.f32.mrf.mxu1 }
 0x257   : > { %v5934_v28 = vrot.slane %v5920_v27, %v9761_v56  ;;  %v7432_v9 = vrot.slane %v7425_v20, %v9759_v53  ;;  %v7458_v38 = vcombine.low %v5912_v18, %v5919_v25  ;;  %v8998_v60 = vcombine.high %v5912_v18, %v5919_v25 }
 0x258   : > { %v4627_v49 = vpack.i.b16 %v3890_v46, %v3841_v6  ;;  %v4629_v31 = vshrl.u32 %v3890_v46, 16  ;;  %v7440_v23 = vrot.slane %v8997_v15, %v9759_v53  ;;  %v7441_v40 = vcombine.low %v7416_v4, %v7424_v13 }
 0x259   : > { %v7465_v35 = vrot.slane %v7458_v38, %v9759_v53  ;;  %v7473_v44 = vrot.slane %v8998_v60, %v9759_v53  ;;  %v7474_v3 = vcombine.low %v5927_v41, %v5934_v28  ;;  %v8999_v55 = vcombine.high %v5927_v41, %v5934_v28  ;;  %v10553_v28 = vpop.f32.mrf.mxu1 }
 0x25a   : > { %v4630_v22 = vpack.i.b16 %v4629_v31, %v4628_v33  ;;  %v8916_v48 = vcombine.low %v4627_v49, %v4627_v49  ;;  %v8917_v43 = vcombine.high %v4627_v49, %v4627_v49  ;;  %v1389_v26 = vshrl.u32 %v10449_v58, 16 }
 0x25b   : > { %v7449_v62 = vcombine.low %v7432_v9, %v7440_v23  ;;  %v7481_v12 = vrot.slane %v7474_v3, %v9759_v53  ;;  %v7489_v5 = vrot.slane %v8999_v55, %v9759_v53  ;;  %v7490_v32 = vcombine.low %v7465_v35, %v7473_v44 }
 0x25c   : > { %v8948_v39 = vcombine.low %v4630_v22, %v4630_v22  ;;  %v8949_v17 = vcombine.high %v4630_v22, %v4630_v22  ;;  %4881 = vst [vmem:[%s9846_s23 + $0x40] sm:$0xf] %v8916_v48  ;;  %4882 = vst [vmem:[%s9846_s23 + $0x44] sm:$0xf] %v8917_v43  ;;  %v877_v57 = vpack.c.bf16 %v795_v0, %v10429_v29  ;;  %v5005_v61 = vshrl.u32 %v10487_v54, 16 }
 0x25d   : > { %v1294_v34 = vpack.c.bf16 %v1212_v45, %v10467_v19  ;;  %v7448_v16 = vrot.slane %v7441_v40, %v9761_v56  ;;  %v7456_v11 = vrot.slane %v7449_v62, %v9761_v56  ;;  %v7498_v37 = vcombine.low %v7481_v12, %v7489_v5  ;;  %v1220_v62 = vpop.f32.mrf.mxu1 }
 0x25e   : > { %4913 = vst [vmem:[%s9846_s23 + $0xc0] sm:$0xf] %v8948_v39  ;;  %4914 = vst [vmem:[%s9846_s23 + $0xc4] sm:$0xf] %v8949_v17  ;;  %v1387_v47 = vpack.i.b16 %v877_v57, %v10449_v58  ;;  %v1390_v1 = vshrl.u32 %v877_v57, 16  ;;  %v7497_v29 = vrot.slane %v7490_v32, %v9761_v56  ;;  %v10535_v0 = vpack.c.bf16 %v803_v2, %v799_v24 }
 0x25f   : > { %v5003_v63 = vpack.i.b16 %v1294_v34, %v10487_v54  ;;  %v5006_v42 = vshrl.u32 %v1294_v34, 16  ;;  %v7457_v50 = vcombine.low %v7448_v16, %v7456_v11  ;;  %v7505_v19 = vrot.slane %v7498_v37, %v9761_v56 }
 0x260   : > { %v1391_v8 = vpack.i.b16 %v1390_v1, %v1389_v26  ;;  %v2323_v30 = vcombine.high %v1387_v47, %v9757_v52  ;;  %v2330_v6 = vrot.slane %v1387_v47, %v9759_v53 }
 0x261   : > { %v10539_v21 = vpack.i.b16 %v5006_v42, %v5005_v61  ;;  %v7506_v58 = vcombine.low %v7497_v29, %v7505_v19  ;;  %v8244_v14 = vshrl.u32 %v7457_v50, 16  ;;  %v5939_v54 = vcombine.high %v5003_v63, %v9757_v52 }
 0x262   : > { %v5946_v7 = vrot.slane %v5003_v63, %v9759_v53  ;;  %v2337_v4 = vrot.slane %v2323_v30, %v9759_v53  ;;  %v2338_v10 = vcombine.high %v2330_v6, %v9545_v51  ;;  %v2345_v20 = vrot.slane %v2330_v6, %v9761_v56  ;;  %v805_v30 = vpop.f32.mrf.mxu0 }
 0x263   : > { %v2372_v24 = vcombine.high %v1391_v8, %v9757_v52  ;;  %v8243_v33 = vpack.i.b16 %v7506_v58, %v7457_v50  ;;  %v8245_v18 = vshrl.u32 %v7506_v58, 16  ;;  %v2379_v25 = vrot.slane %v1391_v8, %v9759_v53 }
 0x264   : > { %v5953_v27 = vrot.slane %v5939_v54, %v9759_v53  ;;  %v2352_v46 = vrot.slane %v2338_v10, %v9761_v56  ;;  %v2353_v41 = vcombine.high %v2337_v4, %v9545_v51  ;;  %v2360_v13 = vrot.slane %v2337_v4, %v9761_v56 }
 0x265   : > { %v2386_v15 = vrot.slane %v2372_v24, %v9759_v53  ;;  %v8246_v9 = vpack.i.b16 %v8245_v18, %v8244_v14  ;;  %v9044_v38 = vcombine.low %v8243_v33, %v8243_v33  ;;  %v9045_v60 = vcombine.high %v8243_v33, %v8243_v33 }
 0x266   : > { %v2387_v49 = vcombine.high %v2379_v25, %v9545_v51  ;;  %v2367_v31 = vrot.slane %v2353_v41, %v9761_v56  ;;  %v2394_v23 = vrot.slane %v2379_v25, %v9761_v56  ;;  %v3891_v45 = vcombine.low %v2345_v20, %v2352_v46 }
 0x267   : > { %v2402_v40 = vcombine.high %v2386_v15, %v9545_v51  ;;  %v2409_v35 = vrot.slane %v2386_v15, %v9761_v56  ;;  %v9076_v44 = vcombine.low %v8246_v9, %v8246_v9  ;;  %v9077_v3 = vcombine.high %v8246_v9, %v8246_v9  ;;  %8497 = vst [vmem:[%s9879_s25 + $0x40] sm:$0xf] %v9044_v38 }
 0x268   : > { %8498 = vst [vmem:[%s9879_s25 + $0x44] sm:$0xf] %v9045_v60  ;;  %v2401_v55 = vrot.slane %v2387_v49, %v9761_v56  ;;  %v8872_v48 = vcombine.high %v2345_v20, %v2352_v46  ;;  %v3907_v43 = vcombine.low %v2360_v13, %v2367_v31  ;;  %v8873_v26 = vcombine.high %v2360_v13, %v2367_v31 }
 0x269   : > { %v2416_v22 = vrot.slane %v2402_v40, %v9761_v56  ;;  %8529 = vst [vmem:[%s9879_s25 + $0xc0] sm:$0xf] %v9076_v44  ;;  %8530 = vst [vmem:[%s9879_s25 + $0xc4] sm:$0xf] %v9077_v3  ;;  %v3898_v12 = vrot.slane %v3891_v45, %v9759_v53  ;;  %v5954_v39 = vcombine.high %v5946_v7, %v9545_v51 }
 0x26a   : > { %v3940_v5 = vcombine.low %v2394_v23, %v2401_v55  ;;  %v8874_v32 = vcombine.high %v2394_v23, %v2401_v55  ;;  %v3906_v17 = vrot.slane %v8872_v48, %v9759_v53  ;;  %v3914_v57 = vrot.slane %v3907_v43, %v9759_v53 }
 0x26b   : > { %v3922_v34 = vrot.slane %v8873_v26, %v9759_v53  ;;  %v3956_v2 = vcombine.low %v2409_v35, %v2416_v22  ;;  %v8875_v37 = vcombine.high %v2409_v35, %v2416_v22  ;;  %v10573_v61 = vpack.c.bf16 %v1220_v62, %v1216_v59 }
 0x26c   : > { %v3947_v16 = vrot.slane %v3940_v5, %v9759_v53  ;;  %v3955_v11 = vrot.slane %v8874_v32, %v9759_v53  ;;  %v3923_v47 = vcombine.low %v3898_v12, %v3906_v17  ;;  %v5968_v42 = vrot.slane %v5954_v39, %v9761_v56  ;;  %v1222_v32 = vpop.f32.mrf.mxu1 }
 0x26d   : > { %v3931_v1 = vcombine.low %v3914_v57, %v3922_v34  ;;  %v3963_v63 = vrot.slane %v3956_v2, %v9759_v53  ;;  %v3971_v50 = vrot.slane %v8875_v37, %v9759_v53  ;;  %v5961_v19 = vrot.slane %v5946_v7, %v9761_v56 }
 0x26e   : > { %v3972_v29 = vcombine.low %v3947_v16, %v3955_v11  ;;  %v5969_v8 = vcombine.high %v5953_v27, %v9545_v51  ;;  %v3930_v6 = vrot.slane %v3923_v47, %v9761_v56  ;;  %v5988_v59 = vcombine.high %v10539_v21, %v9757_v52 }
 0x26f   : > { %v3938_v58 = vrot.slane %v3931_v1, %v9761_v56  ;;  %v5995_v14 = vrot.slane %v10539_v21, %v9759_v53  ;;  %v3980_v54 = vcombine.low %v3963_v63, %v3971_v50  ;;  %v5976_v4 = vrot.slane %v5953_v27, %v9761_v56  ;;  %v809_v21 = vpop.f32.mrf.mxu0 }
 0x270   : > { %v5983_v10 = vrot.slane %v5969_v8, %v9761_v56  ;;  %v7507_v20 = vcombine.low %v5961_v19, %v5968_v42  ;;  %v3979_v24 = vrot.slane %v3972_v29, %v9761_v56  ;;  %v6002_v33 = vrot.slane %v5988_v59, %v9759_v53 }
 0x271   : > { %v3939_v7 = vcombine.low %v3930_v6, %v3938_v58  ;;  %v6003_v18 = vcombine.high %v5995_v14, %v9545_v51  ;;  %v3987_v25 = vrot.slane %v3980_v54, %v9761_v56  ;;  %v9000_v41 = vcombine.high %v5961_v19, %v5968_v42  ;;  %v10601_v43 = vpop.f32.mrf.mxu0 }
 0x272   : > { %v7514_v46 = vrot.slane %v7507_v20, %v9759_v53  ;;  %v7523_v13 = vcombine.low %v5976_v4, %v5983_v10  ;;  %v6010_v27 = vrot.slane %v5995_v14, %v9761_v56  ;;  %v6018_v38 = vcombine.high %v6002_v33, %v9545_v51 }
 0x273   : > { %v4634_v15 = vshrl.u32 %v3939_v7, 16  ;;  %v6017_v9 = vrot.slane %v6003_v18, %v9761_v56  ;;  %v3988_v60 = vcombine.low %v3979_v24, %v3987_v25  ;;  %v6025_v49 = vrot.slane %v6002_v33, %v9761_v56  ;;  %v813_v50 = vpop.f32.mrf.mxu0  ;;  %v1226_v33 = vpop.f32.mrf.mxu1 }
 0x274   : > { %v7522_v31 = vrot.slane %v9000_v41, %v9759_v53  ;;  %v9001_v23 = vcombine.high %v5976_v4, %v5983_v10  ;;  %v6032_v40 = vrot.slane %v6018_v38, %v9761_v56  ;;  %v7530_v35 = vrot.slane %v7523_v13, %v9759_v53 }
 0x275   : > { %v7556_v44 = vcombine.low %v6010_v27, %v6017_v9  ;;  %v9002_v3 = vcombine.high %v6010_v27, %v6017_v9  ;;  %v4633_v55 = vpack.i.b16 %v3988_v60, %v3939_v7  ;;  %v4635_v45 = vshrl.u32 %v3988_v60, 16 }
 0x276   : > { %v7538_v22 = vrot.slane %v9001_v23, %v9759_v53  ;;  %v7539_v48 = vcombine.low %v7514_v46, %v7522_v31  ;;  %v7572_v12 = vcombine.low %v6025_v49, %v6032_v40  ;;  %v9003_v5 = vcombine.high %v6025_v49, %v6032_v40  ;;  %v10639_v40 = vpop.f32.mrf.mxu1 }
 0x277   : > { %v7563_v26 = vrot.slane %v7556_v44, %v9759_v53  ;;  %v7571_v62 = vrot.slane %v9002_v3, %v9759_v53  ;;  %v4636_v39 = vpack.i.b16 %v4635_v45, %v4634_v15  ;;  %v8918_v17 = vcombine.low %v4633_v55, %v4633_v55 }
 0x278   : > { %v8919_v57 = vcombine.high %v4633_v55, %v4633_v55  ;;  %v1397_v34 = vshrl.u32 %v10535_v0, 16  ;;  %v7547_v2 = vcombine.low %v7530_v35, %v7538_v22  ;;  %v7579_v16 = vrot.slane %v7572_v12, %v9759_v53 }
 0x279   : > { %v7587_v11 = vrot.slane %v9003_v5, %v9759_v53  ;;  %v7588_v37 = vcombine.low %v7563_v26, %v7571_v62  ;;  %v8950_v47 = vcombine.low %v4636_v39, %v4636_v39  ;;  %v8951_v1 = vcombine.high %v4636_v39, %v4636_v39  ;;  %4883 = vst [vmem:[%s9846_s23 + $0x48] sm:$0xf] %v8918_v17 }
 0x27a   : > { %4884 = vst [vmem:[%s9846_s23 + $0x4c] sm:$0xf] %v8919_v57  ;;  %v879_v63 = vpack.c.bf16 %v805_v30, %v10515_v36  ;;  %v1296_v42 = vpack.c.bf16 %v1222_v32, %v10553_v28  ;;  %v7546_v29 = vrot.slane %v7539_v48, %v9761_v56  ;;  %v7554_v19 = vrot.slane %v7547_v2, %v9761_v56  ;;  %v1230_v2 = vpop.f32.mrf.mxu1 }
 0x27b   : > { %v7596_v8 = vcombine.low %v7579_v16, %v7587_v11  ;;  %v5013_v6 = vshrl.u32 %v10573_v61, 16  ;;  %4915 = vst [vmem:[%s9846_s23 + $0xc8] sm:$0xf] %v8950_v47  ;;  %4916 = vst [vmem:[%s9846_s23 + $0xcc] sm:$0xf] %v8951_v1  ;;  %v7595_v36 = vrot.slane %v7588_v37, %v9761_v56  ;;  %v10621_v30 = vpack.c.bf16 %v813_v50, %v809_v21 }
 0x27c   : > { %v1395_v58 = vpack.i.b16 %v879_v63, %v10535_v0  ;;  %v1398_v59 = vshrl.u32 %v879_v63, 16  ;;  %v5011_v14 = vpack.i.b16 %v1296_v42, %v10573_v61  ;;  %v5014_v54 = vshrl.u32 %v1296_v42, 16 }
 0x27d   : > { %v7555_v4 = vcombine.low %v7546_v29, %v7554_v19  ;;  %v7603_v28 = vrot.slane %v7596_v8, %v9761_v56 }
 0x27e   : > { %v1399_v10 = vpack.i.b16 %v1398_v59, %v1397_v34  ;;  %v2421_v20 = vcombine.high %v1395_v58, %v9757_v52  ;;  %v2428_v7 = vrot.slane %v1395_v58, %v9759_v53  ;;  %v10625_v24 = vpack.i.b16 %v5014_v54, %v5013_v6 }
 0x27f   : > { %v7604_v0 = vcombine.low %v7595_v36, %v7603_v28  ;;  %v8250_v18 = vshrl.u32 %v7555_v4, 16  ;;  %v6037_v61 = vcombine.high %v5011_v14, %v9757_v52  ;;  %v6044_v25 = vrot.slane %v5011_v14, %v9759_v53 }
 0x280   : > { %v2435_v46 = vrot.slane %v2421_v20, %v9759_v53  ;;  %v2436_v41 = vcombine.high %v2428_v7, %v9545_v51  ;;  %v2443_v13 = vrot.slane %v2428_v7, %v9761_v56  ;;  %v2470_v21 = vcombine.high %v1399_v10, %v9757_v52  ;;  %v815_v20 = vpop.f32.mrf.mxu0 }
 0x281   : > { %v8249_v15 = vpack.i.b16 %v7604_v0, %v7555_v4  ;;  %v8251_v27 = vshrl.u32 %v7604_v0, 16  ;;  %v2477_v9 = vrot.slane %v1399_v10, %v9759_v53  ;;  %v6051_v38 = vrot.slane %v6037_v61, %v9759_v53 }
 0x282   : > { %v2450_v60 = vrot.slane %v2436_v41, %v9761_v56  ;;  %v2451_v49 = vcombine.high %v2435_v46, %v9545_v51  ;;  %v2458_v31 = vrot.slane %v2435_v46, %v9761_v56  ;;  %v2484_v23 = vrot.slane %v2470_v21, %v9759_v53 }
 0x283   : > { %v8252_v35 = vpack.i.b16 %v8251_v27, %v8250_v18  ;;  %v9046_v44 = vcombine.low %v8249_v15, %v8249_v15  ;;  %v9047_v3 = vcombine.high %v8249_v15, %v8249_v15  ;;  %v2485_v55 = vcombine.high %v2477_v9, %v9545_v51 }
 0x284   : > { %v2465_v45 = vrot.slane %v2451_v49, %v9761_v56  ;;  %v2492_v22 = vrot.slane %v2477_v9, %v9761_v56  ;;  %v2500_v48 = vcombine.high %v2484_v23, %v9545_v51  ;;  %v2507_v26 = vrot.slane %v2484_v23, %v9761_v56 }
 0x285   : > { %v9078_v62 = vcombine.low %v8252_v35, %v8252_v35  ;;  %v9079_v12 = vcombine.high %v8252_v35, %v8252_v35  ;;  %8499 = vst [vmem:[%s9879_s25 + $0x48] sm:$0xf] %v9046_v44  ;;  %8500 = vst [vmem:[%s9879_s25 + $0x4c] sm:$0xf] %v9047_v3  ;;  %v2499_v5 = vrot.slane %v2485_v55, %v9761_v56 }
 0x286   : > { %v3989_v32 = vcombine.low %v2443_v13, %v2450_v60  ;;  %v2514_v39 = vrot.slane %v2500_v48, %v9761_v56  ;;  %v8876_v17 = vcombine.high %v2443_v13, %v2450_v60  ;;  %v4005_v57 = vcombine.low %v2458_v31, %v2465_v45 }
 0x287   : > { %v8877_v34 = vcombine.high %v2458_v31, %v2465_v45  ;;  %8531 = vst [vmem:[%s9879_s25 + $0xc8] sm:$0xf] %v9078_v62  ;;  %8532 = vst [vmem:[%s9879_s25 + $0xcc] sm:$0xf] %v9079_v12  ;;  %v4038_v11 = vcombine.low %v2492_v22, %v2499_v5  ;;  %v8878_v37 = vcombine.high %v2492_v22, %v2499_v5 }
 0x288   : > { %v3996_v16 = vrot.slane %v3989_v32, %v9759_v53  ;;  %v6052_v47 = vcombine.high %v6044_v25, %v9545_v51  ;;  %v4004_v1 = vrot.slane %v8876_v17, %v9759_v53  ;;  %v4012_v63 = vrot.slane %v4005_v57, %v9759_v53 }
 0x289   : > { %v4020_v42 = vrot.slane %v8877_v34, %v9759_v53  ;;  %v4054_v50 = vcombine.low %v2507_v26, %v2514_v39  ;;  %v4045_v29 = vrot.slane %v4038_v11, %v9759_v53  ;;  %v4053_v19 = vrot.slane %v8878_v37, %v9759_v53  ;;  %v1232_v37 = vpop.f32.mrf.mxu1 }
 0x28a   : > { %v8879_v8 = vcombine.high %v2507_v26, %v2514_v39  ;;  %v10659_v6 = vpack.c.bf16 %v1230_v2, %v1226_v33  ;;  %v4021_v58 = vcombine.low %v3996_v16, %v4004_v1  ;;  %v6066_v54 = vrot.slane %v6052_v47, %v9761_v56 }
 0x28b   : > { %v4029_v59 = vcombine.low %v4012_v63, %v4020_v42  ;;  %v4061_v14 = vrot.slane %v4054_v50, %v9759_v53  ;;  %v4070_v36 = vcombine.low %v4045_v29, %v4053_v19  ;;  %v6059_v28 = vrot.slane %v6044_v25, %v9761_v56 }
 0x28c   : > { %v4069_v4 = vrot.slane %v8879_v8, %v9759_v53  ;;  %v6067_v10 = vcombine.high %v6051_v38, %v9545_v51  ;;  %v4028_v7 = vrot.slane %v4021_v58, %v9761_v56  ;;  %v6086_v33 = vcombine.high %v10625_v24, %v9757_v52 }
 0x28d   : > { %v4036_v0 = vrot.slane %v4029_v59, %v9761_v56  ;;  %v6093_v18 = vrot.slane %v10625_v24, %v9759_v53  ;;  %v6074_v46 = vrot.slane %v6051_v38, %v9761_v56  ;;  %v7605_v13 = vcombine.low %v6059_v28, %v6066_v54  ;;  %v819_v24 = vpop.f32.mrf.mxu0 }
 0x28e   : > { %v4078_v61 = vcombine.low %v4061_v14, %v4069_v4  ;;  %v6081_v41 = vrot.slane %v6067_v10, %v9761_v56  ;;  %v4077_v21 = vrot.slane %v4070_v36, %v9761_v56  ;;  %v6100_v15 = vrot.slane %v6086_v33, %v9759_v53 }
 0x28f   : > { %v4037_v25 = vcombine.low %v4028_v7, %v4036_v0  ;;  %v6101_v27 = vcombine.high %v6093_v18, %v9545_v51  ;;  %v7612_v60 = vrot.slane %v7605_v13, %v9759_v53  ;;  %v9004_v49 = vcombine.high %v6059_v28, %v6066_v54  ;;  %v10687_v57 = vpop.f32.mrf.mxu0 }
 0x290   : > { %v4085_v9 = vrot.slane %v4078_v61, %v9761_v56  ;;  %v7621_v31 = vcombine.low %v6074_v46, %v6081_v41  ;;  %v6108_v38 = vrot.slane %v6093_v18, %v9761_v56  ;;  %v6116_v44 = vcombine.high %v6100_v15, %v9545_v51 }
 0x291   : > { %v4640_v23 = vshrl.u32 %v4037_v25, 16  ;;  %v6115_v35 = vrot.slane %v6101_v27, %v9761_v56  ;;  %v6123_v55 = vrot.slane %v6100_v15, %v9761_v56  ;;  %v7620_v45 = vrot.slane %v9004_v49, %v9759_v53  ;;  %v823_v4 = vpop.f32.mrf.mxu0  ;;  %v1236_v15 = vpop.f32.mrf.mxu1 }
 0x292   : > { %v4086_v3 = vcombine.low %v4077_v21, %v4085_v9  ;;  %v9005_v22 = vcombine.high %v6074_v46, %v6081_v41  ;;  %v6130_v48 = vrot.slane %v6116_v44, %v9761_v56  ;;  %v7628_v26 = vrot.slane %v7621_v31, %v9759_v53 }
 0x293   : > { %v7654_v62 = vcombine.low %v6108_v38, %v6115_v35  ;;  %v9006_v12 = vcombine.high %v6108_v38, %v6115_v35  ;;  %v7637_v17 = vcombine.low %v7612_v60, %v7620_v45  ;;  %v1405_v42 = vshrl.u32 %v10621_v30, 16 }
 0x294   : > { %v4639_v5 = vpack.i.b16 %v4086_v3, %v4037_v25  ;;  %v4641_v32 = vshrl.u32 %v4086_v3, 16  ;;  %v7636_v39 = vrot.slane %v9005_v22, %v9759_v53  ;;  %v7670_v16 = vcombine.low %v6123_v55, %v6130_v48 }
 0x295   : > { %v7661_v34 = vrot.slane %v7654_v62, %v9759_v53  ;;  %v7669_v2 = vrot.slane %v9006_v12, %v9759_v53  ;;  %v9007_v11 = vcombine.high %v6123_v55, %v6130_v48  ;;  %v881_v14 = vpack.c.bf16 %v815_v20, %v10601_v43  ;;  %v10725_v48 = vpop.f32.mrf.mxu1 }
 0x296   : > { %v4642_v47 = vpack.i.b16 %v4641_v32, %v4640_v23  ;;  %v8920_v1 = vcombine.low %v4639_v5, %v4639_v5  ;;  %v8921_v63 = vcombine.high %v4639_v5, %v4639_v5  ;;  %v7645_v50 = vcombine.low %v7628_v26, %v7636_v39 }
 0x297   : > { %v7677_v29 = vrot.slane %v7670_v16, %v9759_v53  ;;  %v7685_v19 = vrot.slane %v9007_v11, %v9759_v53  ;;  %v7686_v8 = vcombine.low %v7661_v34, %v7669_v2  ;;  %v1298_v54 = vpack.c.bf16 %v1232_v37, %v10639_v40 }
 0x298   : > { %v8952_v58 = vcombine.low %v4642_v47, %v4642_v47  ;;  %v8953_v59 = vcombine.high %v4642_v47, %v4642_v47  ;;  %4885 = vst [vmem:[%s9846_s23 + $0x50] sm:$0xf] %v8920_v1  ;;  %4886 = vst [vmem:[%s9846_s23 + $0x54] sm:$0xf] %v8921_v63  ;;  %v7644_v36 = vrot.slane %v7637_v17, %v9761_v56  ;;  %v5021_v7 = vshrl.u32 %v10659_v6, 16 }
 0x299   : > { %v7652_v28 = vrot.slane %v7645_v50, %v9761_v56  ;;  %v7694_v10 = vcombine.low %v7677_v29, %v7685_v19  ;;  %v1403_v0 = vpack.i.b16 %v881_v14, %v10621_v30  ;;  %v1406_v33 = vshrl.u32 %v881_v14, 16  ;;  %v1240_v50 = vpop.f32.mrf.mxu1 }
 0x29a   : > { %4917 = vst [vmem:[%s9846_s23 + $0xd0] sm:$0xf] %v8952_v58  ;;  %4918 = vst [vmem:[%s9846_s23 + $0xd4] sm:$0xf] %v8953_v59  ;;  %v5019_v18 = vpack.i.b16 %v1298_v54, %v10659_v6  ;;  %v5022_v61 = vshrl.u32 %v1298_v54, 16  ;;  %v7693_v43 = vrot.slane %v7686_v8, %v9761_v56  ;;  %v10707_v20 = vpack.c.bf16 %v823_v4, %v819_v24 }
 0x29b   : > { %v7653_v46 = vcombine.low %v7644_v36, %v7652_v28  ;;  %v7701_v40 = vrot.slane %v7694_v10, %v9761_v56  ;;  %v1407_v41 = vpack.i.b16 %v1406_v33, %v1405_v42  ;;  %v2519_v13 = vcombine.high %v1403_v0, %v9757_v52 }
 0x29c   : > { %v2526_v25 = vrot.slane %v1403_v0, %v9759_v53  ;;  %v10711_v21 = vpack.i.b16 %v5022_v61, %v5021_v7  ;;  %v6135_v6 = vcombine.high %v5019_v18, %v9757_v52  ;;  %v6142_v9 = vrot.slane %v5019_v18, %v9759_v53 }
 0x29d   : > { %v7702_v30 = vcombine.low %v7693_v43, %v7701_v40  ;;  %v8256_v27 = vshrl.u32 %v7653_v46, 16  ;;  %v2533_v60 = vrot.slane %v2519_v13, %v9759_v53  ;;  %v2568_v24 = vcombine.high %v1407_v41, %v9757_v52  ;;  %v825_v13 = vpop.f32.mrf.mxu0 }
 0x29e   : > { %v2534_v49 = vcombine.high %v2526_v25, %v9545_v51  ;;  %v2541_v31 = vrot.slane %v2526_v25, %v9761_v56  ;;  %v2575_v35 = vrot.slane %v1407_v41, %v9759_v53  ;;  %v6149_v44 = vrot.slane %v6135_v6, %v9759_v53 }
 0x29f   : > { %v8255_v23 = vpack.i.b16 %v7702_v30, %v7653_v46  ;;  %v8257_v38 = vshrl.u32 %v7702_v30, 16  ;;  %v2549_v55 = vcombine.high %v2533_v60, %v9545_v51  ;;  %v2556_v45 = vrot.slane %v2533_v60, %v9761_v56 }
 0x2a0   : > { %v2548_v3 = vrot.slane %v2534_v49, %v9761_v56  ;;  %v2582_v22 = vrot.slane %v2568_v24, %v9759_v53  ;;  %v2583_v5 = vcombine.high %v2575_v35, %v9545_v51  ;;  %v2590_v39 = vrot.slane %v2575_v35, %v9761_v56 }
 0x2a1   : > { %v8258_v26 = vpack.i.b16 %v8257_v38, %v8256_v27  ;;  %v9048_v62 = vcombine.low %v8255_v23, %v8255_v23  ;;  %v9049_v12 = vcombine.high %v8255_v23, %v8255_v23  ;;  %v2563_v32 = vrot.slane %v2549_v55, %v9761_v56 }
 0x2a2   : > { %v2598_v17 = vcombine.high %v2582_v22, %v9545_v51  ;;  %v2605_v34 = vrot.slane %v2582_v22, %v9761_v56  ;;  %v2597_v11 = vrot.slane %v2583_v5, %v9761_v56  ;;  %v4087_v37 = vcombine.low %v2541_v31, %v2548_v3 }
 0x2a3   : > { %v9080_v2 = vcombine.low %v8258_v26, %v8258_v26  ;;  %v9081_v16 = vcombine.high %v8258_v26, %v8258_v26  ;;  %8501 = vst [vmem:[%s9879_s25 + $0x50] sm:$0xf] %v9048_v62  ;;  %8502 = vst [vmem:[%s9879_s25 + $0x54] sm:$0xf] %v9049_v12  ;;  %v8880_v1 = vcombine.high %v2541_v31, %v2548_v3 }
 0x2a4   : > { %v2612_v47 = vrot.slane %v2598_v17, %v9761_v56  ;;  %v4103_v63 = vcombine.low %v2556_v45, %v2563_v32  ;;  %v8881_v42 = vcombine.high %v2556_v45, %v2563_v32  ;;  %v4094_v29 = vrot.slane %v4087_v37, %v9759_v53 }
 0x2a5   : > { %8533 = vst [vmem:[%s9879_s25 + $0xd0] sm:$0xf] %v9080_v2  ;;  %8534 = vst [vmem:[%s9879_s25 + $0xd4] sm:$0xf] %v9081_v16  ;;  %v4136_v19 = vcombine.low %v2590_v39, %v2597_v11  ;;  %v8882_v8 = vcombine.high %v2590_v39, %v2597_v11  ;;  %v6150_v58 = vcombine.high %v6142_v9, %v9545_v51 }
 0x2a6   : > { %v4102_v59 = vrot.slane %v8880_v1, %v9759_v53  ;;  %v4110_v14 = vrot.slane %v4103_v63, %v9759_v53  ;;  %v4118_v54 = vrot.slane %v8881_v42, %v9759_v53  ;;  %v4152_v4 = vcombine.low %v2605_v34, %v2612_v47 }
 0x2a7   : > { %v4143_v36 = vrot.slane %v4136_v19, %v9759_v53  ;;  %v4151_v28 = vrot.slane %v8882_v8, %v9759_v53  ;;  %v8883_v10 = vcombine.high %v2605_v34, %v2612_v47  ;;  %v10745_v7 = vpack.c.bf16 %v1240_v50, %v1236_v15  ;;  %v1242_v8 = vpop.f32.mrf.mxu1 }
 0x2a8   : > { %v4119_v0 = vcombine.low %v4094_v29, %v4102_v59  ;;  %v4127_v33 = vcombine.low %v4110_v14, %v4118_v54  ;;  %v4159_v18 = vrot.slane %v4152_v4, %v9759_v53  ;;  %v6164_v61 = vrot.slane %v6150_v58, %v9761_v56 }
 0x2a9   : > { %v4167_v46 = vrot.slane %v8883_v10, %v9759_v53  ;;  %v4168_v43 = vcombine.low %v4143_v36, %v4151_v28  ;;  %v6157_v40 = vrot.slane %v6142_v9, %v9761_v56  ;;  %v6165_v41 = vcombine.high %v6149_v44, %v9545_v51 }
 0x2aa   : > { %v4126_v25 = vrot.slane %v4119_v0, %v9761_v56  ;;  %v4134_v30 = vrot.slane %v4127_v33, %v9761_v56  ;;  %v6184_v15 = vcombine.high %v10711_v21, %v9757_v52  ;;  %v6191_v27 = vrot.slane %v10711_v21, %v9759_v53  ;;  %v829_v21 = vpop.f32.mrf.mxu0 }
 0x2ab   : > { %v4176_v6 = vcombine.low %v4159_v18, %v4167_v46  ;;  %v6172_v60 = vrot.slane %v6149_v44, %v9761_v56  ;;  %v6179_v49 = vrot.slane %v6165_v41, %v9761_v56  ;;  %v7703_v31 = vcombine.low %v6157_v40, %v6164_v61 }
 0x2ac   : > { %v4135_v9 = vcombine.low %v4126_v25, %v4134_v30  ;;  %v4175_v24 = vrot.slane %v4168_v43, %v9761_v56  ;;  %v6198_v23 = vrot.slane %v6184_v15, %v9759_v53  ;;  %v6199_v38 = vcombine.high %v6191_v27, %v9545_v51  ;;  %v10773_v63 = vpop.f32.mrf.mxu0 }
 0x2ad   : > { %v4183_v35 = vrot.slane %v4176_v6, %v9761_v56  ;;  %v7710_v3 = vrot.slane %v7703_v31, %v9759_v53  ;;  %v9008_v55 = vcombine.high %v6157_v40, %v6164_v61  ;;  %v7719_v45 = vcombine.low %v6172_v60, %v6179_v49 }
 0x2ae   : > { %v4646_v22 = vshrl.u32 %v4135_v9, 16  ;;  %v6206_v44 = vrot.slane %v6191_v27, %v9761_v56  ;;  %v6213_v26 = vrot.slane %v6199_v38, %v9761_v56  ;;  %v6214_v62 = vcombine.high %v6198_v23, %v9545_v51  ;;  %v833_v46 = vpop.f32.mrf.mxu0 }
 0x2af   : > { %v4184_v12 = vcombine.low %v4175_v24, %v4183_v35  ;;  %v6221_v5 = vrot.slane %v6198_v23, %v9761_v56  ;;  %v7718_v32 = vrot.slane %v9008_v55, %v9759_v53  ;;  %v9009_v39 = vcombine.high %v6172_v60, %v6179_v49  ;;  %v1246_v23 = vpop.f32.mrf.mxu1 }
 0x2b0   : > { %v6228_v17 = vrot.slane %v6214_v62, %v9761_v56  ;;  %v7726_v34 = vrot.slane %v7719_v45, %v9759_v53  ;;  %v7752_v2 = vcombine.low %v6206_v44, %v6213_v26  ;;  %v9010_v16 = vcombine.high %v6206_v44, %v6213_v26 }
 0x2b1   : > { %v4645_v11 = vpack.i.b16 %v4184_v12, %v4135_v9  ;;  %v4647_v37 = vshrl.u32 %v4184_v12, 16  ;;  %v7734_v47 = vrot.slane %v9009_v39, %v9759_v53  ;;  %v7735_v1 = vcombine.low %v7710_v3, %v7718_v32 }
 0x2b2   : > { %v7759_v42 = vrot.slane %v7752_v2, %v9759_v53  ;;  %v7767_v50 = vrot.slane %v9010_v16, %v9759_v53  ;;  %v7768_v29 = vcombine.low %v6221_v5, %v6228_v17  ;;  %v9011_v19 = vcombine.high %v6221_v5, %v6228_v17  ;;  %v10811_v17 = vpop.f32.mrf.mxu1 }
 0x2b3   : > { %v4648_v58 = vpack.i.b16 %v4647_v37, %v4646_v22  ;;  %v8922_v59 = vcombine.low %v4645_v11, %v4645_v11  ;;  %v8923_v14 = vcombine.high %v4645_v11, %v4645_v11  ;;  %v1413_v54 = vshrl.u32 %v10707_v20, 16 }
 0x2b4   : > { %v7743_v4 = vcombine.low %v7726_v34, %v7734_v47  ;;  %v7775_v36 = vrot.slane %v7768_v29, %v9759_v53  ;;  %v7783_v28 = vrot.slane %v9011_v19, %v9759_v53  ;;  %v7784_v10 = vcombine.low %v7759_v42, %v7767_v50 }
 0x2b5   : > { %v8954_v0 = vcombine.low %v4648_v58, %v4648_v58  ;;  %v8955_v33 = vcombine.high %v4648_v58, %v4648_v58  ;;  %4887 = vst [vmem:[%s9846_s23 + $0x58] sm:$0xf] %v8922_v59  ;;  %4888 = vst [vmem:[%s9846_s23 + $0x5c] sm:$0xf] %v8923_v14  ;;  %v883_v18 = vpack.c.bf16 %v825_v13, %v10687_v57  ;;  %v5029_v25 = vshrl.u32 %v10745_v7, 16 }
 0x2b6   : > { %v1300_v61 = vpack.c.bf16 %v1242_v8, %v10725_v48  ;;  %v7742_v43 = vrot.slane %v7735_v1, %v9761_v56  ;;  %v7750_v40 = vrot.slane %v7743_v4, %v9761_v56  ;;  %v7792_v41 = vcombine.low %v7775_v36, %v7783_v28  ;;  %v1250_v4 = vpop.f32.mrf.mxu1 }
 0x2b7   : > { %4919 = vst [vmem:[%s9846_s23 + $0xd8] sm:$0xf] %v8954_v0  ;;  %4920 = vst [vmem:[%s9846_s23 + $0xdc] sm:$0xf] %v8955_v33  ;;  %v1411_v30 = vpack.i.b16 %v883_v18, %v10707_v20  ;;  %v1414_v15 = vshrl.u32 %v883_v18, 16  ;;  %v7791_v57 = vrot.slane %v7784_v10, %v9761_v56  ;;  %v10793_v13 = vpack.c.bf16 %v833_v46, %v829_v21 }
 0x2b8   : > { %v5027_v27 = vpack.i.b16 %v1300_v61, %v10745_v7  ;;  %v5030_v6 = vshrl.u32 %v1300_v61, 16  ;;  %v7751_v60 = vcombine.low %v7742_v43, %v7750_v40  ;;  %v7799_v48 = vrot.slane %v7792_v41, %v9761_v56 }
 0x2b9   : > { %v1415_v49 = vpack.i.b16 %v1414_v15, %v1413_v54  ;;  %v2617_v31 = vcombine.high %v1411_v30, %v9757_v52  ;;  %v2624_v9 = vrot.slane %v1411_v30, %v9759_v53 }
 0x2ba   : > { %v10797_v24 = vpack.i.b16 %v5030_v6, %v5029_v25  ;;  %v7800_v20 = vcombine.low %v7791_v57, %v7799_v48  ;;  %v8262_v38 = vshrl.u32 %v7751_v60, 16  ;;  %v6233_v7 = vcombine.high %v5027_v27, %v9757_v52 }
 0x2bb   : > { %v6240_v35 = vrot.slane %v5027_v27, %v9759_v53  ;;  %v2631_v3 = vrot.slane %v2617_v31, %v9759_v53  ;;  %v2632_v55 = vcombine.high %v2624_v9, %v9545_v51  ;;  %v2639_v45 = vrot.slane %v2624_v9, %v9761_v56  ;;  %v835_v31 = vpop.f32.mrf.mxu0 }
 0x2bc   : > { %v2666_v21 = vcombine.high %v1415_v49, %v9757_v52  ;;  %v8261_v22 = vpack.i.b16 %v7800_v20, %v7751_v60  ;;  %v8263_v44 = vshrl.u32 %v7800_v20, 16  ;;  %v2673_v26 = vrot.slane %v1415_v49, %v9759_v53 }
 0x2bd   : > { %v6247_v62 = vrot.slane %v6233_v7, %v9759_v53  ;;  %v2646_v12 = vrot.slane %v2632_v55, %v9761_v56  ;;  %v2647_v5 = vcombine.high %v2631_v3, %v9545_v51  ;;  %v2654_v32 = vrot.slane %v2631_v3, %v9761_v56 }
 0x2be   : > { %v2680_v39 = vrot.slane %v2666_v21, %v9759_v53  ;;  %v8264_v34 = vpack.i.b16 %v8263_v44, %v8262_v38  ;;  %v9050_v2 = vcombine.low %v8261_v22, %v8261_v22  ;;  %v9051_v16 = vcombine.high %v8261_v22, %v8261_v22 }
 0x2bf   : > { %v2681_v11 = vcombine.high %v2673_v26, %v9545_v51  ;;  %v2661_v37 = vrot.slane %v2647_v5, %v9761_v56  ;;  %v2688_v47 = vrot.slane %v2673_v26, %v9761_v56  ;;  %v4185_v8 = vcombine.low %v2639_v45, %v2646_v12 }
 0x2c0   : > { %v2696_v1 = vcombine.high %v2680_v39, %v9545_v51  ;;  %v2703_v42 = vrot.slane %v2680_v39, %v9761_v56  ;;  %v9082_v50 = vcombine.low %v8264_v34, %v8264_v34  ;;  %v9083_v29 = vcombine.high %v8264_v34, %v8264_v34  ;;  %8503 = vst [vmem:[%s9879_s25 + $0x58] sm:$0xf] %v9050_v2 }
 0x2c1   : > { %8504 = vst [vmem:[%s9879_s25 + $0x5c] sm:$0xf] %v9051_v16  ;;  %v2695_v19 = vrot.slane %v2681_v11, %v9761_v56  ;;  %v8884_v59 = vcombine.high %v2639_v45, %v2646_v12  ;;  %v4201_v14 = vcombine.low %v2654_v32, %v2661_v37  ;;  %v8885_v54 = vcombine.high %v2654_v32, %v2661_v37 }
 0x2c2   : > { %v2710_v58 = vrot.slane %v2696_v1, %v9761_v56  ;;  %8535 = vst [vmem:[%s9879_s25 + $0xd8] sm:$0xf] %v9082_v50  ;;  %8536 = vst [vmem:[%s9879_s25 + $0xdc] sm:$0xf] %v9083_v29  ;;  %v4192_v36 = vrot.slane %v4185_v8, %v9759_v53  ;;  %v6248_v0 = vcombine.high %v6240_v35, %v9545_v51 }
 0x2c3   : > { %v4234_v28 = vcombine.low %v2688_v47, %v2695_v19  ;;  %v8886_v10 = vcombine.high %v2688_v47, %v2695_v19  ;;  %v4200_v33 = vrot.slane %v8884_v59, %v9759_v53  ;;  %v4208_v18 = vrot.slane %v4201_v14, %v9759_v53 }
 0x2c4   : > { %v4216_v61 = vrot.slane %v8885_v54, %v9759_v53  ;;  %v4250_v46 = vcombine.low %v2703_v42, %v2710_v58  ;;  %v8887_v41 = vcombine.high %v2703_v42, %v2710_v58  ;;  %v10831_v25 = vpack.c.bf16 %v1250_v4, %v1246_v23 }
 0x2c5   : > { %v4241_v43 = vrot.slane %v4234_v28, %v9759_v53  ;;  %v4249_v40 = vrot.slane %v8886_v10, %v9759_v53  ;;  %v4217_v30 = vcombine.low %v4192_v36, %v4200_v33  ;;  %v6262_v6 = vrot.slane %v6248_v0, %v9761_v56  ;;  %v1252_v10 = vpop.f32.mrf.mxu1 }
 0x2c6   : > { %v4225_v15 = vcombine.low %v4208_v18, %v4216_v61  ;;  %v4257_v27 = vrot.slane %v4250_v46, %v9759_v53  ;;  %v4265_v60 = vrot.slane %v8887_v41, %v9759_v53  ;;  %v6255_v48 = vrot.slane %v6240_v35, %v9761_v56 }
 0x2c7   : > { %v4266_v57 = vcombine.low %v4241_v43, %v4249_v40  ;;  %v6263_v49 = vcombine.high %v6247_v62, %v9545_v51  ;;  %v4224_v9 = vrot.slane %v4217_v30, %v9761_v56  ;;  %v6282_v23 = vcombine.high %v10797_v24, %v9757_v52 }
 0x2c8   : > { %v4232_v20 = vrot.slane %v4225_v15, %v9761_v56  ;;  %v6289_v38 = vrot.slane %v10797_v24, %v9759_v53  ;;  %v4274_v7 = vcombine.low %v4257_v27, %v4265_v60  ;;  %v6270_v3 = vrot.slane %v6247_v62, %v9761_v56  ;;  %v839_v24 = vpop.f32.mrf.mxu0 }
 0x2c9   : > { %v6277_v55 = vrot.slane %v6263_v49, %v9761_v56  ;;  %v7801_v45 = vcombine.low %v6255_v48, %v6262_v6  ;;  %v4273_v21 = vrot.slane %v4266_v57, %v9761_v56  ;;  %v6296_v22 = vrot.slane %v6282_v23, %v9759_v53 }
 0x2ca   : > { %v4233_v35 = vcombine.low %v4224_v9, %v4232_v20  ;;  %v6297_v44 = vcombine.high %v6289_v38, %v9545_v51  ;;  %v4281_v26 = vrot.slane %v4274_v7, %v9761_v56  ;;  %v9012_v5 = vcombine.high %v6255_v48, %v6262_v6  ;;  %v10859_v14 = vpop.f32.mrf.mxu0 }
 0x2cb   : > { %v7808_v12 = vrot.slane %v7801_v45, %v9759_v53  ;;  %v7817_v32 = vcombine.low %v6270_v3, %v6277_v55  ;;  %v6304_v62 = vrot.slane %v6289_v38, %v9761_v56  ;;  %v6312_v2 = vcombine.high %v6296_v22, %v9545_v51 }
 0x2cc   : > { %v4652_v39 = vshrl.u32 %v4233_v35, 16  ;;  %v6311_v34 = vrot.slane %v6297_v44, %v9761_v56  ;;  %v4282_v16 = vcombine.low %v4273_v21, %v4281_v26  ;;  %v6319_v11 = vrot.slane %v6296_v22, %v9761_v56  ;;  %v843_v60 = vpop.f32.mrf.mxu0  ;;  %v1256_v22 = vpop.f32.mrf.mxu1 }
 0x2cd   : > { %v7816_v37 = vrot.slane %v9012_v5, %v9759_v53  ;;  %v9013_v47 = vcombine.high %v6270_v3, %v6277_v55  ;;  %v6326_v1 = vrot.slane %v6312_v2, %v9761_v56  ;;  %v7824_v42 = vrot.slane %v7817_v32, %v9759_v53 }
 0x2ce   : > { %v7850_v50 = vcombine.low %v6304_v62, %v6311_v34  ;;  %v9014_v29 = vcombine.high %v6304_v62, %v6311_v34  ;;  %v4651_v19 = vpack.i.b16 %v4282_v16, %v4233_v35  ;;  %v4653_v8 = vshrl.u32 %v4282_v16, 16 }
 0x2cf   : > { %v7832_v58 = vrot.slane %v9013_v47, %v9759_v53  ;;  %v7833_v59 = vcombine.low %v7808_v12, %v7816_v37  ;;  %v7866_v36 = vcombine.low %v6319_v11, %v6326_v1  ;;  %v9015_v28 = vcombine.high %v6319_v11, %v6326_v1  ;;  %v10897_v1 = vpop.f32.mrf.mxu1 }
 0x2d0   : > { %v7857_v54 = vrot.slane %v7850_v50, %v9759_v53  ;;  %v7865_v4 = vrot.slane %v9014_v29, %v9759_v53  ;;  %v4654_v0 = vpack.i.b16 %v4653_v8, %v4652_v39  ;;  %v8924_v33 = vcombine.low %v4651_v19, %v4651_v19 }
 0x2d1   : > { %v8925_v18 = vcombine.high %v4651_v19, %v4651_v19  ;;  %v1421_v61 = vshrl.u32 %v10793_v13, 16  ;;  %v7841_v46 = vcombine.low %v7824_v42, %v7832_v58  ;;  %v7873_v43 = vrot.slane %v7866_v36, %v9759_v53 }
 0x2d2   : > { %v7881_v40 = vrot.slane %v9015_v28, %v9759_v53  ;;  %v7882_v41 = vcombine.low %v7857_v54, %v7865_v4  ;;  %v8956_v30 = vcombine.low %v4654_v0, %v4654_v0  ;;  %v8957_v15 = vcombine.high %v4654_v0, %v4654_v0  ;;  %4889 = vst [vmem:[%s9846_s23 + $0x60] sm:$0xf] %v8924_v33 }
 0x2d3   : > { %4890 = vst [vmem:[%s9846_s23 + $0x64] sm:$0xf] %v8925_v18  ;;  %v885_v27 = vpack.c.bf16 %v835_v31, %v10773_v63  ;;  %v1302_v6 = vpack.c.bf16 %v1252_v10, %v10811_v17  ;;  %v7840_v57 = vrot.slane %v7833_v59, %v9761_v56  ;;  %v7848_v48 = vrot.slane %v7841_v46, %v9761_v56  ;;  %v1260_v46 = vpop.f32.mrf.mxu1 }
 0x2d4   : > { %v7890_v49 = vcombine.low %v7873_v43, %v7881_v40  ;;  %v5037_v9 = vshrl.u32 %v10831_v25, 16  ;;  %4921 = vst [vmem:[%s9846_s23 + $0xe0] sm:$0xf] %v8956_v30  ;;  %4922 = vst [vmem:[%s9846_s23 + $0xe4] sm:$0xf] %v8957_v15  ;;  %v7889_v63 = vrot.slane %v7882_v41, %v9761_v56  ;;  %v10879_v31 = vpack.c.bf16 %v843_v60, %v839_v24 }
 0x2d5   : > { %v1419_v20 = vpack.i.b16 %v885_v27, %v10793_v13  ;;  %v1422_v23 = vshrl.u32 %v885_v27, 16  ;;  %v5035_v38 = vpack.i.b16 %v1302_v6, %v10831_v25  ;;  %v5038_v7 = vshrl.u32 %v1302_v6, 16 }
 0x2d6   : > { %v7849_v3 = vcombine.low %v7840_v57, %v7848_v48  ;;  %v7897_v17 = vrot.slane %v7890_v49, %v9761_v56 }
 0x2d7   : > { %v1423_v55 = vpack.i.b16 %v1422_v23, %v1421_v61  ;;  %v2715_v45 = vcombine.high %v1419_v20, %v9757_v52  ;;  %v2722_v35 = vrot.slane %v1419_v20, %v9759_v53  ;;  %v10883_v21 = vpack.i.b16 %v5038_v7, %v5037_v9 }
 0x2d8   : > { %v7898_v13 = vcombine.low %v7889_v63, %v7897_v17  ;;  %v8268_v44 = vshrl.u32 %v7849_v3, 16  ;;  %v6331_v25 = vcombine.high %v5035_v38, %v9757_v52  ;;  %v6338_v26 = vrot.slane %v5035_v38, %v9759_v53 }
 0x2d9   : > { %v2729_v12 = vrot.slane %v2715_v45, %v9759_v53  ;;  %v2730_v5 = vcombine.high %v2722_v35, %v9545_v51  ;;  %v2737_v32 = vrot.slane %v2722_v35, %v9761_v56  ;;  %v2764_v24 = vcombine.high %v1423_v55, %v9757_v52  ;;  %v845_v45 = vpop.f32.mrf.mxu0 }
 0x2da   : > { %v8267_v39 = vpack.i.b16 %v7898_v13, %v7849_v3  ;;  %v8269_v62 = vshrl.u32 %v7898_v13, 16  ;;  %v2771_v34 = vrot.slane %v1423_v55, %v9759_v53  ;;  %v6345_v2 = vrot.slane %v6331_v25, %v9759_v53 }
 0x2db   : > { %v2744_v16 = vrot.slane %v2730_v5, %v9761_v56  ;;  %v2745_v11 = vcombine.high %v2729_v12, %v9545_v51  ;;  %v2752_v37 = vrot.slane %v2729_v12, %v9761_v56  ;;  %v2778_v47 = vrot.slane %v2764_v24, %v9759_v53 }
 0x2dc   : > { %v8270_v42 = vpack.i.b16 %v8269_v62, %v8268_v44  ;;  %v9052_v50 = vcombine.low %v8267_v39, %v8267_v39  ;;  %v9053_v29 = vcombine.high %v8267_v39, %v8267_v39  ;;  %v2779_v19 = vcombine.high %v2771_v34, %v9545_v51 }
 0x2dd   : > { %v2759_v8 = vrot.slane %v2745_v11, %v9761_v56  ;;  %v2786_v58 = vrot.slane %v2771_v34, %v9761_v56  ;;  %v2794_v59 = vcombine.high %v2778_v47, %v9545_v51  ;;  %v2801_v54 = vrot.slane %v2778_v47, %v9761_v56 }
 0x2de   : > { %v9084_v4 = vcombine.low %v8270_v42, %v8270_v42  ;;  %v9085_v36 = vcombine.high %v8270_v42, %v8270_v42  ;;  %8505 = vst [vmem:[%s9879_s25 + $0x60] sm:$0xf] %v9052_v50  ;;  %8506 = vst [vmem:[%s9879_s25 + $0x64] sm:$0xf] %v9053_v29  ;;  %v2793_v28 = vrot.slane %v2779_v19, %v9761_v56 }
 0x2df   : > { %v4283_v10 = vcombine.low %v2737_v32, %v2744_v16  ;;  %v2808_v0 = vrot.slane %v2794_v59, %v9761_v56  ;;  %v8888_v33 = vcombine.high %v2737_v32, %v2744_v16  ;;  %v4299_v18 = vcombine.low %v2752_v37, %v2759_v8 }
 0x2e0   : > { %v8889_v61 = vcombine.high %v2752_v37, %v2759_v8  ;;  %8537 = vst [vmem:[%s9879_s25 + $0xe0] sm:$0xf] %v9084_v4  ;;  %8538 = vst [vmem:[%s9879_s25 + $0xe4] sm:$0xf] %v9085_v36  ;;  %v4332_v40 = vcombine.low %v2786_v58, %v2793_v28  ;;  %v8890_v41 = vcombine.high %v2786_v58, %v2793_v28 }
 0x2e1   : > { %v4290_v43 = vrot.slane %v4283_v10, %v9759_v53  ;;  %v6346_v30 = vcombine.high %v6338_v26, %v9545_v51  ;;  %v4298_v15 = vrot.slane %v8888_v33, %v9759_v53  ;;  %v4306_v27 = vrot.slane %v4299_v18, %v9759_v53 }
 0x2e2   : > { %v4314_v6 = vrot.slane %v8889_v61, %v9759_v53  ;;  %v4348_v60 = vcombine.low %v2801_v54, %v2808_v0  ;;  %v4339_v57 = vrot.slane %v4332_v40, %v9759_v53  ;;  %v4347_v48 = vrot.slane %v8890_v41, %v9759_v53  ;;  %v1262_v41 = vpop.f32.mrf.mxu1 }
 0x2e3   : > { %v8891_v49 = vcombine.high %v2801_v54, %v2808_v0  ;;  %v10917_v9 = vpack.c.bf16 %v1260_v46, %v1256_v22  ;;  %v4315_v20 = vcombine.low %v4290_v43, %v4298_v15  ;;  %v6360_v7 = vrot.slane %v6346_v30, %v9761_v56 }
 0x2e4   : > { %v4323_v23 = vcombine.low %v4306_v27, %v4314_v6  ;;  %v4355_v38 = vrot.slane %v4348_v60, %v9759_v53  ;;  %v4364_v63 = vcombine.low %v4339_v57, %v4347_v48  ;;  %v6353_v17 = vrot.slane %v6338_v26, %v9761_v56 }
 0x2e5   : > { %v4363_v3 = vrot.slane %v8891_v49, %v9759_v53  ;;  %v6361_v55 = vcombine.high %v6345_v2, %v9545_v51  ;;  %v4322_v35 = vrot.slane %v4315_v20, %v9761_v56  ;;  %v6380_v22 = vcombine.high %v10883_v21, %v9757_v52 }
 0x2e6   : > { %v4330_v13 = vrot.slane %v4323_v23, %v9761_v56  ;;  %v6387_v44 = vrot.slane %v10883_v21, %v9759_v53  ;;  %v6368_v12 = vrot.slane %v6345_v2, %v9761_v56  ;;  %v7899_v32 = vcombine.low %v6353_v17, %v6360_v7  ;;  %v849_v21 = vpop.f32.mrf.mxu0 }
 0x2e7   : > { %v4372_v25 = vcombine.low %v4355_v38, %v4363_v3  ;;  %v6375_v5 = vrot.slane %v6361_v55, %v9761_v56  ;;  %v4371_v24 = vrot.slane %v4364_v63, %v9761_v56  ;;  %v6394_v39 = vrot.slane %v6380_v22, %v9759_v53 }
 0x2e8   : > { %v4331_v26 = vcombine.low %v4322_v35, %v4330_v13  ;;  %v6395_v62 = vcombine.high %v6387_v44, %v9545_v51  ;;  %v7906_v16 = vrot.slane %v7899_v32, %v9759_v53  ;;  %v9016_v11 = vcombine.high %v6353_v17, %v6360_v7  ;;  %v10945_v18 = vpop.f32.mrf.mxu0 }
 0x2e9   : > { %v4379_v34 = vrot.slane %v4372_v25, %v9761_v56  ;;  %v7915_v37 = vcombine.low %v6368_v12, %v6375_v5  ;;  %v6402_v2 = vrot.slane %v6387_v44, %v9761_v56  ;;  %v6410_v50 = vcombine.high %v6394_v39, %v9545_v51 }
 0x2ea   : > { %v4658_v47 = vshrl.u32 %v4331_v26, 16  ;;  %v6409_v42 = vrot.slane %v6395_v62, %v9761_v56  ;;  %v6417_v19 = vrot.slane %v6394_v39, %v9761_v56  ;;  %v7914_v8 = vrot.slane %v9016_v11, %v9759_v53  ;;  %v853_v3 = vpop.f32.mrf.mxu0  ;;  %v1266_v39 = vpop.f32.mrf.mxu1 }
 0x2eb   : > { %v4380_v29 = vcombine.low %v4371_v24, %v4379_v34  ;;  %v9017_v58 = vcombine.high %v6368_v12, %v6375_v5  ;;  %v6424_v59 = vrot.slane %v6410_v50, %v9761_v56  ;;  %v7922_v54 = vrot.slane %v7915_v37, %v9759_v53 }
 0x2ec   : > { %v7948_v4 = vcombine.low %v6402_v2, %v6409_v42  ;;  %v9018_v36 = vcombine.high %v6402_v2, %v6409_v42  ;;  %v7931_v33 = vcombine.low %v7906_v16, %v7914_v8  ;;  %v1429_v6 = vshrl.u32 %v10879_v31, 16 }
 0x2ed   : > { %v4657_v28 = vpack.i.b16 %v4380_v29, %v4331_v26  ;;  %v4659_v10 = vshrl.u32 %v4380_v29, 16  ;;  %v7930_v0 = vrot.slane %v9017_v58, %v9759_v53  ;;  %v7964_v43 = vcombine.low %v6417_v19, %v6424_v59 }
 0x2ee   : > { %v7955_v61 = vrot.slane %v7948_v4, %v9759_v53  ;;  %v7963_v46 = vrot.slane %v9018_v36, %v9759_v53  ;;  %v9019_v40 = vcombine.high %v6417_v19, %v6424_v59  ;;  %v887_v38 = vpack.c.bf16 %v845_v45, %v10859_v14  ;;  %v10983_v59 = vpop.f32.mrf.mxu1 }
 0x2ef   : > { %v4660_v30 = vpack.i.b16 %v4659_v10, %v4658_v47  ;;  %v8926_v15 = vcombine.low %v4657_v28, %v4657_v28  ;;  %v8927_v27 = vcombine.high %v4657_v28, %v4657_v28  ;;  %v7939_v60 = vcombine.low %v7922_v54, %v7930_v0 }
 0x2f0   : > { %v7971_v57 = vrot.slane %v7964_v43, %v9759_v53  ;;  %v7979_v48 = vrot.slane %v9019_v40, %v9759_v53  ;;  %v7980_v49 = vcombine.low %v7955_v61, %v7963_v46  ;;  %v1304_v7 = vpack.c.bf16 %v1262_v41, %v10897_v1 }
 0x2f1   : > { %v8958_v20 = vcombine.low %v4660_v30, %v4660_v30  ;;  %v8959_v23 = vcombine.high %v4660_v30, %v4660_v30  ;;  %4891 = vst [vmem:[%s9846_s23 + $0x68] sm:$0xf] %v8926_v15  ;;  %4892 = vst [vmem:[%s9846_s23 + $0x6c] sm:$0xf] %v8927_v27  ;;  %v7938_v63 = vrot.slane %v7931_v33, %v9761_v56  ;;  %v5045_v35 = vshrl.u32 %v10917_v9, 16 }
 0x2f2   : > { %v7946_v17 = vrot.slane %v7939_v60, %v9761_v56  ;;  %v7988_v55 = vcombine.low %v7971_v57, %v7979_v48  ;;  %v1427_v13 = vpack.i.b16 %v887_v38, %v10879_v31  ;;  %v1430_v22 = vshrl.u32 %v887_v38, 16  ;;  %v1270_v60 = vpop.f32.mrf.mxu1 }
 0x2f3   : > { %4923 = vst [vmem:[%s9846_s23 + $0xe8] sm:$0xf] %v8958_v20  ;;  %4924 = vst [vmem:[%s9846_s23 + $0xec] sm:$0xf] %v8959_v23  ;;  %v5043_v44 = vpack.i.b16 %v1304_v7, %v10917_v9  ;;  %v5046_v25 = vshrl.u32 %v1304_v7, 16  ;;  %v7987_v14 = vrot.slane %v7980_v49, %v9761_v56  ;;  %v10965_v45 = vpack.c.bf16 %v853_v3, %v849_v21 }
 0x2f4   : > { %v7947_v12 = vcombine.low %v7938_v63, %v7946_v17  ;;  %v7995_v1 = vrot.slane %v7988_v55, %v9761_v56  ;;  %v1431_v5 = vpack.i.b16 %v1430_v22, %v1429_v6  ;;  %v2813_v32 = vcombine.high %v1427_v13, %v9757_v52 }
 0x2f5   : > { %v2820_v26 = vrot.slane %v1427_v13, %v9759_v53  ;;  %v10969_v24 = vpack.i.b16 %v5046_v25, %v5045_v35  ;;  %v6429_v9 = vcombine.high %v5043_v44, %v9757_v52  ;;  %v6436_v34 = vrot.slane %v5043_v44, %v9759_v53 }
 0x2f6   : > { %v7996_v31 = vcombine.low %v7987_v14, %v7995_v1  ;;  %v8274_v62 = vshrl.u32 %v7947_v12, 16  ;;  %v2827_v16 = vrot.slane %v2813_v32, %v9759_v53  ;;  %v2862_v21 = vcombine.high %v1431_v5, %v9757_v52 }
 0x2f7   : > { %v2828_v11 = vcombine.high %v2820_v26, %v9545_v51  ;;  %v2835_v37 = vrot.slane %v2820_v26, %v9761_v56  ;;  %v2869_v42 = vrot.slane %v1431_v5, %v9759_v53  ;;  %v6443_v50 = vrot.slane %v6429_v9, %v9759_v53 }
 0x2f8   : > { %v8273_v47 = vpack.i.b16 %v7996_v31, %v7947_v12  ;;  %v8275_v2 = vshrl.u32 %v7996_v31, 16  ;;  %v2843_v19 = vcombine.high %v2827_v16, %v9545_v51  ;;  %v2850_v8 = vrot.slane %v2827_v16, %v9761_v56 }
 0x2f9   : > { %v2842_v29 = vrot.slane %v2828_v11, %v9761_v56  ;;  %v2876_v58 = vrot.slane %v2862_v21, %v9759_v53  ;;  %v2877_v28 = vcombine.high %v2869_v42, %v9545_v51  ;;  %v2884_v0 = vrot.slane %v2869_v42, %v9761_v56 }
 0x2fa   : > { %v8276_v54 = vpack.i.b16 %v8275_v2, %v8274_v62  ;;  %v9054_v4 = vcombine.low %v8273_v47, %v8273_v47  ;;  %v9055_v36 = vcombine.high %v8273_v47, %v8273_v47  ;;  %v2857_v10 = vrot.slane %v2843_v19, %v9761_v56 }
 0x2fb   : > { %v2892_v33 = vcombine.high %v2876_v58, %v9545_v51  ;;  %v2899_v61 = vrot.slane %v2876_v58, %v9761_v56  ;;  %v2891_v40 = vrot.slane %v2877_v28, %v9761_v56  ;;  %v4381_v41 = vcombine.low %v2835_v37, %v2842_v29 }
 0x2fc   : > { %v9086_v46 = vcombine.low %v8276_v54, %v8276_v54  ;;  %v9087_v43 = vcombine.high %v8276_v54, %v8276_v54  ;;  %8507 = vst [vmem:[%s9879_s25 + $0x68] sm:$0xf] %v9054_v4  ;;  %8508 = vst [vmem:[%s9879_s25 + $0x6c] sm:$0xf] %v9055_v36  ;;  %v8892_v15 = vcombine.high %v2835_v37, %v2842_v29 }
 0x2fd   : > { %v2906_v30 = vrot.slane %v2892_v33, %v9761_v56  ;;  %v4397_v27 = vcombine.low %v2850_v8, %v2857_v10  ;;  %v8893_v6 = vcombine.high %v2850_v8, %v2857_v10  ;;  %v4388_v57 = vrot.slane %v4381_v41, %v9759_v53 }
 0x2fe   : > { %8539 = vst [vmem:[%s9879_s25 + $0xe8] sm:$0xf] %v9086_v46  ;;  %8540 = vst [vmem:[%s9879_s25 + $0xec] sm:$0xf] %v9087_v43  ;;  %v4430_v48 = vcombine.low %v2884_v0, %v2891_v40  ;;  %v8894_v49 = vcombine.high %v2884_v0, %v2891_v40  ;;  %v6444_v20 = vcombine.high %v6436_v34, %v9545_v51 }
 0x2ff   : > { %v4396_v23 = vrot.slane %v8892_v15, %v9759_v53  ;;  %v4404_v38 = vrot.slane %v4397_v27, %v9759_v53  ;;  %v4412_v7 = vrot.slane %v8893_v6, %v9759_v53  ;;  %v4446_v3 = vcombine.low %v2899_v61, %v2906_v30 }
 0x300   : > { %v4437_v63 = vrot.slane %v4430_v48, %v9759_v53  ;;  %v4445_v17 = vrot.slane %v8894_v49, %v9759_v53  ;;  %v8895_v55 = vcombine.high %v2899_v61, %v2906_v30  ;;  %v11003_v35 = vpack.c.bf16 %v1270_v60, %v1266_v39  ;;  %v855_v60 = vpop.f32.mrf.mxu0 }
 0x301   : > { %v4413_v13 = vcombine.low %v4388_v57, %v4396_v23  ;;  %v4421_v22 = vcombine.low %v4404_v38, %v4412_v7  ;;  %v4453_v44 = vrot.slane %v4446_v3, %v9759_v53  ;;  %v6458_v25 = vrot.slane %v6444_v20, %v9761_v56  ;;  %v1272_v57 = vpop.f32.mrf.mxu1 }
 0x302   : > { %v4461_v12 = vrot.slane %v8895_v55, %v9759_v53  ;;  %v4462_v14 = vcombine.low %v4437_v63, %v4445_v17  ;;  %v6451_v1 = vrot.slane %v6436_v34, %v9761_v56  ;;  %v6459_v5 = vcombine.high %v6443_v50, %v9545_v51 }
 0x303   : > { %v4420_v32 = vrot.slane %v4413_v13, %v9761_v56  ;;  %v4428_v26 = vrot.slane %v4421_v22, %v9761_v56  ;;  %v6478_v39 = vcombine.high %v10969_v24, %v9757_v52  ;;  %v6485_v31 = vrot.slane %v10969_v24, %v9759_v53 }
 0x304   : > { %v4470_v62 = vcombine.low %v4453_v44, %v4461_v12  ;;  %v6466_v9 = vrot.slane %v6443_v50, %v9761_v56  ;;  %v6473_v16 = vrot.slane %v6459_v5, %v9761_v56  ;;  %v7997_v11 = vcombine.low %v6451_v1, %v6458_v25 }
 0x305   : > { %v4429_v37 = vcombine.low %v4420_v32, %v4428_v26  ;;  %v4469_v34 = vrot.slane %v4462_v14, %v9761_v56  ;;  %v6492_v21 = vrot.slane %v6478_v39, %v9759_v53  ;;  %v6493_v47 = vcombine.high %v6485_v31, %v9545_v51 }
 0x306   : > { %v4477_v2 = vrot.slane %v4470_v62, %v9761_v56  ;;  %v8004_v42 = vrot.slane %v7997_v11, %v9759_v53  ;;  %v9020_v29 = vcombine.high %v6451_v1, %v6458_v25  ;;  %v8013_v19 = vcombine.low %v6466_v9, %v6473_v16 }
 0x307   : > { %v4664_v24 = vshrl.u32 %v4429_v37, 16  ;;  %v6500_v8 = vrot.slane %v6485_v31, %v9761_v56  ;;  %v6507_v50 = vrot.slane %v6493_v47, %v9761_v56  ;;  %v6508_v58 = vcombine.high %v6492_v21, %v9545_v51 }
 0x308   : > { %v4478_v54 = vcombine.low %v4469_v34, %v4477_v2  ;;  %v6515_v4 = vrot.slane %v6492_v21, %v9761_v56  ;;  %v8012_v36 = vrot.slane %v9020_v29, %v9759_v53  ;;  %v9021_v28 = vcombine.high %v6466_v9, %v6473_v16 }
 0x309   : > { %v6522_v10 = vrot.slane %v6508_v58, %v9761_v56  ;;  %v8020_v0 = vrot.slane %v8013_v19, %v9759_v53  ;;  %v8046_v33 = vcombine.low %v6500_v8, %v6507_v50  ;;  %v9022_v61 = vcombine.high %v6500_v8, %v6507_v50 }
 0x30a   : > { %v4663_v46 = vpack.i.b16 %v4478_v54, %v4429_v37  ;;  %v4665_v43 = vshrl.u32 %v4478_v54, 16  ;;  %v8028_v40 = vrot.slane %v9021_v28, %v9759_v53  ;;  %v8029_v41 = vcombine.low %v8004_v42, %v8012_v36 }
 0x30b   : > { %v8053_v30 = vrot.slane %v8046_v33, %v9759_v53  ;;  %v8061_v15 = vrot.slane %v9022_v61, %v9759_v53  ;;  %v8062_v27 = vcombine.low %v6515_v4, %v6522_v10  ;;  %v9023_v6 = vcombine.high %v6515_v4, %v6522_v10 }
 0x30c   : > { %v4666_v48 = vpack.i.b16 %v4665_v43, %v4664_v24  ;;  %v8928_v49 = vcombine.low %v4663_v46, %v4663_v46  ;;  %v8929_v20 = vcombine.high %v4663_v46, %v4663_v46  ;;  %v1437_v23 = vshrl.u32 %v10965_v45, 16 }
 0x30d   : > { %v8037_v38 = vcombine.low %v8020_v0, %v8028_v40  ;;  %v8069_v7 = vrot.slane %v8062_v27, %v9759_v53  ;;  %v8077_v3 = vrot.slane %v9023_v6, %v9759_v53  ;;  %v8078_v63 = vcombine.low %v8053_v30, %v8061_v15 }
 0x30e   : > { %v8960_v17 = vcombine.low %v4666_v48, %v4666_v48  ;;  %v8961_v55 = vcombine.high %v4666_v48, %v4666_v48  ;;  %4893 = vst [vmem:[%s9846_s23 + $0x70] sm:$0xf] %v8928_v49  ;;  %4894 = vst [vmem:[%s9846_s23 + $0x74] sm:$0xf] %v8929_v20  ;;  %v889_v13 = vpack.c.bf16 %v855_v60, %v10945_v18  ;;  %v5053_v14 = vshrl.u32 %v11003_v35, 16 }
 0x30f   : > { %v1306_v22 = vpack.c.bf16 %v1272_v57, %v10983_v59  ;;  %v8036_v44 = vrot.slane %v8029_v41, %v9761_v56  ;;  %v8044_v25 = vrot.slane %v8037_v38, %v9761_v56  ;;  %v8086_v12 = vcombine.low %v8069_v7, %v8077_v3 }
 0x310   : > { %4925 = vst [vmem:[%s9846_s23 + $0xf0] sm:$0xf] %v8960_v17  ;;  %4926 = vst [vmem:[%s9846_s23 + $0xf4] sm:$0xf] %v8961_v55  ;;  %v1435_v1 = vpack.i.b16 %v889_v13, %v10965_v45  ;;  %v1438_v5 = vshrl.u32 %v889_v13, 16  ;;  %v8085_v18 = vrot.slane %v8078_v63, %v9761_v56 }
 0x311   : > { %v5051_v32 = vpack.i.b16 %v1306_v22, %v11003_v35  ;;  %v5054_v26 = vshrl.u32 %v1306_v22, 16  ;;  %v8045_v39 = vcombine.low %v8036_v44, %v8044_v25  ;;  %v8093_v59 = vrot.slane %v8086_v12, %v9761_v56 }
 0x312   : > { %v1439_v31 = vpack.i.b16 %v1438_v5, %v1437_v23  ;;  %v2911_v62 = vcombine.high %v1435_v1, %v9757_v52  ;;  %v2918_v9 = vrot.slane %v1435_v1, %v9759_v53 }
 0x313   : > { %v11051_v16 = vpack.i.b16 %v5054_v26, %v5053_v14  ;;  %v8094_v11 = vcombine.low %v8085_v18, %v8093_v59  ;;  %v8280_v37 = vshrl.u32 %v8045_v39, 16  ;;  %v6527_v45 = vcombine.high %v5051_v32, %v9757_v52 }
 0x314   : > { %v6534_v34 = vrot.slane %v5051_v32, %v9759_v53  ;;  %v2925_v35 = vrot.slane %v2911_v62, %v9759_v53  ;;  %v2926_v21 = vcombine.high %v2918_v9, %v9545_v51  ;;  %v2933_v47 = vrot.slane %v2918_v9, %v9761_v56 }
 0x315   : > { %v2960_v2 = vcombine.high %v1439_v31, %v9757_v52  ;;  %v8279_v42 = vpack.i.b16 %v8094_v11, %v8045_v39  ;;  %v8281_v29 = vshrl.u32 %v8094_v11, 16  ;;  %v2967_v19 = vrot.slane %v1439_v31, %v9759_v53 }
 0x316   : > { %v6541_v24 = vrot.slane %v6527_v45, %v9759_v53  ;;  %v2940_v8 = vrot.slane %v2926_v21, %v9761_v56  ;;  %v2941_v50 = vcombine.high %v2925_v35, %v9545_v51  ;;  %v2948_v58 = vrot.slane %v2925_v35, %v9761_v56 }
 0x317   : > { %v2974_v54 = vrot.slane %v2960_v2, %v9759_v53  ;;  %v8282_v4 = vpack.i.b16 %v8281_v29, %v8280_v37  ;;  %v9056_v36 = vcombine.low %v8279_v42, %v8279_v42  ;;  %v9057_v28 = vcombine.high %v8279_v42, %v8279_v42 }
 0x318   : > { %v2975_v10 = vcombine.high %v2967_v19, %v9545_v51  ;;  %v2955_v0 = vrot.slane %v2941_v50, %v9761_v56  ;;  %v2982_v33 = vrot.slane %v2967_v19, %v9761_v56  ;;  %v4479_v30 = vcombine.low %v2933_v47, %v2940_v8 }
 0x319   : > { %v2990_v61 = vcombine.high %v2974_v54, %v9545_v51  ;;  %v2997_v46 = vrot.slane %v2974_v54, %v9761_v56  ;;  %v9088_v43 = vcombine.low %v8282_v4, %v8282_v4  ;;  %v9089_v40 = vcombine.high %v8282_v4, %v8282_v4  ;;  %8509 = vst [vmem:[%s9879_s25 + $0x70] sm:$0xf] %v9056_v36 }
 0x31a   : > { %8510 = vst [vmem:[%s9879_s25 + $0x74] sm:$0xf] %v9057_v28  ;;  %v2989_v41 = vrot.slane %v2975_v10, %v9761_v56  ;;  %v8896_v27 = vcombine.high %v2933_v47, %v2940_v8  ;;  %v4495_v6 = vcombine.low %v2948_v58, %v2955_v0  ;;  %v8897_v60 = vcombine.high %v2948_v58, %v2955_v0 }
 0x31b   : > { %v3004_v15 = vrot.slane %v2990_v61, %v9761_v56  ;;  %8541 = vst [vmem:[%s9879_s25 + $0xf0] sm:$0xf] %v9088_v43  ;;  %8542 = vst [vmem:[%s9879_s25 + $0xf4] sm:$0xf] %v9089_v40  ;;  %v4486_v57 = vrot.slane %v4479_v30, %v9759_v53  ;;  %v6542_v20 = vcombine.high %v6534_v34, %v9545_v51 }
 0x31c   : > { %v4528_v48 = vcombine.low %v2982_v33, %v2989_v41  ;;  %v8898_v49 = vcombine.high %v2982_v33, %v2989_v41  ;;  %v4494_v23 = vrot.slane %v8896_v27, %v9759_v53  ;;  %v4502_v38 = vrot.slane %v4495_v6, %v9759_v53 }
 0x31d   : > { %v4510_v7 = vrot.slane %v8897_v60, %v9759_v53  ;;  %v4544_v3 = vcombine.low %v2997_v46, %v3004_v15  ;;  %v8899_v55 = vcombine.high %v2997_v46, %v3004_v15  ;;  %v6556_v25 = vrot.slane %v6542_v20, %v9761_v56 }
 0x31e   : > { %v4535_v63 = vrot.slane %v4528_v48, %v9759_v53  ;;  %v4543_v17 = vrot.slane %v8898_v49, %v9759_v53  ;;  %v4511_v13 = vcombine.low %v4486_v57, %v4494_v23  ;;  %v6549_v1 = vrot.slane %v6534_v34, %v9761_v56 }
 0x31f   : > { %v4519_v22 = vcombine.low %v4502_v38, %v4510_v7  ;;  %v4551_v44 = vrot.slane %v4544_v3, %v9759_v53  ;;  %v4559_v12 = vrot.slane %v8899_v55, %v9759_v53  ;;  %v6557_v5 = vcombine.high %v6541_v24, %v9545_v51 }
 0x320   : > { %v4560_v14 = vcombine.low %v4535_v63, %v4543_v17  ;;  %v4518_v32 = vrot.slane %v4511_v13, %v9761_v56  ;;  %v6576_v39 = vcombine.high %v11051_v16, %v9757_v52  ;;  %v6583_v18 = vrot.slane %v11051_v16, %v9759_v53 }
 0x321   : > { %v4526_v26 = vrot.slane %v4519_v22, %v9761_v56  ;;  %v4568_v59 = vcombine.low %v4551_v44, %v4559_v12  ;;  %v6564_v31 = vrot.slane %v6541_v24, %v9761_v56  ;;  %v6571_v62 = vrot.slane %v6557_v5, %v9761_v56 }
 0x322   : > { %v8095_v9 = vcombine.low %v6549_v1, %v6556_v25  ;;  %v4567_v37 = vrot.slane %v4560_v14, %v9761_v56  ;;  %v6590_v45 = vrot.slane %v6576_v39, %v9759_v53  ;;  %v6591_v34 = vcombine.high %v6583_v18, %v9545_v51 }
 0x323   : > { %v4527_v11 = vcombine.low %v4518_v32, %v4526_v26  ;;  %v4575_v35 = vrot.slane %v4568_v59, %v9761_v56  ;;  %v9024_v21 = vcombine.high %v6549_v1, %v6556_v25  ;;  %v8111_v47 = vcombine.low %v6564_v31, %v6571_v62 }
 0x324   : > { %v8102_v52 = vrot.slane %v8095_v9, %v9759_v53  ;;  %v6598_v2 = vrot.slane %v6583_v18, %v9761_v56  ;;  %v6605_v42 = vrot.slane %v6591_v34, %v9761_v56  ;;  %v6606_v29 = vcombine.high %v6590_v45, %v9545_v51 }
 0x325   : > { %v4670_v16 = vshrl.u32 %v4527_v11, 16  ;;  %v4576_v19 = vcombine.low %v4567_v37, %v4575_v35  ;;  %v6613_v24 = vrot.slane %v6590_v45, %v9761_v56  ;;  %v8110_v8 = vrot.slane %v9024_v21, %v9759_v53 }
 0x326   : > { %v9025_v50 = vcombine.high %v6564_v31, %v6571_v62  ;;  %v6620_v58 = vrot.slane %v6606_v29, %v9761_v56  ;;  %v8118_v54 = vrot.slane %v8111_v47, %v9759_v53  ;;  %v8144_v4 = vcombine.low %v6598_v2, %v6605_v42 }
 0x327   : > { %v9026_v36 = vcombine.high %v6598_v2, %v6605_v42  ;;  %v4669_v28 = vpack.i.b16 %v4576_v19, %v4527_v11  ;;  %v4671_v10 = vshrl.u32 %v4576_v19, 16  ;;  %v8127_v33 = vcombine.low %v8102_v52, %v8110_v8 }
 0x328   : > { %v8126_v0 = vrot.slane %v9025_v50, %v9759_v53  ;;  %v8151_v51 = vrot.slane %v8144_v4, %v9759_v53  ;;  %v8160_v46 = vcombine.low %v6613_v24, %v6620_v58  ;;  %v9027_v43 = vcombine.high %v6613_v24, %v6620_v58 }
 0x329   : > { %v8159_v61 = vrot.slane %v9026_v36, %v9759_v53  ;;  %v4672_v40 = vpack.i.b16 %v4671_v10, %v4670_v16  ;;  %v8930_v41 = vcombine.low %v4669_v28, %v4669_v28  ;;  %v8931_v30 = vcombine.high %v4669_v28, %v4669_v28 }
 0x32a   : > { %v8135_v15 = vcombine.low %v8118_v54, %v8126_v0  ;;  %v8167_v27 = vrot.slane %v8160_v46, %v9759_v53  ;;  %v8175_v6 = vrot.slane %v9027_v43, %v9759_v53  ;;  %v8134_v49 = vrot.slane %v8127_v33, %v9761_v56 }
 0x32b   : > { %v8176_v60 = vcombine.low %v8151_v51, %v8159_v61  ;;  %v8962_v57 = vcombine.low %v4672_v40, %v4672_v40  ;;  %v8963_v48 = vcombine.high %v4672_v40, %v4672_v40  ;;  %4895 = vst [vmem:[%s9846_s23 + $0x78] sm:$0xf] %v8930_v41  ;;  %4896 = vst [vmem:[%s9846_s23 + $0x7c] sm:$0xf] %v8931_v30 }
 0x32c   : > { %v8142_v53 = vrot.slane %v8135_v15, %v9761_v56  ;;  %v8184_v20 = vcombine.low %v8167_v27, %v8175_v6 }
 0x32d   : > { %4927 = vst [vmem:[%s9846_s23 + $0xf8] sm:$0xf] %v8962_v57  ;;  %4928 = vst [vmem:[%s9846_s23 + $0xfc] sm:$0xf] %v8963_v48  ;;  %v8183_v38 = vrot.slane %v8176_v60, %v9761_v56 }
 0x32e   : > { %v8143_v23 = vcombine.low %v8134_v49, %v8142_v53  ;;  %v8191_v7 = vrot.slane %v8184_v20, %v9761_v56 }
 0x32f   : > { %9435 = shalt.err (!%p9432_p2)
}
 0x330   : > { %s9436_s9 = scalar_lea.hbm %s11120_s24, 4096  ;;  %s9440_s23 = scalar_lea.hbm %s11222_s3, 8192 }
 0x331   : > { %p9437_p9 = scmp.ne.s32.totalorder %s11120_s24, %s9436_s9  ;;  %p9441_p0 = scmp.lt.s32.totalorder %s11120_s24, %s11222_s3 }
 0x332   : > { %p9442_p7 = scmp.lt.s32.totalorder %s9440_s23, %s9436_s9 }
 0x333   : > { %p9438_p12 = pnand %p9437_p9, %p9676_p3 }
 0x334   : > { %p9443_p5 = por %p9442_p7, %p9441_p0 }
 0x335   : > { %p9439_p13 = pneg %p9438_p12 }
 0x337   : > { %p9444_p1 = pnand %p9443_p5, %p9439_p13 }
 0x339   : > { %9447 = shalt.err (!%p9444_p1)
}
 0x33a   : > { %s9547_s22 = smov 64   ;;  %s9548_s6 = smov 4   ;;  %v8192_v56 = vcombine.low %v8183_v38, %v8191_v7  ;;  %v8286_v63 = vshrl.u32 %v8143_v23, 16 }
 0x33b   : > { %9113 = dma.vmem_to_hbm [thread:$0]  (%p9676_p3), %s11122_s8, 4096, %s11120_s24, %s8546_s29, %s9547_s22, %s9547_s22, %s9548_s6  }
 0x33c   : > { %v8285_v3 = vpack.i.b16 %v8192_v56, %v8143_v23  ;;  %v8287_v17 = vshrl.u32 %v8192_v56, 16  ;;  %s8584_s5 = sshll.u32 %s9879_s25, 4  ;;  %s11166_s8 = scalar_lea.hbm %s11223_s4, %s9101_s27  ;;  %s11168_s5 = int_to_ptr.vmem [resolvable:$true] %s8584_s5 }
 0x33d   : > { %s8551_s24 = scalar_lea.sflag [#allocation10], %s9706_s30  ;;  %s9448_s29 = scalar_lea.vmem %s11168_s5, 4096 }
 0x33e   : > { %v8288_v55 = vpack.i.b16 %v8287_v17, %v8286_v63  ;;  %v9058_v13 = vcombine.low %v8285_v3, %v8285_v3  ;;  %v9059_v22 = vcombine.high %v8285_v3, %v8285_v3  ;;  %p9449_p4 = scmp.ne.s32.totalorder %s11168_s5, %s9448_s29  ;;  %s9549_s11 = smov [#allocation9]  }
 0x33f   : > { %s9452_s18 = sshll.u32 %s9549_s11, 4  ;;  %s9453_s18 = int_to_ptr.vmem [resolvable:$false] %s9452_s18 }
 0x340   : > { %v9090_v44 = vcombine.low %v8288_v55, %v8288_v55  ;;  %v9091_v25 = vcombine.high %v8288_v55, %v8288_v55  ;;  %8511 = vst [vmem:[%s9879_s25 + $0x78] sm:$0xf] %v9058_v13  ;;  %8512 = vst [vmem:[%s9879_s25 + $0x7c] sm:$0xf] %v9059_v22  ;;  %p9450_p6 = pnand %p9449_p4, %p9676_p3  ;;  %s9454_s13 = scalar_lea.vmem %s9453_s18, 8192 }
 0x341   : > { %p9455_p10 = scmp.lt.s32.totalorder %s11168_s5, %s9453_s18  ;;  %p9456_p11 = scmp.lt.s32.totalorder %s9454_s13, %s9448_s29 }
 0x342   : > { %8543 = vst [vmem:[%s9879_s25 + $0xf8] sm:$0xf] %v9090_v44  ;;  %8544 = vst [vmem:[%s9879_s25 + $0xfc] sm:$0xf] %v9091_v25  ;;  %p9451_p8 = pneg %p9450_p6 }
 0x343   : > { %p9457_p2 = por %p9456_p11, %p9455_p10 }
 0x345   : > { %p9458_p9 = pnand %p9457_p2, %p9451_p8 }
 0x347   : > { %9461 = shalt.err (!%p9458_p9)
}
 0x348   : > { %s9462_s25 = scalar_lea.hbm %s11166_s8, 4096  ;;  %s9466_s23 = scalar_lea.hbm %s11223_s4, 8192 }
 0x349   : > { %p9463_p12 = scmp.ne.s32.totalorder %s11166_s8, %s9462_s25  ;;  %p9467_p7 = scmp.lt.s32.totalorder %s11166_s8, %s11223_s4 }
 0x34a   : > { %p9468_p5 = scmp.lt.s32.totalorder %s9466_s23, %s9462_s25 }
 0x34b   : > { %p9464_p13 = pnand %p9463_p12, %p9676_p3 }
 0x34c   : > { %p9469_p1 = por %p9468_p5, %p9467_p7 }
 0x34d   : > { %p9465_p0 = pneg %p9464_p13 }
 0x34f   : > { %p9470_p4 = pnand %p9469_p1, %p9465_p0 }
 0x351   : > { %9473 = shalt.err (!%p9470_p4)
}
 0x352   : > { %9114 = dma.vmem_to_hbm [thread:$0]  (%p9676_p3), %s11168_s5, 4096, %s11166_s8, %s8551_s24, %s9547_s22, %s9547_s22, %s9548_s6  }
 0x353 PF: > { %s8599_s10 = sand.u32 1, %s9516_s15   ;;  %p11236_p6 = scmp.ne.s32.totalorder %s11229_s26, 0 }
 0x354   : > { %p11237_p8 = scmp.ge.s32.totalorder %s9536_s20, 2  ;;  %s8600_s9 = scalar_lea.sflag [#allocation4], %s8599_s10 }
 0x356   : > { %p9129_p10 = pnand %p11237_p8, %p11236_p6 }
 0x358   : > { %p9130_p11 = pneg %p9129_p10 }
 0x35a   : > { %9507 = dma.done.wait (%p9130_p11), %s8600_s9, 4096  }
 0x35b   : > { %9509 = vsyncadd (%p9130_p11), %s8600_s9, 4294963200  ;;  %s8609_s29 = scalar_lea.sflag [#allocation10], %s8599_s10 }
 0x35c   : > { %9511 = dma.done.wait (%p9130_p11), %s8609_s29, 4096  }
 0x35d   : > { %9513 = vsyncadd (%p9130_p11), %s8609_s29, 4294963200  ;;  %s25_s20 = sadd.s32 1, %s9536_s20   ;;  %s11238_s15 = smov %s9520_s16 }
 0x35e   : > { %p22_p2 = scmp.ge.s32.totalorder %s25_s20, 4   ;;  %s11239_s16 = smov %s9524_s17 }
 0x35f   : > { %s11240_s17 = smov %s9685_s7  ;;  %s11241_s18 = smov %s9532_s19 }
 0x360   : > { %s11242_s19 = smov %s11244_s21  ;;  %24 = sbr.rel (!%p22_p2) target bundleno = 9 (0x9), region = 102 }
 0x365   :  { %8614 = vsyncpa [#allocation3], 1 }
 0x366   :  { %8616 = vsyncpa [#allocation3 + $0x1], 1 }
 0x367   :  { %8617 = vsyncpa [#allocation6], 1 }
 0x368   :  { %8618 = vsyncpa [#allocation4], 1 }
 0x369   :  { %8620 = vsyncpa [#allocation4 + $0x1], 1 }
 0x36a   :  { %8621 = vsyncpa [#allocation10], 1 }
 0x36b   :  { %8623 = vsyncpa [#allocation10 + $0x1], 1 }

// kernel: tpu_custom_call.1
= control target key start
LH: loop header
LB: loop body
LE: loop exit
PB: predicated region body
PF: predicated region fallthrough
CT: control target
= control target key end

     0   :  { %10 = vsyncpa [#allocation3], 0  ;;  %s11219_s0 = inlined_call_operand.hbm [shape: bf16[2,256,256], index: 0, kind: input, shape index: {}]   ;;  %s11220_s1 = inlined_call_operand.hbm [shape: bf16[256,256], index: 1, kind: input, shape index: {}]   ;;  %s11221_s2 = inlined_call_operand.hbm [shape: bf16[256,256], index: 2, kind: input, shape index: {}]   ;;  %s11222_s3 = inlined_call_operand.hbm [shape: bf16[2,2,256,128], index: 3, kind: output, shape index: {0}]   ;;  %s11223_s4 = inlined_call_operand.hbm [shape: bf16[2,2,256,128], index: 4, kind: output, shape index: {1}]  }
   0x1   :  { %12 = vsyncpa [#allocation3 + $0x1], 0 }
   0x2   :  { %13 = vsyncpa [#allocation6], 0 }
   0x3   :  { %14 = vsyncpa [#allocation4], 0 }
   0x4   :  { %16 = vsyncpa [#allocation4 + $0x1], 0 }
   0x5   :  { %17 = vsyncpa [#allocation10], 0 }
   0x6   :  { %19 = vsyncpa [#allocation10 + $0x1], 0  ;;  %s9575_s15 = smov 0   ;;  %s9577_s16 = smov 0  }
   0x7   :  { %s9579_s17 = smov 0   ;;  %s9581_s18 = smov 0  }
   0x8   :  { %s9583_s19 = smov 0   ;;  %s9585_s20 = smov 0  }
   0x9 LB: > { %s8725_s21 = sadd.s32 4294967295, %s9536_s20   ;;  %s8726_s22 = sadd.s32 4294967294, %s9536_s20   ;;  %s9536_s20 = sphi %s9585_s20, %s25_s20   ;;  %s9532_s19 = sphi %s9583_s19, %s11242_s19   ;;  %s9528_s18 = sphi %s9581_s18, %s11241_s18   ;;  %s9524_s17 = sphi %s9579_s17, %s11240_s17   ;;  %s9520_s16 = sphi %s9577_s16, %s11239_s16   ;;  %s9516_s15 = sphi %s9575_s15, %s11238_s15  }
   0xa   : > { %p59_p0 = scmp.ne.s32.totalorder %s9520_s16, %s9516_s15  ;;  %p9609_p1 = scmp.eq.s32.totalorder %s8725_s21, 0 }
   0xb   : > { %p9613_p2 = scmp.eq.s32.totalorder %s8725_s21, 1  ;;  %p133_p3 = scmp.eq.s32.totalorder %s8726_s22, 1 }
   0xc   : > { %p9619_p4 = por %p9609_p1, %p59_p0  ;;  %p8727_p5 = scmp.ge.s32.totalorder %s9536_s20, 1 }
   0xd   : > { %p9624_p6 = por %p133_p3, %p59_p0  ;;  %p168_p7 = scmp.lt.s32.totalorder %s9536_s20, 3 }
   0xe   : > { %s9538_s28 = smov [#allocation5]   ;;  %s9539_s5 = smov [#allocation7]  }
   0xf   : > { %s11229_s26 = scalar_select %p9624_p6, 1, 0 }
  0x10   : > { %p9629_p8 = pnand %p8727_p5, %p168_p7  ;;  %s180_s29 = sshll.u32 %s9538_s28, 4  ;;  %s181_s29 = int_to_ptr.vmem [resolvable:$true] %s180_s29 }
  0x11   : > { %s193_s6 = sshll.u32 %s9539_s5, 4  ;;  %s9353_s7 = scalar_lea.vmem %s181_s29, 4096  ;;  %s194_s6 = int_to_ptr.vmem [resolvable:$true] %s193_s6 }
  0x12   : > { %p9117_p9 = pneg %p9629_p8  ;;  %p9354_p13 = scmp.ne.s32.totalorder %s181_s29, %s9353_s7 }
  0x13   : > { %p9361_p5 = scmp.lt.s32.totalorder %s181_s29, %s181_s29  ;;  %p9362_p7 = scmp.lt.s32.totalorder %s9353_s7, %s9353_s7 }
  0x14   : > { %p9638_p11 = pnand %p9117_p9, %p9609_p1 }
  0x15   : > { %p9363_p10 = por %p9362_p7, %p9361_p5 }
  0x16   : > { %p9344_p12 = pneg %p9638_p11 }
  0x18   : > { %p9356_p0 = pnand %p9354_p13, %p9344_p12 }
  0x1a   : > { %p9357_p3 = pneg %p9356_p0 }
  0x1c   : > { %p9364_p9 = pnand %p9363_p10, %p9357_p3 }
  0x1e   : > { %9367 = shalt.err (!%p9364_p9)
}
  0x1f   : > { %s11224_s8 = smov 128   ;;  %s11225_s9 = smov 8  }
  0x20   : > { %9120 = dma.hbm_to_vmem [thread:$0]  (!%p9638_p11), %s11220_s1, 4096, %s181_s29, [#allocation6], %s11224_s8, %s11224_s8, %s11225_s9  }
  0x21   : > { %s9379_s12 = scalar_lea.vmem %s194_s6, 4096  ;;  %p9387_p10 = scmp.lt.s32.totalorder %s194_s6, %s194_s6 }
  0x22   : > { %p9380_p13 = scmp.ne.s32.totalorder %s194_s6, %s9379_s12  ;;  %p9388_p3 = scmp.lt.s32.totalorder %s9379_s12, %s9379_s12 }
  0x24   : > { %p9382_p0 = pnand %p9380_p13, %p9344_p12  ;;  %p9389_p7 = por %p9388_p3, %p9387_p10 }
  0x26   : > { %p9383_p5 = pneg %p9382_p0 }
  0x28   : > { %p9390_p9 = pnand %p9389_p7, %p9383_p5 }
  0x2a   : > { %9393 = shalt.err (!%p9390_p9)
}
  0x2b   : > { %9123 = dma.hbm_to_vmem [thread:$0]  (!%p9638_p11), %s11221_s2, 4096, %s194_s6, [#allocation6], %s11224_s8, %s11224_s8, %s11225_s9  }
  0x2c   : > { %s37_s21 = sadd.s32 1, %s9532_s19  ;;  %s46_s22 = sadd.s32 1, %s9524_s17 }
  0x2d   : > { %p39_p12 = scmp.ge.s32.totalorder %s37_s21, 2  ;;  %p53_p13 = scmp.ne.s32.totalorder %s9524_s17, %s9520_s16 }
  0x2e   : > { %p54_p0 = scmp.eq.s32.totalorder %s9536_s20, 0  ;;  %p9137_p5 = scmp.lt.s32.totalorder %s9536_s20, 2 }
  0x2f   : > { %s11244_s21 = smov (%p39_p12, %s37_s21), 0  ;;  %p9676_p3 = por %p9613_p2, %p53_p13 }
  0x30   : > { %p55_p10 = por %p54_p0, %p53_p13  ;;  %s41_s29 = ssub.s32 %s9532_s19, %s11244_s21 }
  0x31   : > { %s207_s30 = sand.u32 1, %s9524_s17   ;;  %p44_p7 = scmp.eq.s32.totalorder %s41_s29, 0 }
  0x32   : > { %s8731_s5 = sshll.u32 %s207_s30, 8  ;;  %s9100_s6 = sshll.u32 %s9532_s19, 12 }
  0x33   : > { %s9685_s7 = scalar_select %p44_p7, %s9524_s17, %s46_s22  }
  0x34   : > { %s220_s12 = scalar_lea.hbm %s11219_s0, %s9100_s6  ;;  %s211_s13 = scalar_lea.vmem [#allocation2], %s8731_s5 }
  0x35   : > { %s221_s14 = sshll.u32 %s211_s13, 4  ;;  %p9692_p11 = pnand %p9137_p5, %p55_p10  ;;  %s222_s14 = int_to_ptr.vmem [resolvable:$true] %s221_s14 }
  0x36   : > { %s208_s8 = scalar_lea.sflag [#allocation3], %s207_s30  ;;  %s9407_s29 = scalar_lea.vmem %s222_s14, 4096 }
  0x37   : > { %p9396_p2 = pneg %p9692_p11  ;;  %p9408_p9 = scmp.ne.s32.totalorder %s222_s14, %s9407_s29 }
  0x38   : > { %s9542_s22 = smov [#allocation2]  }
  0x39   : > { %p9410_p12 = pnand %p9408_p9, %p9396_p2  ;;  %s9412_s9 = sshll.u32 %s9542_s22, 4  ;;  %s9413_s9 = int_to_ptr.vmem [resolvable:$false] %s9412_s9 }
  0x3a   : > { %s9414_s6 = scalar_lea.vmem %s9413_s9, 8192  ;;  %p9415_p0 = scmp.lt.s32.totalorder %s222_s14, %s9413_s9 }
  0x3b   : > { %p9411_p13 = pneg %p9410_p12  ;;  %p9416_p7 = scmp.lt.s32.totalorder %s9414_s6, %s9407_s29 }
  0x3d   : > { %p9417_p6 = por %p9416_p7, %p9415_p0 }
  0x3f   : > { %p9418_p5 = pnand %p9417_p6, %p9411_p13 }
  0x41   : > { %9421 = shalt.err (!%p9418_p5)
}
  0x42   : > { %s11234_s5 = smov 8   ;;  %s11235_s10 = smov 128  }
  0x43   : > { %9127 = dma.hbm_to_vmem [thread:$0]  (!%p9692_p11), %s220_s12, 4096, %s222_s14, %s208_s8, %s11235_s10, %s11235_s10, %s11234_s5  }
  0x44   : > { %233 = sbr.rel (%p9629_p8) target bundleno = 851 (0x353), region = 32  ;;  %s9706_s30 = sand.u32 (!%p9629_p8), 1, %s9520_s16  }
  0x45   : > { %s9709_s9 = sshll.u32 (!%p9629_p8), %s9706_s30, 8  ;;  %s236_s11 = scalar_lea.sflag (!%p9629_p8), [#allocation3], %s9706_s30 }
  0x46   : > { %s9713_s13 = scalar_lea.vmem (!%p9629_p8), [#allocation2], %s9709_s9 }
  0x49   : > { %9499 = dma.done.wait (%p9619_p4), %s236_s11, 4096  }
  0x4a   : > { %9501 = vsyncadd (%p9619_p4), %s236_s11, 4294963200 }
  0x4b   : > { %9503 = dma.done.wait (%p9609_p1), [#allocation6], 8192  }
  0x4c   : > { %9505 = vsyncadd (%p9609_p1), [#allocation6], 4294959104  ;;  %v9198_v0 = vld [vmem:[#allocation5 + $0x74] ss:$8 sps:$4 sm:$0xff]   ;;  %v9202_v2 = vld [vmem:[#allocation5 + $0x70] ss:$8 sps:$4 sm:$0xff]  }
  0x4d   : > { %v9200_v1 = vld [vmem:[#allocation7 + $0x74] ss:$8 sps:$4 sm:$0xff]   ;;  %665 = vmatprep.subr.bf16.mxu0 %v9198_v0  ;;  %v9203_v3 = vld [vmem:[#allocation7 + $0x70] ss:$8 sps:$4 sm:$0xff]   ;;  %v9204_v4 = vld [vmem:[#allocation5 + $0x64] ss:$8 sps:$4 sm:$0xff]  }
  0x4e   : > { %1082 = vmatprep.subr.bf16.mxu1 %v9200_v1  ;;  %666 = vmatpush1.bf16.msra.mxu0 %v9202_v2  ;;  %v9206_v5 = vld [vmem:[#allocation7 + $0x64] ss:$8 sps:$4 sm:$0xff]   ;;  %v9208_v6 = vld [vmem:[#allocation5 + $0x60] ss:$8 sps:$4 sm:$0xff]   ;;  %v9210_v8 = vld [vmem:[#allocation5 + $0x54] ss:$8 sps:$4 sm:$0xff]  }
  0x4f   : > { %1083 = vmatpush1.bf16.msra.mxu1 %v9203_v3  ;;  %667 = vmatprep.subr.bf16.mxu0 %v9204_v4  ;;  %v9209_v7 = vld [vmem:[#allocation7 + $0x60] ss:$8 sps:$4 sm:$0xff]   ;;  %v9212_v9 = vld [vmem:[#allocation7 + $0x54] ss:$8 sps:$4 sm:$0xff]   ;;  %v9214_v10 = vld [vmem:[#allocation5 + $0x50] ss:$8 sps:$4 sm:$0xff]  }
  0x50   : > { %1084 = vmatprep.subr.bf16.mxu1 %v9206_v5  ;;  %v9215_v11 = vld [vmem:[#allocation7 + $0x50] ss:$8 sps:$4 sm:$0xff]   ;;  %v9216_v12 = vld [vmem:[#allocation5 + $0x44] ss:$8 sps:$4 sm:$0xff]   ;;  %v9220_v14 = vld [vmem:[#allocation5 + $0x40] ss:$8 sps:$4 sm:$0xff]  }
  0x51   : > { %v9218_v13 = vld [vmem:[#allocation7 + $0x44] ss:$8 sps:$4 sm:$0xff]   ;;  %v9221_v15 = vld [vmem:[#allocation7 + $0x40] ss:$8 sps:$4 sm:$0xff]   ;;  %v9222_v16 = vld [vmem:[#allocation5 + $0x34] ss:$8 sps:$4 sm:$0xff]  }
  0x52   : > { %668 = vmatpush1.bf16.msra.mxu0 %v9208_v6  ;;  %v9224_v17 = vld [vmem:[#allocation7 + $0x34] ss:$8 sps:$4 sm:$0xff]   ;;  %v9226_v18 = vld [vmem:[#allocation5 + $0x30] ss:$8 sps:$4 sm:$0xff]   ;;  %v9228_v20 = vld [vmem:[#allocation5 + $0x24] ss:$8 sps:$4 sm:$0xff]  }
  0x53   : > { %1085 = vmatpush1.bf16.msra.mxu1 %v9209_v7  ;;  %669 = vmatprep.subr.bf16.mxu0 %v9210_v8  ;;  %v9227_v19 = vld [vmem:[#allocation7 + $0x30] ss:$8 sps:$4 sm:$0xff]   ;;  %v9230_v21 = vld [vmem:[#allocation7 + $0x24] ss:$8 sps:$4 sm:$0xff]   ;;  %v9232_v22 = vld [vmem:[#allocation5 + $0x20] ss:$8 sps:$4 sm:$0xff]  }
  0x54   : > { %1086 = vmatprep.subr.bf16.mxu1 %v9212_v9  ;;  %v9233_v23 = vld [vmem:[#allocation7 + $0x20] ss:$8 sps:$4 sm:$0xff]   ;;  %v9234_v24 = vld [vmem:[#allocation5 + $0x14] ss:$8 sps:$4 sm:$0xff]   ;;  %v9238_v26 = vld [vmem:[#allocation5 + $0x10] ss:$8 sps:$4 sm:$0xff]  }
  0x55   : > { %v9236_v25 = vld [vmem:[#allocation7 + $0x14] ss:$8 sps:$4 sm:$0xff]   ;;  %v9239_v27 = vld [vmem:[#allocation7 + $0x10] ss:$8 sps:$4 sm:$0xff]   ;;  %v9240_v28 = vld [vmem:[#allocation5 + $0x4] ss:$8 sps:$4 sm:$0xff]  }
  0x56   : > { %670 = vmatpush1.bf16.msra.mxu0 %v9214_v10  ;;  %v9242_v29 = vld [vmem:[#allocation7 + $0x4] ss:$8 sps:$4 sm:$0xff]   ;;  %v9244_v30 = vld [vmem:[#allocation5] ss:$8 sps:$4 sm:$0xff]   ;;  %v9246_v32 = vld [vmem:[#allocation5 + $0xf4] ss:$8 sps:$4 sm:$0xff]  }
  0x57   : > { %1087 = vmatpush1.bf16.msra.mxu1 %v9215_v11  ;;  %671 = vmatprep.subr.bf16.mxu0 %v9216_v12  ;;  %v9245_v31 = vld [vmem:[#allocation7] ss:$8 sps:$4 sm:$0xff]   ;;  %v9248_v33 = vld [vmem:[#allocation7 + $0xf4] ss:$8 sps:$4 sm:$0xff]   ;;  %v9250_v34 = vld [vmem:[#allocation5 + $0xf0] ss:$8 sps:$4 sm:$0xff]  }
  0x58   : > { %1088 = vmatprep.subr.bf16.mxu1 %v9218_v13  ;;  %v9251_v35 = vld [vmem:[#allocation7 + $0xf0] ss:$8 sps:$4 sm:$0xff]   ;;  %v9252_v36 = vld [vmem:[#allocation5 + $0xe4] ss:$8 sps:$4 sm:$0xff]   ;;  %v9256_v38 = vld [vmem:[#allocation5 + $0xe0] ss:$8 sps:$4 sm:$0xff]  }
  0x59   : > { %v9254_v37 = vld [vmem:[#allocation7 + $0xe4] ss:$8 sps:$4 sm:$0xff]   ;;  %v9257_v39 = vld [vmem:[#allocation7 + $0xe0] ss:$8 sps:$4 sm:$0xff]   ;;  %v9258_v40 = vld [vmem:[#allocation5 + $0xd4] ss:$8 sps:$4 sm:$0xff]  }
  0x5a   : > { %672 = vmatpush1.bf16.msra.mxu0 %v9220_v14  ;;  %v9260_v41 = vld [vmem:[#allocation7 + $0xd4] ss:$8 sps:$4 sm:$0xff]   ;;  %v9262_v42 = vld [vmem:[#allocation5 + $0xd0] ss:$8 sps:$4 sm:$0xff]   ;;  %v9264_v44 = vld [vmem:[#allocation5 + $0xc4] ss:$8 sps:$4 sm:$0xff]  }
  0x5b   : > { %1089 = vmatpush1.bf16.msra.mxu1 %v9221_v15  ;;  %673 = vmatprep.subr.bf16.mxu0 %v9222_v16  ;;  %v9263_v43 = vld [vmem:[#allocation7 + $0xd0] ss:$8 sps:$4 sm:$0xff]   ;;  %v9266_v45 = vld [vmem:[#allocation7 + $0xc4] ss:$8 sps:$4 sm:$0xff]   ;;  %v9268_v46 = vld [vmem:[#allocation5 + $0xc0] ss:$8 sps:$4 sm:$0xff]  }
  0x5c   : > { %1090 = vmatprep.subr.bf16.mxu1 %v9224_v17  ;;  %v9269_v47 = vld [vmem:[#allocation7 + $0xc0] ss:$8 sps:$4 sm:$0xff]   ;;  %v9296_v48 = vld [vmem:[%s9713_s13 + $0x4] ss:$8 sps:$4 sm:$0xff]   ;;  %v9270_v49 = vld [vmem:[#allocation5 + $0xb4] ss:$8 sps:$4 sm:$0xff]  }
  0x5d   : > { %v9272_v50 = vld [vmem:[#allocation7 + $0xb4] ss:$8 sps:$4 sm:$0xff]   ;;  %697 = vmatprep.mubr.bf16.mxu0 %v9296_v48  ;;  %1114 = vmatprep.mubr.bf16.mxu1 %v9296_v48  ;;  %v9274_v51 = vld [vmem:[#allocation5 + $0xb0] ss:$8 sps:$4 sm:$0xff]   ;;  %v9276_v53 = vld [vmem:[#allocation5 + $0xa4] ss:$8 sps:$4 sm:$0xff]  }
  0x5e   : > { %674 = vmatpush1.bf16.msra.mxu0 %v9226_v18  ;;  %v9275_v52 = vld [vmem:[#allocation7 + $0xb0] ss:$8 sps:$4 sm:$0xff]   ;;  %v9278_v54 = vld [vmem:[#allocation7 + $0xa4] ss:$8 sps:$4 sm:$0xff]   ;;  %v9280_v55 = vld [vmem:[#allocation5 + $0xa0] ss:$8 sps:$4 sm:$0xff]  }
  0x5f   : > { %1091 = vmatpush1.bf16.msra.mxu1 %v9227_v19  ;;  %675 = vmatprep.subr.bf16.mxu0 %v9228_v20  ;;  %v9281_v56 = vld [vmem:[#allocation7 + $0xa0] ss:$8 sps:$4 sm:$0xff]   ;;  %v9282_v57 = vld [vmem:[#allocation5 + $0x94] ss:$8 sps:$4 sm:$0xff]   ;;  %v9286_v59 = vld [vmem:[#allocation5 + $0x90] ss:$8 sps:$4 sm:$0xff]  }
  0x60   : > { %1092 = vmatprep.subr.bf16.mxu1 %v9230_v21  ;;  %v9284_v58 = vld [vmem:[#allocation7 + $0x94] ss:$8 sps:$4 sm:$0xff]   ;;  %v9287_v60 = vld [vmem:[#allocation7 + $0x90] ss:$8 sps:$4 sm:$0xff]   ;;  %v9288_v61 = vld [vmem:[#allocation5 + $0x84] ss:$8 sps:$4 sm:$0xff]  }
  0x61   : > { %v9290_v62 = vld [vmem:[#allocation7 + $0x84] ss:$8 sps:$4 sm:$0xff]   ;;  %v9292_v63 = vld [vmem:[#allocation5 + $0x80] ss:$8 sps:$4 sm:$0xff]   ;;  %v9297_v2 = vld [vmem:[%s9713_s13 + $0x14] ss:$8 sps:$4 sm:$0xff]  }
  0x62   : > { %676 = vmatpush1.bf16.msra.mxu0 %v9232_v22  ;;  %v9293_v0 = vld [vmem:[#allocation7 + $0x80] ss:$8 sps:$4 sm:$0xff]   ;;  %v9299_v3 = vld [vmem:[%s9713_s13 + $0x10] ss:$8 sps:$4 sm:$0xff]   ;;  %v9300_v4 = vld [vmem:[%s9713_s13 + $0x24] ss:$8 sps:$4 sm:$0xff]  }
  0x63   : > { %1093 = vmatpush1.bf16.msra.mxu1 %v9233_v23  ;;  %677 = vmatprep.subr.bf16.mxu0 %v9234_v24  ;;  %v9294_v1 = vld [vmem:[%s9713_s13] ss:$8 sps:$4 sm:$0xff]   ;;  %v9303_v6 = vld [vmem:[%s9713_s13 + $0x34] ss:$8 sps:$4 sm:$0xff]   ;;  %v9305_v7 = vld [vmem:[%s9713_s13 + $0x30] ss:$8 sps:$4 sm:$0xff]  }
  0x64   : > { %1094 = vmatprep.subr.bf16.mxu1 %v9236_v25  ;;  %v9302_v5 = vld [vmem:[%s9713_s13 + $0x20] ss:$8 sps:$4 sm:$0xff]   ;;  %v9306_v8 = vld [vmem:[%s9713_s13 + $0x44] ss:$8 sps:$4 sm:$0xff]   ;;  %v9309_v10 = vld [vmem:[%s9713_s13 + $0x54] ss:$8 sps:$4 sm:$0xff]  }
  0x65   : > { %v9308_v9 = vld [vmem:[%s9713_s13 + $0x40] ss:$8 sps:$4 sm:$0xff]   ;;  %v9311_v11 = vld [vmem:[%s9713_s13 + $0x50] ss:$8 sps:$4 sm:$0xff]   ;;  %v9312_v12 = vld [vmem:[%s9713_s13 + $0x64] ss:$8 sps:$4 sm:$0xff]  }
  0x66   : > { %678 = vmatpush1.bf16.msra.mxu0 %v9238_v26  ;;  %v9314_v13 = vld [vmem:[%s9713_s13 + $0x60] ss:$8 sps:$4 sm:$0xff]   ;;  %v9315_v14 = vld [vmem:[%s9713_s13 + $0x74] ss:$8 sps:$4 sm:$0xff]   ;;  %v9317_v15 = vld [vmem:[%s9713_s13 + $0x70] ss:$8 sps:$4 sm:$0xff]  }
  0x67   : > { %1095 = vmatpush1.bf16.msra.mxu1 %v9239_v27  ;;  %679 = vmatprep.subr.bf16.mxu0 %v9240_v28  ;;  %v9318_v16 = vld [vmem:[%s9713_s13 + $0x84] ss:$8 sps:$4 sm:$0xff]   ;;  %v9320_v17 = vld [vmem:[%s9713_s13 + $0x80] ss:$8 sps:$4 sm:$0xff]   ;;  %v9321_v18 = vld [vmem:[%s9713_s13 + $0x94] ss:$8 sps:$4 sm:$0xff]  }
  0x68   : > { %1096 = vmatprep.subr.bf16.mxu1 %v9242_v29  ;;  %v9323_v19 = vld [vmem:[%s9713_s13 + $0x90] ss:$8 sps:$4 sm:$0xff]   ;;  %v9324_v20 = vld [vmem:[%s9713_s13 + $0xa4] ss:$8 sps:$4 sm:$0xff]   ;;  %v9326_v21 = vld [vmem:[%s9713_s13 + $0xa0] ss:$8 sps:$4 sm:$0xff]  }
  0x69   : > { %v9327_v22 = vld [vmem:[%s9713_s13 + $0xb4] ss:$8 sps:$4 sm:$0xff]   ;;  %v9329_v23 = vld [vmem:[%s9713_s13 + $0xb0] ss:$8 sps:$4 sm:$0xff]   ;;  %v9330_v24 = vld [vmem:[%s9713_s13 + $0xc4] ss:$8 sps:$4 sm:$0xff]  }
  0x6a   : > { %680 = vmatpush1.bf16.msra.mxu0 %v9244_v30  ;;  %v9332_v25 = vld [vmem:[%s9713_s13 + $0xc0] ss:$8 sps:$4 sm:$0xff]   ;;  %v9333_v26 = vld [vmem:[%s9713_s13 + $0xd4] ss:$8 sps:$4 sm:$0xff]   ;;  %v9335_v27 = vld [vmem:[%s9713_s13 + $0xd0] ss:$8 sps:$4 sm:$0xff]  }
  0x6b   : > { %1097 = vmatpush1.bf16.msra.mxu1 %v9245_v31  ;;  %681 = vmatprep.subr.bf16.mxu0 %v9246_v32  ;;  %v9336_v28 = vld [vmem:[%s9713_s13 + $0xe4] ss:$8 sps:$4 sm:$0xff]   ;;  %v9338_v29 = vld [vmem:[%s9713_s13 + $0xe0] ss:$8 sps:$4 sm:$0xff]   ;;  %v9339_v30 = vld [vmem:[%s9713_s13 + $0xf4] ss:$8 sps:$4 sm:$0xff]  }
  0x6c   : > { %1098 = vmatprep.subr.bf16.mxu1 %v9248_v33  ;;  %v9341_v31 = vld [vmem:[%s9713_s13 + $0xf0] ss:$8 sps:$4 sm:$0xff]   ;;  %v9543_v32 = vmov 1983009808   ;;  %s9846_s23 = scalar_lea.vmem [#allocation8], %s9709_s9  ;;  %s9879_s25 = scalar_lea.vmem [#allocation9], %s9709_s9 }
  0x6d   : > { %v1443_v33 = vunpack.c.l.s4 %v9543_v32  ;;  %s9101_s27 = sshll.u32 %s9528_s18, 12  ;;  %s8566_s8 = sshll.u32 %s9846_s23, 4  ;;  %s11122_s8 = int_to_ptr.vmem [resolvable:$true] %s8566_s8 }
  0x6e   : > { %682 = vmatpush2.bf16.msra.mxu0 %v9250_v34  ;;  %v1445_v34 = vlaneseq  ;;  %s11120_s24 = scalar_lea.hbm %s11222_s3, %s9101_s27  ;;  %s8546_s29 = scalar_lea.sflag [#allocation4], %s9706_s30 }
  0x6f   : > { %1099 = vmatpush2.bf16.msra.mxu1 %v9251_v35  ;;  %683 = vmatprep.subr.bf16.mxu0 %v9252_v36  ;;  %s9422_s22 = scalar_lea.vmem %s11122_s8, 4096  ;;  %s9546_s6 = smov [#allocation8]  }
  0x70   : > { %1100 = vmatprep.subr.bf16.mxu1 %v9254_v37  ;;  %v9544_v37 = vmov 1934713408   ;;  %p9423_p1 = scmp.ne.s32.totalorder %s11122_s8, %s9422_s22  ;;  %s9426_s5 = sshll.u32 %s9546_s6, 4  ;;  %s9427_s5 = int_to_ptr.vmem [resolvable:$false] %s9426_s5 }
  0x71   : > { %s9428_s10 = scalar_lea.vmem %s9427_s5, 8192  ;;  %p9429_p8 = scmp.lt.s32.totalorder %s11122_s8, %s9427_s5 }
  0x72   : > { %684 = vmatpush2.bf16.msra.mxu0 %v9256_v38  ;;  %v1458_v38 = vunpack.c.l.s4 %v9544_v37  ;;  %p9424_p4 = pnand %p9423_p1, %p9676_p3  ;;  %p9430_p10 = scmp.lt.s32.totalorder %s9428_s10, %s9422_s22 }
  0x73   : > { %1101 = vmatpush2.bf16.msra.mxu1 %v9257_v39  ;;  %685 = vmatprep.subr.bf16.mxu0 %v9258_v40 }
  0x74   : > { %1102 = vmatprep.subr.bf16.mxu1 %v9260_v41  ;;  %v1444_v41 = vunpack.c.0.s8 %v1443_v33  ;;  %p9425_p6 = pneg %p9424_p4  ;;  %p9431_p11 = por %p9430_p10, %p9429_p8 }
  0x76   : > { %686 = vmatpush2.bf16.msra.mxu0 %v9262_v42  ;;  %v1446_v42 = vshrl.u32 %v1445_v34, 7  ;;  %p9432_p2 = pnand %p9431_p11, %p9425_p6 }
  0x77   : > { %1103 = vmatpush2.bf16.msra.mxu1 %v9263_v43  ;;  %687 = vmatprep.subr.bf16.mxu0 %v9264_v44 }
  0x78   : > { %1104 = vmatprep.subr.bf16.mxu1 %v9266_v45  ;;  %v1459_v45 = vunpack.c.0.s8 %v1458_v38 }
  0x7a   : > { %688 = vmatpush2.bf16.msra.mxu0 %v9268_v46 }
  0x7b   : > { %1105 = vmatpush2.bf16.msra.mxu1 %v9269_v47  ;;  %689 = vmatprep.subr.bf16.mxu0 %v9270_v49 }
  0x7c   : > { %1106 = vmatprep.subr.bf16.mxu1 %v9272_v50 }
  0x7e   : > { %690 = vmatpush2.bf16.msra.mxu0 %v9274_v51  ;;  %v9545_v51 = vmov 0  }
  0x7f   : > { %1107 = vmatpush2.bf16.msra.mxu1 %v9275_v52  ;;  %691 = vmatprep.subr.bf16.mxu0 %v9276_v53  ;;  %v9757_v52 = vpack.i.b16 %v9545_v51, %v9545_v51  ;;  %v9759_v53 = vsub.s32 %v1444_v41, %v1446_v42 }
  0x80   : > { %1108 = vmatprep.subr.bf16.mxu1 %v9278_v54 }
  0x82   : > { %692 = vmatpush2.bf16.msra.mxu0 %v9280_v55 }
  0x83   : > { %1109 = vmatpush2.bf16.msra.mxu1 %v9281_v56  ;;  %693 = vmatprep.subr.bf16.mxu0 %v9282_v57  ;;  %v9761_v56 = vsub.s32 %v1459_v45, %v1446_v42 }
  0x84   : > { %1110 = vmatprep.subr.bf16.mxu1 %v9284_v58 }
  0x86   : > { %694 = vmatpush2.bf16.msra.mxu0 %v9286_v59 }
  0x87   : > { %1111 = vmatpush2.bf16.msra.mxu1 %v9287_v60  ;;  %695 = vmatprep.subr.bf16.mxu0 %v9288_v61 }
  0x88   : > { %1112 = vmatprep.subr.bf16.mxu1 %v9290_v62 }
  0x8a   : > { %696 = vmatpush2.bf16.msra.mxu0 %v9292_v63 }
  0x8b   : > { %1113 = vmatpush2.bf16.msra.mxu1 %v9293_v0 }
  0x8d   : > { %698 = vmatmul.mubr.bf16.vlgmr.msra.gmra.mxu0 %v9294_v1 }
  0x8e   : > { %1115 = vmatmul.mubr.bf16.vlgmr.msra.gmra.mxu1 %v9294_v1  ;;  %707 = vmatprep.mubr.bf16.mxu0 %v9297_v2 }
  0x8f   : > { %1124 = vmatprep.mubr.bf16.mxu1 %v9297_v2 }
  0x95   : > { %708 = vmatmul.mubr.bf16.gmra.mxu0 %v9299_v3 }
  0x96   : > { %1125 = vmatmul.mubr.bf16.gmra.mxu1 %v9299_v3  ;;  %717 = vmatprep.mubr.bf16.mxu0 %v9300_v4 }
  0x97   : > { %1134 = vmatprep.mubr.bf16.mxu1 %v9300_v4 }
  0x9d   : > { %718 = vmatmul.mubr.bf16.gmra.mxu0 %v9302_v5 }
  0x9e   : > { %1135 = vmatmul.mubr.bf16.gmra.mxu1 %v9302_v5  ;;  %727 = vmatprep.mubr.bf16.mxu0 %v9303_v6 }
  0x9f   : > { %1144 = vmatprep.mubr.bf16.mxu1 %v9303_v6 }
  0xa5   : > { %728 = vmatmul.mubr.bf16.gmra.mxu0 %v9305_v7 }
  0xa6   : > { %1145 = vmatmul.mubr.bf16.gmra.mxu1 %v9305_v7  ;;  %737 = vmatprep.mubr.bf16.mxu0 %v9306_v8 }
  0xa7   : > { %1154 = vmatprep.mubr.bf16.mxu1 %v9306_v8 }
  0xad   : > { %738 = vmatmul.mubr.bf16.gmra.mxu0 %v9308_v9 }
  0xae   : > { %1155 = vmatmul.mubr.bf16.gmra.mxu1 %v9308_v9  ;;  %747 = vmatprep.mubr.bf16.mxu0 %v9309_v10 }
  0xaf   : > { %1164 = vmatprep.mubr.bf16.mxu1 %v9309_v10 }
  0xb5   : > { %748 = vmatmul.mubr.bf16.gmra.mxu0 %v9311_v11 }
  0xb6   : > { %1165 = vmatmul.mubr.bf16.gmra.mxu1 %v9311_v11  ;;  %757 = vmatprep.mubr.bf16.mxu0 %v9312_v12 }
  0xb7   : > { %1174 = vmatprep.mubr.bf16.mxu1 %v9312_v12 }
  0xbd   : > { %758 = vmatmul.mubr.bf16.gmra.mxu0 %v9314_v13 }
  0xbe   : > { %1175 = vmatmul.mubr.bf16.gmra.mxu1 %v9314_v13  ;;  %767 = vmatprep.mubr.bf16.mxu0 %v9315_v14 }
  0xbf   : > { %1184 = vmatprep.mubr.bf16.mxu1 %v9315_v14 }
  0xc5   : > { %768 = vmatmul.mubr.bf16.gmra.mxu0 %v9317_v15 }
  0xc6   : > { %1185 = vmatmul.mubr.bf16.gmra.mxu1 %v9317_v15  ;;  %777 = vmatprep.mubr.bf16.mxu0 %v9318_v16 }
  0xc7   : > { %1194 = vmatprep.mubr.bf16.mxu1 %v9318_v16 }
  0xcd   : > { %778 = vmatmul.mubr.bf16.gmra.mxu0 %v9320_v17 }
  0xce   : > { %1195 = vmatmul.mubr.bf16.gmra.mxu1 %v9320_v17  ;;  %787 = vmatprep.mubr.bf16.mxu0 %v9321_v18 }
  0xcf   : > { %1204 = vmatprep.mubr.bf16.mxu1 %v9321_v18 }
  0xd5   : > { %788 = vmatmul.mubr.bf16.gmra.mxu0 %v9323_v19 }
  0xd6   : > { %1205 = vmatmul.mubr.bf16.gmra.mxu1 %v9323_v19  ;;  %797 = vmatprep.mubr.bf16.mxu0 %v9324_v20 }
  0xd7   : > { %1214 = vmatprep.mubr.bf16.mxu1 %v9324_v20 }
  0xdd   : > { %798 = vmatmul.mubr.bf16.gmra.mxu0 %v9326_v21 }
  0xde   : > { %1215 = vmatmul.mubr.bf16.gmra.mxu1 %v9326_v21  ;;  %807 = vmatprep.mubr.bf16.mxu0 %v9327_v22 }
  0xdf   : > { %1224 = vmatprep.mubr.bf16.mxu1 %v9327_v22 }
  0xe5   : > { %808 = vmatmul.mubr.bf16.gmra.mxu0 %v9329_v23 }
  0xe6   : > { %1225 = vmatmul.mubr.bf16.gmra.mxu1 %v9329_v23  ;;  %817 = vmatprep.mubr.bf16.mxu0 %v9330_v24 }
  0xe7   : > { %1234 = vmatprep.mubr.bf16.mxu1 %v9330_v24 }
  0xed   : > { %818 = vmatmul.mubr.bf16.gmra.mxu0 %v9332_v25 }
  0xee   : > { %1235 = vmatmul.mubr.bf16.gmra.mxu1 %v9332_v25  ;;  %827 = vmatprep.mubr.bf16.mxu0 %v9333_v26 }
  0xef   : > { %1244 = vmatprep.mubr.bf16.mxu1 %v9333_v26 }
  0xf5   : > { %828 = vmatmul.mubr.bf16.gmra.mxu0 %v9335_v27 }
  0xf6   : > { %1245 = vmatmul.mubr.bf16.gmra.mxu1 %v9335_v27  ;;  %837 = vmatprep.mubr.bf16.mxu0 %v9336_v28 }
  0xf7   : > { %1254 = vmatprep.mubr.bf16.mxu1 %v9336_v28 }
  0xfd   : > { %838 = vmatmul.mubr.bf16.gmra.mxu0 %v9338_v29 }
  0xfe   : > { %1255 = vmatmul.mubr.bf16.gmra.mxu1 %v9338_v29  ;;  %847 = vmatprep.mubr.bf16.mxu0 %v9339_v30 }
  0xff   : > { %1264 = vmatprep.mubr.bf16.mxu1 %v9339_v30 }
 0x105   : > { %848 = vmatmul.mubr.bf16.gmra.mxu0 %v9341_v31 }
 0x106   : > { %1265 = vmatmul.mubr.bf16.gmra.mxu1 %v9341_v31 }
 0x14d   : > { %v699_v35 = vpop.f32.mrf.mxu0 }
 0x14e   : > { %v1116_v36 = vpop.f32.mrf.mxu1 }
 0x14f   : > { %v701_v39 = vpop.f32.mrf.mxu0 }
 0x150   : > { %v1118_v40 = vpop.f32.mrf.mxu1 }
 0x151   : > { %v703_v43 = vpop.f32.mrf.mxu0 }
 0x152   : > { %v1120_v44 = vpop.f32.mrf.mxu1  ;;  %v858_v46 = vpack.c.bf16 %v703_v43, %v699_v35 }
 0x153   : > { %v1275_v47 = vpack.c.bf16 %v1120_v44, %v1116_v36  ;;  %v705_v48 = vpop.f32.mrf.mxu0 }
 0x154   : > { %v1122_v49 = vpop.f32.mrf.mxu1  ;;  %v859_v50 = vpack.c.bf16 %v705_v48, %v701_v39  ;;  %v1311_v55 = vshrl.u32 %v858_v46, 16 }
 0x155   : > { %v1276_v54 = vpack.c.bf16 %v1122_v49, %v1118_v40  ;;  %v4933_v61 = vshrl.u32 %v1275_v47, 16  ;;  %v9763_v62 = vpop.f32.mrf.mxu0 }
 0x156   : > { %v1309_v57 = vpack.i.b16 %v859_v50, %v858_v46  ;;  %v1312_v58 = vshrl.u32 %v859_v50, 16  ;;  %v9767_v2 = vpop.f32.mrf.mxu1 }
 0x157   : > { %v4931_v59 = vpack.i.b16 %v1276_v54, %v1275_v47  ;;  %v4934_v60 = vshrl.u32 %v1276_v54, 16  ;;  %v9781_v14 = vpop.f32.mrf.mxu0 }
 0x158   : > { %v1313_v63 = vpack.i.b16 %v1312_v58, %v1311_v55  ;;  %v1441_v0 = vcombine.high %v1309_v57, %v9757_v52  ;;  %v1448_v1 = vrot.slane %v1309_v57, %v9759_v53  ;;  %v9787_v19 = vpop.f32.mrf.mxu1 }
 0x159   : > { %v4935_v3 = vpack.i.b16 %v4934_v60, %v4933_v61  ;;  %v5057_v4 = vcombine.high %v4931_v59, %v9757_v52  ;;  %v5064_v5 = vrot.slane %v4931_v59, %v9759_v53  ;;  %v9799_v32 = vpop.f32.mrf.mxu0 }
 0x15a   : > { %v1455_v6 = vrot.slane %v1441_v0, %v9759_v53  ;;  %v1456_v7 = vcombine.high %v1448_v1, %v9545_v51  ;;  %v1463_v8 = vrot.slane %v1448_v1, %v9761_v56  ;;  %v1490_v9 = vcombine.high %v1313_v63, %v9757_v52  ;;  %v9803_v37 = vpop.f32.mrf.mxu1 }
 0x15b   : > { %v1497_v10 = vrot.slane %v1313_v63, %v9759_v53  ;;  %v5071_v11 = vrot.slane %v5057_v4, %v9759_v53  ;;  %v5072_v12 = vcombine.high %v5064_v5, %v9545_v51  ;;  %v9779_v13 = vrot.slane %v5064_v5, %v9761_v56  ;;  %v715_v50 = vpop.f32.mrf.mxu0 }
 0x15c   : > { %v1470_v15 = vrot.slane %v1456_v7, %v9761_v56  ;;  %v1471_v16 = vcombine.high %v1455_v6, %v9545_v51  ;;  %v1478_v17 = vrot.slane %v1455_v6, %v9761_v56  ;;  %v1504_v18 = vrot.slane %v1490_v9, %v9759_v53  ;;  %v1132_v59 = vpop.f32.mrf.mxu1 }
 0x15d   : > { %v1505_v20 = vcombine.high %v1497_v10, %v9545_v51  ;;  %v1512_v21 = vrot.slane %v1497_v10, %v9761_v56  ;;  %v5086_v22 = vrot.slane %v5072_v12, %v9761_v56  ;;  %v5087_v23 = vcombine.high %v5071_v11, %v9545_v51  ;;  %v719_v10 = vpop.f32.mrf.mxu0 }
 0x15e   : > { %v1485_v24 = vrot.slane %v1471_v16, %v9761_v56  ;;  %v1520_v25 = vcombine.high %v1504_v18, %v9545_v51  ;;  %v1527_v26 = vrot.slane %v1504_v18, %v9761_v56  ;;  %v3009_v27 = vcombine.low %v1463_v8, %v1470_v15 }
 0x15f   : > { %v1519_v28 = vrot.slane %v1505_v20, %v9761_v56  ;;  %v8836_v29 = vcombine.high %v1463_v8, %v1470_v15  ;;  %v5094_v30 = vrot.slane %v5071_v11, %v9761_v56  ;;  %v5101_v31 = vrot.slane %v5087_v23, %v9761_v56 }
 0x160   : > { %v1534_v33 = vrot.slane %v1520_v25, %v9761_v56  ;;  %v3016_v34 = vrot.slane %v3009_v27, %v9759_v53  ;;  %v3025_v35 = vcombine.low %v1478_v17, %v1485_v24  ;;  %v8837_v36 = vcombine.high %v1478_v17, %v1485_v24  ;;  %v1136_v17 = vpop.f32.mrf.mxu1 }
 0x161   : > { %v3024_v38 = vrot.slane %v8836_v29, %v9759_v53  ;;  %v3058_v39 = vcombine.low %v1512_v21, %v1519_v28  ;;  %v8838_v40 = vcombine.high %v1512_v21, %v1519_v28  ;;  %v5106_v41 = vcombine.high %v4935_v3, %v9757_v52 }
 0x162   : > { %v3032_v42 = vrot.slane %v3025_v35, %v9759_v53  ;;  %v3040_v43 = vrot.slane %v8837_v36, %v9759_v53  ;;  %v3074_v44 = vcombine.low %v1527_v26, %v1534_v33  ;;  %v8839_v45 = vcombine.high %v1527_v26, %v1534_v33  ;;  %v9832_v33 = vpop.f32.mrf.mxu0 }
 0x163   : > { %v3041_v46 = vcombine.low %v3016_v34, %v3024_v38  ;;  %v3065_v47 = vrot.slane %v3058_v39, %v9759_v53  ;;  %v3073_v48 = vrot.slane %v8838_v40, %v9759_v53  ;;  %v5113_v49 = vrot.slane %v4935_v3, %v9759_v53 }
 0x164   : > { %v3049_v54 = vcombine.low %v3032_v42, %v3040_v43  ;;  %v3081_v55 = vrot.slane %v3074_v44, %v9759_v53  ;;  %v3089_v57 = vrot.slane %v8839_v45, %v9759_v53  ;;  %v5120_v58 = vrot.slane %v5106_v41, %v9759_v53 }
 0x165   : > { %v3048_v60 = vrot.slane %v3041_v46, %v9761_v56  ;;  %v3090_v61 = vcombine.low %v3065_v47, %v3073_v48  ;;  %v5121_v63 = vcombine.high %v5113_v49, %v9545_v51  ;;  %v5128_v0 = vrot.slane %v5113_v49, %v9761_v56 }
 0x166   : > { %v3056_v1 = vrot.slane %v3049_v54, %v9761_v56  ;;  %v3098_v4 = vcombine.low %v3081_v55, %v3089_v57  ;;  %v5136_v3 = vcombine.high %v5120_v58, %v9545_v51  ;;  %v5143_v5 = vrot.slane %v5120_v58, %v9761_v56  ;;  %v723_v54 = vpop.f32.mrf.mxu0 }
 0x167   : > { %v3097_v6 = vrot.slane %v3090_v61, %v9761_v56  ;;  %v5135_v7 = vrot.slane %v5121_v63, %v9761_v56  ;;  %v6625_v8 = vcombine.low %v9779_v13, %v5086_v22  ;;  %v8964_v9 = vcombine.high %v9779_v13, %v5086_v22 }
 0x168   : > { %v3057_v11 = vcombine.low %v3048_v60, %v3056_v1  ;;  %v3105_v12 = vrot.slane %v3098_v4, %v9761_v56  ;;  %v5150_v15 = vrot.slane %v5136_v3, %v9761_v56  ;;  %v6641_v16 = vcombine.low %v5094_v30, %v5101_v31 }
 0x169   : > { %v6632_v18 = vrot.slane %v6625_v8, %v9759_v53  ;;  %v6640_v20 = vrot.slane %v8964_v9, %v9759_v53  ;;  %v8965_v21 = vcombine.high %v5094_v30, %v5101_v31  ;;  %v6674_v23 = vcombine.low %v5128_v0, %v5135_v7  ;;  %v9835_v30 = vpop.f32.mrf.mxu1 }
 0x16a   : > { %v3106_v24 = vcombine.low %v3097_v6, %v3105_v12  ;;  %v4580_v25 = vshrl.u32 %v3057_v11, 16  ;;  %v6648_v26 = vrot.slane %v6641_v16, %v9759_v53  ;;  %v8966_v27 = vcombine.high %v5128_v0, %v5135_v7 }
 0x16b   : > { %v6656_v13 = vrot.slane %v8965_v21, %v9759_v53  ;;  %v6657_v22 = vcombine.low %v6632_v18, %v6640_v20  ;;  %v6681_v28 = vrot.slane %v6674_v23, %v9759_v53  ;;  %v6690_v29 = vcombine.low %v5143_v5, %v5150_v15  ;;  %v1140_v58 = vpop.f32.mrf.mxu1 }
 0x16c   : > { %v4579_v34 = vpack.i.b16 %v3106_v24, %v3057_v11  ;;  %v4581_v35 = vshrl.u32 %v3106_v24, 16  ;;  %v6689_v36 = vrot.slane %v8966_v27, %v9759_v53  ;;  %v8967_v38 = vcombine.high %v5143_v5, %v5150_v15 }
 0x16d   : > { %v6664_v31 = vrot.slane %v6657_v22, %v9761_v56  ;;  %v6665_v39 = vcombine.low %v6648_v26, %v6656_v13  ;;  %v6697_v40 = vrot.slane %v6690_v29, %v9759_v53  ;;  %v860_v41 = vpack.c.bf16 %v9799_v32, %v9763_v62 }
 0x16e   : > { %v4582_v42 = vpack.i.b16 %v4581_v35, %v4580_v25  ;;  %v8900_v43 = vcombine.low %v4579_v34, %v4579_v34  ;;  %v8901_v44 = vcombine.high %v4579_v34, %v4579_v34  ;;  %v6705_v45 = vrot.slane %v8967_v38, %v9759_v53 }
 0x16f   : > { %v6672_v46 = vrot.slane %v6665_v39, %v9761_v56  ;;  %v6706_v47 = vcombine.low %v6681_v28, %v6689_v36  ;;  %v1325_v48 = vshrl.u32 %v860_v41, 16  ;;  %v1277_v49 = vpack.c.bf16 %v9803_v37, %v9767_v2 }
 0x170   : > { %v8932_v55 = vcombine.low %v4582_v42, %v4582_v42  ;;  %v8933_v57 = vcombine.high %v4582_v42, %v4582_v42  ;;  %4865 = vst [vmem:[%s9846_s23] sm:$0xf] %v8900_v43  ;;  %4866 = vst [vmem:[%s9846_s23 + $0x4] sm:$0xf] %v8901_v44  ;;  %v6714_v62 = vcombine.low %v6697_v40, %v6705_v45 }
 0x171   : > { %v861_v32 = vpack.c.bf16 %v715_v50, %v9781_v14  ;;  %v6673_v60 = vcombine.low %v6664_v31, %v6672_v46  ;;  %v6713_v61 = vrot.slane %v6706_v47, %v9761_v56  ;;  %v4941_v63 = vshrl.u32 %v1277_v49, 16 }
 0x172   : > { %v1278_v2 = vpack.c.bf16 %v1132_v59, %v9787_v19  ;;  %4897 = vst [vmem:[%s9846_s23 + $0x80] sm:$0xf] %v8932_v55  ;;  %4898 = vst [vmem:[%s9846_s23 + $0x84] sm:$0xf] %v8933_v57  ;;  %v6721_v37 = vrot.slane %v6714_v62, %v9761_v56  ;;  %v9856_v4 = vpack.c.bf16 %v723_v54, %v719_v10 }
 0x173   : > { %v1323_v0 = vpack.i.b16 %v861_v32, %v860_v41  ;;  %v1326_v1 = vshrl.u32 %v861_v32, 16  ;;  %v8196_v3 = vshrl.u32 %v6673_v60, 16  ;;  %v9858_v7 = vpack.c.bf16 %v1140_v58, %v1136_v17 }
 0x174   : > { %v4939_v5 = vpack.i.b16 %v1278_v2, %v1277_v49  ;;  %v4942_v6 = vshrl.u32 %v1278_v2, 16  ;;  %v6722_v14 = vcombine.low %v6713_v61, %v6721_v37  ;;  %v1333_v10 = vshrl.u32 %v9856_v4, 16 }
 0x175   : > { %v1327_v50 = vpack.i.b16 %v1326_v1, %v1325_v48  ;;  %v1539_v8 = vcombine.high %v1323_v0, %v9757_v52  ;;  %v1546_v9 = vrot.slane %v1323_v0, %v9759_v53 }
 0x176   : > { %v9862_v19 = vpack.i.b16 %v4942_v6, %v4941_v63  ;;  %v5155_v59 = vcombine.high %v4939_v5, %v9757_v52  ;;  %v5162_v11 = vrot.slane %v4939_v5, %v9759_v53  ;;  %v8195_v12 = vpack.i.b16 %v6722_v14, %v6673_v60 }
 0x177   : > { %v8197_v15 = vshrl.u32 %v6722_v14, 16  ;;  %v1553_v16 = vrot.slane %v1539_v8, %v9759_v53  ;;  %v1554_v17 = vcombine.high %v1546_v9, %v9545_v51  ;;  %v1561_v18 = vrot.slane %v1546_v9, %v9761_v56 }
 0x178   : > { %v1588_v20 = vcombine.high %v1327_v50, %v9757_v52  ;;  %v1595_v21 = vrot.slane %v1327_v50, %v9759_v53  ;;  %v5169_v23 = vrot.slane %v5155_v59, %v9759_v53  ;;  %v9028_v25 = vcombine.low %v8195_v12, %v8195_v12 }
 0x179   : > { %v8198_v24 = vpack.i.b16 %v8197_v15, %v8196_v3  ;;  %v9029_v26 = vcombine.high %v8195_v12, %v8195_v12  ;;  %v1568_v27 = vrot.slane %v1554_v17, %v9761_v56  ;;  %v1569_v13 = vcombine.high %v1553_v16, %v9545_v51 }
 0x17a   : > { %v1576_v22 = vrot.slane %v1553_v16, %v9761_v56  ;;  %v1602_v28 = vrot.slane %v1588_v20, %v9759_v53  ;;  %v1603_v29 = vcombine.high %v1595_v21, %v9545_v51  ;;  %8481 = vst [vmem:[%s9879_s25] sm:$0xf] %v9028_v25  ;;  %v1610_v36 = vrot.slane %v1595_v21, %v9761_v56 }
 0x17b   : > { %v9060_v34 = vcombine.low %v8198_v24, %v8198_v24  ;;  %v9061_v35 = vcombine.high %v8198_v24, %v8198_v24  ;;  %8482 = vst [vmem:[%s9879_s25 + $0x4] sm:$0xf] %v9029_v26  ;;  %v3107_v38 = vcombine.low %v1561_v18, %v1568_v27  ;;  %v1583_v31 = vrot.slane %v1569_v13, %v9761_v56 }
 0x17c   : > { %v1617_v39 = vrot.slane %v1603_v29, %v9761_v56  ;;  %v1618_v40 = vcombine.high %v1602_v28, %v9545_v51  ;;  %v1625_v41 = vrot.slane %v1602_v28, %v9761_v56  ;;  %v8840_v43 = vcombine.high %v1561_v18, %v1568_v27 }
 0x17d   : > { %8513 = vst [vmem:[%s9879_s25 + $0x80] sm:$0xf] %v9060_v34  ;;  %8514 = vst [vmem:[%s9879_s25 + $0x84] sm:$0xf] %v9061_v35  ;;  %v3114_v42 = vrot.slane %v3107_v38, %v9759_v53  ;;  %v5170_v44 = vcombine.high %v5162_v11, %v9545_v51  ;;  %v5177_v45 = vrot.slane %v5162_v11, %v9761_v56  ;;  %v4949_v34 = vshrl.u32 %v9858_v7, 16 }
 0x17e   : > { %v1632_v46 = vrot.slane %v1618_v40, %v9761_v56  ;;  %v3123_v47 = vcombine.low %v1576_v22, %v1583_v31  ;;  %v8841_v48 = vcombine.high %v1576_v22, %v1583_v31  ;;  %v3156_v49 = vcombine.low %v1610_v36, %v1617_v39 }
 0x17f   : > { %v3122_v54 = vrot.slane %v8840_v43, %v9759_v53  ;;  %v8842_v55 = vcombine.high %v1610_v36, %v1617_v39  ;;  %v5184_v57 = vrot.slane %v5170_v44, %v9761_v56  ;;  %v5185_v62 = vcombine.high %v5169_v23, %v9545_v51  ;;  %v725_v43 = vpop.f32.mrf.mxu0 }
 0x180   : > { %v3130_v32 = vrot.slane %v3123_v47, %v9759_v53  ;;  %v3138_v58 = vrot.slane %v8841_v48, %v9759_v53  ;;  %v3163_v60 = vrot.slane %v3156_v49, %v9759_v53  ;;  %v3172_v61 = vcombine.low %v1625_v41, %v1632_v46  ;;  %v1142_v48 = vpop.f32.mrf.mxu1 }
 0x181   : > { %v3139_v63 = vcombine.low %v3114_v42, %v3122_v54  ;;  %v3171_v2 = vrot.slane %v8842_v55, %v9759_v53  ;;  %v8843_v37 = vcombine.high %v1625_v41, %v1632_v46  ;;  %v5192_v0 = vrot.slane %v5169_v23, %v9761_v56 }
 0x182   : > { %v3147_v1 = vcombine.low %v3130_v32, %v3138_v58  ;;  %v3179_v3 = vrot.slane %v3172_v61, %v9759_v53  ;;  %v5199_v5 = vrot.slane %v5185_v62, %v9761_v56  ;;  %v5204_v6 = vcombine.high %v9862_v19, %v9757_v52 }
 0x183   : > { %v3146_v14 = vrot.slane %v3139_v63, %v9761_v56  ;;  %v3187_v50 = vrot.slane %v8843_v37, %v9759_v53  ;;  %v3188_v8 = vcombine.low %v3163_v60, %v3171_v2  ;;  %v5211_v9 = vrot.slane %v9862_v19, %v9759_v53 }
 0x184   : > { %v3154_v59 = vrot.slane %v3147_v1, %v9761_v56  ;;  %v5218_v11 = vrot.slane %v5204_v6, %v9759_v53  ;;  %v6723_v12 = vcombine.low %v5177_v45, %v5184_v57  ;;  %v8968_v15 = vcombine.high %v5177_v45, %v5184_v57 }
 0x185   : > { %v3195_v16 = vrot.slane %v3188_v8, %v9761_v56  ;;  %v3196_v17 = vcombine.low %v3179_v3, %v3187_v50  ;;  %v5219_v18 = vcombine.high %v5211_v9, %v9545_v51  ;;  %v5226_v20 = vrot.slane %v5211_v9, %v9761_v56 }
 0x186   : > { %v3155_v21 = vcombine.low %v3146_v14, %v3154_v59  ;;  %v5234_v23 = vcombine.high %v5218_v11, %v9545_v51  ;;  %v5241_v24 = vrot.slane %v5218_v11, %v9761_v56  ;;  %v6730_v19 = vrot.slane %v6723_v12, %v9759_v53 }
 0x187   : > { %v3203_v25 = vrot.slane %v3196_v17, %v9761_v56  ;;  %v5233_v26 = vrot.slane %v5219_v18, %v9761_v56  ;;  %v6738_v27 = vrot.slane %v8968_v15, %v9759_v53  ;;  %v6739_v13 = vcombine.low %v5192_v0, %v5199_v5  ;;  %v9947_v17 = vpop.f32.mrf.mxu0 }
 0x188   : > { %v4586_v22 = vshrl.u32 %v3155_v21, 16  ;;  %v5248_v28 = vrot.slane %v5234_v23, %v9761_v56  ;;  %v8969_v29 = vcombine.high %v5192_v0, %v5199_v5  ;;  %v863_v60 = vpack.c.bf16 %v725_v43, %v9832_v33 }
 0x189   : > { %v3204_v35 = vcombine.low %v3195_v16, %v3203_v25  ;;  %v6746_v36 = vrot.slane %v6739_v13, %v9759_v53  ;;  %v6755_v38 = vcombine.low %v6730_v19, %v6738_v27  ;;  %v6772_v31 = vcombine.low %v5226_v20, %v5233_v26 }
 0x18a   : > { %v6754_v39 = vrot.slane %v8969_v29, %v9759_v53  ;;  %v8970_v40 = vcombine.high %v5226_v20, %v5233_v26  ;;  %v6788_v41 = vcombine.low %v5241_v24, %v5248_v28  ;;  %v8971_v42 = vcombine.high %v5241_v24, %v5248_v28 }
 0x18b   : > { %v4585_v44 = vpack.i.b16 %v3204_v35, %v3155_v21  ;;  %v4587_v45 = vshrl.u32 %v3204_v35, 16  ;;  %v6762_v46 = vrot.slane %v6755_v38, %v9761_v56  ;;  %v6779_v47 = vrot.slane %v6772_v31, %v9759_v53  ;;  %v9959_v35 = vpop.f32.mrf.mxu0 }
 0x18c   : > { %v6763_v49 = vcombine.low %v6746_v36, %v6754_v39  ;;  %v6787_v54 = vrot.slane %v8970_v40, %v9759_v53  ;;  %v6795_v55 = vrot.slane %v6788_v41, %v9759_v53  ;;  %v6803_v57 = vrot.slane %v8971_v42, %v9759_v53 }
 0x18d   : > { %v4588_v62 = vpack.i.b16 %v4587_v45, %v4586_v22  ;;  %v8902_v32 = vcombine.low %v4585_v44, %v4585_v44  ;;  %v8903_v58 = vcombine.high %v4585_v44, %v4585_v44  ;;  %v1280_v37 = vpack.c.bf16 %v1142_v48, %v9835_v30 }
 0x18e   : > { %v6770_v61 = vrot.slane %v6763_v49, %v9761_v56  ;;  %v6804_v63 = vcombine.low %v6779_v47, %v6787_v54  ;;  %v6812_v2 = vcombine.low %v6795_v55, %v6803_v57  ;;  %v1331_v3 = vpack.i.b16 %v863_v60, %v9856_v4  ;;  %v733_v55 = vpop.f32.mrf.mxu0 }
 0x18f   : > { %v8934_v0 = vcombine.low %v4588_v62, %v4588_v62  ;;  %v8935_v1 = vcombine.high %v4588_v62, %v4588_v62  ;;  %4867 = vst [vmem:[%s9846_s23 + $0x8] sm:$0xf] %v8902_v32  ;;  %4868 = vst [vmem:[%s9846_s23 + $0xc] sm:$0xf] %v8903_v58  ;;  %v1334_v5 = vshrl.u32 %v863_v60, 16  ;;  %v4947_v33 = vpack.i.b16 %v1280_v37, %v9858_v7 }
 0x190   : > { %v6771_v6 = vcombine.low %v6762_v46, %v6770_v61  ;;  %v6811_v14 = vrot.slane %v6804_v63, %v9761_v56  ;;  %v6819_v50 = vrot.slane %v6812_v2, %v9761_v56  ;;  %v1637_v30 = vcombine.high %v1331_v3, %v9757_v52 }
 0x191   : > { %4899 = vst [vmem:[%s9846_s23 + $0x88] sm:$0xf] %v8934_v0  ;;  %4900 = vst [vmem:[%s9846_s23 + $0x8c] sm:$0xf] %v8935_v1  ;;  %v1335_v8 = vpack.i.b16 %v1334_v5, %v1333_v10  ;;  %v1644_v9 = vrot.slane %v1331_v3, %v9759_v53  ;;  %v4950_v59 = vshrl.u32 %v1280_v37, 16  ;;  %v5253_v15 = vcombine.high %v4947_v33, %v9757_v52  ;;  %v1146_v3 = vpop.f32.mrf.mxu1 }
 0x192   : > { %v6820_v11 = vcombine.low %v6811_v14, %v6819_v50  ;;  %v8202_v12 = vshrl.u32 %v6771_v6, 16  ;;  %v5260_v16 = vrot.slane %v4947_v33, %v9759_v53  ;;  %v1651_v7 = vrot.slane %v1637_v30, %v9759_v53  ;;  %v735_v33 = vpop.f32.mrf.mxu0 }
 0x193   : > { %v1652_v18 = vcombine.high %v1644_v9, %v9545_v51  ;;  %v1659_v4 = vrot.slane %v1644_v9, %v9761_v56  ;;  %v1686_v10 = vcombine.high %v1335_v8, %v9757_v52  ;;  %v1693_v23 = vrot.slane %v1335_v8, %v9759_v53 }
 0x194   : > { %v8201_v20 = vpack.i.b16 %v6820_v11, %v6771_v6  ;;  %v8203_v21 = vshrl.u32 %v6820_v11, 16  ;;  %v4951_v24 = vpack.i.b16 %v4950_v59, %v4949_v34  ;;  %v1667_v25 = vcombine.high %v1651_v7, %v9545_v51 }
 0x195   : > { %v1666_v19 = vrot.slane %v1652_v18, %v9761_v56  ;;  %v1674_v26 = vrot.slane %v1651_v7, %v9761_v56  ;;  %v1700_v27 = vrot.slane %v1686_v10, %v9759_v53  ;;  %v1701_v29 = vcombine.high %v1693_v23, %v9545_v51 }
 0x196   : > { %v8204_v13 = vpack.i.b16 %v8203_v21, %v8202_v12  ;;  %v9030_v22 = vcombine.low %v8201_v20, %v8201_v20  ;;  %v9031_v28 = vcombine.high %v8201_v20, %v8201_v20  ;;  %v1681_v34 = vrot.slane %v1667_v25, %v9761_v56  ;;  %v1148_v21 = vpop.f32.mrf.mxu1 }
 0x197   : > { %v1708_v36 = vrot.slane %v1693_v23, %v9761_v56  ;;  %v1716_v38 = vcombine.high %v1700_v27, %v9545_v51  ;;  %v1723_v31 = vrot.slane %v1700_v27, %v9761_v56  ;;  %v1715_v41 = vrot.slane %v1701_v29, %v9761_v56 }
 0x198   : > { %v9062_v39 = vcombine.low %v8204_v13, %v8204_v13  ;;  %v9063_v40 = vcombine.high %v8204_v13, %v8204_v13  ;;  %8483 = vst [vmem:[%s9879_s25 + $0x8] sm:$0xf] %v9030_v22  ;;  %8484 = vst [vmem:[%s9879_s25 + $0xc] sm:$0xf] %v9031_v28  ;;  %v3205_v42 = vcombine.low %v1659_v4, %v1666_v19 }
 0x199   : > { %v1730_v43 = vrot.slane %v1716_v38, %v9761_v56  ;;  %v8844_v44 = vcombine.high %v1659_v4, %v1666_v19  ;;  %v3221_v45 = vcombine.low %v1674_v26, %v1681_v34  ;;  %v8845_v46 = vcombine.high %v1674_v26, %v1681_v34  ;;  %v739_v26 = vpop.f32.mrf.mxu0 }
 0x19a   : > { %8515 = vst [vmem:[%s9879_s25 + $0x88] sm:$0xf] %v9062_v39  ;;  %8516 = vst [vmem:[%s9879_s25 + $0x8c] sm:$0xf] %v9063_v40  ;;  %v3212_v47 = vrot.slane %v3205_v42, %v9759_v53  ;;  %v3254_v48 = vcombine.low %v1708_v36, %v1715_v41  ;;  %v8846_v49 = vcombine.high %v1708_v36, %v1715_v41  ;;  %v1150_v41 = vpop.f32.mrf.mxu1 }
 0x19b   : > { %v5267_v54 = vrot.slane %v5253_v15, %v9759_v53  ;;  %v3220_v57 = vrot.slane %v8844_v44, %v9759_v53  ;;  %v3228_v62 = vrot.slane %v3221_v45, %v9759_v53  ;;  %v3236_v32 = vrot.slane %v8845_v46, %v9759_v53  ;;  %v10003_v46 = vpop.f32.mrf.mxu0 }
 0x19c   : > { %v3270_v58 = vcombine.low %v1723_v31, %v1730_v43  ;;  %v3261_v60 = vrot.slane %v3254_v48, %v9759_v53  ;;  %v3269_v61 = vrot.slane %v8846_v49, %v9759_v53  ;;  %v8847_v63 = vcombine.high %v1723_v31, %v1730_v43 }
 0x19d   : > { %v5268_v2 = vcombine.high %v5260_v16, %v9545_v51  ;;  %v3237_v37 = vcombine.low %v3212_v47, %v3220_v57  ;;  %v3245_v0 = vcombine.low %v3228_v62, %v3236_v32  ;;  %v5283_v50 = vcombine.high %v5267_v54, %v9545_v51 }
 0x19e   : > { %v3277_v1 = vrot.slane %v3270_v58, %v9759_v53  ;;  %v3285_v5 = vrot.slane %v8847_v63, %v9759_v53  ;;  %v3286_v6 = vcombine.low %v3261_v60, %v3269_v61  ;;  %v5275_v9 = vrot.slane %v5260_v16, %v9761_v56  ;;  %v1152_v63 = vpop.f32.mrf.mxu1 }
 0x19f   : > { %v5282_v14 = vrot.slane %v5268_v2, %v9761_v56  ;;  %v3244_v8 = vrot.slane %v3237_v37, %v9761_v56  ;;  %v3252_v30 = vrot.slane %v3245_v0, %v9761_v56  ;;  %v5302_v59 = vcombine.high %v4951_v24, %v9757_v52 }
 0x1a0   : > { %v3294_v11 = vcombine.low %v3277_v1, %v3285_v5  ;;  %v5290_v12 = vrot.slane %v5267_v54, %v9761_v56  ;;  %v5297_v15 = vrot.slane %v5283_v50, %v9761_v56  ;;  %v5309_v7 = vrot.slane %v4951_v24, %v9759_v53  ;;  %v743_v1 = vpop.f32.mrf.mxu0 }
 0x1a1   : > { %v3253_v18 = vcombine.low %v3244_v8, %v3252_v30  ;;  %v5316_v4 = vrot.slane %v5302_v59, %v9759_v53  ;;  %v6821_v10 = vcombine.low %v5275_v9, %v5282_v14  ;;  %v8972_v20 = vcombine.high %v5275_v9, %v5282_v14 }
 0x1a2   : > { %v3293_v23 = vrot.slane %v3286_v6, %v9761_v56  ;;  %v3301_v19 = vrot.slane %v3294_v11, %v9761_v56  ;;  %v5317_v16 = vcombine.high %v5309_v7, %v9545_v51  ;;  %v6837_v25 = vcombine.low %v5290_v12, %v5297_v15 }
 0x1a3   : > { %v4592_v27 = vshrl.u32 %v3253_v18, 16  ;;  %v5324_v13 = vrot.slane %v5309_v7, %v9761_v56  ;;  %v5332_v22 = vcombine.high %v5316_v4, %v9545_v51  ;;  %v6828_v24 = vrot.slane %v6821_v10, %v9759_v53 }
 0x1a4   : > { %v3302_v28 = vcombine.low %v3293_v23, %v3301_v19  ;;  %v5331_v29 = vrot.slane %v5317_v16, %v9761_v56  ;;  %v5339_v34 = vrot.slane %v5316_v4, %v9761_v56  ;;  %v6836_v36 = vrot.slane %v8972_v20, %v9759_v53  ;;  %v1156_v19 = vpop.f32.mrf.mxu1 }
 0x1a5   : > { %v5346_v38 = vrot.slane %v5332_v22, %v9761_v56  ;;  %v6844_v31 = vrot.slane %v6837_v25, %v9759_v53  ;;  %v8973_v39 = vcombine.high %v5290_v12, %v5297_v15  ;;  %v864_v40 = vpack.c.bf16 %v733_v55, %v9947_v17 }
 0x1a6   : > { %v4591_v42 = vpack.i.b16 %v3302_v28, %v3253_v18  ;;  %v4593_v43 = vshrl.u32 %v3302_v28, 16  ;;  %v6853_v44 = vcombine.low %v6828_v24, %v6836_v36  ;;  %v6870_v45 = vcombine.low %v5324_v13, %v5331_v29 }
 0x1a7   : > { %v6852_v47 = vrot.slane %v8973_v39, %v9759_v53  ;;  %v8974_v48 = vcombine.high %v5324_v13, %v5331_v29  ;;  %v6886_v49 = vcombine.low %v5339_v34, %v5346_v38  ;;  %v8975_v54 = vcombine.high %v5339_v34, %v5346_v38 }
 0x1a8   : > { %v4594_v57 = vpack.i.b16 %v4593_v43, %v4592_v27  ;;  %v8904_v62 = vcombine.low %v4591_v42, %v4591_v42  ;;  %v8905_v32 = vcombine.high %v4591_v42, %v4591_v42  ;;  %v1281_v58 = vpack.c.bf16 %v1150_v41, %v1146_v3  ;;  %v10037_v41 = vpop.f32.mrf.mxu1 }
 0x1a9   : > { %v6861_v17 = vcombine.low %v6844_v31, %v6852_v47  ;;  %v6877_v55 = vrot.slane %v6870_v45, %v9759_v53  ;;  %v6885_v60 = vrot.slane %v8974_v48, %v9759_v53  ;;  %v6893_v61 = vrot.slane %v6886_v49, %v9759_v53 }
 0x1aa   : > { %v8936_v2 = vcombine.low %v4594_v57, %v4594_v57  ;;  %v8937_v37 = vcombine.high %v4594_v57, %v4594_v57  ;;  %4869 = vst [vmem:[%s9846_s23 + $0x10] sm:$0xf] %v8904_v62  ;;  %4870 = vst [vmem:[%s9846_s23 + $0x14] sm:$0xf] %v8905_v32  ;;  %v6901_v0 = vrot.slane %v8975_v54, %v9759_v53  ;;  %v1341_v8 = vshrl.u32 %v864_v40, 16 }
 0x1ab   : > { %v6860_v5 = vrot.slane %v6853_v44, %v9761_v56  ;;  %v6868_v3 = vrot.slane %v6861_v17, %v9761_v56  ;;  %v6902_v6 = vcombine.low %v6877_v55, %v6885_v60  ;;  %v865_v14 = vpack.c.bf16 %v735_v33, %v9959_v35 }
 0x1ac   : > { %4901 = vst [vmem:[%s9846_s23 + $0x90] sm:$0xf] %v8936_v2  ;;  %4902 = vst [vmem:[%s9846_s23 + $0x94] sm:$0xf] %v8937_v37  ;;  %v6910_v50 = vcombine.low %v6893_v61, %v6901_v0  ;;  %v4957_v30 = vshrl.u32 %v1281_v58, 16  ;;  %v1282_v9 = vpack.c.bf16 %v1152_v63, %v1148_v21  ;;  %v10017_v15 = vpack.c.bf16 %v743_v1, %v739_v26  ;;  %v1160_v63 = vpop.f32.mrf.mxu1 }
 0x1ad   : > { %v6869_v59 = vcombine.low %v6860_v5, %v6868_v3  ;;  %v1339_v11 = vpack.i.b16 %v865_v14, %v864_v40  ;;  %v1342_v12 = vshrl.u32 %v865_v14, 16  ;;  %v6909_v7 = vrot.slane %v6902_v6, %v9761_v56 }
 0x1ae   : > { %v6917_v18 = vrot.slane %v6910_v50, %v9761_v56  ;;  %v4955_v4 = vpack.i.b16 %v1282_v9, %v1281_v58  ;;  %v4958_v10 = vshrl.u32 %v1282_v9, 16  ;;  %v10057_v9 = vpack.c.bf16 %v1160_v63, %v1156_v19 }
 0x1af   : > { %v8208_v20 = vshrl.u32 %v6869_v59, 16  ;;  %v1343_v23 = vpack.i.b16 %v1342_v12, %v1341_v8  ;;  %v1735_v35 = vcombine.high %v1339_v11, %v9757_v52  ;;  %v1742_v33 = vrot.slane %v1339_v11, %v9759_v53 }
 0x1b0   : > { %v6918_v16 = vcombine.low %v6909_v7, %v6917_v18  ;;  %v10023_v21 = vpack.i.b16 %v4958_v10, %v4957_v30  ;;  %v5351_v25 = vcombine.high %v4955_v4, %v9757_v52  ;;  %v5358_v26 = vrot.slane %v4955_v4, %v9759_v53 }
 0x1b1   : > { %v1749_v27 = vrot.slane %v1735_v35, %v9759_v53  ;;  %v1750_v13 = vcombine.high %v1742_v33, %v9545_v51  ;;  %v1757_v22 = vrot.slane %v1742_v33, %v9761_v56  ;;  %v1784_v24 = vcombine.high %v1343_v23, %v9757_v52 }
 0x1b2   : > { %v8207_v28 = vpack.i.b16 %v6918_v16, %v6869_v59  ;;  %v8209_v29 = vshrl.u32 %v6918_v16, 16  ;;  %v1791_v34 = vrot.slane %v1343_v23, %v9759_v53  ;;  %v5365_v36 = vrot.slane %v5351_v25, %v9759_v53  ;;  %v745_v23 = vpop.f32.mrf.mxu0 }
 0x1b3   : > { %v1764_v38 = vrot.slane %v1750_v13, %v9761_v56  ;;  %v1765_v31 = vcombine.high %v1749_v27, %v9545_v51  ;;  %v1772_v39 = vrot.slane %v1749_v27, %v9761_v56  ;;  %v1798_v40 = vrot.slane %v1784_v24, %v9759_v53 }
 0x1b4   : > { %v8210_v42 = vpack.i.b16 %v8209_v29, %v8208_v20  ;;  %v9032_v43 = vcombine.low %v8207_v28, %v8207_v28  ;;  %v9033_v44 = vcombine.high %v8207_v28, %v8207_v28  ;;  %v1799_v45 = vcombine.high %v1791_v34, %v9545_v51 }
 0x1b5   : > { %v1779_v47 = vrot.slane %v1765_v31, %v9761_v56  ;;  %v1806_v48 = vrot.slane %v1791_v34, %v9761_v56  ;;  %v1814_v49 = vcombine.high %v1798_v40, %v9545_v51  ;;  %v1821_v54 = vrot.slane %v1798_v40, %v9761_v56 }
 0x1b6   : > { %v9064_v57 = vcombine.low %v8210_v42, %v8210_v42  ;;  %v9065_v62 = vcombine.high %v8210_v42, %v8210_v42  ;;  %8485 = vst [vmem:[%s9879_s25 + $0x10] sm:$0xf] %v9032_v43  ;;  %8486 = vst [vmem:[%s9879_s25 + $0x14] sm:$0xf] %v9033_v44  ;;  %v1813_v32 = vrot.slane %v1799_v45, %v9761_v56 }
 0x1b7   : > { %v3303_v58 = vcombine.low %v1757_v22, %v1764_v38  ;;  %v1828_v17 = vrot.slane %v1814_v49, %v9761_v56  ;;  %v8848_v55 = vcombine.high %v1757_v22, %v1764_v38  ;;  %v3319_v60 = vcombine.low %v1772_v39, %v1779_v47 }
 0x1b8   : > { %v8849_v61 = vcombine.high %v1772_v39, %v1779_v47  ;;  %8517 = vst [vmem:[%s9879_s25 + $0x90] sm:$0xf] %v9064_v57  ;;  %8518 = vst [vmem:[%s9879_s25 + $0x94] sm:$0xf] %v9065_v62  ;;  %v3352_v37 = vcombine.low %v1806_v48, %v1813_v32  ;;  %v8850_v0 = vcombine.high %v1806_v48, %v1813_v32 }
 0x1b9   : > { %v3310_v2 = vrot.slane %v3303_v58, %v9759_v53  ;;  %v5366_v1 = vcombine.high %v5358_v26, %v9545_v51  ;;  %v3318_v5 = vrot.slane %v8848_v55, %v9759_v53  ;;  %v3326_v3 = vrot.slane %v3319_v60, %v9759_v53 }
 0x1ba   : > { %v3334_v6 = vrot.slane %v8849_v61, %v9759_v53  ;;  %v3368_v14 = vcombine.low %v1821_v54, %v1828_v17  ;;  %v3359_v50 = vrot.slane %v3352_v37, %v9759_v53  ;;  %v3367_v8 = vrot.slane %v8850_v0, %v9759_v53  ;;  %v1162_v0 = vpop.f32.mrf.mxu1 }
 0x1bb   : > { %v8851_v30 = vcombine.high %v1821_v54, %v1828_v17  ;;  %v3335_v59 = vcombine.low %v3310_v2, %v3318_v5  ;;  %v5380_v7 = vrot.slane %v5366_v1, %v9761_v56  ;;  %v5373_v10 = vrot.slane %v5358_v26, %v9761_v56 }
 0x1bc   : > { %v3343_v11 = vcombine.low %v3326_v3, %v3334_v6  ;;  %v3375_v12 = vrot.slane %v3368_v14, %v9759_v53  ;;  %v3384_v4 = vcombine.low %v3359_v50, %v3367_v8  ;;  %v5381_v20 = vcombine.high %v5365_v36, %v9545_v51 }
 0x1bd   : > { %v3383_v18 = vrot.slane %v8851_v30, %v9759_v53  ;;  %v3342_v35 = vrot.slane %v3335_v59, %v9761_v56  ;;  %v5400_v19 = vcombine.high %v10023_v21, %v9757_v52  ;;  %v5407_v16 = vrot.slane %v10023_v21, %v9759_v53  ;;  %v749_v21 = vpop.f32.mrf.mxu0 }
 0x1be   : > { %v3350_v33 = vrot.slane %v3343_v11, %v9761_v56  ;;  %v5388_v27 = vrot.slane %v5365_v36, %v9761_v56  ;;  %v5395_v13 = vrot.slane %v5381_v20, %v9761_v56  ;;  %v6919_v22 = vcombine.low %v5373_v10, %v5380_v7 }
 0x1bf   : > { %v3392_v25 = vcombine.low %v3375_v12, %v3383_v18  ;;  %v3391_v24 = vrot.slane %v3384_v4, %v9761_v56  ;;  %v5414_v28 = vrot.slane %v5400_v19, %v9759_v53  ;;  %v5415_v29 = vcombine.high %v5407_v16, %v9545_v51  ;;  %v10085_v60 = vpop.f32.mrf.mxu0 }
 0x1c0   : > { %v3351_v26 = vcombine.low %v3342_v35, %v3350_v33  ;;  %v6926_v38 = vrot.slane %v6919_v22, %v9759_v53  ;;  %v8976_v31 = vcombine.high %v5373_v10, %v5380_v7  ;;  %v6935_v39 = vcombine.low %v5388_v27, %v5395_v13 }
 0x1c1   : > { %v3399_v34 = vrot.slane %v3392_v25, %v9761_v56  ;;  %v5422_v36 = vrot.slane %v5407_v16, %v9761_v56  ;;  %v5429_v42 = vrot.slane %v5415_v29, %v9761_v56  ;;  %v5430_v43 = vcombine.high %v5414_v28, %v9545_v51  ;;  %v753_v18 = vpop.f32.mrf.mxu0 }
 0x1c2   : > { %v4598_v40 = vshrl.u32 %v3351_v26, 16  ;;  %v5437_v45 = vrot.slane %v5414_v28, %v9761_v56  ;;  %v6934_v47 = vrot.slane %v8976_v31, %v9759_v53  ;;  %v8977_v48 = vcombine.high %v5388_v27, %v5395_v13  ;;  %v1166_v28 = vpop.f32.mrf.mxu1 }
 0x1c3   : > { %v3400_v44 = vcombine.low %v3391_v24, %v3399_v34  ;;  %v5444_v49 = vrot.slane %v5430_v43, %v9761_v56  ;;  %v6942_v54 = vrot.slane %v6935_v39, %v9759_v53  ;;  %v6968_v57 = vcombine.low %v5422_v36, %v5429_v42 }
 0x1c4   : > { %v8978_v62 = vcombine.high %v5422_v36, %v5429_v42  ;;  %v6950_v17 = vrot.slane %v8977_v48, %v9759_v53  ;;  %v6951_v55 = vcombine.low %v6926_v38, %v6934_v47  ;;  %v1349_v6 = vshrl.u32 %v10017_v15, 16 }
 0x1c5   : > { %v4597_v32 = vpack.i.b16 %v3400_v44, %v3351_v26  ;;  %v4599_v58 = vshrl.u32 %v3400_v44, 16  ;;  %v6975_v61 = vrot.slane %v6968_v57, %v9759_v53  ;;  %v6984_v2 = vcombine.low %v5437_v45, %v5444_v49 }
 0x1c6   : > { %v6983_v63 = vrot.slane %v8978_v62, %v9759_v53  ;;  %v8979_v37 = vcombine.high %v5437_v45, %v5444_v49  ;;  %v6959_v14 = vcombine.low %v6942_v54, %v6950_v17  ;;  %v867_v12 = vpack.c.bf16 %v745_v23, %v10003_v46  ;;  %v10123_v49 = vpop.f32.mrf.mxu1 }
 0x1c7   : > { %v4600_v1 = vpack.i.b16 %v4599_v58, %v4598_v40  ;;  %v8906_v5 = vcombine.low %v4597_v32, %v4597_v32  ;;  %v8907_v3 = vcombine.high %v4597_v32, %v4597_v32  ;;  %v6991_v50 = vrot.slane %v6984_v2, %v9759_v53 }
 0x1c8   : > { %v6999_v8 = vrot.slane %v8979_v37, %v9759_v53  ;;  %v7000_v30 = vcombine.low %v6975_v61, %v6983_v63  ;;  %v1284_v7 = vpack.c.bf16 %v1162_v0, %v10037_v41  ;;  %v6958_v4 = vrot.slane %v6951_v55, %v9761_v56 }
 0x1c9   : > { %v8938_v59 = vcombine.low %v4600_v1, %v4600_v1  ;;  %v8939_v11 = vcombine.high %v4600_v1, %v4600_v1  ;;  %4871 = vst [vmem:[%s9846_s23 + $0x18] sm:$0xf] %v8906_v5  ;;  %4872 = vst [vmem:[%s9846_s23 + $0x1c] sm:$0xf] %v8907_v3  ;;  %v6966_v10 = vrot.slane %v6959_v14, %v9761_v56  ;;  %v4965_v35 = vshrl.u32 %v10057_v9, 16  ;;  %v1170_v14 = vpop.f32.mrf.mxu1 }
 0x1ca   : > { %v7008_v20 = vcombine.low %v6991_v50, %v6999_v8  ;;  %v1347_v33 = vpack.i.b16 %v867_v12, %v10017_v15  ;;  %v1350_v19 = vshrl.u32 %v867_v12, 16  ;;  %v4963_v16 = vpack.i.b16 %v1284_v7, %v10057_v9 }
 0x1cb   : > { %4903 = vst [vmem:[%s9846_s23 + $0x98] sm:$0xf] %v8938_v59  ;;  %4904 = vst [vmem:[%s9846_s23 + $0x9c] sm:$0xf] %v8939_v11  ;;  %v4966_v25 = vshrl.u32 %v1284_v7, 16  ;;  %v6967_v27 = vcombine.low %v6958_v4, %v6966_v10  ;;  %v7007_v46 = vrot.slane %v7000_v30, %v9761_v56  ;;  %v10105_v23 = vpack.c.bf16 %v753_v18, %v749_v21 }
 0x1cc   : > { %v7015_v41 = vrot.slane %v7008_v20, %v9761_v56  ;;  %v1351_v13 = vpack.i.b16 %v1350_v19, %v1349_v6  ;;  %v1833_v22 = vcombine.high %v1347_v33, %v9757_v52  ;;  %v1840_v26 = vrot.slane %v1347_v33, %v9759_v53 }
 0x1cd   : > { %v10109_v24 = vpack.i.b16 %v4966_v25, %v4965_v35  ;;  %v8214_v29 = vshrl.u32 %v6967_v27, 16  ;;  %v5449_v9 = vcombine.high %v4963_v16, %v9757_v52  ;;  %v5456_v34 = vrot.slane %v4963_v16, %v9759_v53 }
 0x1ce   : > { %v7016_v15 = vcombine.low %v7007_v46, %v7015_v41  ;;  %v1847_v38 = vrot.slane %v1833_v22, %v9759_v53  ;;  %v1848_v31 = vcombine.high %v1840_v26, %v9545_v51  ;;  %v1855_v39 = vrot.slane %v1840_v26, %v9761_v56  ;;  %v755_v22 = vpop.f32.mrf.mxu0 }
 0x1cf   : > { %v1882_v21 = vcombine.high %v1351_v13, %v9757_v52  ;;  %v1889_v42 = vrot.slane %v1351_v13, %v9759_v53  ;;  %v5463_v43 = vrot.slane %v5449_v9, %v9759_v53  ;;  %v5464_v59 = vcombine.high %v5456_v34, %v9545_v51 }
 0x1d0   : > { %v8213_v40 = vpack.i.b16 %v7016_v15, %v6967_v27  ;;  %v8215_v36 = vshrl.u32 %v7016_v15, 16  ;;  %v1862_v44 = vrot.slane %v1848_v31, %v9761_v56  ;;  %v1863_v45 = vcombine.high %v1847_v38, %v9545_v51 }
 0x1d1   : > { %v1870_v47 = vrot.slane %v1847_v38, %v9761_v56  ;;  %v1896_v48 = vrot.slane %v1882_v21, %v9759_v53  ;;  %v1897_v32 = vcombine.high %v1889_v42, %v9545_v51  ;;  %v1904_v17 = vrot.slane %v1889_v42, %v9761_v56 }
 0x1d2   : > { %v8216_v54 = vpack.i.b16 %v8215_v36, %v8214_v29  ;;  %v9034_v57 = vcombine.low %v8213_v40, %v8213_v40  ;;  %v9035_v62 = vcombine.high %v8213_v40, %v8213_v40  ;;  %v1877_v58 = vrot.slane %v1863_v45, %v9761_v56 }
 0x1d3   : > { %v1912_v55 = vcombine.high %v1896_v48, %v9545_v51  ;;  %v1919_v61 = vrot.slane %v1896_v48, %v9761_v56  ;;  %v1911_v37 = vrot.slane %v1897_v32, %v9761_v56  ;;  %v3401_v0 = vcombine.low %v1855_v39, %v1862_v44 }
 0x1d4   : > { %v9066_v63 = vcombine.low %v8216_v54, %v8216_v54  ;;  %v9067_v2 = vcombine.high %v8216_v54, %v8216_v54  ;;  %8487 = vst [vmem:[%s9879_s25 + $0x18] sm:$0xf] %v9034_v57  ;;  %8488 = vst [vmem:[%s9879_s25 + $0x1c] sm:$0xf] %v9035_v62  ;;  %v8852_v5 = vcombine.high %v1855_v39, %v1862_v44 }
 0x1d5   : > { %v1926_v1 = vrot.slane %v1912_v55, %v9761_v56  ;;  %v3417_v3 = vcombine.low %v1870_v47, %v1877_v58  ;;  %v8853_v6 = vcombine.high %v1870_v47, %v1877_v58  ;;  %v3408_v50 = vrot.slane %v3401_v0, %v9759_v53 }
 0x1d6   : > { %8519 = vst [vmem:[%s9879_s25 + $0x98] sm:$0xf] %v9066_v63  ;;  %8520 = vst [vmem:[%s9879_s25 + $0x9c] sm:$0xf] %v9067_v2  ;;  %v3450_v8 = vcombine.low %v1904_v17, %v1911_v37  ;;  %v8854_v30 = vcombine.high %v1904_v17, %v1911_v37  ;;  %v3416_v11 = vrot.slane %v8852_v5, %v9759_v53 }
 0x1d7   : > { %v3424_v12 = vrot.slane %v3417_v3, %v9759_v53  ;;  %v3432_v7 = vrot.slane %v8853_v6, %v9759_v53  ;;  %v3466_v18 = vcombine.low %v1919_v61, %v1926_v1  ;;  %v8855_v20 = vcombine.high %v1919_v61, %v1926_v1 }
 0x1d8   : > { %v3457_v4 = vrot.slane %v3450_v8, %v9759_v53  ;;  %v3465_v10 = vrot.slane %v8854_v30, %v9759_v53  ;;  %v10143_v35 = vpack.c.bf16 %v1170_v14, %v1166_v28  ;;  %v3433_v33 = vcombine.low %v3408_v50, %v3416_v11  ;;  %v1172_v30 = vpop.f32.mrf.mxu1 }
 0x1d9   : > { %v3441_v19 = vcombine.low %v3424_v12, %v3432_v7  ;;  %v3473_v16 = vrot.slane %v3466_v18, %v9759_v53  ;;  %v5478_v25 = vrot.slane %v5464_v59, %v9761_v56  ;;  %v3481_v27 = vrot.slane %v8855_v20, %v9759_v53 }
 0x1da   : > { %v3482_v46 = vcombine.low %v3457_v4, %v3465_v10  ;;  %v5471_v41 = vrot.slane %v5456_v34, %v9761_v56  ;;  %v5479_v13 = vcombine.high %v5463_v43, %v9545_v51  ;;  %v3440_v26 = vrot.slane %v3433_v33, %v9761_v56 }
 0x1db   : > { %v3448_v15 = vrot.slane %v3441_v19, %v9761_v56  ;;  %v5498_v28 = vcombine.high %v10109_v24, %v9757_v52  ;;  %v5505_v29 = vrot.slane %v10109_v24, %v9759_v53  ;;  %v3490_v9 = vcombine.low %v3473_v16, %v3481_v27  ;;  %v759_v24 = vpop.f32.mrf.mxu0 }
 0x1dc   : > { %v5486_v38 = vrot.slane %v5463_v43, %v9761_v56  ;;  %v5493_v31 = vrot.slane %v5479_v13, %v9761_v56  ;;  %v7017_v39 = vcombine.low %v5471_v41, %v5478_v25  ;;  %v3489_v21 = vrot.slane %v3482_v46, %v9761_v56 }
 0x1dd   : > { %v3449_v34 = vcombine.low %v3440_v26, %v3448_v15  ;;  %v5512_v40 = vrot.slane %v5498_v28, %v9759_v53  ;;  %v5513_v36 = vcombine.high %v5505_v29, %v9545_v51  ;;  %v3497_v42 = vrot.slane %v3490_v9, %v9761_v56  ;;  %v10171_v3 = vpop.f32.mrf.mxu0 }
 0x1de   : > { %v7024_v44 = vrot.slane %v7017_v39, %v9759_v53  ;;  %v8980_v45 = vcombine.high %v5471_v41, %v5478_v25  ;;  %v7033_v47 = vcombine.low %v5486_v38, %v5493_v31  ;;  %v5520_v43 = vrot.slane %v5505_v29, %v9761_v56 }
 0x1df   : > { %v4604_v48 = vshrl.u32 %v3449_v34, 16  ;;  %v5527_v54 = vrot.slane %v5513_v36, %v9761_v56  ;;  %v5528_v57 = vcombine.high %v5512_v40, %v9545_v51  ;;  %v3498_v62 = vcombine.low %v3489_v21, %v3497_v42  ;;  %v763_v27 = vpop.f32.mrf.mxu0 }
 0x1e0   : > { %v5535_v32 = vrot.slane %v5512_v40, %v9761_v56  ;;  %v7032_v58 = vrot.slane %v8980_v45, %v9759_v53  ;;  %v8981_v17 = vcombine.high %v5486_v38, %v5493_v31  ;;  %v7040_v61 = vrot.slane %v7033_v47, %v9759_v53  ;;  %v1176_v40 = vpop.f32.mrf.mxu1 }
 0x1e1   : > { %v5542_v55 = vrot.slane %v5528_v57, %v9761_v56  ;;  %v7066_v63 = vcombine.low %v5520_v43, %v5527_v54  ;;  %v8982_v2 = vcombine.high %v5520_v43, %v5527_v54  ;;  %v4603_v37 = vpack.i.b16 %v3498_v62, %v3449_v34 }
 0x1e2   : > { %v4605_v0 = vshrl.u32 %v3498_v62, 16  ;;  %v7048_v1 = vrot.slane %v8981_v17, %v9759_v53  ;;  %v7049_v5 = vcombine.low %v7024_v44, %v7032_v58  ;;  %v1357_v7 = vshrl.u32 %v10105_v23, 16 }
 0x1e3   : > { %v7073_v6 = vrot.slane %v7066_v63, %v9759_v53  ;;  %v7081_v14 = vrot.slane %v8982_v2, %v9759_v53  ;;  %v7082_v50 = vcombine.low %v5535_v32, %v5542_v55  ;;  %v8983_v8 = vcombine.high %v5535_v32, %v5542_v55  ;;  %v10209_v55 = vpop.f32.mrf.mxu1 }
 0x1e4   : > { %v4606_v59 = vpack.i.b16 %v4605_v0, %v4604_v48  ;;  %v8908_v11 = vcombine.low %v4603_v37, %v4603_v37  ;;  %v8909_v12 = vcombine.high %v4603_v37, %v4603_v37  ;;  %v7057_v18 = vcombine.low %v7040_v61, %v7048_v1 }
 0x1e5   : > { %v7089_v4 = vrot.slane %v7082_v50, %v9759_v53  ;;  %v7097_v10 = vrot.slane %v8983_v8, %v9759_v53  ;;  %v7098_v20 = vcombine.low %v7073_v6, %v7081_v14  ;;  %v869_v16 = vpack.c.bf16 %v755_v22, %v10085_v60 }
 0x1e6   : > { %v8940_v33 = vcombine.low %v4606_v59, %v4606_v59  ;;  %v8941_v19 = vcombine.high %v4606_v59, %v4606_v59  ;;  %4873 = vst [vmem:[%s9846_s23 + $0x20] sm:$0xf] %v8908_v11  ;;  %4874 = vst [vmem:[%s9846_s23 + $0x24] sm:$0xf] %v8909_v12  ;;  %v1286_v25 = vpack.c.bf16 %v1172_v30, %v10123_v49  ;;  %v4973_v26 = vshrl.u32 %v10143_v35, 16 }
 0x1e7   : > { %v7056_v46 = vrot.slane %v7049_v5, %v9761_v56  ;;  %v7064_v41 = vrot.slane %v7057_v18, %v9761_v56  ;;  %v7106_v13 = vcombine.low %v7089_v4, %v7097_v10  ;;  %v1355_v15 = vpack.i.b16 %v869_v16, %v10105_v23  ;;  %v1180_v18 = vpop.f32.mrf.mxu1 }
 0x1e8   : > { %4905 = vst [vmem:[%s9846_s23 + $0xa0] sm:$0xf] %v8940_v33  ;;  %4906 = vst [vmem:[%s9846_s23 + $0xa4] sm:$0xf] %v8941_v19  ;;  %v1358_v28 = vshrl.u32 %v869_v16, 16  ;;  %v4971_v29 = vpack.i.b16 %v1286_v25, %v10143_v35  ;;  %v4974_v9 = vshrl.u32 %v1286_v25, 16  ;;  %v7105_v60 = vrot.slane %v7098_v20, %v9761_v56 }
 0x1e9   : > { %v7065_v38 = vcombine.low %v7056_v46, %v7064_v41  ;;  %v7113_v49 = vrot.slane %v7106_v13, %v9761_v56  ;;  %v10191_v22 = vpack.c.bf16 %v763_v27, %v759_v24  ;;  %v1931_v39 = vcombine.high %v1355_v15, %v9757_v52 }
 0x1ea   : > { %v1359_v31 = vpack.i.b16 %v1358_v28, %v1357_v7  ;;  %v1938_v34 = vrot.slane %v1355_v15, %v9759_v53  ;;  %v10195_v21 = vpack.i.b16 %v4974_v9, %v4973_v26  ;;  %v5547_v35 = vcombine.high %v4971_v29, %v9757_v52 }
 0x1eb   : > { %v7114_v23 = vcombine.low %v7105_v60, %v7113_v49  ;;  %v8220_v36 = vshrl.u32 %v7065_v38, 16  ;;  %v5554_v42 = vrot.slane %v4971_v29, %v9759_v53  ;;  %v1945_v44 = vrot.slane %v1931_v39, %v9759_v53  ;;  %v765_v39 = vpop.f32.mrf.mxu0 }
 0x1ec   : > { %v1946_v45 = vcombine.high %v1938_v34, %v9545_v51  ;;  %v1953_v47 = vrot.slane %v1938_v34, %v9761_v56  ;;  %v1980_v24 = vcombine.high %v1359_v31, %v9757_v52  ;;  %v1987_v54 = vrot.slane %v1359_v31, %v9759_v53 }
 0x1ed   : > { %v8219_v48 = vpack.i.b16 %v7114_v23, %v7065_v38  ;;  %v8221_v43 = vshrl.u32 %v7114_v23, 16  ;;  %v5561_v57 = vrot.slane %v5547_v35, %v9759_v53  ;;  %v1961_v32 = vcombine.high %v1945_v44, %v9545_v51 }
 0x1ee   : > { %v1960_v62 = vrot.slane %v1946_v45, %v9761_v56  ;;  %v1968_v58 = vrot.slane %v1945_v44, %v9761_v56  ;;  %v1994_v17 = vrot.slane %v1980_v24, %v9759_v53  ;;  %v1995_v37 = vcombine.high %v1987_v54, %v9545_v51 }
 0x1ef   : > { %v8222_v61 = vpack.i.b16 %v8221_v43, %v8220_v36  ;;  %v9036_v63 = vcombine.low %v8219_v48, %v8219_v48  ;;  %v9037_v2 = vcombine.high %v8219_v48, %v8219_v48  ;;  %v1975_v0 = vrot.slane %v1961_v32, %v9761_v56 }
 0x1f0   : > { %v2002_v1 = vrot.slane %v1987_v54, %v9761_v56  ;;  %v2010_v5 = vcombine.high %v1994_v17, %v9545_v51  ;;  %v2017_v6 = vrot.slane %v1994_v17, %v9761_v56  ;;  %v2009_v8 = vrot.slane %v1995_v37, %v9761_v56 }
 0x1f1   : > { %v9068_v14 = vcombine.low %v8222_v61, %v8222_v61  ;;  %v9069_v50 = vcombine.high %v8222_v61, %v8222_v61  ;;  %8489 = vst [vmem:[%s9879_s25 + $0x20] sm:$0xf] %v9036_v63  ;;  %8490 = vst [vmem:[%s9879_s25 + $0x24] sm:$0xf] %v9037_v2  ;;  %v3499_v30 = vcombine.low %v1953_v47, %v1960_v62 }
 0x1f2   : > { %v2024_v59 = vrot.slane %v2010_v5, %v9761_v56  ;;  %v8856_v11 = vcombine.high %v1953_v47, %v1960_v62  ;;  %v3515_v12 = vcombine.low %v1968_v58, %v1975_v0  ;;  %v8857_v7 = vcombine.high %v1968_v58, %v1975_v0 }
 0x1f3   : > { %8521 = vst [vmem:[%s9879_s25 + $0xa0] sm:$0xf] %v9068_v14  ;;  %8522 = vst [vmem:[%s9879_s25 + $0xa4] sm:$0xf] %v9069_v50  ;;  %v3506_v4 = vrot.slane %v3499_v30, %v9759_v53  ;;  %v3548_v10 = vcombine.low %v2002_v1, %v2009_v8  ;;  %v8858_v20 = vcombine.high %v2002_v1, %v2009_v8 }
 0x1f4   : > { %v5562_v33 = vcombine.high %v5554_v42, %v9545_v51  ;;  %v3514_v19 = vrot.slane %v8856_v11, %v9759_v53  ;;  %v3522_v16 = vrot.slane %v3515_v12, %v9759_v53  ;;  %v3530_v25 = vrot.slane %v8857_v7, %v9759_v53 }
 0x1f5   : > { %v3564_v27 = vcombine.low %v2017_v6, %v2024_v59  ;;  %v3555_v46 = vrot.slane %v3548_v10, %v9759_v53  ;;  %v3563_v41 = vrot.slane %v8858_v20, %v9759_v53  ;;  %v8859_v13 = vcombine.high %v2017_v6, %v2024_v59  ;;  %v1182_v20 = vpop.f32.mrf.mxu1 }
 0x1f6   : > { %v10229_v26 = vpack.c.bf16 %v1180_v18, %v1176_v40  ;;  %v3531_v15 = vcombine.low %v3506_v4, %v3514_v19  ;;  %v3539_v28 = vcombine.low %v3522_v16, %v3530_v25  ;;  %v5576_v9 = vrot.slane %v5562_v33, %v9761_v56 }
 0x1f7   : > { %v3571_v29 = vrot.slane %v3564_v27, %v9759_v53  ;;  %v3579_v38 = vrot.slane %v8859_v13, %v9759_v53  ;;  %v3580_v60 = vcombine.low %v3555_v46, %v3563_v41  ;;  %v5569_v49 = vrot.slane %v5554_v42, %v9761_v56 }
 0x1f8   : > { %v5577_v31 = vcombine.high %v5561_v57, %v9545_v51  ;;  %v3538_v34 = vrot.slane %v3531_v15, %v9761_v56  ;;  %v3546_v23 = vrot.slane %v3539_v28, %v9761_v56  ;;  %v5596_v40 = vcombine.high %v10195_v21, %v9757_v52 }
 0x1f9   : > { %v5603_v36 = vrot.slane %v10195_v21, %v9759_v53  ;;  %v3588_v35 = vcombine.low %v3571_v29, %v3579_v38  ;;  %v5584_v44 = vrot.slane %v5561_v57, %v9761_v56  ;;  %v7115_v47 = vcombine.low %v5569_v49, %v5576_v9  ;;  %v769_v21 = vpop.f32.mrf.mxu0 }
 0x1fa   : > { %v5591_v45 = vrot.slane %v5577_v31, %v9761_v56  ;;  %v3547_v42 = vcombine.low %v3538_v34, %v3546_v23  ;;  %v3587_v24 = vrot.slane %v3580_v60, %v9761_v56  ;;  %v5610_v48 = vrot.slane %v5596_v40, %v9759_v53 }
 0x1fb   : > { %v5611_v43 = vcombine.high %v5603_v36, %v9545_v51  ;;  %v3595_v54 = vrot.slane %v3588_v35, %v9761_v56  ;;  %v7122_v62 = vrot.slane %v7115_v47, %v9759_v53  ;;  %v8984_v32 = vcombine.high %v5569_v49, %v5576_v9  ;;  %v10257_v12 = vpop.f32.mrf.mxu0 }
 0x1fc   : > { %v7131_v58 = vcombine.low %v5584_v44, %v5591_v45  ;;  %v4610_v17 = vshrl.u32 %v3547_v42, 16  ;;  %v5618_v57 = vrot.slane %v5603_v36, %v9761_v56  ;;  %v5626_v63 = vcombine.high %v5610_v48, %v9545_v51 }
 0x1fd   : > { %v5625_v61 = vrot.slane %v5611_v43, %v9761_v56  ;;  %v3596_v2 = vcombine.low %v3587_v24, %v3595_v54  ;;  %v5633_v37 = vrot.slane %v5610_v48, %v9761_v56  ;;  %v7130_v0 = vrot.slane %v8984_v32, %v9759_v53  ;;  %v773_v38 = vpop.f32.mrf.mxu0  ;;  %v1186_v48 = vpop.f32.mrf.mxu1 }
 0x1fe   : > { %v8985_v1 = vcombine.high %v5584_v44, %v5591_v45  ;;  %v5640_v5 = vrot.slane %v5626_v63, %v9761_v56  ;;  %v7138_v6 = vrot.slane %v7131_v58, %v9759_v53  ;;  %v1365_v25 = vshrl.u32 %v10191_v22, 16 }
 0x1ff   : > { %v7164_v14 = vcombine.low %v5618_v57, %v5625_v61  ;;  %v8986_v50 = vcombine.high %v5618_v57, %v5625_v61  ;;  %v4609_v8 = vpack.i.b16 %v3596_v2, %v3547_v42  ;;  %v4611_v30 = vshrl.u32 %v3596_v2, 16 }
 0x200   : > { %v7146_v59 = vrot.slane %v8985_v1, %v9759_v53  ;;  %v7147_v11 = vcombine.low %v7122_v62, %v7130_v0  ;;  %v7180_v4 = vcombine.low %v5633_v37, %v5640_v5  ;;  %v8987_v10 = vcombine.high %v5633_v37, %v5640_v5  ;;  %v10295_v5 = vpop.f32.mrf.mxu1 }
 0x201   : > { %v7171_v7 = vrot.slane %v7164_v14, %v9759_v53  ;;  %v7179_v18 = vrot.slane %v8986_v50, %v9759_v53  ;;  %v4612_v33 = vpack.i.b16 %v4611_v30, %v4610_v17  ;;  %v8910_v19 = vcombine.low %v4609_v8, %v4609_v8 }
 0x202   : > { %v8911_v16 = vcombine.high %v4609_v8, %v4609_v8  ;;  %v7155_v27 = vcombine.low %v7138_v6, %v7146_v59  ;;  %v7187_v46 = vrot.slane %v7180_v4, %v9759_v53  ;;  %v7195_v41 = vrot.slane %v8987_v10, %v9759_v53 }
 0x203   : > { %v7196_v13 = vcombine.low %v7171_v7, %v7179_v18  ;;  %v8942_v15 = vcombine.low %v4612_v33, %v4612_v33  ;;  %v8943_v28 = vcombine.high %v4612_v33, %v4612_v33  ;;  %4875 = vst [vmem:[%s9846_s23 + $0x28] sm:$0xf] %v8910_v19  ;;  %v871_v29 = vpack.c.bf16 %v765_v39, %v10171_v3 }
 0x204   : > { %4876 = vst [vmem:[%s9846_s23 + $0x2c] sm:$0xf] %v8911_v16  ;;  %v1288_v9 = vpack.c.bf16 %v1182_v20, %v10209_v55  ;;  %v7154_v60 = vrot.slane %v7147_v11, %v9761_v56  ;;  %v7162_v49 = vrot.slane %v7155_v27, %v9761_v56  ;;  %v7204_v31 = vcombine.low %v7187_v46, %v7195_v41  ;;  %v1190_v27 = vpop.f32.mrf.mxu1 }
 0x205   : > { %v4981_v34 = vshrl.u32 %v10229_v26, 16  ;;  %4907 = vst [vmem:[%s9846_s23 + $0xa8] sm:$0xf] %v8942_v15  ;;  %4908 = vst [vmem:[%s9846_s23 + $0xac] sm:$0xf] %v8943_v28  ;;  %v1363_v23 = vpack.i.b16 %v871_v29, %v10191_v22  ;;  %v1366_v40 = vshrl.u32 %v871_v29, 16  ;;  %v7203_v3 = vrot.slane %v7196_v13, %v9761_v56 }
 0x206   : > { %v4979_v36 = vpack.i.b16 %v1288_v9, %v10229_v26  ;;  %v4982_v35 = vshrl.u32 %v1288_v9, 16  ;;  %v7163_v44 = vcombine.low %v7154_v60, %v7162_v49  ;;  %v7211_v55 = vrot.slane %v7204_v31, %v9761_v56 }
 0x207   : > { %v10277_v39 = vpack.c.bf16 %v773_v38, %v769_v21  ;;  %v1367_v45 = vpack.i.b16 %v1366_v40, %v1365_v25  ;;  %v2029_v47 = vcombine.high %v1363_v23, %v9757_v52  ;;  %v2036_v42 = vrot.slane %v1363_v23, %v9759_v53 }
 0x208   : > { %v10281_v24 = vpack.i.b16 %v4982_v35, %v4981_v34  ;;  %v7212_v22 = vcombine.low %v7203_v3, %v7211_v55  ;;  %v8226_v43 = vshrl.u32 %v7163_v44, 16  ;;  %v5645_v26 = vcombine.high %v4979_v36, %v9757_v52 }
 0x209   : > { %v5652_v54 = vrot.slane %v4979_v36, %v9759_v53  ;;  %v2043_v62 = vrot.slane %v2029_v47, %v9759_v53  ;;  %v2044_v32 = vcombine.high %v2036_v42, %v9545_v51  ;;  %v2051_v58 = vrot.slane %v2036_v42, %v9761_v56  ;;  %v775_v47 = vpop.f32.mrf.mxu0 }
 0x20a   : > { %v2078_v21 = vcombine.high %v1367_v45, %v9757_v52  ;;  %v8225_v17 = vpack.i.b16 %v7212_v22, %v7163_v44  ;;  %v8227_v57 = vshrl.u32 %v7212_v22, 16  ;;  %v2085_v61 = vrot.slane %v1367_v45, %v9759_v53 }
 0x20b   : > { %v5659_v63 = vrot.slane %v5645_v26, %v9759_v53  ;;  %v2058_v2 = vrot.slane %v2044_v32, %v9761_v56  ;;  %v2059_v37 = vcombine.high %v2043_v62, %v9545_v51  ;;  %v2066_v0 = vrot.slane %v2043_v62, %v9761_v56 }
 0x20c   : > { %v2092_v1 = vrot.slane %v2078_v21, %v9759_v53  ;;  %v8228_v6 = vpack.i.b16 %v8227_v57, %v8226_v43  ;;  %v9038_v14 = vcombine.low %v8225_v17, %v8225_v17  ;;  %v9039_v50 = vcombine.high %v8225_v17, %v8225_v17 }
 0x20d   : > { %v2093_v8 = vcombine.high %v2085_v61, %v9545_v51  ;;  %v2073_v30 = vrot.slane %v2059_v37, %v9761_v56  ;;  %v2100_v59 = vrot.slane %v2085_v61, %v9761_v56  ;;  %v3597_v20 = vcombine.low %v2051_v58, %v2058_v2 }
 0x20e   : > { %v2108_v11 = vcombine.high %v2092_v1, %v9545_v51  ;;  %v2115_v7 = vrot.slane %v2092_v1, %v9761_v56  ;;  %v9070_v18 = vcombine.low %v8228_v6, %v8228_v6  ;;  %v9071_v4 = vcombine.high %v8228_v6, %v8228_v6  ;;  %8491 = vst [vmem:[%s9879_s25 + $0x28] sm:$0xf] %v9038_v14 }
 0x20f   : > { %8492 = vst [vmem:[%s9879_s25 + $0x2c] sm:$0xf] %v9039_v50  ;;  %v2107_v10 = vrot.slane %v2093_v8, %v9761_v56  ;;  %v8860_v19 = vcombine.high %v2051_v58, %v2058_v2  ;;  %v3613_v16 = vcombine.low %v2066_v0, %v2073_v30  ;;  %v8861_v25 = vcombine.high %v2066_v0, %v2073_v30 }
 0x210   : > { %v2122_v33 = vrot.slane %v2108_v11, %v9761_v56  ;;  %8523 = vst [vmem:[%s9879_s25 + $0xa8] sm:$0xf] %v9070_v18  ;;  %8524 = vst [vmem:[%s9879_s25 + $0xac] sm:$0xf] %v9071_v4  ;;  %v3604_v46 = vrot.slane %v3597_v20, %v9759_v53  ;;  %v5660_v15 = vcombine.high %v5652_v54, %v9545_v51 }
 0x211   : > { %v3646_v41 = vcombine.low %v2100_v59, %v2107_v10  ;;  %v8862_v13 = vcombine.high %v2100_v59, %v2107_v10  ;;  %v3612_v28 = vrot.slane %v8860_v19, %v9759_v53  ;;  %v3620_v29 = vrot.slane %v3613_v16, %v9759_v53 }
 0x212   : > { %v3628_v9 = vrot.slane %v8861_v25, %v9759_v53  ;;  %v3662_v38 = vcombine.low %v2115_v7, %v2122_v33  ;;  %v8863_v31 = vcombine.high %v2115_v7, %v2122_v33  ;;  %v10315_v34 = vpack.c.bf16 %v1190_v27, %v1186_v48 }
 0x213   : > { %v3653_v60 = vrot.slane %v3646_v41, %v9759_v53  ;;  %v3661_v49 = vrot.slane %v8862_v13, %v9759_v53  ;;  %v3629_v23 = vcombine.low %v3604_v46, %v3612_v28  ;;  %v5674_v35 = vrot.slane %v5660_v15, %v9761_v56  ;;  %v1192_v13 = vpop.f32.mrf.mxu1 }
 0x214   : > { %v3637_v40 = vcombine.low %v3620_v29, %v3628_v9  ;;  %v3669_v36 = vrot.slane %v3662_v38, %v9759_v53  ;;  %v3677_v44 = vrot.slane %v8863_v31, %v9759_v53  ;;  %v5667_v55 = vrot.slane %v5652_v54, %v9761_v56 }
 0x215   : > { %v3678_v3 = vcombine.low %v3653_v60, %v3661_v49  ;;  %v5675_v45 = vcombine.high %v5659_v63, %v9545_v51  ;;  %v3636_v42 = vrot.slane %v3629_v23, %v9761_v56  ;;  %v5694_v48 = vcombine.high %v10281_v24, %v9757_v52 }
 0x216   : > { %v3644_v22 = vrot.slane %v3637_v40, %v9761_v56  ;;  %v5701_v43 = vrot.slane %v10281_v24, %v9759_v53  ;;  %v3686_v26 = vcombine.low %v3669_v36, %v3677_v44  ;;  %v5682_v62 = vrot.slane %v5659_v63, %v9761_v56  ;;  %v779_v24 = vpop.f32.mrf.mxu0 }
 0x217   : > { %v5689_v32 = vrot.slane %v5675_v45, %v9761_v56  ;;  %v7213_v58 = vcombine.low %v5667_v55, %v5674_v35  ;;  %v3685_v21 = vrot.slane %v3678_v3, %v9761_v56  ;;  %v5708_v17 = vrot.slane %v5694_v48, %v9759_v53 }
 0x218   : > { %v3645_v54 = vcombine.low %v3636_v42, %v3644_v22  ;;  %v5709_v57 = vcombine.high %v5701_v43, %v9545_v51  ;;  %v3693_v61 = vrot.slane %v3686_v26, %v9761_v56  ;;  %v8988_v37 = vcombine.high %v5667_v55, %v5674_v35  ;;  %v10343_v16 = vpop.f32.mrf.mxu0 }
 0x219   : > { %v7220_v2 = vrot.slane %v7213_v58, %v9759_v53  ;;  %v7229_v0 = vcombine.low %v5682_v62, %v5689_v32  ;;  %v5716_v63 = vrot.slane %v5701_v43, %v9761_v56  ;;  %v5724_v14 = vcombine.high %v5708_v17, %v9545_v51 }
 0x21a   : > { %v4616_v1 = vshrl.u32 %v3645_v54, 16  ;;  %v5723_v6 = vrot.slane %v5709_v57, %v9761_v56  ;;  %v3694_v50 = vcombine.low %v3685_v21, %v3693_v61  ;;  %v5731_v8 = vrot.slane %v5708_v17, %v9761_v56  ;;  %v783_v44 = vpop.f32.mrf.mxu0  ;;  %v1196_v17 = vpop.f32.mrf.mxu1 }
 0x21b   : > { %v7228_v30 = vrot.slane %v8988_v37, %v9759_v53  ;;  %v8989_v59 = vcombine.high %v5682_v62, %v5689_v32  ;;  %v5738_v11 = vrot.slane %v5724_v14, %v9761_v56  ;;  %v7236_v7 = vrot.slane %v7229_v0, %v9759_v53 }
 0x21c   : > { %v7262_v18 = vcombine.low %v5716_v63, %v5723_v6  ;;  %v8990_v4 = vcombine.high %v5716_v63, %v5723_v6  ;;  %v4615_v10 = vpack.i.b16 %v3694_v50, %v3645_v54  ;;  %v4617_v20 = vshrl.u32 %v3694_v50, 16 }
 0x21d   : > { %v7244_v33 = vrot.slane %v8989_v59, %v9759_v53  ;;  %v7245_v19 = vcombine.low %v7220_v2, %v7228_v30  ;;  %v7278_v46 = vcombine.low %v5731_v8, %v5738_v11  ;;  %v8991_v41 = vcombine.high %v5731_v8, %v5738_v11  ;;  %v10381_v11 = vpop.f32.mrf.mxu1 }
 0x21e   : > { %v7269_v25 = vrot.slane %v7262_v18, %v9759_v53  ;;  %v7277_v27 = vrot.slane %v8990_v4, %v9759_v53  ;;  %v4618_v15 = vpack.i.b16 %v4617_v20, %v4616_v1  ;;  %v8912_v28 = vcombine.low %v4615_v10, %v4615_v10 }
 0x21f   : > { %v8913_v29 = vcombine.high %v4615_v10, %v4615_v10  ;;  %v1373_v9 = vshrl.u32 %v10277_v39, 16  ;;  %v7253_v38 = vcombine.low %v7236_v7, %v7244_v33  ;;  %v7285_v60 = vrot.slane %v7278_v46, %v9759_v53 }
 0x220   : > { %v7293_v49 = vrot.slane %v8991_v41, %v9759_v53  ;;  %v7294_v31 = vcombine.low %v7269_v25, %v7277_v27  ;;  %v8944_v23 = vcombine.low %v4618_v15, %v4618_v15  ;;  %v8945_v40 = vcombine.high %v4618_v15, %v4618_v15  ;;  %4877 = vst [vmem:[%s9846_s23 + $0x30] sm:$0xf] %v8912_v28 }
 0x221   : > { %4878 = vst [vmem:[%s9846_s23 + $0x34] sm:$0xf] %v8913_v29  ;;  %v873_v36 = vpack.c.bf16 %v775_v47, %v10257_v12  ;;  %v1290_v35 = vpack.c.bf16 %v1192_v13, %v10295_v5  ;;  %v7252_v3 = vrot.slane %v7245_v19, %v9761_v56  ;;  %v7260_v55 = vrot.slane %v7253_v38, %v9761_v56  ;;  %v1200_v38 = vpop.f32.mrf.mxu1 }
 0x222   : > { %v7302_v45 = vcombine.low %v7285_v60, %v7293_v49  ;;  %v4989_v42 = vshrl.u32 %v10315_v34, 16  ;;  %4909 = vst [vmem:[%s9846_s23 + $0xb0] sm:$0xf] %v8944_v23  ;;  %4910 = vst [vmem:[%s9846_s23 + $0xb4] sm:$0xf] %v8945_v40  ;;  %v7301_v12 = vrot.slane %v7294_v31, %v9761_v56  ;;  %v10363_v47 = vpack.c.bf16 %v783_v44, %v779_v24 }
 0x223   : > { %v1371_v22 = vpack.i.b16 %v873_v36, %v10277_v39  ;;  %v1374_v48 = vshrl.u32 %v873_v36, 16  ;;  %v4987_v43 = vpack.i.b16 %v1290_v35, %v10315_v34  ;;  %v4990_v26 = vshrl.u32 %v1290_v35, 16 }
 0x224   : > { %v7261_v62 = vcombine.low %v7252_v3, %v7260_v55  ;;  %v7309_v5 = vrot.slane %v7302_v45, %v9761_v56 }
 0x225   : > { %v1375_v32 = vpack.i.b16 %v1374_v48, %v1373_v9  ;;  %v2127_v58 = vcombine.high %v1371_v22, %v9757_v52  ;;  %v2134_v54 = vrot.slane %v1371_v22, %v9759_v53  ;;  %v10367_v21 = vpack.i.b16 %v4990_v26, %v4989_v42 }
 0x226   : > { %v7310_v39 = vcombine.low %v7301_v12, %v7309_v5  ;;  %v8232_v57 = vshrl.u32 %v7261_v62, 16  ;;  %v5743_v34 = vcombine.high %v4987_v43, %v9757_v52  ;;  %v5750_v61 = vrot.slane %v4987_v43, %v9759_v53 }
 0x227   : > { %v2141_v2 = vrot.slane %v2127_v58, %v9759_v53  ;;  %v2142_v37 = vcombine.high %v2134_v54, %v9545_v51  ;;  %v2149_v0 = vrot.slane %v2134_v54, %v9761_v56  ;;  %v2176_v24 = vcombine.high %v1375_v32, %v9757_v52  ;;  %v785_v58 = vpop.f32.mrf.mxu0 }
 0x228   : > { %v8231_v1 = vpack.i.b16 %v7310_v39, %v7261_v62  ;;  %v8233_v63 = vshrl.u32 %v7310_v39, 16  ;;  %v2183_v6 = vrot.slane %v1375_v32, %v9759_v53  ;;  %v5757_v14 = vrot.slane %v5743_v34, %v9759_v53 }
 0x229   : > { %v2156_v50 = vrot.slane %v2142_v37, %v9761_v56  ;;  %v2157_v8 = vcombine.high %v2141_v2, %v9545_v51  ;;  %v2164_v30 = vrot.slane %v2141_v2, %v9761_v56  ;;  %v2190_v59 = vrot.slane %v2176_v24, %v9759_v53 }
 0x22a   : > { %v8234_v7 = vpack.i.b16 %v8233_v63, %v8232_v57  ;;  %v9040_v18 = vcombine.low %v8231_v1, %v8231_v1  ;;  %v9041_v4 = vcombine.high %v8231_v1, %v8231_v1  ;;  %v2191_v10 = vcombine.high %v2183_v6, %v9545_v51 }
 0x22b   : > { %v2171_v20 = vrot.slane %v2157_v8, %v9761_v56  ;;  %v2198_v33 = vrot.slane %v2183_v6, %v9761_v56  ;;  %v2206_v19 = vcombine.high %v2190_v59, %v9545_v51  ;;  %v2213_v25 = vrot.slane %v2190_v59, %v9761_v56 }
 0x22c   : > { %v9072_v27 = vcombine.low %v8234_v7, %v8234_v7  ;;  %v9073_v46 = vcombine.high %v8234_v7, %v8234_v7  ;;  %8493 = vst [vmem:[%s9879_s25 + $0x30] sm:$0xf] %v9040_v18  ;;  %8494 = vst [vmem:[%s9879_s25 + $0x34] sm:$0xf] %v9041_v4  ;;  %v2205_v41 = vrot.slane %v2191_v10, %v9761_v56 }
 0x22d   : > { %v3695_v13 = vcombine.low %v2149_v0, %v2156_v50  ;;  %v2220_v15 = vrot.slane %v2206_v19, %v9761_v56  ;;  %v8864_v28 = vcombine.high %v2149_v0, %v2156_v50  ;;  %v3711_v29 = vcombine.low %v2164_v30, %v2171_v20 }
 0x22e   : > { %v8865_v9 = vcombine.high %v2164_v30, %v2171_v20  ;;  %8525 = vst [vmem:[%s9879_s25 + $0xb0] sm:$0xf] %v9072_v27  ;;  %8526 = vst [vmem:[%s9879_s25 + $0xb4] sm:$0xf] %v9073_v46  ;;  %v3744_v49 = vcombine.low %v2198_v33, %v2205_v41  ;;  %v8866_v31 = vcombine.high %v2198_v33, %v2205_v41 }
 0x22f   : > { %v3702_v60 = vrot.slane %v3695_v13, %v9759_v53  ;;  %v5758_v23 = vcombine.high %v5750_v61, %v9545_v51  ;;  %v3710_v40 = vrot.slane %v8864_v28, %v9759_v53  ;;  %v3718_v36 = vrot.slane %v3711_v29, %v9759_v53 }
 0x230   : > { %v3726_v35 = vrot.slane %v8865_v9, %v9759_v53  ;;  %v3760_v44 = vcombine.low %v2213_v25, %v2220_v15  ;;  %v3751_v3 = vrot.slane %v3744_v49, %v9759_v53  ;;  %v3759_v55 = vrot.slane %v8866_v31, %v9759_v53  ;;  %v1202_v31 = vpop.f32.mrf.mxu1 }
 0x231   : > { %v8867_v45 = vcombine.high %v2213_v25, %v2220_v15  ;;  %v10401_v42 = vpack.c.bf16 %v1200_v38, %v1196_v17  ;;  %v3727_v22 = vcombine.low %v3702_v60, %v3710_v40  ;;  %v5772_v26 = vrot.slane %v5758_v23, %v9761_v56 }
 0x232   : > { %v3735_v48 = vcombine.low %v3718_v36, %v3726_v35  ;;  %v3767_v43 = vrot.slane %v3760_v44, %v9759_v53  ;;  %v3776_v12 = vcombine.low %v3751_v3, %v3759_v55  ;;  %v5765_v5 = vrot.slane %v5750_v61, %v9761_v56 }
 0x233   : > { %v3775_v62 = vrot.slane %v8867_v45, %v9759_v53  ;;  %v5773_v32 = vcombine.high %v5757_v14, %v9545_v51  ;;  %v3734_v54 = vrot.slane %v3727_v22, %v9761_v56  ;;  %v5792_v17 = vcombine.high %v10367_v21, %v9757_v52 }
 0x234   : > { %v3742_v39 = vrot.slane %v3735_v48, %v9761_v56  ;;  %v5799_v57 = vrot.slane %v10367_v21, %v9759_v53  ;;  %v5780_v2 = vrot.slane %v5757_v14, %v9761_v56  ;;  %v7311_v0 = vcombine.low %v5765_v5, %v5772_v26  ;;  %v789_v21 = vpop.f32.mrf.mxu0 }
 0x235   : > { %v3784_v34 = vcombine.low %v3767_v43, %v3775_v62  ;;  %v5787_v37 = vrot.slane %v5773_v32, %v9761_v56  ;;  %v3783_v24 = vrot.slane %v3776_v12, %v9761_v56  ;;  %v5806_v1 = vrot.slane %v5792_v17, %v9759_v53 }
 0x236   : > { %v3743_v61 = vcombine.low %v3734_v54, %v3742_v39  ;;  %v5807_v63 = vcombine.high %v5799_v57, %v9545_v51  ;;  %v7318_v50 = vrot.slane %v7311_v0, %v9759_v53  ;;  %v8992_v8 = vcombine.high %v5765_v5, %v5772_v26  ;;  %v10429_v29 = vpop.f32.mrf.mxu0 }
 0x237   : > { %v3791_v6 = vrot.slane %v3784_v34, %v9761_v56  ;;  %v7327_v30 = vcombine.low %v5780_v2, %v5787_v37  ;;  %v5814_v14 = vrot.slane %v5799_v57, %v9761_v56  ;;  %v5822_v18 = vcombine.high %v5806_v1, %v9545_v51 }
 0x238   : > { %v4622_v59 = vshrl.u32 %v3743_v61, 16  ;;  %v5821_v7 = vrot.slane %v5807_v63, %v9761_v56  ;;  %v5829_v10 = vrot.slane %v5806_v1, %v9761_v56  ;;  %v7326_v20 = vrot.slane %v8992_v8, %v9759_v53  ;;  %v793_v62 = vpop.f32.mrf.mxu0  ;;  %v1206_v1 = vpop.f32.mrf.mxu1 }
 0x239   : > { %v3792_v4 = vcombine.low %v3783_v24, %v3791_v6  ;;  %v8993_v33 = vcombine.high %v5780_v2, %v5787_v37  ;;  %v5836_v19 = vrot.slane %v5822_v18, %v9761_v56  ;;  %v7334_v25 = vrot.slane %v7327_v30, %v9759_v53 }
 0x23a   : > { %v7360_v27 = vcombine.low %v5814_v14, %v5821_v7  ;;  %v8994_v46 = vcombine.high %v5814_v14, %v5821_v7  ;;  %v7343_v28 = vcombine.low %v7318_v50, %v7326_v20  ;;  %v1381_v35 = vshrl.u32 %v10363_v47, 16 }
 0x23b   : > { %v4621_v41 = vpack.i.b16 %v3792_v4, %v3743_v61  ;;  %v4623_v13 = vshrl.u32 %v3792_v4, 16  ;;  %v7342_v15 = vrot.slane %v8993_v33, %v9759_v53  ;;  %v7376_v60 = vcombine.low %v5829_v10, %v5836_v19 }
 0x23c   : > { %v7367_v9 = vrot.slane %v7360_v27, %v9759_v53  ;;  %v7375_v38 = vrot.slane %v8994_v46, %v9759_v53  ;;  %v8995_v49 = vcombine.high %v5829_v10, %v5836_v19  ;;  %v875_v43 = vpack.c.bf16 %v785_v58, %v10343_v16  ;;  %v10467_v19 = vpop.f32.mrf.mxu1 }
 0x23d   : > { %v4624_v23 = vpack.i.b16 %v4623_v13, %v4622_v59  ;;  %v8914_v40 = vcombine.low %v4621_v41, %v4621_v41  ;;  %v8915_v36 = vcombine.high %v4621_v41, %v4621_v41  ;;  %v7351_v44 = vcombine.low %v7334_v25, %v7342_v15 }
 0x23e   : > { %v7383_v3 = vrot.slane %v7376_v60, %v9759_v53  ;;  %v7391_v55 = vrot.slane %v8995_v49, %v9759_v53  ;;  %v7392_v45 = vcombine.low %v7367_v9, %v7375_v38  ;;  %v1292_v26 = vpack.c.bf16 %v1202_v31, %v10381_v11 }
 0x23f   : > { %v8946_v22 = vcombine.low %v4624_v23, %v4624_v23  ;;  %v8947_v48 = vcombine.high %v4624_v23, %v4624_v23  ;;  %4879 = vst [vmem:[%s9846_s23 + $0x38] sm:$0xf] %v8914_v40  ;;  %4880 = vst [vmem:[%s9846_s23 + $0x3c] sm:$0xf] %v8915_v36  ;;  %v7350_v12 = vrot.slane %v7343_v28, %v9761_v56  ;;  %v4997_v54 = vshrl.u32 %v10401_v42, 16 }
 0x240   : > { %v7358_v5 = vrot.slane %v7351_v44, %v9761_v56  ;;  %v7400_v32 = vcombine.low %v7383_v3, %v7391_v55  ;;  %v1379_v39 = vpack.i.b16 %v875_v43, %v10363_v47  ;;  %v1382_v17 = vshrl.u32 %v875_v43, 16  ;;  %v1210_v44 = vpop.f32.mrf.mxu1 }
 0x241   : > { %4911 = vst [vmem:[%s9846_s23 + $0xb8] sm:$0xf] %v8946_v22  ;;  %4912 = vst [vmem:[%s9846_s23 + $0xbc] sm:$0xf] %v8947_v48  ;;  %v4995_v57 = vpack.i.b16 %v1292_v26, %v10401_v42  ;;  %v4998_v34 = vshrl.u32 %v1292_v26, 16  ;;  %v7399_v16 = vrot.slane %v7392_v45, %v9761_v56  ;;  %v10449_v58 = vpack.c.bf16 %v793_v62, %v789_v21 }
 0x242   : > { %v7359_v2 = vcombine.low %v7350_v12, %v7358_v5  ;;  %v7407_v11 = vrot.slane %v7400_v32, %v9761_v56  ;;  %v1383_v37 = vpack.i.b16 %v1382_v17, %v1381_v35  ;;  %v2225_v0 = vcombine.high %v1379_v39, %v9757_v52 }
 0x243   : > { %v2232_v61 = vrot.slane %v1379_v39, %v9759_v53  ;;  %v10453_v24 = vpack.i.b16 %v4998_v34, %v4997_v54  ;;  %v5841_v42 = vcombine.high %v4995_v57, %v9757_v52  ;;  %v5848_v6 = vrot.slane %v4995_v57, %v9759_v53 }
 0x244   : > { %v7408_v47 = vcombine.low %v7399_v16, %v7407_v11  ;;  %v8238_v63 = vshrl.u32 %v7359_v2, 16  ;;  %v2239_v50 = vrot.slane %v2225_v0, %v9759_v53  ;;  %v2274_v21 = vcombine.high %v1383_v37, %v9757_v52  ;;  %v795_v0 = vpop.f32.mrf.mxu0 }
 0x245   : > { %v2240_v8 = vcombine.high %v2232_v61, %v9545_v51  ;;  %v2247_v30 = vrot.slane %v2232_v61, %v9761_v56  ;;  %v2281_v7 = vrot.slane %v1383_v37, %v9759_v53  ;;  %v5855_v18 = vrot.slane %v5841_v42, %v9759_v53 }
 0x246   : > { %v8237_v59 = vpack.i.b16 %v7408_v47, %v7359_v2  ;;  %v8239_v14 = vshrl.u32 %v7408_v47, 16  ;;  %v2255_v10 = vcombine.high %v2239_v50, %v9545_v51  ;;  %v2262_v20 = vrot.slane %v2239_v50, %v9761_v56 }
 0x247   : > { %v2254_v4 = vrot.slane %v2240_v8, %v9761_v56  ;;  %v2288_v33 = vrot.slane %v2274_v21, %v9759_v53  ;;  %v2289_v41 = vcombine.high %v2281_v7, %v9545_v51  ;;  %v2296_v15 = vrot.slane %v2281_v7, %v9761_v56 }
 0x248   : > { %v8240_v25 = vpack.i.b16 %v8239_v14, %v8238_v63  ;;  %v9042_v27 = vcombine.low %v8237_v59, %v8237_v59  ;;  %v9043_v46 = vcombine.high %v8237_v59, %v8237_v59  ;;  %v2269_v13 = vrot.slane %v2255_v10, %v9761_v56 }
 0x249   : > { %v2304_v28 = vcombine.high %v2288_v33, %v9545_v51  ;;  %v2311_v9 = vrot.slane %v2288_v33, %v9761_v56  ;;  %v2303_v49 = vrot.slane %v2289_v41, %v9761_v56  ;;  %v3793_v31 = vcombine.low %v2247_v30, %v2254_v4 }
 0x24a   : > { %v9074_v38 = vcombine.low %v8240_v25, %v8240_v25  ;;  %v9075_v60 = vcombine.high %v8240_v25, %v8240_v25  ;;  %8495 = vst [vmem:[%s9879_s25 + $0x38] sm:$0xf] %v9042_v27  ;;  %8496 = vst [vmem:[%s9879_s25 + $0x3c] sm:$0xf] %v9043_v46  ;;  %v8868_v40 = vcombine.high %v2247_v30, %v2254_v4 }
 0x24b   : > { %v2318_v23 = vrot.slane %v2304_v28, %v9761_v56  ;;  %v3809_v36 = vcombine.low %v2262_v20, %v2269_v13  ;;  %v8869_v35 = vcombine.high %v2262_v20, %v2269_v13  ;;  %v3800_v3 = vrot.slane %v3793_v31, %v9759_v53 }
 0x24c   : > { %8527 = vst [vmem:[%s9879_s25 + $0xb8] sm:$0xf] %v9074_v38  ;;  %8528 = vst [vmem:[%s9879_s25 + $0xbc] sm:$0xf] %v9075_v60  ;;  %v3842_v55 = vcombine.low %v2296_v15, %v2303_v49  ;;  %v8870_v45 = vcombine.high %v2296_v15, %v2303_v49  ;;  %v5856_v22 = vcombine.high %v5848_v6, %v9545_v51 }
 0x24d   : > { %v3808_v48 = vrot.slane %v8868_v40, %v9759_v53  ;;  %v3816_v43 = vrot.slane %v3809_v36, %v9759_v53  ;;  %v3824_v26 = vrot.slane %v8869_v35, %v9759_v53  ;;  %v3858_v62 = vcombine.low %v2311_v9, %v2318_v23 }
 0x24e   : > { %v3849_v12 = vrot.slane %v3842_v55, %v9759_v53  ;;  %v3857_v5 = vrot.slane %v8870_v45, %v9759_v53  ;;  %v8871_v32 = vcombine.high %v2311_v9, %v2318_v23  ;;  %v10487_v54 = vpack.c.bf16 %v1210_v44, %v1206_v1  ;;  %v1212_v45 = vpop.f32.mrf.mxu1 }
 0x24f   : > { %v3825_v39 = vcombine.low %v3800_v3, %v3808_v48  ;;  %v3833_v17 = vcombine.low %v3816_v43, %v3824_v26  ;;  %v3865_v57 = vrot.slane %v3858_v62, %v9759_v53  ;;  %v5870_v34 = vrot.slane %v5856_v22, %v9761_v56 }
 0x250   : > { %v3873_v2 = vrot.slane %v8871_v32, %v9759_v53  ;;  %v3874_v16 = vcombine.low %v3849_v12, %v3857_v5  ;;  %v5863_v11 = vrot.slane %v5848_v6, %v9761_v56  ;;  %v5871_v37 = vcombine.high %v5855_v18, %v9545_v51 }
 0x251   : > { %v3832_v61 = vrot.slane %v3825_v39, %v9761_v56  ;;  %v3840_v47 = vrot.slane %v3833_v17, %v9761_v56  ;;  %v5890_v1 = vcombine.high %v10453_v24, %v9757_v52  ;;  %v5897_v63 = vrot.slane %v10453_v24, %v9759_v53  ;;  %v799_v24 = vpop.f32.mrf.mxu0 }
 0x252   : > { %v3882_v42 = vcombine.low %v3865_v57, %v3873_v2  ;;  %v5878_v50 = vrot.slane %v5855_v18, %v9761_v56  ;;  %v5885_v8 = vrot.slane %v5871_v37, %v9761_v56  ;;  %v7409_v30 = vcombine.low %v5863_v11, %v5870_v34 }
 0x253   : > { %v3841_v6 = vcombine.low %v3832_v61, %v3840_v47  ;;  %v3881_v21 = vrot.slane %v3874_v16, %v9761_v56  ;;  %v5904_v59 = vrot.slane %v5890_v1, %v9759_v53  ;;  %v5905_v14 = vcombine.high %v5897_v63, %v9545_v51  ;;  %v10515_v36 = vpop.f32.mrf.mxu0 }
 0x254   : > { %v3889_v7 = vrot.slane %v3882_v42, %v9761_v56  ;;  %v7416_v4 = vrot.slane %v7409_v30, %v9759_v53  ;;  %v8996_v10 = vcombine.high %v5863_v11, %v5870_v34  ;;  %v7425_v20 = vcombine.low %v5878_v50, %v5885_v8 }
 0x255   : > { %v4628_v33 = vshrl.u32 %v3841_v6, 16  ;;  %v5912_v18 = vrot.slane %v5897_v63, %v9761_v56  ;;  %v5919_v25 = vrot.slane %v5905_v14, %v9761_v56  ;;  %v5920_v27 = vcombine.high %v5904_v59, %v9545_v51  ;;  %v803_v2 = vpop.f32.mrf.mxu0 }
 0x256   : > { %v3890_v46 = vcombine.low %v3881_v21, %v3889_v7  ;;  %v5927_v41 = vrot.slane %v5904_v59, %v9761_v56  ;;  %v7424_v13 = vrot.slane %v8996_v10, %v9759_v53  ;;  %v8997_v15 = vcombine.high %v5878_v50, %v5885_v8  ;;  %v1216_v59 = vpop.f32.mrf.mxu1 }
 0x257   : > { %v5934_v28 = vrot.slane %v5920_v27, %v9761_v56  ;;  %v7432_v9 = vrot.slane %v7425_v20, %v9759_v53  ;;  %v7458_v38 = vcombine.low %v5912_v18, %v5919_v25  ;;  %v8998_v60 = vcombine.high %v5912_v18, %v5919_v25 }
 0x258   : > { %v4627_v49 = vpack.i.b16 %v3890_v46, %v3841_v6  ;;  %v4629_v31 = vshrl.u32 %v3890_v46, 16  ;;  %v7440_v23 = vrot.slane %v8997_v15, %v9759_v53  ;;  %v7441_v40 = vcombine.low %v7416_v4, %v7424_v13 }
 0x259   : > { %v7465_v35 = vrot.slane %v7458_v38, %v9759_v53  ;;  %v7473_v44 = vrot.slane %v8998_v60, %v9759_v53  ;;  %v7474_v3 = vcombine.low %v5927_v41, %v5934_v28  ;;  %v8999_v55 = vcombine.high %v5927_v41, %v5934_v28  ;;  %v10553_v28 = vpop.f32.mrf.mxu1 }
 0x25a   : > { %v4630_v22 = vpack.i.b16 %v4629_v31, %v4628_v33  ;;  %v8916_v48 = vcombine.low %v4627_v49, %v4627_v49  ;;  %v8917_v43 = vcombine.high %v4627_v49, %v4627_v49  ;;  %v1389_v26 = vshrl.u32 %v10449_v58, 16 }
 0x25b   : > { %v7449_v62 = vcombine.low %v7432_v9, %v7440_v23  ;;  %v7481_v12 = vrot.slane %v7474_v3, %v9759_v53  ;;  %v7489_v5 = vrot.slane %v8999_v55, %v9759_v53  ;;  %v7490_v32 = vcombine.low %v7465_v35, %v7473_v44 }
 0x25c   : > { %v8948_v39 = vcombine.low %v4630_v22, %v4630_v22  ;;  %v8949_v17 = vcombine.high %v4630_v22, %v4630_v22  ;;  %4881 = vst [vmem:[%s9846_s23 + $0x40] sm:$0xf] %v8916_v48  ;;  %4882 = vst [vmem:[%s9846_s23 + $0x44] sm:$0xf] %v8917_v43  ;;  %v877_v57 = vpack.c.bf16 %v795_v0, %v10429_v29  ;;  %v5005_v61 = vshrl.u32 %v10487_v54, 16 }
 0x25d   : > { %v1294_v34 = vpack.c.bf16 %v1212_v45, %v10467_v19  ;;  %v7448_v16 = vrot.slane %v7441_v40, %v9761_v56  ;;  %v7456_v11 = vrot.slane %v7449_v62, %v9761_v56  ;;  %v7498_v37 = vcombine.low %v7481_v12, %v7489_v5  ;;  %v1220_v62 = vpop.f32.mrf.mxu1 }
 0x25e   : > { %4913 = vst [vmem:[%s9846_s23 + $0xc0] sm:$0xf] %v8948_v39  ;;  %4914 = vst [vmem:[%s9846_s23 + $0xc4] sm:$0xf] %v8949_v17  ;;  %v1387_v47 = vpack.i.b16 %v877_v57, %v10449_v58  ;;  %v1390_v1 = vshrl.u32 %v877_v57, 16  ;;  %v7497_v29 = vrot.slane %v7490_v32, %v9761_v56  ;;  %v10535_v0 = vpack.c.bf16 %v803_v2, %v799_v24 }
 0x25f   : > { %v5003_v63 = vpack.i.b16 %v1294_v34, %v10487_v54  ;;  %v5006_v42 = vshrl.u32 %v1294_v34, 16  ;;  %v7457_v50 = vcombine.low %v7448_v16, %v7456_v11  ;;  %v7505_v19 = vrot.slane %v7498_v37, %v9761_v56 }
 0x260   : > { %v1391_v8 = vpack.i.b16 %v1390_v1, %v1389_v26  ;;  %v2323_v30 = vcombine.high %v1387_v47, %v9757_v52  ;;  %v2330_v6 = vrot.slane %v1387_v47, %v9759_v53 }
 0x261   : > { %v10539_v21 = vpack.i.b16 %v5006_v42, %v5005_v61  ;;  %v7506_v58 = vcombine.low %v7497_v29, %v7505_v19  ;;  %v8244_v14 = vshrl.u32 %v7457_v50, 16  ;;  %v5939_v54 = vcombine.high %v5003_v63, %v9757_v52 }
 0x262   : > { %v5946_v7 = vrot.slane %v5003_v63, %v9759_v53  ;;  %v2337_v4 = vrot.slane %v2323_v30, %v9759_v53  ;;  %v2338_v10 = vcombine.high %v2330_v6, %v9545_v51  ;;  %v2345_v20 = vrot.slane %v2330_v6, %v9761_v56  ;;  %v805_v30 = vpop.f32.mrf.mxu0 }
 0x263   : > { %v2372_v24 = vcombine.high %v1391_v8, %v9757_v52  ;;  %v8243_v33 = vpack.i.b16 %v7506_v58, %v7457_v50  ;;  %v8245_v18 = vshrl.u32 %v7506_v58, 16  ;;  %v2379_v25 = vrot.slane %v1391_v8, %v9759_v53 }
 0x264   : > { %v5953_v27 = vrot.slane %v5939_v54, %v9759_v53  ;;  %v2352_v46 = vrot.slane %v2338_v10, %v9761_v56  ;;  %v2353_v41 = vcombine.high %v2337_v4, %v9545_v51  ;;  %v2360_v13 = vrot.slane %v2337_v4, %v9761_v56 }
 0x265   : > { %v2386_v15 = vrot.slane %v2372_v24, %v9759_v53  ;;  %v8246_v9 = vpack.i.b16 %v8245_v18, %v8244_v14  ;;  %v9044_v38 = vcombine.low %v8243_v33, %v8243_v33  ;;  %v9045_v60 = vcombine.high %v8243_v33, %v8243_v33 }
 0x266   : > { %v2387_v49 = vcombine.high %v2379_v25, %v9545_v51  ;;  %v2367_v31 = vrot.slane %v2353_v41, %v9761_v56  ;;  %v2394_v23 = vrot.slane %v2379_v25, %v9761_v56  ;;  %v3891_v45 = vcombine.low %v2345_v20, %v2352_v46 }
 0x267   : > { %v2402_v40 = vcombine.high %v2386_v15, %v9545_v51  ;;  %v2409_v35 = vrot.slane %v2386_v15, %v9761_v56  ;;  %v9076_v44 = vcombine.low %v8246_v9, %v8246_v9  ;;  %v9077_v3 = vcombine.high %v8246_v9, %v8246_v9  ;;  %8497 = vst [vmem:[%s9879_s25 + $0x40] sm:$0xf] %v9044_v38 }
 0x268   : > { %8498 = vst [vmem:[%s9879_s25 + $0x44] sm:$0xf] %v9045_v60  ;;  %v2401_v55 = vrot.slane %v2387_v49, %v9761_v56  ;;  %v8872_v48 = vcombine.high %v2345_v20, %v2352_v46  ;;  %v3907_v43 = vcombine.low %v2360_v13, %v2367_v31  ;;  %v8873_v26 = vcombine.high %v2360_v13, %v2367_v31 }
 0x269   : > { %v2416_v22 = vrot.slane %v2402_v40, %v9761_v56  ;;  %8529 = vst [vmem:[%s9879_s25 + $0xc0] sm:$0xf] %v9076_v44  ;;  %8530 = vst [vmem:[%s9879_s25 + $0xc4] sm:$0xf] %v9077_v3  ;;  %v3898_v12 = vrot.slane %v3891_v45, %v9759_v53  ;;  %v5954_v39 = vcombine.high %v5946_v7, %v9545_v51 }
 0x26a   : > { %v3940_v5 = vcombine.low %v2394_v23, %v2401_v55  ;;  %v8874_v32 = vcombine.high %v2394_v23, %v2401_v55  ;;  %v3906_v17 = vrot.slane %v8872_v48, %v9759_v53  ;;  %v3914_v57 = vrot.slane %v3907_v43, %v9759_v53 }
 0x26b   : > { %v3922_v34 = vrot.slane %v8873_v26, %v9759_v53  ;;  %v3956_v2 = vcombine.low %v2409_v35, %v2416_v22  ;;  %v8875_v37 = vcombine.high %v2409_v35, %v2416_v22  ;;  %v10573_v61 = vpack.c.bf16 %v1220_v62, %v1216_v59 }
 0x26c   : > { %v3947_v16 = vrot.slane %v3940_v5, %v9759_v53  ;;  %v3955_v11 = vrot.slane %v8874_v32, %v9759_v53  ;;  %v3923_v47 = vcombine.low %v3898_v12, %v3906_v17  ;;  %v5968_v42 = vrot.slane %v5954_v39, %v9761_v56  ;;  %v1222_v32 = vpop.f32.mrf.mxu1 }
 0x26d   : > { %v3931_v1 = vcombine.low %v3914_v57, %v3922_v34  ;;  %v3963_v63 = vrot.slane %v3956_v2, %v9759_v53  ;;  %v3971_v50 = vrot.slane %v8875_v37, %v9759_v53  ;;  %v5961_v19 = vrot.slane %v5946_v7, %v9761_v56 }
 0x26e   : > { %v3972_v29 = vcombine.low %v3947_v16, %v3955_v11  ;;  %v5969_v8 = vcombine.high %v5953_v27, %v9545_v51  ;;  %v3930_v6 = vrot.slane %v3923_v47, %v9761_v56  ;;  %v5988_v59 = vcombine.high %v10539_v21, %v9757_v52 }
 0x26f   : > { %v3938_v58 = vrot.slane %v3931_v1, %v9761_v56  ;;  %v5995_v14 = vrot.slane %v10539_v21, %v9759_v53  ;;  %v3980_v54 = vcombine.low %v3963_v63, %v3971_v50  ;;  %v5976_v4 = vrot.slane %v5953_v27, %v9761_v56  ;;  %v809_v21 = vpop.f32.mrf.mxu0 }
 0x270   : > { %v5983_v10 = vrot.slane %v5969_v8, %v9761_v56  ;;  %v7507_v20 = vcombine.low %v5961_v19, %v5968_v42  ;;  %v3979_v24 = vrot.slane %v3972_v29, %v9761_v56  ;;  %v6002_v33 = vrot.slane %v5988_v59, %v9759_v53 }
 0x271   : > { %v3939_v7 = vcombine.low %v3930_v6, %v3938_v58  ;;  %v6003_v18 = vcombine.high %v5995_v14, %v9545_v51  ;;  %v3987_v25 = vrot.slane %v3980_v54, %v9761_v56  ;;  %v9000_v41 = vcombine.high %v5961_v19, %v5968_v42  ;;  %v10601_v43 = vpop.f32.mrf.mxu0 }
 0x272   : > { %v7514_v46 = vrot.slane %v7507_v20, %v9759_v53  ;;  %v7523_v13 = vcombine.low %v5976_v4, %v5983_v10  ;;  %v6010_v27 = vrot.slane %v5995_v14, %v9761_v56  ;;  %v6018_v38 = vcombine.high %v6002_v33, %v9545_v51 }
 0x273   : > { %v4634_v15 = vshrl.u32 %v3939_v7, 16  ;;  %v6017_v9 = vrot.slane %v6003_v18, %v9761_v56  ;;  %v3988_v60 = vcombine.low %v3979_v24, %v3987_v25  ;;  %v6025_v49 = vrot.slane %v6002_v33, %v9761_v56  ;;  %v813_v50 = vpop.f32.mrf.mxu0  ;;  %v1226_v33 = vpop.f32.mrf.mxu1 }
 0x274   : > { %v7522_v31 = vrot.slane %v9000_v41, %v9759_v53  ;;  %v9001_v23 = vcombine.high %v5976_v4, %v5983_v10  ;;  %v6032_v40 = vrot.slane %v6018_v38, %v9761_v56  ;;  %v7530_v35 = vrot.slane %v7523_v13, %v9759_v53 }
 0x275   : > { %v7556_v44 = vcombine.low %v6010_v27, %v6017_v9  ;;  %v9002_v3 = vcombine.high %v6010_v27, %v6017_v9  ;;  %v4633_v55 = vpack.i.b16 %v3988_v60, %v3939_v7  ;;  %v4635_v45 = vshrl.u32 %v3988_v60, 16 }
 0x276   : > { %v7538_v22 = vrot.slane %v9001_v23, %v9759_v53  ;;  %v7539_v48 = vcombine.low %v7514_v46, %v7522_v31  ;;  %v7572_v12 = vcombine.low %v6025_v49, %v6032_v40  ;;  %v9003_v5 = vcombine.high %v6025_v49, %v6032_v40  ;;  %v10639_v40 = vpop.f32.mrf.mxu1 }
 0x277   : > { %v7563_v26 = vrot.slane %v7556_v44, %v9759_v53  ;;  %v7571_v62 = vrot.slane %v9002_v3, %v9759_v53  ;;  %v4636_v39 = vpack.i.b16 %v4635_v45, %v4634_v15  ;;  %v8918_v17 = vcombine.low %v4633_v55, %v4633_v55 }
 0x278   : > { %v8919_v57 = vcombine.high %v4633_v55, %v4633_v55  ;;  %v1397_v34 = vshrl.u32 %v10535_v0, 16  ;;  %v7547_v2 = vcombine.low %v7530_v35, %v7538_v22  ;;  %v7579_v16 = vrot.slane %v7572_v12, %v9759_v53 }
 0x279   : > { %v7587_v11 = vrot.slane %v9003_v5, %v9759_v53  ;;  %v7588_v37 = vcombine.low %v7563_v26, %v7571_v62  ;;  %v8950_v47 = vcombine.low %v4636_v39, %v4636_v39  ;;  %v8951_v1 = vcombine.high %v4636_v39, %v4636_v39  ;;  %4883 = vst [vmem:[%s9846_s23 + $0x48] sm:$0xf] %v8918_v17 }
 0x27a   : > { %4884 = vst [vmem:[%s9846_s23 + $0x4c] sm:$0xf] %v8919_v57  ;;  %v879_v63 = vpack.c.bf16 %v805_v30, %v10515_v36  ;;  %v1296_v42 = vpack.c.bf16 %v1222_v32, %v10553_v28  ;;  %v7546_v29 = vrot.slane %v7539_v48, %v9761_v56  ;;  %v7554_v19 = vrot.slane %v7547_v2, %v9761_v56  ;;  %v1230_v2 = vpop.f32.mrf.mxu1 }
 0x27b   : > { %v7596_v8 = vcombine.low %v7579_v16, %v7587_v11  ;;  %v5013_v6 = vshrl.u32 %v10573_v61, 16  ;;  %4915 = vst [vmem:[%s9846_s23 + $0xc8] sm:$0xf] %v8950_v47  ;;  %4916 = vst [vmem:[%s9846_s23 + $0xcc] sm:$0xf] %v8951_v1  ;;  %v7595_v36 = vrot.slane %v7588_v37, %v9761_v56  ;;  %v10621_v30 = vpack.c.bf16 %v813_v50, %v809_v21 }
 0x27c   : > { %v1395_v58 = vpack.i.b16 %v879_v63, %v10535_v0  ;;  %v1398_v59 = vshrl.u32 %v879_v63, 16  ;;  %v5011_v14 = vpack.i.b16 %v1296_v42, %v10573_v61  ;;  %v5014_v54 = vshrl.u32 %v1296_v42, 16 }
 0x27d   : > { %v7555_v4 = vcombine.low %v7546_v29, %v7554_v19  ;;  %v7603_v28 = vrot.slane %v7596_v8, %v9761_v56 }
 0x27e   : > { %v1399_v10 = vpack.i.b16 %v1398_v59, %v1397_v34  ;;  %v2421_v20 = vcombine.high %v1395_v58, %v9757_v52  ;;  %v2428_v7 = vrot.slane %v1395_v58, %v9759_v53  ;;  %v10625_v24 = vpack.i.b16 %v5014_v54, %v5013_v6 }
 0x27f   : > { %v7604_v0 = vcombine.low %v7595_v36, %v7603_v28  ;;  %v8250_v18 = vshrl.u32 %v7555_v4, 16  ;;  %v6037_v61 = vcombine.high %v5011_v14, %v9757_v52  ;;  %v6044_v25 = vrot.slane %v5011_v14, %v9759_v53 }
 0x280   : > { %v2435_v46 = vrot.slane %v2421_v20, %v9759_v53  ;;  %v2436_v41 = vcombine.high %v2428_v7, %v9545_v51  ;;  %v2443_v13 = vrot.slane %v2428_v7, %v9761_v56  ;;  %v2470_v21 = vcombine.high %v1399_v10, %v9757_v52  ;;  %v815_v20 = vpop.f32.mrf.mxu0 }
 0x281   : > { %v8249_v15 = vpack.i.b16 %v7604_v0, %v7555_v4  ;;  %v8251_v27 = vshrl.u32 %v7604_v0, 16  ;;  %v2477_v9 = vrot.slane %v1399_v10, %v9759_v53  ;;  %v6051_v38 = vrot.slane %v6037_v61, %v9759_v53 }
 0x282   : > { %v2450_v60 = vrot.slane %v2436_v41, %v9761_v56  ;;  %v2451_v49 = vcombine.high %v2435_v46, %v9545_v51  ;;  %v2458_v31 = vrot.slane %v2435_v46, %v9761_v56  ;;  %v2484_v23 = vrot.slane %v2470_v21, %v9759_v53 }
 0x283   : > { %v8252_v35 = vpack.i.b16 %v8251_v27, %v8250_v18  ;;  %v9046_v44 = vcombine.low %v8249_v15, %v8249_v15  ;;  %v9047_v3 = vcombine.high %v8249_v15, %v8249_v15  ;;  %v2485_v55 = vcombine.high %v2477_v9, %v9545_v51 }
 0x284   : > { %v2465_v45 = vrot.slane %v2451_v49, %v9761_v56  ;;  %v2492_v22 = vrot.slane %v2477_v9, %v9761_v56  ;;  %v2500_v48 = vcombine.high %v2484_v23, %v9545_v51  ;;  %v2507_v26 = vrot.slane %v2484_v23, %v9761_v56 }
 0x285   : > { %v9078_v62 = vcombine.low %v8252_v35, %v8252_v35  ;;  %v9079_v12 = vcombine.high %v8252_v35, %v8252_v35  ;;  %8499 = vst [vmem:[%s9879_s25 + $0x48] sm:$0xf] %v9046_v44  ;;  %8500 = vst [vmem:[%s9879_s25 + $0x4c] sm:$0xf] %v9047_v3  ;;  %v2499_v5 = vrot.slane %v2485_v55, %v9761_v56 }
 0x286   : > { %v3989_v32 = vcombine.low %v2443_v13, %v2450_v60  ;;  %v2514_v39 = vrot.slane %v2500_v48, %v9761_v56  ;;  %v8876_v17 = vcombine.high %v2443_v13, %v2450_v60  ;;  %v4005_v57 = vcombine.low %v2458_v31, %v2465_v45 }
 0x287   : > { %v8877_v34 = vcombine.high %v2458_v31, %v2465_v45  ;;  %8531 = vst [vmem:[%s9879_s25 + $0xc8] sm:$0xf] %v9078_v62  ;;  %8532 = vst [vmem:[%s9879_s25 + $0xcc] sm:$0xf] %v9079_v12  ;;  %v4038_v11 = vcombine.low %v2492_v22, %v2499_v5  ;;  %v8878_v37 = vcombine.high %v2492_v22, %v2499_v5 }
 0x288   : > { %v3996_v16 = vrot.slane %v3989_v32, %v9759_v53  ;;  %v6052_v47 = vcombine.high %v6044_v25, %v9545_v51  ;;  %v4004_v1 = vrot.slane %v8876_v17, %v9759_v53  ;;  %v4012_v63 = vrot.slane %v4005_v57, %v9759_v53 }
 0x289   : > { %v4020_v42 = vrot.slane %v8877_v34, %v9759_v53  ;;  %v4054_v50 = vcombine.low %v2507_v26, %v2514_v39  ;;  %v4045_v29 = vrot.slane %v4038_v11, %v9759_v53  ;;  %v4053_v19 = vrot.slane %v8878_v37, %v9759_v53  ;;  %v1232_v37 = vpop.f32.mrf.mxu1 }
 0x28a   : > { %v8879_v8 = vcombine.high %v2507_v26, %v2514_v39  ;;  %v10659_v6 = vpack.c.bf16 %v1230_v2, %v1226_v33  ;;  %v4021_v58 = vcombine.low %v3996_v16, %v4004_v1  ;;  %v6066_v54 = vrot.slane %v6052_v47, %v9761_v56 }
 0x28b   : > { %v4029_v59 = vcombine.low %v4012_v63, %v4020_v42  ;;  %v4061_v14 = vrot.slane %v4054_v50, %v9759_v53  ;;  %v4070_v36 = vcombine.low %v4045_v29, %v4053_v19  ;;  %v6059_v28 = vrot.slane %v6044_v25, %v9761_v56 }
 0x28c   : > { %v4069_v4 = vrot.slane %v8879_v8, %v9759_v53  ;;  %v6067_v10 = vcombine.high %v6051_v38, %v9545_v51  ;;  %v4028_v7 = vrot.slane %v4021_v58, %v9761_v56  ;;  %v6086_v33 = vcombine.high %v10625_v24, %v9757_v52 }
 0x28d   : > { %v4036_v0 = vrot.slane %v4029_v59, %v9761_v56  ;;  %v6093_v18 = vrot.slane %v10625_v24, %v9759_v53  ;;  %v6074_v46 = vrot.slane %v6051_v38, %v9761_v56  ;;  %v7605_v13 = vcombine.low %v6059_v28, %v6066_v54  ;;  %v819_v24 = vpop.f32.mrf.mxu0 }
 0x28e   : > { %v4078_v61 = vcombine.low %v4061_v14, %v4069_v4  ;;  %v6081_v41 = vrot.slane %v6067_v10, %v9761_v56  ;;  %v4077_v21 = vrot.slane %v4070_v36, %v9761_v56  ;;  %v6100_v15 = vrot.slane %v6086_v33, %v9759_v53 }
 0x28f   : > { %v4037_v25 = vcombine.low %v4028_v7, %v4036_v0  ;;  %v6101_v27 = vcombine.high %v6093_v18, %v9545_v51  ;;  %v7612_v60 = vrot.slane %v7605_v13, %v9759_v53  ;;  %v9004_v49 = vcombine.high %v6059_v28, %v6066_v54  ;;  %v10687_v57 = vpop.f32.mrf.mxu0 }
 0x290   : > { %v4085_v9 = vrot.slane %v4078_v61, %v9761_v56  ;;  %v7621_v31 = vcombine.low %v6074_v46, %v6081_v41  ;;  %v6108_v38 = vrot.slane %v6093_v18, %v9761_v56  ;;  %v6116_v44 = vcombine.high %v6100_v15, %v9545_v51 }
 0x291   : > { %v4640_v23 = vshrl.u32 %v4037_v25, 16  ;;  %v6115_v35 = vrot.slane %v6101_v27, %v9761_v56  ;;  %v6123_v55 = vrot.slane %v6100_v15, %v9761_v56  ;;  %v7620_v45 = vrot.slane %v9004_v49, %v9759_v53  ;;  %v823_v4 = vpop.f32.mrf.mxu0  ;;  %v1236_v15 = vpop.f32.mrf.mxu1 }
 0x292   : > { %v4086_v3 = vcombine.low %v4077_v21, %v4085_v9  ;;  %v9005_v22 = vcombine.high %v6074_v46, %v6081_v41  ;;  %v6130_v48 = vrot.slane %v6116_v44, %v9761_v56  ;;  %v7628_v26 = vrot.slane %v7621_v31, %v9759_v53 }
 0x293   : > { %v7654_v62 = vcombine.low %v6108_v38, %v6115_v35  ;;  %v9006_v12 = vcombine.high %v6108_v38, %v6115_v35  ;;  %v7637_v17 = vcombine.low %v7612_v60, %v7620_v45  ;;  %v1405_v42 = vshrl.u32 %v10621_v30, 16 }
 0x294   : > { %v4639_v5 = vpack.i.b16 %v4086_v3, %v4037_v25  ;;  %v4641_v32 = vshrl.u32 %v4086_v3, 16  ;;  %v7636_v39 = vrot.slane %v9005_v22, %v9759_v53  ;;  %v7670_v16 = vcombine.low %v6123_v55, %v6130_v48 }
 0x295   : > { %v7661_v34 = vrot.slane %v7654_v62, %v9759_v53  ;;  %v7669_v2 = vrot.slane %v9006_v12, %v9759_v53  ;;  %v9007_v11 = vcombine.high %v6123_v55, %v6130_v48  ;;  %v881_v14 = vpack.c.bf16 %v815_v20, %v10601_v43  ;;  %v10725_v48 = vpop.f32.mrf.mxu1 }
 0x296   : > { %v4642_v47 = vpack.i.b16 %v4641_v32, %v4640_v23  ;;  %v8920_v1 = vcombine.low %v4639_v5, %v4639_v5  ;;  %v8921_v63 = vcombine.high %v4639_v5, %v4639_v5  ;;  %v7645_v50 = vcombine.low %v7628_v26, %v7636_v39 }
 0x297   : > { %v7677_v29 = vrot.slane %v7670_v16, %v9759_v53  ;;  %v7685_v19 = vrot.slane %v9007_v11, %v9759_v53  ;;  %v7686_v8 = vcombine.low %v7661_v34, %v7669_v2  ;;  %v1298_v54 = vpack.c.bf16 %v1232_v37, %v10639_v40 }
 0x298   : > { %v8952_v58 = vcombine.low %v4642_v47, %v4642_v47  ;;  %v8953_v59 = vcombine.high %v4642_v47, %v4642_v47  ;;  %4885 = vst [vmem:[%s9846_s23 + $0x50] sm:$0xf] %v8920_v1  ;;  %4886 = vst [vmem:[%s9846_s23 + $0x54] sm:$0xf] %v8921_v63  ;;  %v7644_v36 = vrot.slane %v7637_v17, %v9761_v56  ;;  %v5021_v7 = vshrl.u32 %v10659_v6, 16 }
 0x299   : > { %v7652_v28 = vrot.slane %v7645_v50, %v9761_v56  ;;  %v7694_v10 = vcombine.low %v7677_v29, %v7685_v19  ;;  %v1403_v0 = vpack.i.b16 %v881_v14, %v10621_v30  ;;  %v1406_v33 = vshrl.u32 %v881_v14, 16  ;;  %v1240_v50 = vpop.f32.mrf.mxu1 }
 0x29a   : > { %4917 = vst [vmem:[%s9846_s23 + $0xd0] sm:$0xf] %v8952_v58  ;;  %4918 = vst [vmem:[%s9846_s23 + $0xd4] sm:$0xf] %v8953_v59  ;;  %v5019_v18 = vpack.i.b16 %v1298_v54, %v10659_v6  ;;  %v5022_v61 = vshrl.u32 %v1298_v54, 16  ;;  %v7693_v43 = vrot.slane %v7686_v8, %v9761_v56  ;;  %v10707_v20 = vpack.c.bf16 %v823_v4, %v819_v24 }
 0x29b   : > { %v7653_v46 = vcombine.low %v7644_v36, %v7652_v28  ;;  %v7701_v40 = vrot.slane %v7694_v10, %v9761_v56  ;;  %v1407_v41 = vpack.i.b16 %v1406_v33, %v1405_v42  ;;  %v2519_v13 = vcombine.high %v1403_v0, %v9757_v52 }
 0x29c   : > { %v2526_v25 = vrot.slane %v1403_v0, %v9759_v53  ;;  %v10711_v21 = vpack.i.b16 %v5022_v61, %v5021_v7  ;;  %v6135_v6 = vcombine.high %v5019_v18, %v9757_v52  ;;  %v6142_v9 = vrot.slane %v5019_v18, %v9759_v53 }
 0x29d   : > { %v7702_v30 = vcombine.low %v7693_v43, %v7701_v40  ;;  %v8256_v27 = vshrl.u32 %v7653_v46, 16  ;;  %v2533_v60 = vrot.slane %v2519_v13, %v9759_v53  ;;  %v2568_v24 = vcombine.high %v1407_v41, %v9757_v52  ;;  %v825_v13 = vpop.f32.mrf.mxu0 }
 0x29e   : > { %v2534_v49 = vcombine.high %v2526_v25, %v9545_v51  ;;  %v2541_v31 = vrot.slane %v2526_v25, %v9761_v56  ;;  %v2575_v35 = vrot.slane %v1407_v41, %v9759_v53  ;;  %v6149_v44 = vrot.slane %v6135_v6, %v9759_v53 }
 0x29f   : > { %v8255_v23 = vpack.i.b16 %v7702_v30, %v7653_v46  ;;  %v8257_v38 = vshrl.u32 %v7702_v30, 16  ;;  %v2549_v55 = vcombine.high %v2533_v60, %v9545_v51  ;;  %v2556_v45 = vrot.slane %v2533_v60, %v9761_v56 }
 0x2a0   : > { %v2548_v3 = vrot.slane %v2534_v49, %v9761_v56  ;;  %v2582_v22 = vrot.slane %v2568_v24, %v9759_v53  ;;  %v2583_v5 = vcombine.high %v2575_v35, %v9545_v51  ;;  %v2590_v39 = vrot.slane %v2575_v35, %v9761_v56 }
 0x2a1   : > { %v8258_v26 = vpack.i.b16 %v8257_v38, %v8256_v27  ;;  %v9048_v62 = vcombine.low %v8255_v23, %v8255_v23  ;;  %v9049_v12 = vcombine.high %v8255_v23, %v8255_v23  ;;  %v2563_v32 = vrot.slane %v2549_v55, %v9761_v56 }
 0x2a2   : > { %v2598_v17 = vcombine.high %v2582_v22, %v9545_v51  ;;  %v2605_v34 = vrot.slane %v2582_v22, %v9761_v56  ;;  %v2597_v11 = vrot.slane %v2583_v5, %v9761_v56  ;;  %v4087_v37 = vcombine.low %v2541_v31, %v2548_v3 }
 0x2a3   : > { %v9080_v2 = vcombine.low %v8258_v26, %v8258_v26  ;;  %v9081_v16 = vcombine.high %v8258_v26, %v8258_v26  ;;  %8501 = vst [vmem:[%s9879_s25 + $0x50] sm:$0xf] %v9048_v62  ;;  %8502 = vst [vmem:[%s9879_s25 + $0x54] sm:$0xf] %v9049_v12  ;;  %v8880_v1 = vcombine.high %v2541_v31, %v2548_v3 }
 0x2a4   : > { %v2612_v47 = vrot.slane %v2598_v17, %v9761_v56  ;;  %v4103_v63 = vcombine.low %v2556_v45, %v2563_v32  ;;  %v8881_v42 = vcombine.high %v2556_v45, %v2563_v32  ;;  %v4094_v29 = vrot.slane %v4087_v37, %v9759_v53 }
 0x2a5   : > { %8533 = vst [vmem:[%s9879_s25 + $0xd0] sm:$0xf] %v9080_v2  ;;  %8534 = vst [vmem:[%s9879_s25 + $0xd4] sm:$0xf] %v9081_v16  ;;  %v4136_v19 = vcombine.low %v2590_v39, %v2597_v11  ;;  %v8882_v8 = vcombine.high %v2590_v39, %v2597_v11  ;;  %v6150_v58 = vcombine.high %v6142_v9, %v9545_v51 }
 0x2a6   : > { %v4102_v59 = vrot.slane %v8880_v1, %v9759_v53  ;;  %v4110_v14 = vrot.slane %v4103_v63, %v9759_v53  ;;  %v4118_v54 = vrot.slane %v8881_v42, %v9759_v53  ;;  %v4152_v4 = vcombine.low %v2605_v34, %v2612_v47 }
 0x2a7   : > { %v4143_v36 = vrot.slane %v4136_v19, %v9759_v53  ;;  %v4151_v28 = vrot.slane %v8882_v8, %v9759_v53  ;;  %v8883_v10 = vcombine.high %v2605_v34, %v2612_v47  ;;  %v10745_v7 = vpack.c.bf16 %v1240_v50, %v1236_v15  ;;  %v1242_v8 = vpop.f32.mrf.mxu1 }
 0x2a8   : > { %v4119_v0 = vcombine.low %v4094_v29, %v4102_v59  ;;  %v4127_v33 = vcombine.low %v4110_v14, %v4118_v54  ;;  %v4159_v18 = vrot.slane %v4152_v4, %v9759_v53  ;;  %v6164_v61 = vrot.slane %v6150_v58, %v9761_v56 }
 0x2a9   : > { %v4167_v46 = vrot.slane %v8883_v10, %v9759_v53  ;;  %v4168_v43 = vcombine.low %v4143_v36, %v4151_v28  ;;  %v6157_v40 = vrot.slane %v6142_v9, %v9761_v56  ;;  %v6165_v41 = vcombine.high %v6149_v44, %v9545_v51 }
 0x2aa   : > { %v4126_v25 = vrot.slane %v4119_v0, %v9761_v56  ;;  %v4134_v30 = vrot.slane %v4127_v33, %v9761_v56  ;;  %v6184_v15 = vcombine.high %v10711_v21, %v9757_v52  ;;  %v6191_v27 = vrot.slane %v10711_v21, %v9759_v53  ;;  %v829_v21 = vpop.f32.mrf.mxu0 }
 0x2ab   : > { %v4176_v6 = vcombine.low %v4159_v18, %v4167_v46  ;;  %v6172_v60 = vrot.slane %v6149_v44, %v9761_v56  ;;  %v6179_v49 = vrot.slane %v6165_v41, %v9761_v56  ;;  %v7703_v31 = vcombine.low %v6157_v40, %v6164_v61 }
 0x2ac   : > { %v4135_v9 = vcombine.low %v4126_v25, %v4134_v30  ;;  %v4175_v24 = vrot.slane %v4168_v43, %v9761_v56  ;;  %v6198_v23 = vrot.slane %v6184_v15, %v9759_v53  ;;  %v6199_v38 = vcombine.high %v6191_v27, %v9545_v51  ;;  %v10773_v63 = vpop.f32.mrf.mxu0 }
 0x2ad   : > { %v4183_v35 = vrot.slane %v4176_v6, %v9761_v56  ;;  %v7710_v3 = vrot.slane %v7703_v31, %v9759_v53  ;;  %v9008_v55 = vcombine.high %v6157_v40, %v6164_v61  ;;  %v7719_v45 = vcombine.low %v6172_v60, %v6179_v49 }
 0x2ae   : > { %v4646_v22 = vshrl.u32 %v4135_v9, 16  ;;  %v6206_v44 = vrot.slane %v6191_v27, %v9761_v56  ;;  %v6213_v26 = vrot.slane %v6199_v38, %v9761_v56  ;;  %v6214_v62 = vcombine.high %v6198_v23, %v9545_v51  ;;  %v833_v46 = vpop.f32.mrf.mxu0 }
 0x2af   : > { %v4184_v12 = vcombine.low %v4175_v24, %v4183_v35  ;;  %v6221_v5 = vrot.slane %v6198_v23, %v9761_v56  ;;  %v7718_v32 = vrot.slane %v9008_v55, %v9759_v53  ;;  %v9009_v39 = vcombine.high %v6172_v60, %v6179_v49  ;;  %v1246_v23 = vpop.f32.mrf.mxu1 }
 0x2b0   : > { %v6228_v17 = vrot.slane %v6214_v62, %v9761_v56  ;;  %v7726_v34 = vrot.slane %v7719_v45, %v9759_v53  ;;  %v7752_v2 = vcombine.low %v6206_v44, %v6213_v26  ;;  %v9010_v16 = vcombine.high %v6206_v44, %v6213_v26 }
 0x2b1   : > { %v4645_v11 = vpack.i.b16 %v4184_v12, %v4135_v9  ;;  %v4647_v37 = vshrl.u32 %v4184_v12, 16  ;;  %v7734_v47 = vrot.slane %v9009_v39, %v9759_v53  ;;  %v7735_v1 = vcombine.low %v7710_v3, %v7718_v32 }
 0x2b2   : > { %v7759_v42 = vrot.slane %v7752_v2, %v9759_v53  ;;  %v7767_v50 = vrot.slane %v9010_v16, %v9759_v53  ;;  %v7768_v29 = vcombine.low %v6221_v5, %v6228_v17  ;;  %v9011_v19 = vcombine.high %v6221_v5, %v6228_v17  ;;  %v10811_v17 = vpop.f32.mrf.mxu1 }
 0x2b3   : > { %v4648_v58 = vpack.i.b16 %v4647_v37, %v4646_v22  ;;  %v8922_v59 = vcombine.low %v4645_v11, %v4645_v11  ;;  %v8923_v14 = vcombine.high %v4645_v11, %v4645_v11  ;;  %v1413_v54 = vshrl.u32 %v10707_v20, 16 }
 0x2b4   : > { %v7743_v4 = vcombine.low %v7726_v34, %v7734_v47  ;;  %v7775_v36 = vrot.slane %v7768_v29, %v9759_v53  ;;  %v7783_v28 = vrot.slane %v9011_v19, %v9759_v53  ;;  %v7784_v10 = vcombine.low %v7759_v42, %v7767_v50 }
 0x2b5   : > { %v8954_v0 = vcombine.low %v4648_v58, %v4648_v58  ;;  %v8955_v33 = vcombine.high %v4648_v58, %v4648_v58  ;;  %4887 = vst [vmem:[%s9846_s23 + $0x58] sm:$0xf] %v8922_v59  ;;  %4888 = vst [vmem:[%s9846_s23 + $0x5c] sm:$0xf] %v8923_v14  ;;  %v883_v18 = vpack.c.bf16 %v825_v13, %v10687_v57  ;;  %v5029_v25 = vshrl.u32 %v10745_v7, 16 }
 0x2b6   : > { %v1300_v61 = vpack.c.bf16 %v1242_v8, %v10725_v48  ;;  %v7742_v43 = vrot.slane %v7735_v1, %v9761_v56  ;;  %v7750_v40 = vrot.slane %v7743_v4, %v9761_v56  ;;  %v7792_v41 = vcombine.low %v7775_v36, %v7783_v28  ;;  %v1250_v4 = vpop.f32.mrf.mxu1 }
 0x2b7   : > { %4919 = vst [vmem:[%s9846_s23 + $0xd8] sm:$0xf] %v8954_v0  ;;  %4920 = vst [vmem:[%s9846_s23 + $0xdc] sm:$0xf] %v8955_v33  ;;  %v1411_v30 = vpack.i.b16 %v883_v18, %v10707_v20  ;;  %v1414_v15 = vshrl.u32 %v883_v18, 16  ;;  %v7791_v57 = vrot.slane %v7784_v10, %v9761_v56  ;;  %v10793_v13 = vpack.c.bf16 %v833_v46, %v829_v21 }
 0x2b8   : > { %v5027_v27 = vpack.i.b16 %v1300_v61, %v10745_v7  ;;  %v5030_v6 = vshrl.u32 %v1300_v61, 16  ;;  %v7751_v60 = vcombine.low %v7742_v43, %v7750_v40  ;;  %v7799_v48 = vrot.slane %v7792_v41, %v9761_v56 }
 0x2b9   : > { %v1415_v49 = vpack.i.b16 %v1414_v15, %v1413_v54  ;;  %v2617_v31 = vcombine.high %v1411_v30, %v9757_v52  ;;  %v2624_v9 = vrot.slane %v1411_v30, %v9759_v53 }
 0x2ba   : > { %v10797_v24 = vpack.i.b16 %v5030_v6, %v5029_v25  ;;  %v7800_v20 = vcombine.low %v7791_v57, %v7799_v48  ;;  %v8262_v38 = vshrl.u32 %v7751_v60, 16  ;;  %v6233_v7 = vcombine.high %v5027_v27, %v9757_v52 }
 0x2bb   : > { %v6240_v35 = vrot.slane %v5027_v27, %v9759_v53  ;;  %v2631_v3 = vrot.slane %v2617_v31, %v9759_v53  ;;  %v2632_v55 = vcombine.high %v2624_v9, %v9545_v51  ;;  %v2639_v45 = vrot.slane %v2624_v9, %v9761_v56  ;;  %v835_v31 = vpop.f32.mrf.mxu0 }
 0x2bc   : > { %v2666_v21 = vcombine.high %v1415_v49, %v9757_v52  ;;  %v8261_v22 = vpack.i.b16 %v7800_v20, %v7751_v60  ;;  %v8263_v44 = vshrl.u32 %v7800_v20, 16  ;;  %v2673_v26 = vrot.slane %v1415_v49, %v9759_v53 }
 0x2bd   : > { %v6247_v62 = vrot.slane %v6233_v7, %v9759_v53  ;;  %v2646_v12 = vrot.slane %v2632_v55, %v9761_v56  ;;  %v2647_v5 = vcombine.high %v2631_v3, %v9545_v51  ;;  %v2654_v32 = vrot.slane %v2631_v3, %v9761_v56 }
 0x2be   : > { %v2680_v39 = vrot.slane %v2666_v21, %v9759_v53  ;;  %v8264_v34 = vpack.i.b16 %v8263_v44, %v8262_v38  ;;  %v9050_v2 = vcombine.low %v8261_v22, %v8261_v22  ;;  %v9051_v16 = vcombine.high %v8261_v22, %v8261_v22 }
 0x2bf   : > { %v2681_v11 = vcombine.high %v2673_v26, %v9545_v51  ;;  %v2661_v37 = vrot.slane %v2647_v5, %v9761_v56  ;;  %v2688_v47 = vrot.slane %v2673_v26, %v9761_v56  ;;  %v4185_v8 = vcombine.low %v2639_v45, %v2646_v12 }
 0x2c0   : > { %v2696_v1 = vcombine.high %v2680_v39, %v9545_v51  ;;  %v2703_v42 = vrot.slane %v2680_v39, %v9761_v56  ;;  %v9082_v50 = vcombine.low %v8264_v34, %v8264_v34  ;;  %v9083_v29 = vcombine.high %v8264_v34, %v8264_v34  ;;  %8503 = vst [vmem:[%s9879_s25 + $0x58] sm:$0xf] %v9050_v2 }
 0x2c1   : > { %8504 = vst [vmem:[%s9879_s25 + $0x5c] sm:$0xf] %v9051_v16  ;;  %v2695_v19 = vrot.slane %v2681_v11, %v9761_v56  ;;  %v8884_v59 = vcombine.high %v2639_v45, %v2646_v12  ;;  %v4201_v14 = vcombine.low %v2654_v32, %v2661_v37  ;;  %v8885_v54 = vcombine.high %v2654_v32, %v2661_v37 }
 0x2c2   : > { %v2710_v58 = vrot.slane %v2696_v1, %v9761_v56  ;;  %8535 = vst [vmem:[%s9879_s25 + $0xd8] sm:$0xf] %v9082_v50  ;;  %8536 = vst [vmem:[%s9879_s25 + $0xdc] sm:$0xf] %v9083_v29  ;;  %v4192_v36 = vrot.slane %v4185_v8, %v9759_v53  ;;  %v6248_v0 = vcombine.high %v6240_v35, %v9545_v51 }
 0x2c3   : > { %v4234_v28 = vcombine.low %v2688_v47, %v2695_v19  ;;  %v8886_v10 = vcombine.high %v2688_v47, %v2695_v19  ;;  %v4200_v33 = vrot.slane %v8884_v59, %v9759_v53  ;;  %v4208_v18 = vrot.slane %v4201_v14, %v9759_v53 }
 0x2c4   : > { %v4216_v61 = vrot.slane %v8885_v54, %v9759_v53  ;;  %v4250_v46 = vcombine.low %v2703_v42, %v2710_v58  ;;  %v8887_v41 = vcombine.high %v2703_v42, %v2710_v58  ;;  %v10831_v25 = vpack.c.bf16 %v1250_v4, %v1246_v23 }
 0x2c5   : > { %v4241_v43 = vrot.slane %v4234_v28, %v9759_v53  ;;  %v4249_v40 = vrot.slane %v8886_v10, %v9759_v53  ;;  %v4217_v30 = vcombine.low %v4192_v36, %v4200_v33  ;;  %v6262_v6 = vrot.slane %v6248_v0, %v9761_v56  ;;  %v1252_v10 = vpop.f32.mrf.mxu1 }
 0x2c6   : > { %v4225_v15 = vcombine.low %v4208_v18, %v4216_v61  ;;  %v4257_v27 = vrot.slane %v4250_v46, %v9759_v53  ;;  %v4265_v60 = vrot.slane %v8887_v41, %v9759_v53  ;;  %v6255_v48 = vrot.slane %v6240_v35, %v9761_v56 }
 0x2c7   : > { %v4266_v57 = vcombine.low %v4241_v43, %v4249_v40  ;;  %v6263_v49 = vcombine.high %v6247_v62, %v9545_v51  ;;  %v4224_v9 = vrot.slane %v4217_v30, %v9761_v56  ;;  %v6282_v23 = vcombine.high %v10797_v24, %v9757_v52 }
 0x2c8   : > { %v4232_v20 = vrot.slane %v4225_v15, %v9761_v56  ;;  %v6289_v38 = vrot.slane %v10797_v24, %v9759_v53  ;;  %v4274_v7 = vcombine.low %v4257_v27, %v4265_v60  ;;  %v6270_v3 = vrot.slane %v6247_v62, %v9761_v56  ;;  %v839_v24 = vpop.f32.mrf.mxu0 }
 0x2c9   : > { %v6277_v55 = vrot.slane %v6263_v49, %v9761_v56  ;;  %v7801_v45 = vcombine.low %v6255_v48, %v6262_v6  ;;  %v4273_v21 = vrot.slane %v4266_v57, %v9761_v56  ;;  %v6296_v22 = vrot.slane %v6282_v23, %v9759_v53 }
 0x2ca   : > { %v4233_v35 = vcombine.low %v4224_v9, %v4232_v20  ;;  %v6297_v44 = vcombine.high %v6289_v38, %v9545_v51  ;;  %v4281_v26 = vrot.slane %v4274_v7, %v9761_v56  ;;  %v9012_v5 = vcombine.high %v6255_v48, %v6262_v6  ;;  %v10859_v14 = vpop.f32.mrf.mxu0 }
 0x2cb   : > { %v7808_v12 = vrot.slane %v7801_v45, %v9759_v53  ;;  %v7817_v32 = vcombine.low %v6270_v3, %v6277_v55  ;;  %v6304_v62 = vrot.slane %v6289_v38, %v9761_v56  ;;  %v6312_v2 = vcombine.high %v6296_v22, %v9545_v51 }
 0x2cc   : > { %v4652_v39 = vshrl.u32 %v4233_v35, 16  ;;  %v6311_v34 = vrot.slane %v6297_v44, %v9761_v56  ;;  %v4282_v16 = vcombine.low %v4273_v21, %v4281_v26  ;;  %v6319_v11 = vrot.slane %v6296_v22, %v9761_v56  ;;  %v843_v60 = vpop.f32.mrf.mxu0  ;;  %v1256_v22 = vpop.f32.mrf.mxu1 }
 0x2cd   : > { %v7816_v37 = vrot.slane %v9012_v5, %v9759_v53  ;;  %v9013_v47 = vcombine.high %v6270_v3, %v6277_v55  ;;  %v6326_v1 = vrot.slane %v6312_v2, %v9761_v56  ;;  %v7824_v42 = vrot.slane %v7817_v32, %v9759_v53 }
 0x2ce   : > { %v7850_v50 = vcombine.low %v6304_v62, %v6311_v34  ;;  %v9014_v29 = vcombine.high %v6304_v62, %v6311_v34  ;;  %v4651_v19 = vpack.i.b16 %v4282_v16, %v4233_v35  ;;  %v4653_v8 = vshrl.u32 %v4282_v16, 16 }
 0x2cf   : > { %v7832_v58 = vrot.slane %v9013_v47, %v9759_v53  ;;  %v7833_v59 = vcombine.low %v7808_v12, %v7816_v37  ;;  %v7866_v36 = vcombine.low %v6319_v11, %v6326_v1  ;;  %v9015_v28 = vcombine.high %v6319_v11, %v6326_v1  ;;  %v10897_v1 = vpop.f32.mrf.mxu1 }
 0x2d0   : > { %v7857_v54 = vrot.slane %v7850_v50, %v9759_v53  ;;  %v7865_v4 = vrot.slane %v9014_v29, %v9759_v53  ;;  %v4654_v0 = vpack.i.b16 %v4653_v8, %v4652_v39  ;;  %v8924_v33 = vcombine.low %v4651_v19, %v4651_v19 }
 0x2d1   : > { %v8925_v18 = vcombine.high %v4651_v19, %v4651_v19  ;;  %v1421_v61 = vshrl.u32 %v10793_v13, 16  ;;  %v7841_v46 = vcombine.low %v7824_v42, %v7832_v58  ;;  %v7873_v43 = vrot.slane %v7866_v36, %v9759_v53 }
 0x2d2   : > { %v7881_v40 = vrot.slane %v9015_v28, %v9759_v53  ;;  %v7882_v41 = vcombine.low %v7857_v54, %v7865_v4  ;;  %v8956_v30 = vcombine.low %v4654_v0, %v4654_v0  ;;  %v8957_v15 = vcombine.high %v4654_v0, %v4654_v0  ;;  %4889 = vst [vmem:[%s9846_s23 + $0x60] sm:$0xf] %v8924_v33 }
 0x2d3   : > { %4890 = vst [vmem:[%s9846_s23 + $0x64] sm:$0xf] %v8925_v18  ;;  %v885_v27 = vpack.c.bf16 %v835_v31, %v10773_v63  ;;  %v1302_v6 = vpack.c.bf16 %v1252_v10, %v10811_v17  ;;  %v7840_v57 = vrot.slane %v7833_v59, %v9761_v56  ;;  %v7848_v48 = vrot.slane %v7841_v46, %v9761_v56  ;;  %v1260_v46 = vpop.f32.mrf.mxu1 }
 0x2d4   : > { %v7890_v49 = vcombine.low %v7873_v43, %v7881_v40  ;;  %v5037_v9 = vshrl.u32 %v10831_v25, 16  ;;  %4921 = vst [vmem:[%s9846_s23 + $0xe0] sm:$0xf] %v8956_v30  ;;  %4922 = vst [vmem:[%s9846_s23 + $0xe4] sm:$0xf] %v8957_v15  ;;  %v7889_v63 = vrot.slane %v7882_v41, %v9761_v56  ;;  %v10879_v31 = vpack.c.bf16 %v843_v60, %v839_v24 }
 0x2d5   : > { %v1419_v20 = vpack.i.b16 %v885_v27, %v10793_v13  ;;  %v1422_v23 = vshrl.u32 %v885_v27, 16  ;;  %v5035_v38 = vpack.i.b16 %v1302_v6, %v10831_v25  ;;  %v5038_v7 = vshrl.u32 %v1302_v6, 16 }
 0x2d6   : > { %v7849_v3 = vcombine.low %v7840_v57, %v7848_v48  ;;  %v7897_v17 = vrot.slane %v7890_v49, %v9761_v56 }
 0x2d7   : > { %v1423_v55 = vpack.i.b16 %v1422_v23, %v1421_v61  ;;  %v2715_v45 = vcombine.high %v1419_v20, %v9757_v52  ;;  %v2722_v35 = vrot.slane %v1419_v20, %v9759_v53  ;;  %v10883_v21 = vpack.i.b16 %v5038_v7, %v5037_v9 }
 0x2d8   : > { %v7898_v13 = vcombine.low %v7889_v63, %v7897_v17  ;;  %v8268_v44 = vshrl.u32 %v7849_v3, 16  ;;  %v6331_v25 = vcombine.high %v5035_v38, %v9757_v52  ;;  %v6338_v26 = vrot.slane %v5035_v38, %v9759_v53 }
 0x2d9   : > { %v2729_v12 = vrot.slane %v2715_v45, %v9759_v53  ;;  %v2730_v5 = vcombine.high %v2722_v35, %v9545_v51  ;;  %v2737_v32 = vrot.slane %v2722_v35, %v9761_v56  ;;  %v2764_v24 = vcombine.high %v1423_v55, %v9757_v52  ;;  %v845_v45 = vpop.f32.mrf.mxu0 }
 0x2da   : > { %v8267_v39 = vpack.i.b16 %v7898_v13, %v7849_v3  ;;  %v8269_v62 = vshrl.u32 %v7898_v13, 16  ;;  %v2771_v34 = vrot.slane %v1423_v55, %v9759_v53  ;;  %v6345_v2 = vrot.slane %v6331_v25, %v9759_v53 }
 0x2db   : > { %v2744_v16 = vrot.slane %v2730_v5, %v9761_v56  ;;  %v2745_v11 = vcombine.high %v2729_v12, %v9545_v51  ;;  %v2752_v37 = vrot.slane %v2729_v12, %v9761_v56  ;;  %v2778_v47 = vrot.slane %v2764_v24, %v9759_v53 }
 0x2dc   : > { %v8270_v42 = vpack.i.b16 %v8269_v62, %v8268_v44  ;;  %v9052_v50 = vcombine.low %v8267_v39, %v8267_v39  ;;  %v9053_v29 = vcombine.high %v8267_v39, %v8267_v39  ;;  %v2779_v19 = vcombine.high %v2771_v34, %v9545_v51 }
 0x2dd   : > { %v2759_v8 = vrot.slane %v2745_v11, %v9761_v56  ;;  %v2786_v58 = vrot.slane %v2771_v34, %v9761_v56  ;;  %v2794_v59 = vcombine.high %v2778_v47, %v9545_v51  ;;  %v2801_v54 = vrot.slane %v2778_v47, %v9761_v56 }
 0x2de   : > { %v9084_v4 = vcombine.low %v8270_v42, %v8270_v42  ;;  %v9085_v36 = vcombine.high %v8270_v42, %v8270_v42  ;;  %8505 = vst [vmem:[%s9879_s25 + $0x60] sm:$0xf] %v9052_v50  ;;  %8506 = vst [vmem:[%s9879_s25 + $0x64] sm:$0xf] %v9053_v29  ;;  %v2793_v28 = vrot.slane %v2779_v19, %v9761_v56 }
 0x2df   : > { %v4283_v10 = vcombine.low %v2737_v32, %v2744_v16  ;;  %v2808_v0 = vrot.slane %v2794_v59, %v9761_v56  ;;  %v8888_v33 = vcombine.high %v2737_v32, %v2744_v16  ;;  %v4299_v18 = vcombine.low %v2752_v37, %v2759_v8 }
 0x2e0   : > { %v8889_v61 = vcombine.high %v2752_v37, %v2759_v8  ;;  %8537 = vst [vmem:[%s9879_s25 + $0xe0] sm:$0xf] %v9084_v4  ;;  %8538 = vst [vmem:[%s9879_s25 + $0xe4] sm:$0xf] %v9085_v36  ;;  %v4332_v40 = vcombine.low %v2786_v58, %v2793_v28  ;;  %v8890_v41 = vcombine.high %v2786_v58, %v2793_v28 }
 0x2e1   : > { %v4290_v43 = vrot.slane %v4283_v10, %v9759_v53  ;;  %v6346_v30 = vcombine.high %v6338_v26, %v9545_v51  ;;  %v4298_v15 = vrot.slane %v8888_v33, %v9759_v53  ;;  %v4306_v27 = vrot.slane %v4299_v18, %v9759_v53 }
 0x2e2   : > { %v4314_v6 = vrot.slane %v8889_v61, %v9759_v53  ;;  %v4348_v60 = vcombine.low %v2801_v54, %v2808_v0  ;;  %v4339_v57 = vrot.slane %v4332_v40, %v9759_v53  ;;  %v4347_v48 = vrot.slane %v8890_v41, %v9759_v53  ;;  %v1262_v41 = vpop.f32.mrf.mxu1 }
 0x2e3   : > { %v8891_v49 = vcombine.high %v2801_v54, %v2808_v0  ;;  %v10917_v9 = vpack.c.bf16 %v1260_v46, %v1256_v22  ;;  %v4315_v20 = vcombine.low %v4290_v43, %v4298_v15  ;;  %v6360_v7 = vrot.slane %v6346_v30, %v9761_v56 }
 0x2e4   : > { %v4323_v23 = vcombine.low %v4306_v27, %v4314_v6  ;;  %v4355_v38 = vrot.slane %v4348_v60, %v9759_v53  ;;  %v4364_v63 = vcombine.low %v4339_v57, %v4347_v48  ;;  %v6353_v17 = vrot.slane %v6338_v26, %v9761_v56 }
 0x2e5   : > { %v4363_v3 = vrot.slane %v8891_v49, %v9759_v53  ;;  %v6361_v55 = vcombine.high %v6345_v2, %v9545_v51  ;;  %v4322_v35 = vrot.slane %v4315_v20, %v9761_v56  ;;  %v6380_v22 = vcombine.high %v10883_v21, %v9757_v52 }
 0x2e6   : > { %v4330_v13 = vrot.slane %v4323_v23, %v9761_v56  ;;  %v6387_v44 = vrot.slane %v10883_v21, %v9759_v53  ;;  %v6368_v12 = vrot.slane %v6345_v2, %v9761_v56  ;;  %v7899_v32 = vcombine.low %v6353_v17, %v6360_v7  ;;  %v849_v21 = vpop.f32.mrf.mxu0 }
 0x2e7   : > { %v4372_v25 = vcombine.low %v4355_v38, %v4363_v3  ;;  %v6375_v5 = vrot.slane %v6361_v55, %v9761_v56  ;;  %v4371_v24 = vrot.slane %v4364_v63, %v9761_v56  ;;  %v6394_v39 = vrot.slane %v6380_v22, %v9759_v53 }
 0x2e8   : > { %v4331_v26 = vcombine.low %v4322_v35, %v4330_v13  ;;  %v6395_v62 = vcombine.high %v6387_v44, %v9545_v51  ;;  %v7906_v16 = vrot.slane %v7899_v32, %v9759_v53  ;;  %v9016_v11 = vcombine.high %v6353_v17, %v6360_v7  ;;  %v10945_v18 = vpop.f32.mrf.mxu0 }
 0x2e9   : > { %v4379_v34 = vrot.slane %v4372_v25, %v9761_v56  ;;  %v7915_v37 = vcombine.low %v6368_v12, %v6375_v5  ;;  %v6402_v2 = vrot.slane %v6387_v44, %v9761_v56  ;;  %v6410_v50 = vcombine.high %v6394_v39, %v9545_v51 }
 0x2ea   : > { %v4658_v47 = vshrl.u32 %v4331_v26, 16  ;;  %v6409_v42 = vrot.slane %v6395_v62, %v9761_v56  ;;  %v6417_v19 = vrot.slane %v6394_v39, %v9761_v56  ;;  %v7914_v8 = vrot.slane %v9016_v11, %v9759_v53  ;;  %v853_v3 = vpop.f32.mrf.mxu0  ;;  %v1266_v39 = vpop.f32.mrf.mxu1 }
 0x2eb   : > { %v4380_v29 = vcombine.low %v4371_v24, %v4379_v34  ;;  %v9017_v58 = vcombine.high %v6368_v12, %v6375_v5  ;;  %v6424_v59 = vrot.slane %v6410_v50, %v9761_v56  ;;  %v7922_v54 = vrot.slane %v7915_v37, %v9759_v53 }
 0x2ec   : > { %v7948_v4 = vcombine.low %v6402_v2, %v6409_v42  ;;  %v9018_v36 = vcombine.high %v6402_v2, %v6409_v42  ;;  %v7931_v33 = vcombine.low %v7906_v16, %v7914_v8  ;;  %v1429_v6 = vshrl.u32 %v10879_v31, 16 }
 0x2ed   : > { %v4657_v28 = vpack.i.b16 %v4380_v29, %v4331_v26  ;;  %v4659_v10 = vshrl.u32 %v4380_v29, 16  ;;  %v7930_v0 = vrot.slane %v9017_v58, %v9759_v53  ;;  %v7964_v43 = vcombine.low %v6417_v19, %v6424_v59 }
 0x2ee   : > { %v7955_v61 = vrot.slane %v7948_v4, %v9759_v53  ;;  %v7963_v46 = vrot.slane %v9018_v36, %v9759_v53  ;;  %v9019_v40 = vcombine.high %v6417_v19, %v6424_v59  ;;  %v887_v38 = vpack.c.bf16 %v845_v45, %v10859_v14  ;;  %v10983_v59 = vpop.f32.mrf.mxu1 }
 0x2ef   : > { %v4660_v30 = vpack.i.b16 %v4659_v10, %v4658_v47  ;;  %v8926_v15 = vcombine.low %v4657_v28, %v4657_v28  ;;  %v8927_v27 = vcombine.high %v4657_v28, %v4657_v28  ;;  %v7939_v60 = vcombine.low %v7922_v54, %v7930_v0 }
 0x2f0   : > { %v7971_v57 = vrot.slane %v7964_v43, %v9759_v53  ;;  %v7979_v48 = vrot.slane %v9019_v40, %v9759_v53  ;;  %v7980_v49 = vcombine.low %v7955_v61, %v7963_v46  ;;  %v1304_v7 = vpack.c.bf16 %v1262_v41, %v10897_v1 }
 0x2f1   : > { %v8958_v20 = vcombine.low %v4660_v30, %v4660_v30  ;;  %v8959_v23 = vcombine.high %v4660_v30, %v4660_v30  ;;  %4891 = vst [vmem:[%s9846_s23 + $0x68] sm:$0xf] %v8926_v15  ;;  %4892 = vst [vmem:[%s9846_s23 + $0x6c] sm:$0xf] %v8927_v27  ;;  %v7938_v63 = vrot.slane %v7931_v33, %v9761_v56  ;;  %v5045_v35 = vshrl.u32 %v10917_v9, 16 }
 0x2f2   : > { %v7946_v17 = vrot.slane %v7939_v60, %v9761_v56  ;;  %v7988_v55 = vcombine.low %v7971_v57, %v7979_v48  ;;  %v1427_v13 = vpack.i.b16 %v887_v38, %v10879_v31  ;;  %v1430_v22 = vshrl.u32 %v887_v38, 16  ;;  %v1270_v60 = vpop.f32.mrf.mxu1 }
 0x2f3   : > { %4923 = vst [vmem:[%s9846_s23 + $0xe8] sm:$0xf] %v8958_v20  ;;  %4924 = vst [vmem:[%s9846_s23 + $0xec] sm:$0xf] %v8959_v23  ;;  %v5043_v44 = vpack.i.b16 %v1304_v7, %v10917_v9  ;;  %v5046_v25 = vshrl.u32 %v1304_v7, 16  ;;  %v7987_v14 = vrot.slane %v7980_v49, %v9761_v56  ;;  %v10965_v45 = vpack.c.bf16 %v853_v3, %v849_v21 }
 0x2f4   : > { %v7947_v12 = vcombine.low %v7938_v63, %v7946_v17  ;;  %v7995_v1 = vrot.slane %v7988_v55, %v9761_v56  ;;  %v1431_v5 = vpack.i.b16 %v1430_v22, %v1429_v6  ;;  %v2813_v32 = vcombine.high %v1427_v13, %v9757_v52 }
 0x2f5   : > { %v2820_v26 = vrot.slane %v1427_v13, %v9759_v53  ;;  %v10969_v24 = vpack.i.b16 %v5046_v25, %v5045_v35  ;;  %v6429_v9 = vcombine.high %v5043_v44, %v9757_v52  ;;  %v6436_v34 = vrot.slane %v5043_v44, %v9759_v53 }
 0x2f6   : > { %v7996_v31 = vcombine.low %v7987_v14, %v7995_v1  ;;  %v8274_v62 = vshrl.u32 %v7947_v12, 16  ;;  %v2827_v16 = vrot.slane %v2813_v32, %v9759_v53  ;;  %v2862_v21 = vcombine.high %v1431_v5, %v9757_v52 }
 0x2f7   : > { %v2828_v11 = vcombine.high %v2820_v26, %v9545_v51  ;;  %v2835_v37 = vrot.slane %v2820_v26, %v9761_v56  ;;  %v2869_v42 = vrot.slane %v1431_v5, %v9759_v53  ;;  %v6443_v50 = vrot.slane %v6429_v9, %v9759_v53 }
 0x2f8   : > { %v8273_v47 = vpack.i.b16 %v7996_v31, %v7947_v12  ;;  %v8275_v2 = vshrl.u32 %v7996_v31, 16  ;;  %v2843_v19 = vcombine.high %v2827_v16, %v9545_v51  ;;  %v2850_v8 = vrot.slane %v2827_v16, %v9761_v56 }
 0x2f9   : > { %v2842_v29 = vrot.slane %v2828_v11, %v9761_v56  ;;  %v2876_v58 = vrot.slane %v2862_v21, %v9759_v53  ;;  %v2877_v28 = vcombine.high %v2869_v42, %v9545_v51  ;;  %v2884_v0 = vrot.slane %v2869_v42, %v9761_v56 }
 0x2fa   : > { %v8276_v54 = vpack.i.b16 %v8275_v2, %v8274_v62  ;;  %v9054_v4 = vcombine.low %v8273_v47, %v8273_v47  ;;  %v9055_v36 = vcombine.high %v8273_v47, %v8273_v47  ;;  %v2857_v10 = vrot.slane %v2843_v19, %v9761_v56 }
 0x2fb   : > { %v2892_v33 = vcombine.high %v2876_v58, %v9545_v51  ;;  %v2899_v61 = vrot.slane %v2876_v58, %v9761_v56  ;;  %v2891_v40 = vrot.slane %v2877_v28, %v9761_v56  ;;  %v4381_v41 = vcombine.low %v2835_v37, %v2842_v29 }
 0x2fc   : > { %v9086_v46 = vcombine.low %v8276_v54, %v8276_v54  ;;  %v9087_v43 = vcombine.high %v8276_v54, %v8276_v54  ;;  %8507 = vst [vmem:[%s9879_s25 + $0x68] sm:$0xf] %v9054_v4  ;;  %8508 = vst [vmem:[%s9879_s25 + $0x6c] sm:$0xf] %v9055_v36  ;;  %v8892_v15 = vcombine.high %v2835_v37, %v2842_v29 }
 0x2fd   : > { %v2906_v30 = vrot.slane %v2892_v33, %v9761_v56  ;;  %v4397_v27 = vcombine.low %v2850_v8, %v2857_v10  ;;  %v8893_v6 = vcombine.high %v2850_v8, %v2857_v10  ;;  %v4388_v57 = vrot.slane %v4381_v41, %v9759_v53 }
 0x2fe   : > { %8539 = vst [vmem:[%s9879_s25 + $0xe8] sm:$0xf] %v9086_v46  ;;  %8540 = vst [vmem:[%s9879_s25 + $0xec] sm:$0xf] %v9087_v43  ;;  %v4430_v48 = vcombine.low %v2884_v0, %v2891_v40  ;;  %v8894_v49 = vcombine.high %v2884_v0, %v2891_v40  ;;  %v6444_v20 = vcombine.high %v6436_v34, %v9545_v51 }
 0x2ff   : > { %v4396_v23 = vrot.slane %v8892_v15, %v9759_v53  ;;  %v4404_v38 = vrot.slane %v4397_v27, %v9759_v53  ;;  %v4412_v7 = vrot.slane %v8893_v6, %v9759_v53  ;;  %v4446_v3 = vcombine.low %v2899_v61, %v2906_v30 }
 0x300   : > { %v4437_v63 = vrot.slane %v4430_v48, %v9759_v53  ;;  %v4445_v17 = vrot.slane %v8894_v49, %v9759_v53  ;;  %v8895_v55 = vcombine.high %v2899_v61, %v2906_v30  ;;  %v11003_v35 = vpack.c.bf16 %v1270_v60, %v1266_v39  ;;  %v855_v60 = vpop.f32.mrf.mxu0 }
 0x301   : > { %v4413_v13 = vcombine.low %v4388_v57, %v4396_v23  ;;  %v4421_v22 = vcombine.low %v4404_v38, %v4412_v7  ;;  %v4453_v44 = vrot.slane %v4446_v3, %v9759_v53  ;;  %v6458_v25 = vrot.slane %v6444_v20, %v9761_v56  ;;  %v1272_v57 = vpop.f32.mrf.mxu1 }
 0x302   : > { %v4461_v12 = vrot.slane %v8895_v55, %v9759_v53  ;;  %v4462_v14 = vcombine.low %v4437_v63, %v4445_v17  ;;  %v6451_v1 = vrot.slane %v6436_v34, %v9761_v56  ;;  %v6459_v5 = vcombine.high %v6443_v50, %v9545_v51 }
 0x303   : > { %v4420_v32 = vrot.slane %v4413_v13, %v9761_v56  ;;  %v4428_v26 = vrot.slane %v4421_v22, %v9761_v56  ;;  %v6478_v39 = vcombine.high %v10969_v24, %v9757_v52  ;;  %v6485_v31 = vrot.slane %v10969_v24, %v9759_v53 }
 0x304   : > { %v4470_v62 = vcombine.low %v4453_v44, %v4461_v12  ;;  %v6466_v9 = vrot.slane %v6443_v50, %v9761_v56  ;;  %v6473_v16 = vrot.slane %v6459_v5, %v9761_v56  ;;  %v7997_v11 = vcombine.low %v6451_v1, %v6458_v25 }
 0x305   : > { %v4429_v37 = vcombine.low %v4420_v32, %v4428_v26  ;;  %v4469_v34 = vrot.slane %v4462_v14, %v9761_v56  ;;  %v6492_v21 = vrot.slane %v6478_v39, %v9759_v53  ;;  %v6493_v47 = vcombine.high %v6485_v31, %v9545_v51 }
 0x306   : > { %v4477_v2 = vrot.slane %v4470_v62, %v9761_v56  ;;  %v8004_v42 = vrot.slane %v7997_v11, %v9759_v53  ;;  %v9020_v29 = vcombine.high %v6451_v1, %v6458_v25  ;;  %v8013_v19 = vcombine.low %v6466_v9, %v6473_v16 }
 0x307   : > { %v4664_v24 = vshrl.u32 %v4429_v37, 16  ;;  %v6500_v8 = vrot.slane %v6485_v31, %v9761_v56  ;;  %v6507_v50 = vrot.slane %v6493_v47, %v9761_v56  ;;  %v6508_v58 = vcombine.high %v6492_v21, %v9545_v51 }
 0x308   : > { %v4478_v54 = vcombine.low %v4469_v34, %v4477_v2  ;;  %v6515_v4 = vrot.slane %v6492_v21, %v9761_v56  ;;  %v8012_v36 = vrot.slane %v9020_v29, %v9759_v53  ;;  %v9021_v28 = vcombine.high %v6466_v9, %v6473_v16 }
 0x309   : > { %v6522_v10 = vrot.slane %v6508_v58, %v9761_v56  ;;  %v8020_v0 = vrot.slane %v8013_v19, %v9759_v53  ;;  %v8046_v33 = vcombine.low %v6500_v8, %v6507_v50  ;;  %v9022_v61 = vcombine.high %v6500_v8, %v6507_v50 }
 0x30a   : > { %v4663_v46 = vpack.i.b16 %v4478_v54, %v4429_v37  ;;  %v4665_v43 = vshrl.u32 %v4478_v54, 16  ;;  %v8028_v40 = vrot.slane %v9021_v28, %v9759_v53  ;;  %v8029_v41 = vcombine.low %v8004_v42, %v8012_v36 }
 0x30b   : > { %v8053_v30 = vrot.slane %v8046_v33, %v9759_v53  ;;  %v8061_v15 = vrot.slane %v9022_v61, %v9759_v53  ;;  %v8062_v27 = vcombine.low %v6515_v4, %v6522_v10  ;;  %v9023_v6 = vcombine.high %v6515_v4, %v6522_v10 }
 0x30c   : > { %v4666_v48 = vpack.i.b16 %v4665_v43, %v4664_v24  ;;  %v8928_v49 = vcombine.low %v4663_v46, %v4663_v46  ;;  %v8929_v20 = vcombine.high %v4663_v46, %v4663_v46  ;;  %v1437_v23 = vshrl.u32 %v10965_v45, 16 }
 0x30d   : > { %v8037_v38 = vcombine.low %v8020_v0, %v8028_v40  ;;  %v8069_v7 = vrot.slane %v8062_v27, %v9759_v53  ;;  %v8077_v3 = vrot.slane %v9023_v6, %v9759_v53  ;;  %v8078_v63 = vcombine.low %v8053_v30, %v8061_v15 }
 0x30e   : > { %v8960_v17 = vcombine.low %v4666_v48, %v4666_v48  ;;  %v8961_v55 = vcombine.high %v4666_v48, %v4666_v48  ;;  %4893 = vst [vmem:[%s9846_s23 + $0x70] sm:$0xf] %v8928_v49  ;;  %4894 = vst [vmem:[%s9846_s23 + $0x74] sm:$0xf] %v8929_v20  ;;  %v889_v13 = vpack.c.bf16 %v855_v60, %v10945_v18  ;;  %v5053_v14 = vshrl.u32 %v11003_v35, 16 }
 0x30f   : > { %v1306_v22 = vpack.c.bf16 %v1272_v57, %v10983_v59  ;;  %v8036_v44 = vrot.slane %v8029_v41, %v9761_v56  ;;  %v8044_v25 = vrot.slane %v8037_v38, %v9761_v56  ;;  %v8086_v12 = vcombine.low %v8069_v7, %v8077_v3 }
 0x310   : > { %4925 = vst [vmem:[%s9846_s23 + $0xf0] sm:$0xf] %v8960_v17  ;;  %4926 = vst [vmem:[%s9846_s23 + $0xf4] sm:$0xf] %v8961_v55  ;;  %v1435_v1 = vpack.i.b16 %v889_v13, %v10965_v45  ;;  %v1438_v5 = vshrl.u32 %v889_v13, 16  ;;  %v8085_v18 = vrot.slane %v8078_v63, %v9761_v56 }
 0x311   : > { %v5051_v32 = vpack.i.b16 %v1306_v22, %v11003_v35  ;;  %v5054_v26 = vshrl.u32 %v1306_v22, 16  ;;  %v8045_v39 = vcombine.low %v8036_v44, %v8044_v25  ;;  %v8093_v59 = vrot.slane %v8086_v12, %v9761_v56 }
 0x312   : > { %v1439_v31 = vpack.i.b16 %v1438_v5, %v1437_v23  ;;  %v2911_v62 = vcombine.high %v1435_v1, %v9757_v52  ;;  %v2918_v9 = vrot.slane %v1435_v1, %v9759_v53 }
 0x313   : > { %v11051_v16 = vpack.i.b16 %v5054_v26, %v5053_v14  ;;  %v8094_v11 = vcombine.low %v8085_v18, %v8093_v59  ;;  %v8280_v37 = vshrl.u32 %v8045_v39, 16  ;;  %v6527_v45 = vcombine.high %v5051_v32, %v9757_v52 }
 0x314   : > { %v6534_v34 = vrot.slane %v5051_v32, %v9759_v53  ;;  %v2925_v35 = vrot.slane %v2911_v62, %v9759_v53  ;;  %v2926_v21 = vcombine.high %v2918_v9, %v9545_v51  ;;  %v2933_v47 = vrot.slane %v2918_v9, %v9761_v56 }
 0x315   : > { %v2960_v2 = vcombine.high %v1439_v31, %v9757_v52  ;;  %v8279_v42 = vpack.i.b16 %v8094_v11, %v8045_v39  ;;  %v8281_v29 = vshrl.u32 %v8094_v11, 16  ;;  %v2967_v19 = vrot.slane %v1439_v31, %v9759_v53 }
 0x316   : > { %v6541_v24 = vrot.slane %v6527_v45, %v9759_v53  ;;  %v2940_v8 = vrot.slane %v2926_v21, %v9761_v56  ;;  %v2941_v50 = vcombine.high %v2925_v35, %v9545_v51  ;;  %v2948_v58 = vrot.slane %v2925_v35, %v9761_v56 }
 0x317   : > { %v2974_v54 = vrot.slane %v2960_v2, %v9759_v53  ;;  %v8282_v4 = vpack.i.b16 %v8281_v29, %v8280_v37  ;;  %v9056_v36 = vcombine.low %v8279_v42, %v8279_v42  ;;  %v9057_v28 = vcombine.high %v8279_v42, %v8279_v42 }
 0x318   : > { %v2975_v10 = vcombine.high %v2967_v19, %v9545_v51  ;;  %v2955_v0 = vrot.slane %v2941_v50, %v9761_v56  ;;  %v2982_v33 = vrot.slane %v2967_v19, %v9761_v56  ;;  %v4479_v30 = vcombine.low %v2933_v47, %v2940_v8 }
 0x319   : > { %v2990_v61 = vcombine.high %v2974_v54, %v9545_v51  ;;  %v2997_v46 = vrot.slane %v2974_v54, %v9761_v56  ;;  %v9088_v43 = vcombine.low %v8282_v4, %v8282_v4  ;;  %v9089_v40 = vcombine.high %v8282_v4, %v8282_v4  ;;  %8509 = vst [vmem:[%s9879_s25 + $0x70] sm:$0xf] %v9056_v36 }
 0x31a   : > { %8510 = vst [vmem:[%s9879_s25 + $0x74] sm:$0xf] %v9057_v28  ;;  %v2989_v41 = vrot.slane %v2975_v10, %v9761_v56  ;;  %v8896_v27 = vcombine.high %v2933_v47, %v2940_v8  ;;  %v4495_v6 = vcombine.low %v2948_v58, %v2955_v0  ;;  %v8897_v60 = vcombine.high %v2948_v58, %v2955_v0 }
 0x31b   : > { %v3004_v15 = vrot.slane %v2990_v61, %v9761_v56  ;;  %8541 = vst [vmem:[%s9879_s25 + $0xf0] sm:$0xf] %v9088_v43  ;;  %8542 = vst [vmem:[%s9879_s25 + $0xf4] sm:$0xf] %v9089_v40  ;;  %v4486_v57 = vrot.slane %v4479_v30, %v9759_v53  ;;  %v6542_v20 = vcombine.high %v6534_v34, %v9545_v51 }
 0x31c   : > { %v4528_v48 = vcombine.low %v2982_v33, %v2989_v41  ;;  %v8898_v49 = vcombine.high %v2982_v33, %v2989_v41  ;;  %v4494_v23 = vrot.slane %v8896_v27, %v9759_v53  ;;  %v4502_v38 = vrot.slane %v4495_v6, %v9759_v53 }
 0x31d   : > { %v4510_v7 = vrot.slane %v8897_v60, %v9759_v53  ;;  %v4544_v3 = vcombine.low %v2997_v46, %v3004_v15  ;;  %v8899_v55 = vcombine.high %v2997_v46, %v3004_v15  ;;  %v6556_v25 = vrot.slane %v6542_v20, %v9761_v56 }
 0x31e   : > { %v4535_v63 = vrot.slane %v4528_v48, %v9759_v53  ;;  %v4543_v17 = vrot.slane %v8898_v49, %v9759_v53  ;;  %v4511_v13 = vcombine.low %v4486_v57, %v4494_v23  ;;  %v6549_v1 = vrot.slane %v6534_v34, %v9761_v56 }
 0x31f   : > { %v4519_v22 = vcombine.low %v4502_v38, %v4510_v7  ;;  %v4551_v44 = vrot.slane %v4544_v3, %v9759_v53  ;;  %v4559_v12 = vrot.slane %v8899_v55, %v9759_v53  ;;  %v6557_v5 = vcombine.high %v6541_v24, %v9545_v51 }
 0x320   : > { %v4560_v14 = vcombine.low %v4535_v63, %v4543_v17  ;;  %v4518_v32 = vrot.slane %v4511_v13, %v9761_v56  ;;  %v6576_v39 = vcombine.high %v11051_v16, %v9757_v52  ;;  %v6583_v18 = vrot.slane %v11051_v16, %v9759_v53 }
 0x321   : > { %v4526_v26 = vrot.slane %v4519_v22, %v9761_v56  ;;  %v4568_v59 = vcombine.low %v4551_v44, %v4559_v12  ;;  %v6564_v31 = vrot.slane %v6541_v24, %v9761_v56  ;;  %v6571_v62 = vrot.slane %v6557_v5, %v9761_v56 }
 0x322   : > { %v8095_v9 = vcombine.low %v6549_v1, %v6556_v25  ;;  %v4567_v37 = vrot.slane %v4560_v14, %v9761_v56  ;;  %v6590_v45 = vrot.slane %v6576_v39, %v9759_v53  ;;  %v6591_v34 = vcombine.high %v6583_v18, %v9545_v51 }
 0x323   : > { %v4527_v11 = vcombine.low %v4518_v32, %v4526_v26  ;;  %v4575_v35 = vrot.slane %v4568_v59, %v9761_v56  ;;  %v9024_v21 = vcombine.high %v6549_v1, %v6556_v25  ;;  %v8111_v47 = vcombine.low %v6564_v31, %v6571_v62 }
 0x324   : > { %v8102_v52 = vrot.slane %v8095_v9, %v9759_v53  ;;  %v6598_v2 = vrot.slane %v6583_v18, %v9761_v56  ;;  %v6605_v42 = vrot.slane %v6591_v34, %v9761_v56  ;;  %v6606_v29 = vcombine.high %v6590_v45, %v9545_v51 }
 0x325   : > { %v4670_v16 = vshrl.u32 %v4527_v11, 16  ;;  %v4576_v19 = vcombine.low %v4567_v37, %v4575_v35  ;;  %v6613_v24 = vrot.slane %v6590_v45, %v9761_v56  ;;  %v8110_v8 = vrot.slane %v9024_v21, %v9759_v53 }
 0x326   : > { %v9025_v50 = vcombine.high %v6564_v31, %v6571_v62  ;;  %v6620_v58 = vrot.slane %v6606_v29, %v9761_v56  ;;  %v8118_v54 = vrot.slane %v8111_v47, %v9759_v53  ;;  %v8144_v4 = vcombine.low %v6598_v2, %v6605_v42 }
 0x327   : > { %v9026_v36 = vcombine.high %v6598_v2, %v6605_v42  ;;  %v4669_v28 = vpack.i.b16 %v4576_v19, %v4527_v11  ;;  %v4671_v10 = vshrl.u32 %v4576_v19, 16  ;;  %v8127_v33 = vcombine.low %v8102_v52, %v8110_v8 }
 0x328   : > { %v8126_v0 = vrot.slane %v9025_v50, %v9759_v53  ;;  %v8151_v51 = vrot.slane %v8144_v4, %v9759_v53  ;;  %v8160_v46 = vcombine.low %v6613_v24, %v6620_v58  ;;  %v9027_v43 = vcombine.high %v6613_v24, %v6620_v58 }
 0x329   : > { %v8159_v61 = vrot.slane %v9026_v36, %v9759_v53  ;;  %v4672_v40 = vpack.i.b16 %v4671_v10, %v4670_v16  ;;  %v8930_v41 = vcombine.low %v4669_v28, %v4669_v28  ;;  %v8931_v30 = vcombine.high %v4669_v28, %v4669_v28 }
 0x32a   : > { %v8135_v15 = vcombine.low %v8118_v54, %v8126_v0  ;;  %v8167_v27 = vrot.slane %v8160_v46, %v9759_v53  ;;  %v8175_v6 = vrot.slane %v9027_v43, %v9759_v53  ;;  %v8134_v49 = vrot.slane %v8127_v33, %v9761_v56 }
 0x32b   : > { %v8176_v60 = vcombine.low %v8151_v51, %v8159_v61  ;;  %v8962_v57 = vcombine.low %v4672_v40, %v4672_v40  ;;  %v8963_v48 = vcombine.high %v4672_v40, %v4672_v40  ;;  %4895 = vst [vmem:[%s9846_s23 + $0x78] sm:$0xf] %v8930_v41  ;;  %4896 = vst [vmem:[%s9846_s23 + $0x7c] sm:$0xf] %v8931_v30 }
 0x32c   : > { %v8142_v53 = vrot.slane %v8135_v15, %v9761_v56  ;;  %v8184_v20 = vcombine.low %v8167_v27, %v8175_v6 }
 0x32d   : > { %4927 = vst [vmem:[%s9846_s23 + $0xf8] sm:$0xf] %v8962_v57  ;;  %4928 = vst [vmem:[%s9846_s23 + $0xfc] sm:$0xf] %v8963_v48  ;;  %v8183_v38 = vrot.slane %v8176_v60, %v9761_v56 }
 0x32e   : > { %v8143_v23 = vcombine.low %v8134_v49, %v8142_v53  ;;  %v8191_v7 = vrot.slane %v8184_v20, %v9761_v56 }
 0x32f   : > { %9435 = shalt.err (!%p9432_p2)
}
 0x330   : > { %s9436_s9 = scalar_lea.hbm %s11120_s24, 4096  ;;  %s9440_s23 = scalar_lea.hbm %s11222_s3, 8192 }
 0x331   : > { %p9437_p9 = scmp.ne.s32.totalorder %s11120_s24, %s9436_s9  ;;  %p9441_p0 = scmp.lt.s32.totalorder %s11120_s24, %s11222_s3 }
 0x332   : > { %p9442_p7 = scmp.lt.s32.totalorder %s9440_s23, %s9436_s9 }
 0x333   : > { %p9438_p12 = pnand %p9437_p9, %p9676_p3 }
 0x334   : > { %p9443_p5 = por %p9442_p7, %p9441_p0 }
 0x335   : > { %p9439_p13 = pneg %p9438_p12 }
 0x337   : > { %p9444_p1 = pnand %p9443_p5, %p9439_p13 }
 0x339   : > { %9447 = shalt.err (!%p9444_p1)
}
 0x33a   : > { %s9547_s22 = smov 64   ;;  %s9548_s6 = smov 4   ;;  %v8192_v56 = vcombine.low %v8183_v38, %v8191_v7  ;;  %v8286_v63 = vshrl.u32 %v8143_v23, 16 }
 0x33b   : > { %9113 = dma.vmem_to_hbm [thread:$0]  (%p9676_p3), %s11122_s8, 4096, %s11120_s24, %s8546_s29, %s9547_s22, %s9547_s22, %s9548_s6  }
 0x33c   : > { %v8285_v3 = vpack.i.b16 %v8192_v56, %v8143_v23  ;;  %v8287_v17 = vshrl.u32 %v8192_v56, 16  ;;  %s8584_s5 = sshll.u32 %s9879_s25, 4  ;;  %s11166_s8 = scalar_lea.hbm %s11223_s4, %s9101_s27  ;;  %s11168_s5 = int_to_ptr.vmem [resolvable:$true] %s8584_s5 }
 0x33d   : > { %s8551_s24 = scalar_lea.sflag [#allocation10], %s9706_s30  ;;  %s9448_s29 = scalar_lea.vmem %s11168_s5, 4096 }
 0x33e   : > { %v8288_v55 = vpack.i.b16 %v8287_v17, %v8286_v63  ;;  %v9058_v13 = vcombine.low %v8285_v3, %v8285_v3  ;;  %v9059_v22 = vcombine.high %v8285_v3, %v8285_v3  ;;  %p9449_p4 = scmp.ne.s32.totalorder %s11168_s5, %s9448_s29  ;;  %s9549_s11 = smov [#allocation9]  }
 0x33f   : > { %s9452_s18 = sshll.u32 %s9549_s11, 4  ;;  %s9453_s18 = int_to_ptr.vmem [resolvable:$false] %s9452_s18 }
 0x340   : > { %v9090_v44 = vcombine.low %v8288_v55, %v8288_v55  ;;  %v9091_v25 = vcombine.high %v8288_v55, %v8288_v55  ;;  %8511 = vst [vmem:[%s9879_s25 + $0x78] sm:$0xf] %v9058_v13  ;;  %8512 = vst [vmem:[%s9879_s25 + $0x7c] sm:$0xf] %v9059_v22  ;;  %p9450_p6 = pnand %p9449_p4, %p9676_p3  ;;  %s9454_s13 = scalar_lea.vmem %s9453_s18, 8192 }
 0x341   : > { %p9455_p10 = scmp.lt.s32.totalorder %s11168_s5, %s9453_s18  ;;  %p9456_p11 = scmp.lt.s32.totalorder %s9454_s13, %s9448_s29 }
 0x342   : > { %8543 = vst [vmem:[%s9879_s25 + $0xf8] sm:$0xf] %v9090_v44  ;;  %8544 = vst [vmem:[%s9879_s25 + $0xfc] sm:$0xf] %v9091_v25  ;;  %p9451_p8 = pneg %p9450_p6 }
 0x343   : > { %p9457_p2 = por %p9456_p11, %p9455_p10 }
 0x345   : > { %p9458_p9 = pnand %p9457_p2, %p9451_p8 }
 0x347   : > { %9461 = shalt.err (!%p9458_p9)
}
 0x348   : > { %s9462_s25 = scalar_lea.hbm %s11166_s8, 4096  ;;  %s9466_s23 = scalar_lea.hbm %s11223_s4, 8192 }
 0x349   : > { %p9463_p12 = scmp.ne.s32.totalorder %s11166_s8, %s9462_s25  ;;  %p9467_p7 = scmp.lt.s32.totalorder %s11166_s8, %s11223_s4 }
 0x34a   : > { %p9468_p5 = scmp.lt.s32.totalorder %s9466_s23, %s9462_s25 }
 0x34b   : > { %p9464_p13 = pnand %p9463_p12, %p9676_p3 }
 0x34c   : > { %p9469_p1 = por %p9468_p5, %p9467_p7 }
 0x34d   : > { %p9465_p0 = pneg %p9464_p13 }
 0x34f   : > { %p9470_p4 = pnand %p9469_p1, %p9465_p0 }
 0x351   : > { %9473 = shalt.err (!%p9470_p4)
}
 0x352   : > { %9114 = dma.vmem_to_hbm [thread:$0]  (%p9676_p3), %s11168_s5, 4096, %s11166_s8, %s8551_s24, %s9547_s22, %s9547_s22, %s9548_s6  }
 0x353 PF: > { %s8599_s10 = sand.u32 1, %s9516_s15   ;;  %p11236_p6 = scmp.ne.s32.totalorder %s11229_s26, 0 }
 0x354   : > { %p11237_p8 = scmp.ge.s32.totalorder %s9536_s20, 2  ;;  %s8600_s9 = scalar_lea.sflag [#allocation4], %s8599_s10 }
 0x356   : > { %p9129_p10 = pnand %p11237_p8, %p11236_p6 }
 0x358   : > { %p9130_p11 = pneg %p9129_p10 }
 0x35a   : > { %9507 = dma.done.wait (%p9130_p11), %s8600_s9, 4096  }
 0x35b   : > { %9509 = vsyncadd (%p9130_p11), %s8600_s9, 4294963200  ;;  %s8609_s29 = scalar_lea.sflag [#allocation10], %s8599_s10 }
 0x35c   : > { %9511 = dma.done.wait (%p9130_p11), %s8609_s29, 4096  }
 0x35d   : > { %9513 = vsyncadd (%p9130_p11), %s8609_s29, 4294963200  ;;  %s25_s20 = sadd.s32 1, %s9536_s20   ;;  %s11238_s15 = smov %s9520_s16 }
 0x35e   : > { %p22_p2 = scmp.ge.s32.totalorder %s25_s20, 4   ;;  %s11239_s16 = smov %s9524_s17 }
 0x35f   : > { %s11240_s17 = smov %s9685_s7  ;;  %s11241_s18 = smov %s9532_s19 }
 0x360   : > { %s11242_s19 = smov %s11244_s21  ;;  %24 = sbr.rel (!%p22_p2) target bundleno = 9 (0x9), region = 102 }
 0x365   :  { %8614 = vsyncpa [#allocation3], 1 }
 0x366   :  { %8616 = vsyncpa [#allocation3 + $0x1], 1 }
 0x367   :  { %8617 = vsyncpa [#allocation6], 1 }
 0x368   :  { %8618 = vsyncpa [#allocation4], 1 }
 0x369   :  { %8620 = vsyncpa [#allocation4 + $0x1], 1 }
 0x36a   :  { %8621 = vsyncpa [#allocation10], 1 }
 0x36b   :  { %8623 = vsyncpa [#allocation10 + $0x1], 1 }

</bundles_post_ra>
